<compile_context>
chip_gen: v5e
topology: v5e:2x2
jax: 0.10.0
libtpu: 0.0.40
codegen_flags: <defaults>
</compile_context>

<pallas_src>
import functools

import jax
import jax.numpy as jnp
from jax.experimental import pallas as pl
from jax.experimental.pallas import tpu as pltpu


def _round_up(v, mult):
    return ((v + mult - 1) // mult) * mult


def _fused_kernel(x_ref, w1_ref, g_ref, b_ref, w2_ref, o_ref, h_ref, *, count, eps):
    """Single VMEM-resident kernel.

    x_ref : (N, Cin, HWp)  bf16   input, spatial flattened onto lanes, zero lane pad
    w1_ref: (Cmid, Cin)    bf16   conv1 weights with channel scale pre-folded
    g_ref : (Cmid, 1)      f32    BN gamma
    b_ref : (Cmid, 1)      f32    BN beta
    w2_ref: (Cout, Cmid)   bf16   conv2 weights
    o_ref : (N, Cout, HWp) f32    output
    h_ref : (N, Cmid, HWp) f32    VMEM scratch for the conv1 result
    """
    n = x_ref.shape[0]
    cmid = w1_ref.shape[0]

    # conv1 (1x1) as weight-stationary matmuls + BN sum / sum-of-squares.
    # Zero-padded lane columns produce exactly-zero h columns, so they add
    # nothing to the statistics; we divide by the true sample count below.
    s = jnp.zeros((cmid, 1), dtype=jnp.float32)
    ss = jnp.zeros((cmid, 1), dtype=jnp.float32)
    for bi in range(n):
        hb = jnp.dot(w1_ref[...], x_ref[bi], preferred_element_type=jnp.float32)
        h_ref[bi] = hb
        s = s + jnp.sum(hb, axis=1, keepdims=True)
        ss = ss + jnp.sum(hb * hb, axis=1, keepdims=True)

    # BN constant folding (training-mode biased variance), all O(Cmid).
    inv_cnt = 1.0 / count
    mean = s * inv_cnt
    var = jnp.maximum(ss * inv_cnt - mean * mean, 0.0)
    a = jax.lax.rsqrt(var + eps) * g_ref[...]        # (Cmid, 1)
    b = b_ref[...] - mean * a                        # (Cmid, 1)

    # BN collapsed to a 2-op affine, then conv2 (1x1) on the MXU.
    for bi in range(n):
        hn = (h_ref[bi] * a + b).astype(jnp.bfloat16)
        o_ref[bi] = jnp.dot(w2_ref[...], hn, preferred_element_type=jnp.float32)


def fused_forward(x_nchw, scale_nc11, w1_oc_ic, gamma, beta, w2_oc_ic):
    """x_nchw: (N, Cin, H, W); scale_nc11: (1, Cin, 1, 1);
       w1_oc_ic: (Cmid, Cin); w2_oc_ic: (Cout, Cmid); gamma/beta: (Cmid,)"""
    eps = 1e-05
    n, cin, hh, ww = x_nchw.shape
    cmid = w1_oc_ic.shape[0]
    cout = w2_oc_ic.shape[0]
    hw = hh * ww
    hwp = _round_up(hw, 128)            # 196 -> 256 lane-dense

    # Keep NCHW (no wrapper transposes): flatten spatial onto the lane axis,
    # cast to bf16 *before* padding so layout traffic is halved.
    x = x_nchw.astype(jnp.bfloat16).reshape(n, cin, hw)
    x = jnp.pad(x, ((0, 0), (0, 0), (0, hwp - hw)))

    # Fold channelwise scale into conv1 weights: (x*s) conv w1 == x conv (s*w1)
    w1s = (w1_oc_ic * scale_nc11.reshape(1, cin)).astype(jnp.bfloat16)   # (Cmid, Cin)
    w2 = w2_oc_ic.astype(jnp.bfloat16)                                   # (Cout, Cmid)
    g = gamma.reshape(cmid, 1).astype(jnp.float32)
    b = beta.reshape(cmid, 1).astype(jnp.float32)

    kernel = functools.partial(_fused_kernel, count=float(n * hw), eps=eps)

    out_p = pl.pallas_call(
        kernel,
        out_shape=jax.ShapeDtypeStruct((n, cout, hwp), jnp.float32),
        grid_spec=pltpu.PrefetchScalarGridSpec(
            num_scalar_prefetch=0,
            grid=(1,),
            in_specs=[
                pl.BlockSpec((n, cin, hwp), lambda i: (0, 0, 0)),
                pl.BlockSpec((cmid, cin), lambda i: (0, 0)),
                pl.BlockSpec((cmid, 1), lambda i: (0, 0)),
                pl.BlockSpec((cmid, 1), lambda i: (0, 0)),
                pl.BlockSpec((cout, cmid), lambda i: (0, 0)),
            ],
            out_specs=pl.BlockSpec((n, cout, hwp), lambda i: (0, 0, 0)),
            scratch_shapes=[pltpu.VMEM((n, cmid, hwp), jnp.float32)],
        ),
        compiler_params=pltpu.CompilerParams(
            dimension_semantics=("arbitrary",)),
    )(x, w1s, g, b, w2)

    # TODO(synk): running_mean/running_var momentum updates are a training-only
    # buffer side effect with no functional output; not materialized here.

    # strip lane padding; NCHW is restored by a plain reshape (no transpose)
    return out_p[:, :, :hw].reshape(n, cout, hh, ww)


def _reference(x_nchw, scale_nc11, w1_oc_ic, gamma, beta, w2_oc_ic):
    eps = 1e-05
    x = x_nchw * scale_nc11
    h = jnp.einsum("nchw,oc->nohw", x, w1_oc_ic)
    mean = jnp.mean(h, axis=(0, 2, 3), keepdims=True)
    var = jnp.mean((h - mean) ** 2, axis=(0, 2, 3), keepdims=True)
    hn = (h - mean) * jax.lax.rsqrt(var + eps)
    hn = hn * gamma.reshape(1, -1, 1, 1) + beta.reshape(1, -1, 1, 1)
    return jnp.einsum("nchw,oc->nohw", hn, w2_oc_ic)


if __name__ == "__main__":
    # Channel counts fixed by the module; spatial 14x14 as in the spec, batch=2.
    N, CIN, CMID, COUT, H, W = 2, 576, 136, 816, 14, 14

    key = jax.random.PRNGKey(0)
    k_x, k_s, k_w1, k_w2, k_g, k_b = jax.random.split(key, 6)

    x196 = jax.random.normal(k_x, (N, CIN, H, W), dtype=jnp.float32)
    x201 = jax.random.normal(k_s, (1, CIN, 1, 1), dtype=jnp.float32)

    # Deterministic synthetic parameters.
    w1 = jax.random.normal(k_w1, (CMID, CIN), dtype=jnp.float32) * 0.05   # conv2d68 (1x1)
    w2 = jax.random.normal(k_w2, (COUT, CMID), dtype=jnp.float32) * 0.05  # conv2d69 (1x1)
    gamma = 1.0 + 0.1 * jax.random.normal(k_g, (CMID,), dtype=jnp.float32)  # BN weight
    beta = 0.1 * jax.random.normal(k_b, (CMID,), dtype=jnp.float32)         # BN bias

    fused = jax.jit(fused_forward)
    out = jax.block_until_ready(fused(x196, x201, w1, gamma, beta, w2))

    ref = _reference(x196, x201, w1, gamma, beta, w2)
    assert out.shape == (N, COUT, H, W)
    # bf16 matmul inputs (f32 accumulation) vs a pure-f32 reference -> relaxed tolerance.
    assert jnp.allclose(out, ref, atol=5e-2, rtol=5e-2), "mismatch vs reference"

    print("KERNEL_OK")
</pallas_src>

<mosaic_0001>
module attributes {stable_mosaic.version = 11 : i64} {
  func.func @_fused_kernel(%arg0: i32, %arg1: memref<2x576x256xbf16, #tpu.memory_space<vmem>>, %arg2: memref<136x576xbf16, #tpu.memory_space<vmem>>, %arg3: memref<136x1xf32, #tpu.memory_space<vmem>>, %arg4: memref<136x1xf32, #tpu.memory_space<vmem>>, %arg5: memref<816x136xbf16, #tpu.memory_space<vmem>>, %arg6: memref<2x816x256xf32, #tpu.memory_space<vmem>>, %arg7: memref<2x136x256xf32, #tpu.memory_space<vmem>>) attributes {dimension_semantics = [#tpu.dimension_semantics<arbitrary>], iteration_bounds = array<i64: 1>, scalar_prefetch = 0 : i64, scratch_operands = 1 : i64, tpu.core_type = #tpu.core_type<tc>, window_params = [{pipeline_mode = #tpu.pipeline_mode<synchronous>, transform_indices = @transform_0, window_bounds = array<i64: 2, 576, 256>}, {pipeline_mode = #tpu.pipeline_mode<synchronous>, transform_indices = @transform_1, window_bounds = array<i64: 136, 576>}, {pipeline_mode = #tpu.pipeline_mode<synchronous>, transform_indices = @transform_2, window_bounds = array<i64: 136, 1>}, {pipeline_mode = #tpu.pipeline_mode<synchronous>, transform_indices = @transform_3, window_bounds = array<i64: 136, 1>}, {pipeline_mode = #tpu.pipeline_mode<synchronous>, transform_indices = @transform_4, window_bounds = array<i64: 816, 136>}, {pipeline_mode = #tpu.pipeline_mode<synchronous>, transform_indices = @transform_5, window_bounds = array<i64: 2, 816, 256>}]} {
    %cst = arith.constant 0.000000e+00 : f32
    %0 = vector.broadcast %cst : f32 to vector<136x1xf32>
    %cst_0 = arith.constant 0.000000e+00 : f32
    %1 = vector.broadcast %cst_0 : f32 to vector<136x1xf32>
    %c0 = arith.constant 0 : index
    %c0_1 = arith.constant 0 : index
    %2 = vector.load %arg2[%c0, %c0_1] : memref<136x576xbf16, #tpu.memory_space<vmem>>, vector<136x576xbf16>
    %c0_2 = arith.constant 0 : index
    %c0_3 = arith.constant 0 : index
    %c0_4 = arith.constant 0 : index
    %3 = vector.load %arg1[%c0_2, %c0_3, %c0_4] : memref<2x576x256xbf16, #tpu.memory_space<vmem>>, vector<1x576x256xbf16>
    %4 = vector.shape_cast %3 : vector<1x576x256xbf16> to vector<576x256xbf16>
    %cst_5 = arith.constant dense<0.000000e+00> : vector<136x256xf32>
    %5 = tpu.matmul %2, %4, %cst_5 {dimension_numbers = #tpu.dot_dimension_numbers<[1], [0], [0], [1], [0, 0, 1, 1], [], []>} : vector<136x576xbf16>, vector<576x256xbf16>, vector<136x256xf32> -> vector<136x256xf32>
    %c0_6 = arith.constant 0 : index
    %c0_7 = arith.constant 0 : index
    %c0_8 = arith.constant 0 : index
    %6 = vector.load %arg7[%c0_6, %c0_7, %c0_8] : memref<2x136x256xf32, #tpu.memory_space<vmem>>, vector<1x136x256xf32>
    %7 = vector.shape_cast %6 : vector<1x136x256xf32> to vector<136x256xf32>
    %8 = vector.shape_cast %5 : vector<136x256xf32> to vector<1x136x256xf32>
    tpu.vector_store %arg7[%c0_6, %c0_7, %c0_8], %8 {strides = array<i32>} : memref<2x136x256xf32, #tpu.memory_space<vmem>>, vector<1x136x256xf32>,
    %cst_9 = arith.constant dense<0.000000e+00> : vector<136xf32>
    %9 = vector.multi_reduction <add>, %5, %cst_9 [1] : vector<136x256xf32> to vector<136xf32>
    %10 = vector.shape_cast %9 : vector<136xf32> to vector<136x1xf32>
    %11 = arith.addf %0, %10 : vector<136x1xf32>
    %12 = arith.mulf %5, %5 : vector<136x256xf32>
    %cst_10 = arith.constant dense<0.000000e+00> : vector<136xf32>
    %13 = vector.multi_reduction <add>, %12, %cst_10 [1] : vector<136x256xf32> to vector<136xf32>
    %14 = vector.shape_cast %13 : vector<136xf32> to vector<136x1xf32>
    %15 = arith.addf %1, %14 : vector<136x1xf32>
    %c0_11 = arith.constant 0 : index
    %c0_12 = arith.constant 0 : index
    %16 = vector.load %arg2[%c0_11, %c0_12] : memref<136x576xbf16, #tpu.memory_space<vmem>>, vector<136x576xbf16>
    %c1 = arith.constant 1 : index
    %c0_13 = arith.constant 0 : index
    %c0_14 = arith.constant 0 : index
    %17 = vector.load %arg1[%c1, %c0_13, %c0_14] : memref<2x576x256xbf16, #tpu.memory_space<vmem>>, vector<1x576x256xbf16>
    %18 = vector.shape_cast %17 : vector<1x576x256xbf16> to vector<576x256xbf16>
    %cst_15 = arith.constant dense<0.000000e+00> : vector<136x256xf32>
    %19 = tpu.matmul %16, %18, %cst_15 {dimension_numbers = #tpu.dot_dimension_numbers<[1], [0], [0], [1], [0, 0, 1, 1], [], []>} : vector<136x576xbf16>, vector<576x256xbf16>, vector<136x256xf32> -> vector<136x256xf32>
    %c1_16 = arith.constant 1 : index
    %c0_17 = arith.constant 0 : index
    %c0_18 = arith.constant 0 : index
    %20 = vector.load %arg7[%c1_16, %c0_17, %c0_18] : memref<2x136x256xf32, #tpu.memory_space<vmem>>, vector<1x136x256xf32>
    %21 = vector.shape_cast %20 : vector<1x136x256xf32> to vector<136x256xf32>
    %22 = vector.shape_cast %19 : vector<136x256xf32> to vector<1x136x256xf32>
    tpu.vector_store %arg7[%c1_16, %c0_17, %c0_18], %22 {strides = array<i32>} : memref<2x136x256xf32, #tpu.memory_space<vmem>>, vector<1x136x256xf32>,
    %cst_19 = arith.constant dense<0.000000e+00> : vector<136xf32>
    %23 = vector.multi_reduction <add>, %19, %cst_19 [1] : vector<136x256xf32> to vector<136xf32>
    %24 = vector.shape_cast %23 : vector<136xf32> to vector<136x1xf32>
    %25 = arith.addf %11, %24 : vector<136x1xf32>
    %26 = arith.mulf %19, %19 : vector<136x256xf32>
    %cst_20 = arith.constant dense<0.000000e+00> : vector<136xf32>
    %27 = vector.multi_reduction <add>, %26, %cst_20 [1] : vector<136x256xf32> to vector<136xf32>
    %28 = vector.shape_cast %27 : vector<136xf32> to vector<136x1xf32>
    %29 = arith.addf %15, %28 : vector<136x1xf32>
    %cst_21 = arith.constant 0.00255102036 : f32
    %30 = vector.broadcast %cst_21 : f32 to vector<136x1xf32>
    %31 = arith.mulf %25, %30 : vector<136x1xf32>
    %cst_22 = arith.constant 0.00255102036 : f32
    %32 = vector.broadcast %cst_22 : f32 to vector<136x1xf32>
    %33 = arith.mulf %29, %32 : vector<136x1xf32>
    %34 = arith.mulf %31, %31 : vector<136x1xf32>
    %35 = arith.subf %33, %34 : vector<136x1xf32>
    %cst_23 = arith.constant 0.000000e+00 : f32
    %36 = vector.broadcast %cst_23 : f32 to vector<136x1xf32>
    %37 = arith.maximumf %35, %36 : vector<136x1xf32>
    %cst_24 = arith.constant 9.99999974E-6 : f32
    %38 = vector.broadcast %cst_24 : f32 to vector<136x1xf32>
    %39 = arith.addf %37, %38 : vector<136x1xf32>
    %40 = math.rsqrt %39 : vector<136x1xf32>
    %c0_25 = arith.constant 0 : index
    %c0_26 = arith.constant 0 : index
    %41 = vector.load %arg3[%c0_25, %c0_26] : memref<136x1xf32, #tpu.memory_space<vmem>>, vector<136x1xf32>
    %42 = arith.mulf %40, %41 : vector<136x1xf32>
    %c0_27 = arith.constant 0 : index
    %c0_28 = arith.constant 0 : index
    %43 = vector.load %arg4[%c0_27, %c0_28] : memref<136x1xf32, #tpu.memory_space<vmem>>, vector<136x1xf32>
    %44 = arith.mulf %31, %42 : vector<136x1xf32>
    %45 = arith.subf %43, %44 : vector<136x1xf32>
    %c0_29 = arith.constant 0 : index
    %c0_30 = arith.constant 0 : index
    %c0_31 = arith.constant 0 : index
    %46 = vector.load %arg7[%c0_29, %c0_30, %c0_31] : memref<2x136x256xf32, #tpu.memory_space<vmem>>, vector<1x136x256xf32>
    %47 = vector.shape_cast %46 : vector<1x136x256xf32> to vector<136x256xf32>
    %48 = vector.broadcast %42 : vector<136x1xf32> to vector<136x256xf32>
    %49 = arith.mulf %47, %48 : vector<136x256xf32>
    %50 = vector.broadcast %45 : vector<136x1xf32> to vector<136x256xf32>
    %51 = arith.addf %49, %50 : vector<136x256xf32>
    %52 = arith.truncf %51 : vector<136x256xf32> to vector<136x256xbf16>
    %c0_32 = arith.constant 0 : index
    %c0_33 = arith.constant 0 : index
    %53 = vector.load %arg5[%c0_32, %c0_33] : memref<816x136xbf16, #tpu.memory_space<vmem>>, vector<816x136xbf16>
    %cst_34 = arith.constant dense<0.000000e+00> : vector<816x256xf32>
    %54 = tpu.matmul %53, %52, %cst_34 {dimension_numbers = #tpu.dot_dimension_numbers<[1], [0], [0], [1], [0, 0, 1, 1], [], []>} : vector<816x136xbf16>, vector<136x256xbf16>, vector<816x256xf32> -> vector<816x256xf32>
    %c0_35 = arith.constant 0 : index
    %c0_36 = arith.constant 0 : index
    %c0_37 = arith.constant 0 : index
    %55 = vector.load %arg6[%c0_35, %c0_36, %c0_37] : memref<2x816x256xf32, #tpu.memory_space<vmem>>, vector<1x816x256xf32>
    %56 = vector.shape_cast %55 : vector<1x816x256xf32> to vector<816x256xf32>
    %57 = vector.shape_cast %54 : vector<816x256xf32> to vector<1x816x256xf32>
    tpu.vector_store %arg6[%c0_35, %c0_36, %c0_37], %57 {strides = array<i32>} : memref<2x816x256xf32, #tpu.memory_space<vmem>>, vector<1x816x256xf32>,
    %c1_38 = arith.constant 1 : index
    %c0_39 = arith.constant 0 : index
    %c0_40 = arith.constant 0 : index
    %58 = vector.load %arg7[%c1_38, %c0_39, %c0_40] : memref<2x136x256xf32, #tpu.memory_space<vmem>>, vector<1x136x256xf32>
    %59 = vector.shape_cast %58 : vector<1x136x256xf32> to vector<136x256xf32>
    %60 = vector.broadcast %42 : vector<136x1xf32> to vector<136x256xf32>
    %61 = arith.mulf %59, %60 : vector<136x256xf32>
    %62 = vector.broadcast %45 : vector<136x1xf32> to vector<136x256xf32>
    %63 = arith.addf %61, %62 : vector<136x256xf32>
    %64 = arith.truncf %63 : vector<136x256xf32> to vector<136x256xbf16>
    %c0_41 = arith.constant 0 : index
    %c0_42 = arith.constant 0 : index
    %65 = vector.load %arg5[%c0_41, %c0_42] : memref<816x136xbf16, #tpu.memory_space<vmem>>, vector<816x136xbf16>
    %cst_43 = arith.constant dense<0.000000e+00> : vector<816x256xf32>
    %66 = tpu.matmul %65, %64, %cst_43 {dimension_numbers = #tpu.dot_dimension_numbers<[1], [0], [0], [1], [0, 0, 1, 1], [], []>} : vector<816x136xbf16>, vector<136x256xbf16>, vector<816x256xf32> -> vector<816x256xf32>
    %c1_44 = arith.constant 1 : index
    %c0_45 = arith.constant 0 : index
    %c0_46 = arith.constant 0 : index
    %67 = vector.load %arg6[%c1_44, %c0_45, %c0_46] : memref<2x816x256xf32, #tpu.memory_space<vmem>>, vector<1x816x256xf32>
    %68 = vector.shape_cast %67 : vector<1x816x256xf32> to vector<816x256xf32>
    %69 = vector.shape_cast %66 : vector<816x256xf32> to vector<1x816x256xf32>
    tpu.vector_store %arg6[%c1_44, %c0_45, %c0_46], %69 {strides = array<i32>} : memref<2x816x256xf32, #tpu.memory_space<vmem>>, vector<1x816x256xf32>,
    return
  }
  func.func @transform_0(%arg0: i32) -> (i32, i32, i32) {
    %c0_i32 = arith.constant 0 : i32
    %c0_i32_0 = arith.constant 0 : i32
    %c0_i32_1 = arith.constant 0 : i32
    %c0_i32_2 = arith.constant 0 : i32
    return %c0_i32, %c0_i32_0, %c0_i32_1 : i32, i32, i32
  }
  func.func @transform_1(%arg0: i32) -> (i32, i32) {
    %c0_i32 = arith.constant 0 : i32
    %c0_i32_0 = arith.constant 0 : i32
    %c0_i32_1 = arith.constant 0 : i32
    return %c0_i32, %c0_i32_0 : i32, i32
  }
  func.func @transform_2(%arg0: i32) -> (i32, i32) {
    %c0_i32 = arith.constant 0 : i32
    %c0_i32_0 = arith.constant 0 : i32
    %c0_i32_1 = arith.constant 0 : i32
    return %c0_i32, %c0_i32_0 : i32, i32
  }
  func.func @transform_3(%arg0: i32) -> (i32, i32) {
    %c0_i32 = arith.constant 0 : i32
    %c0_i32_0 = arith.constant 0 : i32
    %c0_i32_1 = arith.constant 0 : i32
    return %c0_i32, %c0_i32_0 : i32, i32
  }
  func.func @transform_4(%arg0: i32) -> (i32, i32) {
    %c0_i32 = arith.constant 0 : i32
    %c0_i32_0 = arith.constant 0 : i32
    %c0_i32_1 = arith.constant 0 : i32
    return %c0_i32, %c0_i32_0 : i32, i32
  }
  func.func @transform_5(%arg0: i32) -> (i32, i32, i32) {
    %c0_i32 = arith.constant 0 : i32
    %c0_i32_0 = arith.constant 0 : i32
    %c0_i32_1 = arith.constant 0 : i32
    %c0_i32_2 = arith.constant 0 : i32
    return %c0_i32, %c0_i32_0, %c0_i32_1 : i32, i32, i32
  }
}

</mosaic_0001>

<bundles_post_ra>
// kernel: fused_forward.1
= control target key start
LH: loop header
LB: loop body
LE: loop exit
PB: predicated region body
PF: predicated region fallthrough
CT: control target
= control target key end

     0   :  { %vm721_vm0 = vcmask 523264   ;;  %s16037_s0 = inlined_call_operand.vmem [shape: bf16[2,576,256], index: 0, kind: input, shape index: {}]   ;;  %s16038_s1 = inlined_call_operand.vmem [shape: bf16[136,576], index: 1, kind: input, shape index: {}]   ;;  %s16039_s2 = inlined_call_operand.vmem [shape: f32[136,1], index: 2, kind: input, shape index: {}]   ;;  %s16040_s3 = inlined_call_operand.vmem [shape: f32[136,1], index: 3, kind: input, shape index: {}]   ;;  %s16041_s4 = inlined_call_operand.vmem [shape: bf16[816,136], index: 4, kind: input, shape index: {}]   ;;  %s16042_s5 = inlined_call_operand.vmem [shape: f32[2,816,256], index: 5, kind: output, shape index: {}]  }
   0x1   :  { %v7898_v0 = vld [vmem:[%s16037_s0 + $0x70] sm:$0xf]  ;;  %v9963_v1 = vld [vmem:[%s16037_s0 + $0x74] sm:$0xf0]  ;;  %v7890_v11 = vld [vmem:[%s16037_s0 + $0x60] sm:$0xf] }
   0x2   :  { %v7962_v2 = vld [vmem:[%s16037_s0 + $0xf0] sm:$0xf]  ;;  %v7899_v3 = vor.u32 %v9963_v1, %v7898_v0  ;;  %v9979_v4 = vld [vmem:[%s16037_s0 + $0xf4] sm:$0xf0]  ;;  %v9961_v13 = vld [vmem:[%s16037_s0 + $0x64] sm:$0xf0] }
   0x3   :  { %v8026_v5 = vld [vmem:[%s16037_s0 + $0x170] sm:$0xf]  ;;  %v9995_v6 = vld [vmem:[%s16037_s0 + $0x174] sm:$0xf0]  ;;  %v7963_v7 = vor.u32 %v9979_v4, %v7962_v2  ;;  %v7954_v14 = vld [vmem:[%s16037_s0 + $0xe0] sm:$0xf]  ;;  %v7891_v16 = vor.u32 %v9961_v13, %v7890_v11 }
   0x4   :  { %v8027_v8 = vor.u32 %v9995_v6, %v8026_v5  ;;  %v8090_v9 = vld [vmem:[%s16037_s0 + $0x1f0] sm:$0xf]  ;;  %v10011_v10 = vld [vmem:[%s16037_s0 + $0x1f4] sm:$0xf0]  ;;  %749 = vmatpush.bf16.msra.mxu0 %v7899_v3  ;;  %v9977_v15 = vld [vmem:[%s16037_s0 + $0xe4] sm:$0xf0] }
   0x5   :  { %v8091_v12 = vor.u32 %v10011_v10, %v8090_v9  ;;  %802 = vmatpush.bf16.msra.mxu1 %v7963_v7  ;;  %v7955_v17 = vor.u32 %v9977_v15, %v7954_v14  ;;  %v8018_v18 = vld [vmem:[%s16037_s0 + $0x160] sm:$0xf]  ;;  %v9993_v19 = vld [vmem:[%s16037_s0 + $0x164] sm:$0xf0]  ;;  %v7882_v23 = vld [vmem:[%s16037_s0 + $0x50] sm:$0xf] }
   0x6   :  { %855 = vmatpush.bf16.msra.mxu2 %v8027_v8  ;;  %v8082_v20 = vld [vmem:[%s16037_s0 + $0x1e0] sm:$0xf]  ;;  %v8019_v21 = vor.u32 %v9993_v19, %v8018_v18  ;;  %v10009_v22 = vld [vmem:[%s16037_s0 + $0x1e4] sm:$0xf0]  ;;  %v9959_v24 = vld [vmem:[%s16037_s0 + $0x54] sm:$0xf0] }
   0x7   :  { %908 = vmatpush.bf16.msra.mxu3 %v8091_v12  ;;  %v8083_v25 = vor.u32 %v10009_v22, %v8082_v20  ;;  %v7946_v26 = vld [vmem:[%s16037_s0 + $0xd0] sm:$0xf]  ;;  %v9975_v27 = vld [vmem:[%s16037_s0 + $0xd4] sm:$0xf0]  ;;  %v7883_v29 = vor.u32 %v9959_v24, %v7882_v23  ;;  %v7874_v35 = vld [vmem:[%s16037_s0 + $0x40] sm:$0xf] }
   0x8   :  { %v8010_v28 = vld [vmem:[%s16037_s0 + $0x150] sm:$0xf]  ;;  %750 = vmatpush.bf16.msra.mxu0 %v7891_v16  ;;  %v9991_v30 = vld [vmem:[%s16037_s0 + $0x154] sm:$0xf0]  ;;  %v7947_v33 = vor.u32 %v9975_v27, %v7946_v26  ;;  %v9957_v36 = vld [vmem:[%s16037_s0 + $0x44] sm:$0xf0] }
   0x9   :  { %v8074_v31 = vld [vmem:[%s16037_s0 + $0x1d0] sm:$0xf]  ;;  %v10007_v32 = vld [vmem:[%s16037_s0 + $0x1d4] sm:$0xf0]  ;;  %803 = vmatpush.bf16.msra.mxu1 %v7955_v17  ;;  %v8011_v34 = vor.u32 %v9991_v30, %v8010_v28  ;;  %v7938_v37 = vld [vmem:[%s16037_s0 + $0xc0] sm:$0xf]  ;;  %v7875_v44 = vor.u32 %v9957_v36, %v7874_v35 }
   0xa   :  { %856 = vmatpush.bf16.msra.mxu2 %v8019_v21  ;;  %v8075_v38 = vor.u32 %v10007_v32, %v8074_v31  ;;  %v9973_v39 = vld [vmem:[%s16037_s0 + $0xc4] sm:$0xf0]  ;;  %v8002_v40 = vld [vmem:[%s16037_s0 + $0x140] sm:$0xf]  ;;  %v7866_v47 = vld [vmem:[%s16037_s0 + $0x30] sm:$0xf] }
   0xb   :  { %909 = vmatpush.bf16.msra.mxu3 %v8083_v25  ;;  %v9989_v41 = vld [vmem:[%s16037_s0 + $0x144] sm:$0xf0]  ;;  %v8066_v42 = vld [vmem:[%s16037_s0 + $0x1c0] sm:$0xf]  ;;  %v7939_v45 = vor.u32 %v9973_v39, %v7938_v37  ;;  %v9955_v48 = vld [vmem:[%s16037_s0 + $0x34] sm:$0xf0] }
   0xc   :  { %v10005_v43 = vld [vmem:[%s16037_s0 + $0x1c4] sm:$0xf0]  ;;  %751 = vmatpush.bf16.msra.mxu0 %v7883_v29  ;;  %v8003_v46 = vor.u32 %v9989_v41, %v8002_v40  ;;  %v7930_v49 = vld [vmem:[%s16037_s0 + $0xb0] sm:$0xf]  ;;  %v9971_v51 = vld [vmem:[%s16037_s0 + $0xb4] sm:$0xf0]  ;;  %v7867_v56 = vor.u32 %v9955_v48, %v7866_v47 }
   0xd   :  { %804 = vmatpush.bf16.msra.mxu1 %v7947_v33  ;;  %v8067_v50 = vor.u32 %v10005_v43, %v8066_v42  ;;  %v7994_v52 = vld [vmem:[%s16037_s0 + $0x130] sm:$0xf]  ;;  %v9987_v53 = vld [vmem:[%s16037_s0 + $0x134] sm:$0xf0]  ;;  %v7931_v57 = vor.u32 %v9971_v51, %v7930_v49  ;;  %v7858_v59 = vld [vmem:[%s16037_s0 + $0x20] sm:$0xf] }
   0xe   :  { %857 = vmatpush.bf16.msra.mxu2 %v8011_v34  ;;  %v8058_v54 = vld [vmem:[%s16037_s0 + $0x1b0] sm:$0xf]  ;;  %v10003_v55 = vld [vmem:[%s16037_s0 + $0x1b4] sm:$0xf0]  ;;  %v7995_v58 = vor.u32 %v9987_v53, %v7994_v52  ;;  %v9953_v60 = vld [vmem:[%s16037_s0 + $0x24] sm:$0xf0] }
   0xf   :  { %910 = vmatpush.bf16.msra.mxu3 %v8075_v38  ;;  %v7922_v61 = vld [vmem:[%s16037_s0 + $0xa0] sm:$0xf]  ;;  %v8059_v62 = vor.u32 %v10003_v55, %v8058_v54  ;;  %v9969_v63 = vld [vmem:[%s16037_s0 + $0xa4] sm:$0xf0]  ;;  %v7859_v4 = vor.u32 %v9953_v60, %v7858_v59  ;;  %v7850_v7 = vld [vmem:[%s16037_s0 + $0x10] sm:$0xf] }
  0x10   :  { %752 = vmatpush.bf16.msra.mxu0 %v7875_v44  ;;  %v7986_v0 = vld [vmem:[%s16037_s0 + $0x120] sm:$0xf]  ;;  %v9985_v1 = vld [vmem:[%s16037_s0 + $0x124] sm:$0xf0]  ;;  %v7923_v5 = vor.u32 %v9969_v63, %v7922_v61  ;;  %v9951_v8 = vld [vmem:[%s16037_s0 + $0x14] sm:$0xf0] }
  0x11   :  { %805 = vmatpush.bf16.msra.mxu1 %v7939_v45  ;;  %v8050_v2 = vld [vmem:[%s16037_s0 + $0x1a0] sm:$0xf]  ;;  %v10001_v3 = vld [vmem:[%s16037_s0 + $0x1a4] sm:$0xf0]  ;;  %v7987_v6 = vor.u32 %v9985_v1, %v7986_v0  ;;  %v7914_v9 = vld [vmem:[%s16037_s0 + $0x90] sm:$0xf]  ;;  %v7851_v16 = vor.u32 %v9951_v8, %v7850_v7 }
  0x12   :  { %858 = vmatpush.bf16.msra.mxu2 %v8003_v46  ;;  %v8051_v10 = vor.u32 %v10001_v3, %v8050_v2  ;;  %v9967_v11 = vld [vmem:[%s16037_s0 + $0x94] sm:$0xf0]  ;;  %v7978_v12 = vld [vmem:[%s16037_s0 + $0x110] sm:$0xf]  ;;  %v7842_v19 = vld [vmem:[%s16037_s0] sm:$0xf] }
  0x13   :  { %911 = vmatpush.bf16.msra.mxu3 %v8067_v50  ;;  %v9983_v13 = vld [vmem:[%s16037_s0 + $0x114] sm:$0xf0]  ;;  %v8042_v14 = vld [vmem:[%s16037_s0 + $0x190] sm:$0xf]  ;;  %v7915_v17 = vor.u32 %v9967_v11, %v7914_v9  ;;  %v9949_v20 = vld [vmem:[%s16037_s0 + $0x4] sm:$0xf0] }
  0x14   :  { %753 = vmatpush.bf16.msra.mxu0 %v7867_v56  ;;  %v9999_v15 = vld [vmem:[%s16037_s0 + $0x194] sm:$0xf0]  ;;  %v7979_v18 = vor.u32 %v9983_v13, %v7978_v12  ;;  %v7906_v21 = vld [vmem:[%s16037_s0 + $0x80] sm:$0xf]  ;;  %v9965_v23 = vld [vmem:[%s16037_s0 + $0x84] sm:$0xf0]  ;;  %v7843_v28 = vor.u32 %v9949_v20, %v7842_v19 }
  0x15   :  { %806 = vmatpush.bf16.msra.mxu1 %v7931_v57  ;;  %v8043_v22 = vor.u32 %v9999_v15, %v8042_v14  ;;  %v7970_v24 = vld [vmem:[%s16037_s0 + $0x100] sm:$0xf]  ;;  %v9981_v25 = vld [vmem:[%s16037_s0 + $0x104] sm:$0xf0]  ;;  %v9910_v30 = vld [vmem:[%s16038_s1 + $0x10] sm:$0xf0]  ;;  %v7907_v32 = vor.u32 %v9965_v23, %v7906_v21 }
  0x16   :  { %859 = vmatpush.bf16.msra.mxu2 %v7995_v58  ;;  %v8034_v26 = vld [vmem:[%s16037_s0 + $0x180] sm:$0xf]  ;;  %v9997_v27 = vld [vmem:[%s16037_s0 + $0x184] sm:$0xf0]  ;;  %v9908_v31 = vld [vmem:[%s16038_s1 + $0x4] sm:$0xf]  ;;  %v7971_v33 = vor.u32 %v9981_v25, %v7970_v24 }
  0x17   :  { %912 = vmatpush.bf16.msra.mxu3 %v8059_v62  ;;  %v7682_v29 = vld [vmem:[%s16038_s1] sm:$0xf]  ;;  %v7684_v34 = vld [vmem:[%s16038_s1 + $0x14] sm:$0xf0]  ;;  %v7690_v35 = vld [vmem:[%s16038_s1 + $0x8] sm:$0xf]  ;;  %v8035_v37 = vor.u32 %v9997_v27, %v8034_v26 }
  0x18   :  { %754 = vmatpush.bf16.msra.mxu0 %v7859_v4  ;;  %v9911_v36 = vld [vmem:[%s16038_s1 + $0x18] sm:$0xf0]  ;;  %v9909_v38 = vld [vmem:[%s16038_s1 + $0xc] sm:$0xf]  ;;  %v7692_v39 = vld [vmem:[%s16038_s1 + $0x1c] sm:$0xf0]  ;;  %v10621_v40 = vor.u32 %v9910_v30, %v7682_v29  ;;  %v10623_v41 = vor.u32 %v9908_v31, %v7684_v34 }
  0x19   :  { %807 = vmatpush.bf16.msra.mxu1 %v7923_v5  ;;  %v10625_v42 = vor.u32 %v9911_v36, %v7690_v35  ;;  %v10627_v43 = vor.u32 %v9909_v38, %v7692_v39  ;;  %v7702_v44 = vld [vmem:[%s16038_s1 + $0x28] sm:$0xf]  ;;  %v9915_v45 = vld [vmem:[%s16038_s1 + $0x38] sm:$0xf0]  ;;  %v9913_v46 = vld [vmem:[%s16038_s1 + $0x2c] sm:$0xf] }
  0x1a   :  { %860 = vmatpush.bf16.msra.mxu2 %v7987_v6  ;;  %v7704_v47 = vld [vmem:[%s16038_s1 + $0x3c] sm:$0xf0]  ;;  %v7710_v48 = vld [vmem:[%s16038_s1 + $0x30] sm:$0xf]  ;;  %v9916_v49 = vld [vmem:[%s16038_s1 + $0x40] sm:$0xf0]  ;;  %v10657_v52 = vor.u32 %v9915_v45, %v7702_v44 }
  0x1b   :  { %913 = vmatpush.bf16.msra.mxu3 %v8051_v10  ;;  %v9914_v50 = vld [vmem:[%s16038_s1 + $0x34] sm:$0xf]  ;;  %v7712_v51 = vld [vmem:[%s16038_s1 + $0x44] sm:$0xf0]  ;;  %v10659_v53 = vor.u32 %v9913_v46, %v7704_v47  ;;  %v10661_v54 = vor.u32 %v9916_v49, %v7710_v48  ;;  %v7722_v56 = vld [vmem:[%s16038_s1 + $0x50] sm:$0xf] }
  0x1c   :  { %755 = vmatpush.bf16.msra.mxu0 %v7851_v16  ;;  %v10663_v55 = vor.u32 %v9914_v50, %v7712_v51  ;;  %v9920_v57 = vld [vmem:[%s16038_s1 + $0x60] sm:$0xf0]  ;;  %v9918_v58 = vld [vmem:[%s16038_s1 + $0x54] sm:$0xf]  ;;  %v7724_v59 = vld [vmem:[%s16038_s1 + $0x64] sm:$0xf0] }
  0x1d   :  { %808 = vmatpush.bf16.msra.mxu1 %v7915_v17  ;;  %v7730_v60 = vld [vmem:[%s16038_s1 + $0x58] sm:$0xf]  ;;  %v9921_v61 = vld [vmem:[%s16038_s1 + $0x68] sm:$0xf0]  ;;  %v9919_v62 = vld [vmem:[%s16038_s1 + $0x5c] sm:$0xf]  ;;  %v10693_v0 = vor.u32 %v9920_v57, %v7722_v56  ;;  %v10695_v1 = vor.u32 %v9918_v58, %v7724_v59 }
  0x1e   :  { %861 = vmatpush.bf16.msra.mxu2 %v7979_v18  ;;  %v7732_v63 = vld [vmem:[%s16038_s1 + $0x6c] sm:$0xf0]  ;;  %v10697_v2 = vor.u32 %v9921_v61, %v7730_v60  ;;  %v7742_v4 = vld [vmem:[%s16038_s1 + $0x78] sm:$0xf]  ;;  %v9925_v5 = vld [vmem:[%s16038_s1 + $0x88] sm:$0xf0] }
  0x1f   :  { %914 = vmatpush.bf16.msra.mxu3 %v8043_v22  ;;  %v10699_v3 = vor.u32 %v9919_v62, %v7732_v63  ;;  %v9923_v6 = vld [vmem:[%s16038_s1 + $0x7c] sm:$0xf]  ;;  %v7744_v7 = vld [vmem:[%s16038_s1 + $0x8c] sm:$0xf0]  ;;  %v7750_v8 = vld [vmem:[%s16038_s1 + $0x80] sm:$0xf]  ;;  %v10729_v12 = vor.u32 %v9925_v5, %v7742_v4 }
  0x20   :  { %756 = vmatpush.bf16.msra.mxu0 %v7843_v28  ;;  %v9926_v9 = vld [vmem:[%s16038_s1 + $0x90] sm:$0xf0]  ;;  %v9924_v10 = vld [vmem:[%s16038_s1 + $0x84] sm:$0xf]  ;;  %v7752_v11 = vld [vmem:[%s16038_s1 + $0x94] sm:$0xf0]  ;;  %v10731_v13 = vor.u32 %v9923_v6, %v7744_v7 }
  0x21   :  { %809 = vmatpush.bf16.msra.mxu1 %v7907_v32  ;;  %v10733_v14 = vor.u32 %v9926_v9, %v7750_v8  ;;  %v10735_v15 = vor.u32 %v9924_v10, %v7752_v11  ;;  %v7762_v16 = vld [vmem:[%s16038_s1 + $0xa0] sm:$0xf]  ;;  %v9930_v17 = vld [vmem:[%s16038_s1 + $0xb0] sm:$0xf0]  ;;  %v9928_v18 = vld [vmem:[%s16038_s1 + $0xa4] sm:$0xf] }
  0x22   :  { %862 = vmatpush.bf16.msra.mxu2 %v7971_v33  ;;  %v7764_v19 = vld [vmem:[%s16038_s1 + $0xb4] sm:$0xf0]  ;;  %v7770_v20 = vld [vmem:[%s16038_s1 + $0xa8] sm:$0xf]  ;;  %v9931_v21 = vld [vmem:[%s16038_s1 + $0xb8] sm:$0xf0]  ;;  %v10765_v24 = vor.u32 %v9930_v17, %v7762_v16 }
  0x23   :  { %915 = vmatpush.bf16.msra.mxu3 %v8035_v37  ;;  %757 = vmatmul.bf16.vlgmr.msra.gmra.mxu0 %v10621_v40  ;;  %v9929_v22 = vld [vmem:[%s16038_s1 + $0xac] sm:$0xf]  ;;  %v7772_v23 = vld [vmem:[%s16038_s1 + $0xbc] sm:$0xf0]  ;;  %v10767_v25 = vor.u32 %v9928_v18, %v7764_v19  ;;  %v10769_v26 = vor.u32 %v9931_v21, %v7770_v20  ;;  %v7782_v28 = vld [vmem:[%s16038_s1 + $0xc8] sm:$0xf] }
  0x24   :  { %810 = vmatmul.bf16.vlgmr.msra.gmra.mxu1 %v10623_v41  ;;  %v10771_v27 = vor.u32 %v9929_v22, %v7772_v23  ;;  %v9935_v29 = vld [vmem:[%s16038_s1 + $0xd8] sm:$0xf0]  ;;  %v9933_v30 = vld [vmem:[%s16038_s1 + $0xcc] sm:$0xf]  ;;  %v7784_v31 = vld [vmem:[%s16038_s1 + $0xdc] sm:$0xf0] }
  0x25   :  { %863 = vmatmul.bf16.vlgmr.msra.gmra.mxu2 %v10625_v42  ;;  %v7790_v32 = vld [vmem:[%s16038_s1 + $0xd0] sm:$0xf]  ;;  %v9936_v33 = vld [vmem:[%s16038_s1 + $0xe0] sm:$0xf0]  ;;  %v9934_v34 = vld [vmem:[%s16038_s1 + $0xd4] sm:$0xf]  ;;  %v10801_v36 = vor.u32 %v9935_v29, %v7782_v28  ;;  %v10803_v37 = vor.u32 %v9933_v30, %v7784_v31 }
  0x26   :  { %916 = vmatmul.bf16.vlgmr.msra.gmra.mxu3 %v10627_v43  ;;  %v7792_v35 = vld [vmem:[%s16038_s1 + $0xe4] sm:$0xf0]  ;;  %v10805_v38 = vor.u32 %v9936_v33, %v7790_v32  ;;  %v9962_v44 = vld [vmem:[%s16037_s0 + $0x74] sm:$0xf]  ;;  %v7900_v45 = vld [vmem:[%s16037_s0 + $0x78] sm:$0xf0] }
  0x27   :  { %v10807_v39 = vor.u32 %v9934_v34, %v7792_v35  ;;  %v9978_v46 = vld [vmem:[%s16037_s0 + $0xf4] sm:$0xf]  ;;  %v7903_v47 = vor.u32 %v9962_v44, %v7900_v45  ;;  %v7964_v48 = vld [vmem:[%s16037_s0 + $0xf8] sm:$0xf0]  ;;  %v9960_v57 = vld [vmem:[%s16037_s0 + $0x64] sm:$0xf] }
  0x28   :  { %v9994_v49 = vld [vmem:[%s16037_s0 + $0x174] sm:$0xf]  ;;  %v8028_v50 = vld [vmem:[%s16037_s0 + $0x178] sm:$0xf0]  ;;  %v7967_v51 = vor.u32 %v9978_v46, %v7964_v48  ;;  %v7892_v58 = vld [vmem:[%s16037_s0 + $0x68] sm:$0xf0] }
  0x29   :  { %v8031_v56 = vor.u32 %v9994_v49, %v8028_v50  ;;  %v9976_v59 = vld [vmem:[%s16037_s0 + $0xe4] sm:$0xf]  ;;  %1014 = vmatpush.bf16.msrb.mxu1 %v7903_v47  ;;  %v7895_v60 = vor.u32 %v9960_v57, %v7892_v58  ;;  %v7956_v61 = vld [vmem:[%s16037_s0 + $0xe8] sm:$0xf0]  ;;  %v9958_v6 = vld [vmem:[%s16037_s0 + $0x54] sm:$0xf] }
  0x2a   :  { %v9992_v62 = vld [vmem:[%s16037_s0 + $0x164] sm:$0xf]  ;;  %v8020_v63 = vld [vmem:[%s16037_s0 + $0x168] sm:$0xf0]  ;;  %1067 = vmatpush.bf16.msrb.mxu2 %v7967_v51  ;;  %v7959_v4 = vor.u32 %v9976_v59, %v7956_v61  ;;  %v7884_v7 = vld [vmem:[%s16037_s0 + $0x58] sm:$0xf0] }
  0x2b   :  { %1120 = vmatpush.bf16.msrb.mxu3 %v8031_v56  ;;  %v8023_v5 = vor.u32 %v9992_v62, %v8020_v63  ;;  %v9974_v8 = vld [vmem:[%s16037_s0 + $0xd4] sm:$0xf]  ;;  %v7948_v9 = vld [vmem:[%s16037_s0 + $0xd8] sm:$0xf0]  ;;  %v7887_v16 = vor.u32 %v9958_v6, %v7884_v7  ;;  %v7802_v17 = vld [vmem:[%s16038_s1 + $0xf0] sm:$0xf] }
  0x2c   :  { %v9990_v10 = vld [vmem:[%s16037_s0 + $0x154] sm:$0xf]  ;;  %v8012_v11 = vld [vmem:[%s16037_s0 + $0x158] sm:$0xf0]  ;;  %v9940_v18 = vld [vmem:[%s16038_s1 + $0x100] sm:$0xf0]  ;;  %v7951_v20 = vor.u32 %v9974_v8, %v7948_v9 }
  0x2d   :  { %1015 = vmatpush.bf16.msrb.mxu1 %v7895_v60  ;;  %v9938_v19 = vld [vmem:[%s16038_s1 + $0xf4] sm:$0xf]  ;;  %v8015_v21 = vor.u32 %v9990_v10, %v8012_v11  ;;  %v7804_v22 = vld [vmem:[%s16038_s1 + $0x104] sm:$0xf0]  ;;  %v7810_v23 = vld [vmem:[%s16038_s1 + $0xf8] sm:$0xf]  ;;  %v10891_v31 = vor.u32 %v9940_v18, %v7802_v17 }
  0x2e   :  { %1068 = vmatpush.bf16.msrb.mxu2 %v7959_v4  ;;  %v9941_v28 = vld [vmem:[%s16038_s1 + $0x108] sm:$0xf0]  ;;  %v9939_v29 = vld [vmem:[%s16038_s1 + $0xfc] sm:$0xf]  ;;  %v7812_v30 = vld [vmem:[%s16038_s1 + $0x10c] sm:$0xf0]  ;;  %v10902_v35 = vor.u32 %v9938_v19, %v7804_v22 }
  0x2f   :  { %1121 = vmatpush.bf16.msrb.mxu3 %v8023_v5  ;;  %v9956_v32 = vld [vmem:[%s16037_s0 + $0x44] sm:$0xf]  ;;  %v7876_v33 = vld [vmem:[%s16037_s0 + $0x48] sm:$0xf0]  ;;  %v10904_v44 = vor.u32 %v9941_v28, %v7810_v23  ;;  %v10915_v49 = vor.u32 %v9939_v29, %v7812_v30  ;;  %v8122_v56 = vld [vmem:[%s16037_s0 + $0x230] sm:$0xf] }
  0x30   :  { %v9972_v34 = vld [vmem:[%s16037_s0 + $0xc4] sm:$0xf]  ;;  %v7879_v45 = vor.u32 %v9956_v32, %v7876_v33  ;;  %v7940_v46 = vld [vmem:[%s16037_s0 + $0xc8] sm:$0xf0]  ;;  %v10019_v57 = vld [vmem:[%s16037_s0 + $0x234] sm:$0xf0] }
  0x31   :  { %1016 = vmatpush.bf16.msrb.mxu1 %v7887_v16  ;;  %v9988_v47 = vld [vmem:[%s16037_s0 + $0x144] sm:$0xf]  ;;  %v8004_v48 = vld [vmem:[%s16037_s0 + $0x148] sm:$0xf0]  ;;  %v7943_v50 = vor.u32 %v9972_v34, %v7940_v46  ;;  %v9954_v58 = vld [vmem:[%s16037_s0 + $0x34] sm:$0xf]  ;;  %v8123_v62 = vor.u32 %v10019_v57, %v8122_v56 }
  0x32   :  { %1069 = vmatpush.bf16.msrb.mxu2 %v7951_v20  ;;  %v8007_v51 = vor.u32 %v9988_v47, %v8004_v48  ;;  %v7868_v59 = vld [vmem:[%s16037_s0 + $0x38] sm:$0xf0]  ;;  %v9970_v60 = vld [vmem:[%s16037_s0 + $0xb4] sm:$0xf]  ;;  %v8114_v8 = vld [vmem:[%s16037_s0 + $0x220] sm:$0xf] }
  0x33   :  { %762 = vmatmul.bf16.gmra.mxu0 %v10657_v52  ;;  %1122 = vmatpush.bf16.msrb.mxu3 %v8015_v21  ;;  %v7932_v61 = vld [vmem:[%s16037_s0 + $0xb8] sm:$0xf0]  ;;  %v7871_v63 = vor.u32 %v9954_v58, %v7868_v59  ;;  %v9986_v4 = vld [vmem:[%s16037_s0 + $0x134] sm:$0xf]  ;;  %v10017_v9 = vld [vmem:[%s16037_s0 + $0x224] sm:$0xf0] }
  0x34   :  { %815 = vmatmul.bf16.gmra.mxu1 %v10659_v53  ;;  %v7996_v5 = vld [vmem:[%s16037_s0 + $0x138] sm:$0xf0]  ;;  %v7935_v6 = vor.u32 %v9970_v60, %v7932_v61  ;;  %965 = vmatpush.bf16.msrb.mxu0 %v8123_v62  ;;  %v9952_v10 = vld [vmem:[%s16037_s0 + $0x24] sm:$0xf]  ;;  %v8115_v11 = vor.u32 %v10017_v9, %v8114_v8  ;;  %v7860_v16 = vld [vmem:[%s16037_s0 + $0x28] sm:$0xf0] }
  0x35   :  { %868 = vmatmul.bf16.gmra.mxu2 %v10661_v54  ;;  %1017 = vmatpush.bf16.msrb.mxu1 %v7879_v45  ;;  %v7999_v7 = vor.u32 %v9986_v4, %v7996_v5  ;;  %v9968_v17 = vld [vmem:[%s16037_s0 + $0xa4] sm:$0xf]  ;;  %v7924_v18 = vld [vmem:[%s16037_s0 + $0xa8] sm:$0xf0]  ;;  %v7863_v19 = vor.u32 %v9952_v10, %v7860_v16  ;;  %v7822_v23 = vld [vmem:[%s16038_s1 + $0x118] sm:$0xf] }
  0x36   :  { %921 = vmatmul.bf16.gmra.mxu3 %v10663_v55  ;;  %1070 = vmatpush.bf16.msrb.mxu2 %v7943_v50  ;;  %v7927_v20 = vor.u32 %v9968_v17, %v7924_v18  ;;  %v9984_v21 = vld [vmem:[%s16037_s0 + $0x124] sm:$0xf]  ;;  %v7988_v22 = vld [vmem:[%s16037_s0 + $0x128] sm:$0xf0]  ;;  %v8106_v30 = vld [vmem:[%s16037_s0 + $0x210] sm:$0xf] }
  0x37   :  { %1123 = vmatpush.bf16.msrb.mxu3 %v8007_v51  ;;  %v9945_v28 = vld [vmem:[%s16038_s1 + $0x128] sm:$0xf0]  ;;  %v7991_v29 = vor.u32 %v9984_v21, %v7988_v22  ;;  %v10015_v32 = vld [vmem:[%s16037_s0 + $0x214] sm:$0xf0]  ;;  %v9950_v33 = vld [vmem:[%s16037_s0 + $0x14] sm:$0xf] }
  0x38   :  { %966 = vmatpush.bf16.msrb.mxu0 %v8115_v11  ;;  %v8107_v34 = vor.u32 %v10015_v32, %v8106_v30  ;;  %v7852_v45 = vld [vmem:[%s16037_s0 + $0x18] sm:$0xf0]  ;;  %v9966_v46 = vld [vmem:[%s16037_s0 + $0x94] sm:$0xf]  ;;  %v7824_v57 = vld [vmem:[%s16038_s1 + $0x12c] sm:$0xf0]  ;;  %v11017_v4 = vor.u32 %v9945_v28, %v7822_v23 }
  0x39   :  { %1018 = vmatpush.bf16.msrb.mxu1 %v7871_v63  ;;  %v7916_v47 = vld [vmem:[%s16037_s0 + $0x98] sm:$0xf0]  ;;  %v7855_v50 = vor.u32 %v9950_v33, %v7852_v45  ;;  %v9982_v51 = vld [vmem:[%s16037_s0 + $0x114] sm:$0xf]  ;;  %v7830_v58 = vld [vmem:[%s16038_s1 + $0x120] sm:$0xf] }
  0x3a   :  { %1071 = vmatpush.bf16.msrb.mxu2 %v7935_v6  ;;  %v9943_v48 = vld [vmem:[%s16038_s1 + $0x11c] sm:$0xf]  ;;  %v9946_v59 = vld [vmem:[%s16038_s1 + $0x130] sm:$0xf0]  ;;  %v7919_v60 = vor.u32 %v9966_v46, %v7916_v47  ;;  %v9944_v61 = vld [vmem:[%s16038_s1 + $0x124] sm:$0xf] }
  0x3b   :  { %1124 = vmatpush.bf16.msrb.mxu3 %v7999_v7  ;;  %v7980_v56 = vld [vmem:[%s16037_s0 + $0x118] sm:$0xf0]  ;;  %v7832_v62 = vld [vmem:[%s16038_s1 + $0x134] sm:$0xf0]  ;;  %v8098_v5 = vld [vmem:[%s16037_s0 + $0x200] sm:$0xf]  ;;  %v11028_v8 = vor.u32 %v9943_v48, %v7824_v57  ;;  %v11030_v9 = vor.u32 %v9946_v59, %v7830_v58 }
  0x3c   :  { %v7983_v63 = vor.u32 %v9982_v51, %v7980_v56  ;;  %967 = vmatpush.bf16.msrb.mxu0 %v8107_v34  ;;  %v10013_v6 = vld [vmem:[%s16037_s0 + $0x204] sm:$0xf0]  ;;  %v9948_v7 = vld [vmem:[%s16037_s0 + $0x4] sm:$0xf]  ;;  %v7844_v10 = vld [vmem:[%s16037_s0 + $0x8] sm:$0xf0]  ;;  %v11041_v17 = vor.u32 %v9944_v61, %v7832_v62 }
  0x3d   :  { %1019 = vmatpush.bf16.msrb.mxu1 %v7863_v19  ;;  %v9964_v11 = vld [vmem:[%s16037_s0 + $0x84] sm:$0xf]  ;;  %v7908_v16 = vld [vmem:[%s16037_s0 + $0x88] sm:$0xf0]  ;;  %v8099_v18 = vor.u32 %v10013_v6, %v8098_v5  ;;  %v7847_v19 = vor.u32 %v9948_v7, %v7844_v10  ;;  %v7698_v5 = vld [vmem:[%s16038_s1 + $0x10] sm:$0xf] }
  0x3e   :  { %1072 = vmatpush.bf16.msrb.mxu2 %v7927_v20  ;;  %v9980_v20 = vld [vmem:[%s16037_s0 + $0x104] sm:$0xf]  ;;  %v7972_v21 = vld [vmem:[%s16037_s0 + $0x108] sm:$0xf0]  ;;  %v7911_v22 = vor.u32 %v9964_v11, %v7908_v16 }
  0x3f   :  { %1125 = vmatpush.bf16.msrb.mxu3 %v7991_v29  ;;  %v7975_v23 = vor.u32 %v9980_v20, %v7972_v21  ;;  %v69_v28 = vld [vmem:[%s16038_s1 + $0x140] sm:$0xff]  ;;  %v70_v29 = vld [vmem:[%s16038_s1 + $0x148] sm:$0xff] }
  0x40   :  { %968 = vmatpush.bf16.msrb.mxu0 %v8099_v18  ;;  %v275_v30 = vunpack.c.l.b16 %v69_v28  ;;  %v276_v32 = vunpack.c.h.b16 %v69_v28  ;;  %v277_v33 = vunpack.c.l.b16 %v70_v29  ;;  %v278_v34 = vunpack.c.h.b16 %v70_v29  ;;  %v9912_v6 = vld [vmem:[%s16038_s1 + $0x20] sm:$0xf0] }
  0x41   :  { %1020 = vmatpush.bf16.msrb.mxu1 %v7855_v50  ;;  %v11079_v10 = vor.u32 %v9912_v6, %v7698_v5 }
  0x42   :  { %1073 = vmatpush.bf16.msrb.mxu2 %v7919_v60  ;;  %v11059_v45 = vpack.c.b16 %v275_v30, %v275_v30  ;;  %v11061_v47 = vpack.c.b16 %v276_v32, %v276_v32  ;;  %v11063_v48 = vpack.c.b16 %v277_v33, %v277_v33  ;;  %v11065_v51 = vpack.c.b16 %v278_v34, %v278_v34  ;;  %v7718_v34 = vld [vmem:[%s16038_s1 + $0x38] sm:$0xf] }
  0x43   :  { %767 = vmatmul.bf16.gmra.mxu0 %v10693_v0  ;;  %1126 = vmatpush.bf16.msrb.mxu3 %v7983_v63 }
  0x44   :  { %820 = vmatmul.bf16.gmra.mxu1 %v10695_v1 }
  0x45   :  { %873 = vmatmul.bf16.gmra.mxu2 %v10697_v2  ;;  %1021 = vmatpush.bf16.msrb.mxu1 %v7847_v19 }
  0x46   :  { %926 = vmatmul.bf16.gmra.mxu3 %v10699_v3  ;;  %1074 = vmatpush.bf16.msrb.mxu2 %v7911_v22 }
  0x47   :  { %1127 = vmatpush.bf16.msrb.mxu3 %v7975_v23 }
  0x53   :  { %772 = vmatmul.bf16.gmra.mxu0 %v10729_v12 }
  0x54   :  { %825 = vmatmul.bf16.gmra.mxu1 %v10731_v13 }
  0x55   :  { %878 = vmatmul.bf16.gmra.mxu2 %v10733_v14 }
  0x56   :  { %931 = vmatmul.bf16.gmra.mxu3 %v10735_v15 }
  0x63   :  { %777 = vmatmul.bf16.gmra.mxu0 %v10765_v24 }
  0x64   :  { %830 = vmatmul.bf16.gmra.mxu1 %v10767_v25 }
  0x65   :  { %883 = vmatmul.bf16.gmra.mxu2 %v10769_v26 }
  0x66   :  { %936 = vmatmul.bf16.gmra.mxu3 %v10771_v27 }
  0x73   :  { %782 = vmatmul.bf16.gmra.mxu0 %v10801_v36 }
  0x74   :  { %835 = vmatmul.bf16.gmra.mxu1 %v10803_v37 }
  0x75   :  { %888 = vmatmul.bf16.gmra.mxu2 %v10805_v38 }
  0x76   :  { %941 = vmatmul.bf16.gmra.mxu3 %v10807_v39 }
  0x83   :  { %787 = vmatmul.bf16.gmra.mxu0 %v10891_v31 }
  0x84   :  { %840 = vmatmul.bf16.gmra.mxu1 %v10902_v35 }
  0x85   :  { %893 = vmatmul.bf16.gmra.mxu2 %v10904_v44 }
  0x86   :  { %946 = vmatmul.bf16.gmra.mxu3 %v10915_v49 }
  0x93   :  { %792 = vmatmul.bf16.gmra.mxu0 %v11017_v4 }
  0x94   :  { %845 = vmatmul.bf16.gmra.mxu1 %v11028_v8 }
  0x95   :  { %898 = vmatmul.bf16.gmra.mxu2 %v11030_v9 }
  0x96   :  { %951 = vmatmul.bf16.gmra.mxu3 %v11041_v17 }
  0xa0   :  { %v758_v46 = vpop.f32.mrf.mxu0 }
  0xa1   :  { %v811_v50 = vpop.f32.mrf.mxu1 }
  0xa2   :  { %v812_v56 = vadd.f32 %v811_v50, %v758_v46 }
  0xa3   :  { %797 = vmatmul.bf16.gmra.mxu0 %v11059_v45 }
  0xa4   :  { %850 = vmatmul.bf16.gmra.mxu1 %v11061_v47 }
  0xa5   :  { %903 = vmatmul.bf16.gmra.mxu2 %v11063_v48 }
  0xa6   :  { %956 = vmatmul.bf16.gmra.mxu3 %v11065_v51 }
  0xa8   :  { %v864_v57 = vpop.f32.mrf.mxu2  ;;  %v760_v60 = vpop.f32.mrf.mxu0 }
  0xa9   :  { %v865_v58 = vadd.f32 %v864_v57, %v812_v56  ;;  %v917_v59 = vpop.f32.mrf.mxu3  ;;  %v813_v61 = vpop.f32.mrf.mxu1 }
  0xaa   :  { %v814_v63 = vadd.f32 %v813_v61, %v760_v60 }
  0xab   :  { %v11071_v62 = vadd.f32 %v917_v59, %v865_v58 }
  0xb0   :  { %v866_v7 = vpop.f32.mrf.mxu2  ;;  %v763_v18 = vpop.f32.mrf.mxu0 }
  0xb1   :  { %v867_v11 = vadd.f32 %v866_v7, %v814_v63  ;;  %v919_v16 = vpop.f32.mrf.mxu3  ;;  %v816_v19 = vpop.f32.mrf.mxu1 }
  0xb2   :  { %v817_v21 = vadd.f32 %v816_v19, %v763_v18 }
  0xb3   :  { %v11081_v20 = vadd.f32 %v919_v16, %v867_v11  ;;  %8128 = vmatmul.msk.bf16.vlgmr.msrb.gmra.mxu0 %vm721_vm0, %v11079_v10  ;;  %v7738_v16 = vld [vmem:[%s16038_s1 + $0x60] sm:$0xf] }
  0xb4   :  { %1022 = vmatmul.bf16.vlgmr.msrb.gmra.mxu1 %v10621_v40  ;;  %v9917_v40 = vld [vmem:[%s16038_s1 + $0x48] sm:$0xf0] }
  0xb5   :  { %1075 = vmatmul.bf16.vlgmr.msrb.gmra.mxu2 %v10623_v41  ;;  %v11096_v41 = vor.u32 %v9917_v40, %v7718_v34 }
  0xb6   :  { %1128 = vmatmul.bf16.vlgmr.msrb.gmra.mxu3 %v10625_v42 }
  0xb8   :  { %v869_v22 = vpop.f32.mrf.mxu2  ;;  %v765_v29 = vpop.f32.mrf.mxu0 }
  0xb9   :  { %v870_v23 = vadd.f32 %v869_v22, %v817_v21  ;;  %v922_v28 = vpop.f32.mrf.mxu3  ;;  %v818_v30 = vpop.f32.mrf.mxu1 }
  0xba   :  { %v819_v33 = vadd.f32 %v818_v30, %v765_v29 }
  0xbb   :  { %v11088_v32 = vadd.f32 %v922_v28, %v870_v23 }
  0xc0   :  { %v871_v46 = vpop.f32.mrf.mxu2  ;;  %v768_v56 = vpop.f32.mrf.mxu0 }
  0xc1   :  { %v872_v42 = vadd.f32 %v871_v46, %v819_v33  ;;  %v924_v50 = vpop.f32.mrf.mxu3  ;;  %v821_v57 = vpop.f32.mrf.mxu1 }
  0xc2   :  { %v822_v59 = vadd.f32 %v821_v57, %v768_v56 }
  0xc3   :  { %v11098_v58 = vadd.f32 %v924_v50, %v872_v42  ;;  %8129 = vmatmul.msk.bf16.gmra.mxu0 %vm721_vm0, %v11096_v41  ;;  %v7758_v50 = vld [vmem:[%s16038_s1 + $0x88] sm:$0xf] }
  0xc4   :  { %1027 = vmatmul.bf16.gmra.mxu1 %v10657_v52  ;;  %v9922_v52 = vld [vmem:[%s16038_s1 + $0x70] sm:$0xf0] }
  0xc5   :  { %1080 = vmatmul.bf16.gmra.mxu2 %v10659_v53  ;;  %v11113_v53 = vor.u32 %v9922_v52, %v7738_v16 }
  0xc6   :  { %1133 = vmatmul.bf16.gmra.mxu3 %v10661_v54 }
  0xc8   :  { %v874_v60 = vpop.f32.mrf.mxu2  ;;  %v770_v5 = vpop.f32.mrf.mxu0 }
  0xc9   :  { %v875_v61 = vadd.f32 %v874_v60, %v822_v59  ;;  %v927_v63 = vpop.f32.mrf.mxu3  ;;  %v823_v6 = vpop.f32.mrf.mxu1 }
  0xca   :  { %v824_v11 = vadd.f32 %v823_v6, %v770_v5 }
  0xcb   :  { %v11105_v7 = vadd.f32 %v927_v63, %v875_v61 }
  0xd0   :  { %v876_v18 = vpop.f32.mrf.mxu2  ;;  %v773_v21 = vpop.f32.mrf.mxu0 }
  0xd1   :  { %v877_v54 = vadd.f32 %v876_v18, %v824_v11  ;;  %v929_v19 = vpop.f32.mrf.mxu3  ;;  %v826_v22 = vpop.f32.mrf.mxu1 }
  0xd2   :  { %v827_v28 = vadd.f32 %v826_v22, %v773_v21 }
  0xd3   :  { %v11115_v23 = vadd.f32 %v929_v19, %v877_v54  ;;  %8130 = vmatmul.msk.bf16.gmra.mxu0 %vm721_vm0, %v11113_v53  ;;  %v7778_v19 = vld [vmem:[%s16038_s1 + $0xb0] sm:$0xf] }
  0xd4   :  { %1032 = vmatmul.bf16.gmra.mxu1 %v10693_v0  ;;  %v9927_v0 = vld [vmem:[%s16038_s1 + $0x98] sm:$0xf0] }
  0xd5   :  { %1085 = vmatmul.bf16.gmra.mxu2 %v10695_v1  ;;  %v11130_v1 = vor.u32 %v9927_v0, %v7758_v50 }
  0xd6   :  { %1138 = vmatmul.bf16.gmra.mxu3 %v10697_v2 }
  0xd8   :  { %v879_v29 = vpop.f32.mrf.mxu2  ;;  %v775_v34 = vpop.f32.mrf.mxu0 }
  0xd9   :  { %v880_v30 = vadd.f32 %v879_v29, %v827_v28  ;;  %v932_v33 = vpop.f32.mrf.mxu3  ;;  %v828_v40 = vpop.f32.mrf.mxu1 }
  0xda   :  { %v829_v42 = vadd.f32 %v828_v40, %v775_v34 }
  0xdb   :  { %v11122_v46 = vadd.f32 %v932_v33, %v880_v30 }
  0xe0   :  { %v881_v56 = vpop.f32.mrf.mxu2  ;;  %v778_v59 = vpop.f32.mrf.mxu0 }
  0xe1   :  { %v882_v2 = vadd.f32 %v881_v56, %v829_v42  ;;  %v934_v57 = vpop.f32.mrf.mxu3  ;;  %v831_v60 = vpop.f32.mrf.mxu1 }
  0xe2   :  { %v832_v63 = vadd.f32 %v831_v60, %v778_v59 }
  0xe3   :  { %v11132_v61 = vadd.f32 %v934_v57, %v882_v2  ;;  %8131 = vmatmul.msk.bf16.gmra.mxu0 %vm721_vm0, %v11130_v1  ;;  %v7798_v57 = vld [vmem:[%s16038_s1 + $0xd8] sm:$0xf] }
  0xe4   :  { %1037 = vmatmul.bf16.gmra.mxu1 %v10729_v12  ;;  %v9932_v12 = vld [vmem:[%s16038_s1 + $0xc0] sm:$0xf0] }
  0xe5   :  { %1090 = vmatmul.bf16.gmra.mxu2 %v10731_v13  ;;  %v11147_v13 = vor.u32 %v9932_v12, %v7778_v19  ;;  %v10075_v12 = vld [vmem:[%s16037_s0 + $0x2b4] sm:$0xf0] }
  0xe6   :  { %1143 = vmatmul.bf16.gmra.mxu3 %v10733_v14 }
  0xe8   :  { %v884_v5 = vpop.f32.mrf.mxu2  ;;  %v780_v16 = vpop.f32.mrf.mxu0 }
  0xe9   :  { %v885_v6 = vadd.f32 %v884_v5, %v832_v63  ;;  %v937_v11 = vpop.f32.mrf.mxu3  ;;  %v833_v52 = vpop.f32.mrf.mxu1 }
  0xea   :  { %v834_v54 = vadd.f32 %v833_v52, %v780_v16  ;;  %v10010_v16 = vld [vmem:[%s16037_s0 + $0x1f4] sm:$0xf]  ;;  %v8092_v52 = vld [vmem:[%s16037_s0 + $0x1f8] sm:$0xf0] }
  0xeb   :  { %v11139_v18 = vadd.f32 %v937_v11, %v885_v6  ;;  %v8095_v19 = vor.u32 %v10010_v16, %v8092_v52  ;;  %v10071_v52 = vld [vmem:[%s16037_s0 + $0x294] sm:$0xf0] }
  0xed   :  { %1173 = vmatpush.bf16.msra.mxu0 %v8095_v19  ;;  %v10087_v19 = vld [vmem:[%s16037_s0 + $0x314] sm:$0xf0] }
  0xf0   :  { %v886_v21 = vpop.f32.mrf.mxu2  ;;  %v783_v28 = vpop.f32.mrf.mxu0 }
  0xf1   :  { %v887_v14 = vadd.f32 %v886_v21, %v834_v54  ;;  %v939_v22 = vpop.f32.mrf.mxu3  ;;  %v836_v29 = vpop.f32.mrf.mxu1  ;;  %v8436_v54 = vld [vmem:[%s16037_s0 + $0x2b0] sm:$0xf] }
  0xf2   :  { %v837_v33 = vadd.f32 %v836_v29, %v783_v28  ;;  %v8500_v21 = vld [vmem:[%s16037_s0 + $0x330] sm:$0xf]  ;;  %v8084_v29 = vld [vmem:[%s16037_s0 + $0x1e8] sm:$0xf0] }
  0xf3   :  { %v11149_v30 = vadd.f32 %v939_v22, %v887_v14  ;;  %8132 = vmatmul.msk.bf16.gmra.mxu0 %vm721_vm0, %v11147_v13  ;;  %v10091_v14 = vld [vmem:[%s16037_s0 + $0x334] sm:$0xf0]  ;;  %v8437_v22 = vor.u32 %v10075_v12, %v8436_v54  ;;  %v8484_v54 = vld [vmem:[%s16037_s0 + $0x310] sm:$0xf]  ;;  %v7818_v12 = vld [vmem:[%s16038_s1 + $0x100] sm:$0xf] }
  0xf4   :  { %1042 = vmatmul.bf16.gmra.mxu1 %v10765_v24  ;;  %v9937_v24 = vld [vmem:[%s16038_s1 + $0xe8] sm:$0xf0]  ;;  %v8501_v28 = vor.u32 %v10091_v14, %v8500_v21  ;;  %v9942_v21 = vld [vmem:[%s16038_s1 + $0x110] sm:$0xf0] }
  0xf5   :  { %1095 = vmatmul.bf16.gmra.mxu2 %v10767_v25  ;;  %v11164_v25 = vor.u32 %v9937_v24, %v7798_v57 }
  0xf6   :  { %1148 = vmatmul.bf16.gmra.mxu3 %v10769_v26  ;;  %2211 = vmatpush.bf16.msra.mxu2 %v8437_v22  ;;  %v8485_v22 = vor.u32 %v10087_v19, %v8484_v54  ;;  %v8124_v54 = vld [vmem:[%s16037_s0 + $0x238] sm:$0xf0]  ;;  %v8404_v19 = vld [vmem:[%s16037_s0 + $0x270] sm:$0xf] }
  0xf7   :  { %2264 = vmatpush.bf16.msra.mxu3 %v8501_v28 }
  0xf8   :  { %v889_v34 = vpop.f32.mrf.mxu2  ;;  %v785_v50 = vpop.f32.mrf.mxu0 }
  0xf9   :  { %v890_v40 = vadd.f32 %v889_v34, %v837_v33  ;;  %v942_v42 = vpop.f32.mrf.mxu3  ;;  %v838_v0 = vpop.f32.mrf.mxu1  ;;  %v8428_v33 = vld [vmem:[%s16037_s0 + $0x2a0] sm:$0xf] }
  0xfa   :  { %v839_v2 = vadd.f32 %v838_v0, %v785_v50  ;;  %v10073_v50 = vld [vmem:[%s16037_s0 + $0x2a4] sm:$0xf0]  ;;  %v8492_v0 = vld [vmem:[%s16037_s0 + $0x320] sm:$0xf] }
  0xfb   :  { %v11156_v56 = vadd.f32 %v942_v42, %v890_v40  ;;  %v8429_v24 = vor.u32 %v10073_v50, %v8428_v33  ;;  %v8412_v33 = vld [vmem:[%s16037_s0 + $0x280] sm:$0xf]  ;;  %v10069_v50 = vld [vmem:[%s16037_s0 + $0x284] sm:$0xf0] }
  0xfd   :  { %2212 = vmatpush.bf16.msra.mxu2 %v8429_v24  ;;  %v8413_v24 = vor.u32 %v10069_v50, %v8412_v33  ;;  %v8396_v50 = vld [vmem:[%s16037_s0 + $0x260] sm:$0xf] }
 0x100   :  { %v891_v59 = vpop.f32.mrf.mxu2  ;;  %v788_v63 = vpop.f32.mrf.mxu0 }
 0x101   :  { %v892_v26 = vadd.f32 %v891_v59, %v839_v2  ;;  %v944_v60 = vpop.f32.mrf.mxu3  ;;  %v841_v5 = vpop.f32.mrf.mxu1  ;;  %v10089_v2 = vld [vmem:[%s16037_s0 + $0x324] sm:$0xf0] }
 0x102   :  { %v842_v11 = vadd.f32 %v841_v5, %v788_v63  ;;  %v8493_v59 = vor.u32 %v10089_v2, %v8492_v0  ;;  %v10006_v63 = vld [vmem:[%s16037_s0 + $0x1d4] sm:$0xf]  ;;  %v8076_v5 = vld [vmem:[%s16037_s0 + $0x1d8] sm:$0xf0]  ;;  %v8476_v0 = vld [vmem:[%s16037_s0 + $0x300] sm:$0xf] }
 0x103   :  { %v11166_v6 = vadd.f32 %v944_v60, %v892_v26  ;;  %8133 = vmatmul.msk.bf16.gmra.mxu0 %vm721_vm0, %v11164_v25  ;;  %v8079_v16 = vor.u32 %v10006_v63, %v8076_v5  ;;  %v10085_v2 = vld [vmem:[%s16037_s0 + $0x304] sm:$0xf0]  ;;  %v10002_v5 = vld [vmem:[%s16037_s0 + $0x1b4] sm:$0xf] }
 0x104   :  { %1047 = vmatmul.bf16.gmra.mxu1 %v10801_v36  ;;  %2265 = vmatpush.bf16.msra.mxu3 %v8493_v59  ;;  %v8477_v63 = vor.u32 %v10085_v2, %v8476_v0  ;;  %v10065_v0 = vld [vmem:[%s16037_s0 + $0x264] sm:$0xf0] }
 0x105   :  { %1100 = vmatmul.bf16.gmra.mxu2 %v10803_v37  ;;  %v10008_v37 = vld [vmem:[%s16037_s0 + $0x1e4] sm:$0xf] }
 0x106   :  { %1153 = vmatmul.bf16.gmra.mxu3 %v10805_v38  ;;  %v8087_v42 = vor.u32 %v10008_v37, %v8084_v29  ;;  %v10004_v37 = vld [vmem:[%s16037_s0 + $0x1c4] sm:$0xf]  ;;  %v8068_v29 = vld [vmem:[%s16037_s0 + $0x1c8] sm:$0xf0] }
 0x108   :  { %v894_v36 = vpop.f32.mrf.mxu2  ;;  %v790_v40 = vpop.f32.mrf.mxu0  ;;  %1174 = vmatpush.bf16.msra.mxu0 %v8087_v42  ;;  %2266 = vmatpush.bf16.msra.mxu3 %v8485_v22  ;;  %v8071_v42 = vor.u32 %v10004_v37, %v8068_v29  ;;  %v8052_v37 = vld [vmem:[%s16037_s0 + $0x1a8] sm:$0xf0]  ;;  %v10016_v29 = vld [vmem:[%s16037_s0 + $0x224] sm:$0xf] }
 0x109   :  { %v895_v34 = vadd.f32 %v894_v36, %v842_v11  ;;  %v947_v38 = vpop.f32.mrf.mxu3  ;;  %v843_v57 = vpop.f32.mrf.mxu1  ;;  %v8420_v11 = vld [vmem:[%s16037_s0 + $0x290] sm:$0xf]  ;;  %v11235_v36 = vor.u32 %v9942_v21, %v7818_v12  ;;  %v10067_v12 = vld [vmem:[%s16037_s0 + $0x274] sm:$0xf0] }
 0x10a   :  { %v844_v60 = vadd.f32 %v843_v57, %v790_v40  ;;  %v8421_v14 = vor.u32 %v10071_v52, %v8420_v11  ;;  %v8060_v11 = vld [vmem:[%s16037_s0 + $0x1b8] sm:$0xf0] }
 0x10b   :  { %v11209_v26 = vadd.f32 %v947_v38, %v895_v34  ;;  %v8063_v52 = vor.u32 %v10002_v5, %v8060_v11 }
 0x10c   :  { %1175 = vmatpush.bf16.msra.mxu0 %v8079_v16  ;;  %2213 = vmatpush.bf16.msra.mxu2 %v8421_v14  ;;  %v10018_v16 = vld [vmem:[%s16037_s0 + $0x234] sm:$0xf]  ;;  %v8405_v14 = vor.u32 %v10067_v12, %v8404_v19  ;;  %v8044_v19 = vld [vmem:[%s16037_s0 + $0x198] sm:$0xf0] }
 0x10d   :  { %v8127_v21 = vor.u32 %v10018_v16, %v8124_v54  ;;  %2267 = vmatpush.bf16.msra.mxu3 %v8477_v63  ;;  %v10081_v63 = vld [vmem:[%s16037_s0 + $0x2e4] sm:$0xf0]  ;;  %v9998_v54 = vld [vmem:[%s16037_s0 + $0x194] sm:$0xf] }
 0x10e   :  { %v7838_v16 = vld [vmem:[%s16038_s1 + $0x128] sm:$0xf]  ;;  %v10014_v12 = vld [vmem:[%s16037_s0 + $0x214] sm:$0xf] }
 0x10f   :  { %1230 = vmatpush.bf16.msra.mxu1 %v8127_v21  ;;  %v8047_v21 = vor.u32 %v9998_v54, %v8044_v19 }
 0x110   :  { %v896_v28 = vpop.f32.mrf.mxu2  ;;  %v793_v40 = vpop.f32.mrf.mxu0  ;;  %1176 = vmatpush.bf16.msra.mxu0 %v8071_v42  ;;  %2214 = vmatpush.bf16.msra.mxu2 %v8413_v24  ;;  %v8116_v42 = vld [vmem:[%s16037_s0 + $0x228] sm:$0xf0]  ;;  %v8397_v24 = vor.u32 %v10065_v0, %v8396_v50  ;;  %v10012_v50 = vld [vmem:[%s16037_s0 + $0x204] sm:$0xf] }
 0x111   :  { %v897_v34 = vadd.f32 %v896_v28, %v844_v60  ;;  %v949_v38 = vpop.f32.mrf.mxu3  ;;  %v846_v57 = vpop.f32.mrf.mxu1 }
 0x112   :  { %v847_v60 = vadd.f32 %v846_v57, %v793_v40  ;;  %v8119_v57 = vor.u32 %v10016_v29, %v8116_v42  ;;  %v10079_v29 = vld [vmem:[%s16037_s0 + $0x2d4] sm:$0xf0]  ;;  %v8036_v42 = vld [vmem:[%s16037_s0 + $0x188] sm:$0xf0] }
 0x113   :  { %v11255_v59 = vadd.f32 %v949_v38, %v897_v34  ;;  %8134 = vmatmul.msk.bf16.gmra.mxu0 %vm721_vm0, %v11235_v36 }
 0x114   :  { %1052 = vmatmul.bf16.gmra.mxu1 %v10891_v31  ;;  %v8468_v31 = vld [vmem:[%s16037_s0 + $0x2f0] sm:$0xf]  ;;  %1177 = vmatpush.bf16.msra.mxu0 %v8063_v52 }
 0x115   :  { %1105 = vmatmul.bf16.gmra.mxu2 %v10902_v35  ;;  %v10083_v35 = vld [vmem:[%s16037_s0 + $0x2f4] sm:$0xf0]  ;;  %1231 = vmatpush.bf16.msra.mxu1 %v8119_v57 }
 0x116   :  { %1158 = vmatmul.bf16.gmra.mxu3 %v10904_v44  ;;  %v8469_v22 = vor.u32 %v10083_v35, %v8468_v31  ;;  %2215 = vmatpush.bf16.msra.mxu2 %v8405_v14  ;;  %v10000_v44 = vld [vmem:[%s16037_s0 + $0x1a4] sm:$0xf]  ;;  %v8108_v14 = vld [vmem:[%s16037_s0 + $0x218] sm:$0xf0]  ;;  %v8388_v31 = vld [vmem:[%s16037_s0 + $0x250] sm:$0xf] }
 0x117   :  { %v8055_v40 = vor.u32 %v10000_v44, %v8052_v37  ;;  %v10063_v35 = vld [vmem:[%s16037_s0 + $0x254] sm:$0xf0]  ;;  %v8452_v37 = vld [vmem:[%s16037_s0 + $0x2d0] sm:$0xf] }
 0x118   :  { %v899_v28 = vpop.f32.mrf.mxu2  ;;  %v795_v38 = vpop.f32.mrf.mxu0  ;;  %2268 = vmatpush.bf16.msra.mxu3 %v8469_v22  ;;  %v9947_v22 = vld [vmem:[%s16038_s1 + $0x138] sm:$0xf0]  ;;  %v8389_v44 = vor.u32 %v10063_v35, %v8388_v31 }
 0x119   :  { %v900_v33 = vadd.f32 %v899_v28, %v847_v60  ;;  %v952_v34 = vpop.f32.mrf.mxu3  ;;  %v848_v2 = vpop.f32.mrf.mxu1  ;;  %v8460_v60 = vld [vmem:[%s16037_s0 + $0x2e0] sm:$0xf]  ;;  %1178 = vmatpush.bf16.msra.mxu0 %v8055_v40  ;;  %v8111_v28 = vor.u32 %v10014_v12, %v8108_v14  ;;  %v9996_v40 = vld [vmem:[%s16037_s0 + $0x184] sm:$0xf]  ;;  %v10077_v12 = vld [vmem:[%s16037_s0 + $0x2c4] sm:$0xf0] }
 0x11a   :  { %v849_v11 = vadd.f32 %v848_v2, %v795_v38  ;;  %v8461_v52 = vor.u32 %v10081_v63, %v8460_v60  ;;  %2216 = vmatpush.bf16.msra.mxu2 %v8397_v24  ;;  %v11342_v38 = vor.u32 %v9947_v22, %v7838_v16  ;;  %v8039_v24 = vor.u32 %v9996_v40, %v8036_v42  ;;  %v8100_v60 = vld [vmem:[%s16037_s0 + $0x208] sm:$0xf0]  ;;  %v8380_v63 = vld [vmem:[%s16037_s0 + $0x240] sm:$0xf]  ;;  %v10061_v16 = vld [vmem:[%s16037_s0 + $0x244] sm:$0xf0] }
 0x11b   :  { %v11310_v5 = vadd.f32 %v952_v34, %v900_v33  ;;  %v8453_v33 = vor.u32 %v10079_v29, %v8452_v37  ;;  %1232 = vmatpush.bf16.msra.mxu1 %v8111_v28  ;;  %v8103_v54 = vor.u32 %v10012_v50, %v8100_v60  ;;  %v8381_v19 = vor.u32 %v10061_v16, %v8380_v63  ;;  %v71_v37 = vld [vmem:[%s16038_s1 + $0x150] sm:$0xf]  ;;  %v8220_v16 = vld [vmem:[%s16038_s1] sm:$0xf] }
 0x11c   :  { %2269 = vmatpush.bf16.msra.mxu3 %v8461_v52 }
 0x11d   :  { %1179 = vmatpush.bf16.msra.mxu0 %v8047_v21 }
 0x11e   :  { %2217 = vmatpush.bf16.msra.mxu2 %v8389_v44 }
 0x11f   :  { %1233 = vmatpush.bf16.msra.mxu1 %v8103_v54 }
 0x120   :  { %v901_v34 = vpop.f32.mrf.mxu2  ;;  %v798_v57 = vpop.f32.mrf.mxu0  ;;  %2270 = vmatpush.bf16.msra.mxu3 %v8453_v33 }
 0x121   :  { %v902_v0 = vadd.f32 %v901_v34, %v849_v11  ;;  %v954_v2 = vpop.f32.mrf.mxu3  ;;  %v851_v52 = vpop.f32.mrf.mxu1  ;;  %v8444_v11 = vld [vmem:[%s16037_s0 + $0x2c0] sm:$0xf]  ;;  %1180 = vmatpush.bf16.msra.mxu0 %v8039_v24  ;;  %v279_v34 = vunpack.c.l.b16 %v71_v37 }
 0x122   :  { %v852_v14 = vadd.f32 %v851_v52, %v798_v57  ;;  %v8445_v31 = vor.u32 %v10077_v12, %v8444_v11  ;;  %2218 = vmatpush.bf16.msra.mxu2 %v8381_v19 }
 0x123   :  { %v11368_v21 = vadd.f32 %v954_v2, %v902_v0  ;;  %8135 = vmatmul.msk.bf16.gmra.mxu0 %vm721_vm0, %v11342_v38 }
 0x124   :  { %1057 = vmatmul.bf16.gmra.mxu1 %v11017_v4  ;;  %2271 = vmatpush.bf16.msra.mxu3 %v8445_v31  ;;  %v11380_v4 = vpack.c.b16 %v279_v34, %v279_v34 }
 0x125   :  { %1110 = vmatmul.bf16.gmra.mxu2 %v11028_v8 }
 0x126   :  { %1163 = vmatmul.bf16.gmra.mxu3 %v11030_v9 }
 0x128   :  { %v904_v35 = vpop.f32.mrf.mxu2  ;;  %v800_v44 = vpop.f32.mrf.mxu0 }
 0x129   :  { %v905_v22 = vadd.f32 %v904_v35, %v852_v14  ;;  %v957_v28 = vpop.f32.mrf.mxu3  ;;  %v853_v29 = vpop.f32.mrf.mxu1 }
 0x12b   :  { %v11378_v33 = vadd.f32 %v957_v28, %v905_v22 }
 0x130   :  { %v906_v40 = vpop.f32.mrf.mxu2  ;;  %v970_v42 = vpop.f32.mrf.mxu0 }
 0x131   :  { %v959_v8 = vpop.f32.mrf.mxu3  ;;  %v11383_v9 = vadd.f32 %v970_v42, %v11071_v62  ;;  %v1023_v50 = vpop.f32.mrf.mxu1  ;;  %v10025_v40 = vld [vmem:[%s16038_s1 + $0x2c] sm:$0xf] }
 0x133   :  { %16118 = vst [vmem:[#allocation3_spill] sm:$0xff] %v11383_v9  ;;  %8136 = vmatmul.msk.bf16.gmra.mxu0 %vm721_vm0, %v11380_v4 }
 0x134   :  { %1062 = vmatmul.bf16.gmra.mxu1 %v11059_v45  ;;  %v10022_v45 = vld [vmem:[%s16038_s1 + $0x10] sm:$0xf0] }
 0x135   :  { %1115 = vmatmul.bf16.gmra.mxu2 %v11061_v47  ;;  %v10020_v47 = vld [vmem:[%s16038_s1 + $0x4] sm:$0xf]  ;;  %v11407_v11 = vor.u32 %v10022_v45, %v8220_v16 }
 0x136   :  { %1168 = vmatmul.bf16.gmra.mxu3 %v11063_v48  ;;  %v8222_v48 = vld [vmem:[%s16038_s1 + $0x14] sm:$0xf0] }
 0x137   :  { %v11412_v31 = vor.u32 %v10020_v47, %v8222_v48 }
 0x138   :  { %v1076_v0 = vpop.f32.mrf.mxu2  ;;  %v972_v24 = vpop.f32.mrf.mxu0 }
 0x139   :  { %v1077_v2 = vadd.f32 %v1076_v0, %v1023_v50  ;;  %v1129_v57 = vpop.f32.mrf.mxu3  ;;  %v11391_v60 = vadd.f32 %v972_v24, %v11081_v20  ;;  %v1025_v63 = vpop.f32.mrf.mxu1  ;;  %16121 = vst [vmem:[#allocation6_spill] sm:$0xff] %v11412_v31 }
 0x13b   :  { %16119 = vst [vmem:[#allocation4_spill] sm:$0xff] %v11391_v60  ;;  %v11393_v62 = vadd.f32 %v1129_v57, %v1077_v2 }
 0x140   :  { %v1078_v20 = vpop.f32.mrf.mxu2  ;;  %v975_v19 = vpop.f32.mrf.mxu0 }
 0x141   :  { %v1079_v52 = vadd.f32 %v1078_v20, %v1025_v63  ;;  %v1131_v54 = vpop.f32.mrf.mxu3  ;;  %v11410_v12 = vadd.f32 %v975_v19, %v11088_v32  ;;  %v1028_v14 = vpop.f32.mrf.mxu1  ;;  %v10030_v19 = vld [vmem:[%s16038_s1 + $0x54] sm:$0xf] }
 0x143   :  { %16120 = vst [vmem:[#allocation5_spill] sm:$0xff] %v11410_v12  ;;  %v11414_v35 = vadd.f32 %v1131_v54, %v1079_v52  ;;  %1181 = vmatmul.bf16.vlgmr.msra.gmra.mxu0 %v10627_v43  ;;  %v8240_v43 = vld [vmem:[%s16038_s1 + $0x28] sm:$0xf] }
 0x144   :  { %8137 = vmatmul.msk.bf16.vlgmr.msra.gmra.mxu1 %vm721_vm0, %v11079_v10  ;;  %v10027_v10 = vld [vmem:[%s16038_s1 + $0x38] sm:$0xf0] }
 0x145   :  { %2219 = vmatmul.bf16.vlgmr.msra.gmra.mxu2 %v11407_v11  ;;  %v11438_v2 = vor.u32 %v10027_v10, %v8240_v43 }
 0x146   :  { %2272 = vmatmul.bf16.vlgmr.msra.gmra.mxu3 %v11412_v31 }
 0x148   :  { %v1081_v22 = vpop.f32.mrf.mxu2  ;;  %v977_v37 = vpop.f32.mrf.mxu0 }
 0x149   :  { %v1082_v28 = vadd.f32 %v1081_v22, %v1028_v14  ;;  %v1134_v44 = vpop.f32.mrf.mxu3  ;;  %v11422_v32 = vadd.f32 %v977_v37, %v11098_v58  ;;  %v1030_v29 = vpop.f32.mrf.mxu1  ;;  %v8242_v58 = vld [vmem:[%s16038_s1 + $0x3c] sm:$0xf0] }
 0x14a   :  { %v11443_v63 = vor.u32 %v10025_v40, %v8242_v58 }
 0x14b   :  { %16122 = vst [vmem:[#allocation7_spill] sm:$0xff] %v11422_v32  ;;  %v11424_v34 = vadd.f32 %v1134_v44, %v1082_v28 }
 0x14c   :  { %16124 = vst [vmem:[#allocation9_spill] sm:$0xff] %v11443_v63 }
 0x150   :  { %v1083_v8 = vpop.f32.mrf.mxu2  ;;  %v980_v0 = vpop.f32.mrf.mxu0 }
 0x151   :  { %v1084_v42 = vadd.f32 %v1083_v8, %v1030_v29  ;;  %v1136_v50 = vpop.f32.mrf.mxu3  ;;  %v11441_v57 = vadd.f32 %v980_v0, %v11105_v7  ;;  %v1033_v24 = vpop.f32.mrf.mxu1 }
 0x153   :  { %16123 = vst [vmem:[#allocation8_spill] sm:$0xff] %v11441_v57  ;;  %v11445_v16 = vadd.f32 %v1136_v50, %v1084_v42  ;;  %1186 = vmatmul.bf16.gmra.mxu0 %v10663_v55  ;;  %v8260_v55 = vld [vmem:[%s16038_s1 + $0x50] sm:$0xf] }
 0x154   :  { %8138 = vmatmul.msk.bf16.gmra.mxu1 %vm721_vm0, %v11096_v41  ;;  %v10032_v41 = vld [vmem:[%s16038_s1 + $0x60] sm:$0xf0] }
 0x155   :  { %2224 = vmatmul.bf16.gmra.mxu2 %v11438_v2  ;;  %v11469_v37 = vor.u32 %v10032_v41, %v8260_v55 }
 0x156   :  { %2277 = vmatmul.bf16.gmra.mxu3 %v11443_v63 }
 0x158   :  { %v1086_v45 = vpop.f32.mrf.mxu2  ;;  %v982_v20 = vpop.f32.mrf.mxu0 }
 0x159   :  { %v1087_v47 = vadd.f32 %v1086_v45, %v1033_v24  ;;  %v1139_v48 = vpop.f32.mrf.mxu3  ;;  %v11453_v7 = vadd.f32 %v982_v20, %v11115_v23  ;;  %v1035_v52 = vpop.f32.mrf.mxu1  ;;  %v8262_v23 = vld [vmem:[%s16038_s1 + $0x64] sm:$0xf0]  ;;  %v10035_v45 = vld [vmem:[%s16038_s1 + $0x7c] sm:$0xf] }
 0x15a   :  { %v11474_v10 = vor.u32 %v10030_v19, %v8262_v23 }
 0x15b   :  { %16125 = vst [vmem:[#allocation10_spill] sm:$0xff] %v11453_v7  ;;  %v11455_v54 = vadd.f32 %v1139_v48, %v1087_v47 }
 0x15c   :  { %16127 = vst [vmem:[#allocation12_spill] sm:$0xff] %v11474_v10 }
 0x160   :  { %v1088_v14 = vpop.f32.mrf.mxu2  ;;  %v985_v44 = vpop.f32.mrf.mxu0 }
 0x161   :  { %v1089_v22 = vadd.f32 %v1088_v14, %v1035_v52  ;;  %v1141_v28 = vpop.f32.mrf.mxu3  ;;  %v11472_v29 = vadd.f32 %v985_v44, %v11122_v46  ;;  %v1038_v43 = vpop.f32.mrf.mxu1 }
 0x163   :  { %16126 = vst [vmem:[#allocation11_spill] sm:$0xff] %v11472_v29  ;;  %v11476_v40 = vadd.f32 %v1141_v28, %v1089_v22  ;;  %1191 = vmatmul.bf16.gmra.mxu0 %v10699_v3  ;;  %v8280_v3 = vld [vmem:[%s16038_s1 + $0x78] sm:$0xf] }
 0x164   :  { %8139 = vmatmul.msk.bf16.gmra.mxu1 %vm721_vm0, %v11113_v53  ;;  %v10037_v53 = vld [vmem:[%s16038_s1 + $0x88] sm:$0xf0] }
 0x165   :  { %2229 = vmatmul.bf16.gmra.mxu2 %v11469_v37  ;;  %v11500_v55 = vor.u32 %v10037_v53, %v8280_v3 }
 0x166   :  { %2282 = vmatmul.bf16.gmra.mxu3 %v11474_v10 }
 0x168   :  { %v1091_v58 = vpop.f32.mrf.mxu2  ;;  %v987_v50 = vpop.f32.mrf.mxu0 }
 0x169   :  { %v1092_v8 = vadd.f32 %v1091_v58, %v1038_v43  ;;  %v1144_v42 = vpop.f32.mrf.mxu3  ;;  %v11484_v46 = vadd.f32 %v987_v50, %v11132_v61  ;;  %v1040_v0 = vpop.f32.mrf.mxu1  ;;  %v8282_v61 = vld [vmem:[%s16038_s1 + $0x8c] sm:$0xf0] }
 0x16a   :  { %v11505_v23 = vor.u32 %v10035_v45, %v8282_v61 }
 0x16b   :  { %16128 = vst [vmem:[#allocation13_spill] sm:$0xff] %v11484_v46  ;;  %v11486_v24 = vadd.f32 %v1144_v42, %v1092_v8  ;;  %v10040_v42 = vld [vmem:[%s16038_s1 + $0xa4] sm:$0xf] }
 0x16c   :  { %16130 = vst [vmem:[#allocation15_spill] sm:$0xff] %v11505_v23 }
 0x170   :  { %v1093_v47 = vpop.f32.mrf.mxu2  ;;  %v990_v52 = vpop.f32.mrf.mxu0 }
 0x171   :  { %v1094_v48 = vadd.f32 %v1093_v47, %v1040_v0  ;;  %v1146_v20 = vpop.f32.mrf.mxu3  ;;  %v11503_v41 = vadd.f32 %v990_v52, %v11139_v18  ;;  %v1043_v19 = vpop.f32.mrf.mxu1 }
 0x173   :  { %16129 = vst [vmem:[#allocation14_spill] sm:$0xff] %v11503_v41  ;;  %v11507_v14 = vadd.f32 %v1146_v20, %v1094_v48  ;;  %1196 = vmatmul.bf16.gmra.mxu0 %v10735_v15  ;;  %v8300_v15 = vld [vmem:[%s16038_s1 + $0xa0] sm:$0xf] }
 0x174   :  { %8140 = vmatmul.msk.bf16.gmra.mxu1 %vm721_vm0, %v11130_v1  ;;  %v10042_v1 = vld [vmem:[%s16038_s1 + $0xb0] sm:$0xf0] }
 0x175   :  { %2234 = vmatmul.bf16.gmra.mxu2 %v11500_v55  ;;  %v11531_v45 = vor.u32 %v10042_v1, %v8300_v15 }
 0x176   :  { %2287 = vmatmul.bf16.gmra.mxu3 %v11505_v23 }
 0x178   :  { %v1096_v22 = vpop.f32.mrf.mxu2  ;;  %v992_v43 = vpop.f32.mrf.mxu0 }
 0x179   :  { %v1097_v28 = vadd.f32 %v1096_v22, %v1043_v19  ;;  %v1149_v44 = vpop.f32.mrf.mxu3  ;;  %v11515_v18 = vadd.f32 %v992_v43, %v11149_v30  ;;  %v1045_v58 = vpop.f32.mrf.mxu1  ;;  %v8302_v30 = vld [vmem:[%s16038_s1 + $0xb4] sm:$0xf0] }
 0x17a   :  { %v11536_v48 = vor.u32 %v10040_v42, %v8302_v30 }
 0x17b   :  { %16131 = vst [vmem:[#allocation16_spill] sm:$0xff] %v11515_v18  ;;  %v11517_v8 = vadd.f32 %v1149_v44, %v1097_v28 }
 0x17c   :  { %16133 = vst [vmem:[#allocation18_spill] sm:$0xff] %v11536_v48 }
 0x180   :  { %v1098_v50 = vpop.f32.mrf.mxu2  ;;  %v995_v53 = vpop.f32.mrf.mxu0 }
 0x181   :  { %v1099_v0 = vadd.f32 %v1098_v50, %v1045_v58  ;;  %v1151_v3 = vpop.f32.mrf.mxu3  ;;  %v11534_v61 = vadd.f32 %v995_v53, %v11156_v56  ;;  %v1048_v47 = vpop.f32.mrf.mxu1  ;;  %v10045_v58 = vld [vmem:[%s16038_s1 + $0xcc] sm:$0xf] }
 0x183   :  { %16132 = vst [vmem:[#allocation17_spill] sm:$0xff] %v11534_v61  ;;  %v11538_v20 = vadd.f32 %v1151_v3, %v1099_v0  ;;  %1201 = vmatmul.bf16.gmra.mxu0 %v10771_v27  ;;  %v8320_v27 = vld [vmem:[%s16038_s1 + $0xc8] sm:$0xf] }
 0x184   :  { %8141 = vmatmul.msk.bf16.gmra.mxu1 %vm721_vm0, %v11147_v13  ;;  %v10047_v13 = vld [vmem:[%s16038_s1 + $0xd8] sm:$0xf0] }
 0x185   :  { %2239 = vmatmul.bf16.gmra.mxu2 %v11531_v45  ;;  %v11562_v50 = vor.u32 %v10047_v13, %v8320_v27 }
 0x186   :  { %2292 = vmatmul.bf16.gmra.mxu3 %v11536_v48  ;;  %v8414_v48 = vld [vmem:[%s16037_s0 + $0x288] sm:$0xf0] }
 0x188   :  { %v1101_v52 = vpop.f32.mrf.mxu2  ;;  %v997_v28 = vpop.f32.mrf.mxu0 }
 0x189   :  { %v1102_v19 = vadd.f32 %v1101_v52, %v1048_v47  ;;  %v1154_v22 = vpop.f32.mrf.mxu3  ;;  %v11546_v56 = vadd.f32 %v997_v28, %v11166_v6  ;;  %v1050_v44 = vpop.f32.mrf.mxu1  ;;  %v8322_v6 = vld [vmem:[%s16038_s1 + $0xdc] sm:$0xf0]  ;;  %v8564_v52 = vld [vmem:[%s16037_s0 + $0x3b0] sm:$0xf]  ;;  %v10074_v28 = vld [vmem:[%s16037_s0 + $0x2b4] sm:$0xf] }
 0x18a   :  { %v11567_v53 = vor.u32 %v10045_v58, %v8322_v6  ;;  %v8556_v58 = vld [vmem:[%s16037_s0 + $0x3a0] sm:$0xf]  ;;  %v10105_v6 = vld [vmem:[%s16037_s0 + $0x3a4] sm:$0xf0] }
 0x18b   :  { %16134 = vst [vmem:[#allocation19_spill] sm:$0xff] %v11546_v56  ;;  %v11548_v43 = vadd.f32 %v1154_v22, %v1102_v19  ;;  %v10107_v19 = vld [vmem:[%s16037_s0 + $0x3b4] sm:$0xf0]  ;;  %v8628_v22 = vld [vmem:[%s16037_s0 + $0x430] sm:$0xf] }
 0x18c   :  { %16136 = vst [vmem:[#allocation21_spill] sm:$0xff] %v11567_v53 }
 0x190   :  { %v1103_v15 = vpop.f32.mrf.mxu2  ;;  %v1000_v30 = vpop.f32.mrf.mxu0 }
 0x191   :  { %v1104_v1 = vadd.f32 %v1103_v15, %v1050_v44  ;;  %v1156_v42 = vpop.f32.mrf.mxu3  ;;  %v11565_v0 = vadd.f32 %v1000_v30, %v11209_v26  ;;  %v1053_v3 = vpop.f32.mrf.mxu1  ;;  %v8565_v26 = vor.u32 %v10107_v19, %v8564_v52  ;;  %v8620_v15 = vld [vmem:[%s16037_s0 + $0x420] sm:$0xf]  ;;  %v8557_v52 = vor.u32 %v10105_v6, %v8556_v58  ;;  %v10121_v19 = vld [vmem:[%s16037_s0 + $0x424] sm:$0xf0]  ;;  %v8612_v58 = vld [vmem:[%s16037_s0 + $0x410] sm:$0xf] }
 0x192   :  { %v10119_v6 = vld [vmem:[%s16037_s0 + $0x414] sm:$0xf0] }
 0x193   :  { %16135 = vst [vmem:[#allocation20_spill] sm:$0xff] %v11565_v0  ;;  %v11569_v47 = vadd.f32 %v1156_v42, %v1104_v1  ;;  %1206 = vmatmul.bf16.gmra.mxu0 %v10807_v39  ;;  %v10123_v39 = vld [vmem:[%s16037_s0 + $0x434] sm:$0xf0] }
 0x194   :  { %8142 = vmatmul.msk.bf16.gmra.mxu1 %vm721_vm0, %v11164_v25  ;;  %v8629_v44 = vor.u32 %v10123_v39, %v8628_v22  ;;  %v8438_v25 = vld [vmem:[%s16037_s0 + $0x2b8] sm:$0xf0]  ;;  %2317 = vmatpush.bf16.msrb.mxu0 %v8565_v26  ;;  %v10072_v26 = vld [vmem:[%s16037_s0 + $0x2a4] sm:$0xf]  ;;  %v8430_v22 = vld [vmem:[%s16037_s0 + $0x2a8] sm:$0xf0] }
 0x195   :  { %2244 = vmatmul.bf16.gmra.mxu2 %v11562_v50  ;;  %v8441_v27 = vor.u32 %v10074_v28, %v8438_v25  ;;  %v8621_v28 = vor.u32 %v10121_v19, %v8620_v15  ;;  %v10070_v15 = vld [vmem:[%s16037_s0 + $0x294] sm:$0xf]  ;;  %v10052_v19 = vld [vmem:[%s16038_s1 + $0x100] sm:$0xf0] }
 0x196   :  { %2297 = vmatmul.bf16.gmra.mxu3 %v11567_v53  ;;  %2370 = vmatpush.bf16.msrb.mxu1 %v8629_v44  ;;  %v8433_v44 = vor.u32 %v10072_v26, %v8430_v22  ;;  %v10050_v26 = vld [vmem:[%s16038_s1 + $0xf4] sm:$0xf]  ;;  %v8342_v22 = vld [vmem:[%s16038_s1 + $0x104] sm:$0xf0]  ;;  %v10068_v53 = vld [vmem:[%s16037_s0 + $0x284] sm:$0xf] }
 0x197   :  { %2476 = vmatpush.bf16.msrb.mxu3 %v8441_v27  ;;  %v8548_v27 = vld [vmem:[%s16037_s0 + $0x390] sm:$0xf] }
 0x198   :  { %v1106_v13 = vpop.f32.mrf.mxu2  ;;  %v1002_v30 = vpop.f32.mrf.mxu0  ;;  %2318 = vmatpush.bf16.msrb.mxu0 %v8557_v52  ;;  %v8340_v52 = vld [vmem:[%s16038_s1 + $0xf0] sm:$0xf] }
 0x199   :  { %v1107_v1 = vadd.f32 %v1106_v13, %v1053_v3  ;;  %v1159_v42 = vpop.f32.mrf.mxu3  ;;  %v11613_v39 = vadd.f32 %v1002_v30, %v11255_v59  ;;  %v1055_v3 = vpop.f32.mrf.mxu1  ;;  %v10103_v13 = vld [vmem:[%s16037_s0 + $0x394] sm:$0xf0] }
 0x19a   :  { %2371 = vmatpush.bf16.msrb.mxu1 %v8621_v28  ;;  %v8549_v59 = vor.u32 %v10103_v13, %v8548_v27  ;;  %v10101_v27 = vld [vmem:[%s16037_s0 + $0x384] sm:$0xf0]  ;;  %v8604_v13 = vld [vmem:[%s16037_s0 + $0x400] sm:$0xf] }
 0x19b   :  { %16137 = vst [vmem:[#allocation22_spill] sm:$0xff] %v11613_v39  ;;  %v11615_v25 = vadd.f32 %v1159_v42, %v1107_v1  ;;  %v8422_v1 = vld [vmem:[%s16037_s0 + $0x298] sm:$0xf0]  ;;  %2477 = vmatpush.bf16.msrb.mxu3 %v8433_v44  ;;  %v8613_v42 = vor.u32 %v10119_v6, %v8612_v58  ;;  %v8540_v44 = vld [vmem:[%s16037_s0 + $0x380] sm:$0xf] }
 0x19c   :  { %v8425_v30 = vor.u32 %v10070_v15, %v8422_v1  ;;  %2319 = vmatpush.bf16.msrb.mxu0 %v8549_v59  ;;  %v11656_v1 = vor.u32 %v10052_v19, %v8340_v52  ;;  %v8541_v59 = vor.u32 %v10101_v27, %v8540_v44  ;;  %v11670_v52 = vor.u32 %v10050_v26, %v8342_v22  ;;  %v8532_v27 = vld [vmem:[%s16037_s0 + $0x370] sm:$0xf]  ;;  %v10131_v22 = vld [vmem:[%s16037_s0 + $0x474] sm:$0xf0] }
 0x19d   :  { %v8417_v44 = vor.u32 %v10068_v53, %v8414_v48  ;;  %v8596_v26 = vld [vmem:[%s16037_s0 + $0x3f0] sm:$0xf] }
 0x19e   :  { %2372 = vmatpush.bf16.msrb.mxu1 %v8613_v42  ;;  %v10117_v42 = vld [vmem:[%s16037_s0 + $0x404] sm:$0xf0]  ;;  %16139 = vst [vmem:[#allocation24_spill] sm:$0xff] %v11670_v52  ;;  %v8660_v53 = vld [vmem:[%s16037_s0 + $0x470] sm:$0xf] }
 0x19f   :  { %2478 = vmatpush.bf16.msrb.mxu3 %v8425_v30  ;;  %v8605_v30 = vor.u32 %v10117_v42, %v8604_v13  ;;  %v8524_v42 = vld [vmem:[%s16037_s0 + $0x360] sm:$0xf] }
 0x1a0   :  { %v1108_v28 = vpop.f32.mrf.mxu2  ;;  %v1005_v15 = vpop.f32.mrf.mxu0  ;;  %2320 = vmatpush.bf16.msrb.mxu0 %v8541_v59 }
 0x1a1   :  { %v1109_v58 = vadd.f32 %v1108_v28, %v1055_v3  ;;  %v1161_v6 = vpop.f32.mrf.mxu3  ;;  %v11668_v3 = vadd.f32 %v1005_v15, %v11310_v5  ;;  %v1058_v28 = vpop.f32.mrf.mxu1  ;;  %v10099_v5 = vld [vmem:[%s16037_s0 + $0x374] sm:$0xf0] }
 0x1a2   :  { %2373 = vmatpush.bf16.msrb.mxu1 %v8605_v30  ;;  %v8533_v48 = vor.u32 %v10099_v5, %v8532_v27  ;;  %v10097_v30 = vld [vmem:[%s16037_s0 + $0x364] sm:$0xf0]  ;;  %v8588_v27 = vld [vmem:[%s16037_s0 + $0x3e0] sm:$0xf] }
 0x1a3   :  { %16138 = vst [vmem:[#allocation23_spill] sm:$0xff] %v11668_v3  ;;  %v11672_v19 = vadd.f32 %v1161_v6, %v1109_v58  ;;  %1211 = vmatmul.bf16.gmra.mxu0 %v10915_v49  ;;  %v10115_v49 = vld [vmem:[%s16037_s0 + $0x3f4] sm:$0xf0]  ;;  %v8661_v58 = vor.u32 %v10131_v22, %v8660_v53  ;;  %v8406_v6 = vld [vmem:[%s16037_s0 + $0x278] sm:$0xf0]  ;;  %2479 = vmatpush.bf16.msrb.mxu3 %v8417_v44 }
 0x1a4   :  { %8143 = vmatmul.msk.bf16.gmra.mxu1 %vm721_vm0, %v11235_v36  ;;  %v8597_v13 = vor.u32 %v10115_v49, %v8596_v26  ;;  %v10066_v36 = vld [vmem:[%s16037_s0 + $0x274] sm:$0xf]  ;;  %2321 = vmatpush.bf16.msrb.mxu0 %v8533_v48  ;;  %v8525_v48 = vor.u32 %v10097_v30, %v8524_v42  ;;  %v10113_v49 = vld [vmem:[%s16037_s0 + $0x3e4] sm:$0xf0]  ;;  %v8652_v53 = vld [vmem:[%s16037_s0 + $0x460] sm:$0xf] }
 0x1a5   :  { %2249 = vmatmul.bf16.gmra.mxu2 %v11656_v1  ;;  %v8409_v15 = vor.u32 %v10066_v36, %v8406_v6  ;;  %v10129_v22 = vld [vmem:[%s16037_s0 + $0x464] sm:$0xf0]  ;;  %v10064_v6 = vld [vmem:[%s16037_s0 + $0x264] sm:$0xf] }
 0x1a6   :  { %2302 = vmatmul.bf16.gmra.mxu3 %v11670_v52  ;;  %2374 = vmatpush.bf16.msrb.mxu1 %v8597_v13  ;;  %v8653_v36 = vor.u32 %v10129_v22, %v8652_v53  ;;  %v10057_v53 = vld [vmem:[%s16038_s1 + $0x128] sm:$0xf0] }
 0x1a7   :  { %2427 = vmatpush.bf16.msrb.mxu2 %v8661_v58  ;;  %2480 = vmatpush.bf16.msrb.mxu3 %v8409_v15  ;;  %v8580_v15 = vld [vmem:[%s16037_s0 + $0x3d0] sm:$0xf] }
 0x1a8   :  { %v1111_v59 = vpop.f32.mrf.mxu2  ;;  %v1007_v44 = vpop.f32.mrf.mxu0  ;;  %2322 = vmatpush.bf16.msrb.mxu0 %v8525_v48  ;;  %v8644_v48 = vld [vmem:[%s16037_s0 + $0x450] sm:$0xf] }
 0x1a9   :  { %v1112_v5 = vadd.f32 %v1111_v59, %v1058_v28  ;;  %v1164_v26 = vpop.f32.mrf.mxu3  ;;  %v11722_v13 = vadd.f32 %v1007_v44, %v11368_v21  ;;  %v1060_v58 = vpop.f32.mrf.mxu1  ;;  %v8589_v28 = vor.u32 %v10113_v49, %v8588_v27  ;;  %v8398_v59 = vld [vmem:[%s16037_s0 + $0x268] sm:$0xf0]  ;;  %v8360_v21 = vld [vmem:[%s16038_s1 + $0x118] sm:$0xf]  ;;  %v8516_v27 = vld [vmem:[%s16037_s0 + $0x350] sm:$0xf] }
 0x1aa   :  { %v8401_v30 = vor.u32 %v10064_v6, %v8398_v59  ;;  %v10095_v44 = vld [vmem:[%s16037_s0 + $0x354] sm:$0xf0]  ;;  %v8390_v6 = vld [vmem:[%s16037_s0 + $0x258] sm:$0xf0] }
 0x1ab   :  { %16140 = vst [vmem:[#allocation25_spill] sm:$0xff] %v11722_v13  ;;  %v11730_v42 = vadd.f32 %v1164_v26, %v1112_v5  ;;  %2375 = vmatpush.bf16.msrb.mxu1 %v8589_v28  ;;  %2428 = vmatpush.bf16.msrb.mxu2 %v8653_v36  ;;  %v8517_v5 = vor.u32 %v10095_v44, %v8516_v27  ;;  %v10111_v26 = vld [vmem:[%s16037_s0 + $0x3d4] sm:$0xf0]  ;;  %v10062_v36 = vld [vmem:[%s16037_s0 + $0x254] sm:$0xf] }
 0x1ac   :  { %v10127_v49 = vld [vmem:[%s16037_s0 + $0x454] sm:$0xf0]  ;;  %v8581_v22 = vor.u32 %v10111_v26, %v8580_v15  ;;  %v10055_v59 = vld [vmem:[%s16038_s1 + $0x11c] sm:$0xf]  ;;  %v8362_v27 = vld [vmem:[%s16038_s1 + $0x12c] sm:$0xf0]  ;;  %2481 = vmatpush.bf16.msrb.mxu3 %v8401_v30  ;;  %v8393_v44 = vor.u32 %v10062_v36, %v8390_v6 }
 0x1ad   :  { %v8645_v28 = vor.u32 %v10127_v49, %v8644_v48  ;;  %2323 = vmatpush.bf16.msrb.mxu0 %v8517_v5  ;;  %v8508_v26 = vld [vmem:[%s16037_s0 + $0x340] sm:$0xf]  ;;  %v10093_v48 = vld [vmem:[%s16037_s0 + $0x344] sm:$0xf0]  ;;  %v11777_v5 = vor.u32 %v10057_v53, %v8360_v21 }
 0x1ae   :  { %v8572_v49 = vld [vmem:[%s16037_s0 + $0x3c0] sm:$0xf]  ;;  %v8509_v36 = vor.u32 %v10093_v48, %v8508_v26  ;;  %v10125_v6 = vld [vmem:[%s16037_s0 + $0x444] sm:$0xf0]  ;;  %v10060_v26 = vld [vmem:[%s16037_s0 + $0x244] sm:$0xf] }
 0x1af   :  { %2376 = vmatpush.bf16.msrb.mxu1 %v8581_v22  ;;  %2429 = vmatpush.bf16.msrb.mxu2 %v8645_v28  ;;  %v10109_v22 = vld [vmem:[%s16037_s0 + $0x3c4] sm:$0xf0]  ;;  %v8636_v28 = vld [vmem:[%s16037_s0 + $0x440] sm:$0xf]  ;;  %v8382_v48 = vld [vmem:[%s16037_s0 + $0x248] sm:$0xf0] }
 0x1b0   :  { %v1113_v15 = vpop.f32.mrf.mxu2  ;;  %v1010_v30 = vpop.f32.mrf.mxu0  ;;  %v8573_v21 = vor.u32 %v10109_v22, %v8572_v49  ;;  %v8637_v53 = vor.u32 %v10125_v6, %v8636_v28  ;;  %2482 = vmatpush.bf16.msrb.mxu3 %v8393_v44  ;;  %v8385_v31 = vor.u32 %v10060_v26, %v8382_v48  ;;  %v1531_v44 = vld [vmem:[%s16038_s1 + $0x140] sm:$0xff] }
 0x1b1   :  { %v1114_v52 = vadd.f32 %v1113_v15, %v1060_v58  ;;  %v1166_v23 = vpop.f32.mrf.mxu3  ;;  %v11789_v10 = vadd.f32 %v1010_v30, %v11378_v33  ;;  %v1063_v58 = vpop.f32.mrf.mxu1  ;;  %v11791_v15 = vor.u32 %v10055_v59, %v8362_v27  ;;  %2324 = vmatpush.bf16.msrb.mxu0 %v8509_v36  ;;  %v1738_v49 = vunpack.c.l.b16 %v1531_v44 }
 0x1b2   :  { %v1739_v30 = vunpack.c.h.b16 %v1531_v44  ;;  %v10023_v44 = vld [vmem:[%s16038_s1 + $0x18] sm:$0xf0] }
 0x1b3   :  { %16141 = vst [vmem:[#allocation26_spill] sm:$0xff] %v11789_v10  ;;  %v11799_v63 = vadd.f32 %v1166_v23, %v1114_v52  ;;  %1216 = vmatmul.bf16.gmra.mxu0 %v11041_v17  ;;  %2377 = vmatpush.bf16.msrb.mxu1 %v8573_v21  ;;  %v11811_v28 = vpack.c.b16 %v1738_v49, %v1738_v49 }
 0x1b4   :  { %16142 = vst [vmem:[#allocation27_spill] sm:$0xff] %v11791_v15  ;;  %8144 = vmatmul.msk.bf16.gmra.mxu1 %vm721_vm0, %v11342_v38  ;;  %2430 = vmatpush.bf16.msrb.mxu2 %v8637_v53 }
 0x1b5   :  { %2254 = vmatmul.bf16.gmra.mxu2 %v11777_v5  ;;  %2483 = vmatpush.bf16.msrb.mxu3 %v8385_v31 }
 0x1b6   :  { %2307 = vmatmul.bf16.gmra.mxu3 %v11791_v15 }
 0x1b8   :  { %v1116_v33 = vpop.f32.mrf.mxu2  ;;  %v1012_v23 = vpop.f32.mrf.mxu0 }
 0x1b9   :  { %v1117_v59 = vadd.f32 %v1116_v33, %v1063_v58  ;;  %v1169_v27 = vpop.f32.mrf.mxu3  ;;  %v1065_v52 = vpop.f32.mrf.mxu1  ;;  %v11814_v58 = vpack.c.b16 %v1739_v30, %v1739_v30  ;;  %v1381_v23 = vmul.f32 %v11383_v9, %v11383_v9 }
 0x1ba   :  { %v8228_v52 = vld [vmem:[%s16038_s1 + $0x8] sm:$0xf] }
 0x1bb   :  { %v11809_v17 = vadd.f32 %v1169_v27, %v1117_v59  ;;  %16143 = vst [vmem:[#allocation28_spill] sm:$0xff] %v11814_v58 }
 0x1c0   :  { %v1118_v38 = vpop.f32.mrf.mxu2  ;;  %v1182_v22 = vpop.f32.mrf.mxu0 }
 0x1c1   :  { %v1171_v36 = vpop.f32.mrf.mxu3  ;;  %v1183_v31 = vadd.f32 %v1182_v22, %v11393_v62  ;;  %v1235_v6 = vpop.f32.mrf.mxu1  ;;  %v8230_v38 = vld [vmem:[%s16038_s1 + $0x1c] sm:$0xf0]  ;;  %v10024_v22 = vld [vmem:[%s16038_s1 + $0x20] sm:$0xf0] }
 0x1c2   :  { %v8236_v36 = vld [vmem:[%s16038_s1 + $0x10] sm:$0xf] }
 0x1c3   :  { %v11816_v21 = vadd.f32 %v1235_v6, %v1183_v31  ;;  %1221 = vmatmul.bf16.gmra.mxu0 %v11065_v51  ;;  %v11854_v6 = vor.u32 %v10023_v44, %v8228_v52  ;;  %v1383_v52 = vmul.f32 %v11391_v60, %v11391_v60 }
 0x1c4   :  { %8145 = vmatmul.msk.bf16.gmra.mxu1 %vm721_vm0, %v11380_v4 }
 0x1c5   :  { %16144 = vst [vmem:[#allocation29_spill] sm:$0xff] %v11816_v21  ;;  %2259 = vmatmul.bf16.gmra.mxu2 %v11811_v28  ;;  %v1313_v53 = vadd.f32 %v11816_v21, %v11383_v9  ;;  %v1382_v51 = vmul.f32 %v11816_v21, %v11816_v21 }
 0x1c6   :  { %2312 = vmatmul.bf16.gmra.mxu3 %v11814_v58 }
 0x1c7   :  { %1314 = vadd.xlane.f32.xlu1 %v1313_v53  ;;  %v1415_v30 = vadd.f32 %v1382_v51, %v1381_v23 }
 0x1c8   :  { %v2220_v26 = vpop.f32.mrf.mxu2  ;;  %v1184_v48 = vpop.f32.mrf.mxu0 }
 0x1c9   :  { %v2273_v62 = vpop.f32.mrf.mxu3  ;;  %v1185_v59 = vadd.f32 %v1184_v48, %v11414_v35  ;;  %v1237_v27 = vpop.f32.mrf.mxu1  ;;  %v10021_v35 = vld [vmem:[%s16038_s1 + $0xc] sm:$0xf]  ;;  %v11858_v48 = vor.u32 %v10024_v22, %v8236_v36 }
 0x1ca   :  { %v11825_v33 = vadd.f32 %v2273_v62, %v2220_v26  ;;  %v11856_v62 = vor.u32 %v10021_v35, %v8230_v38  ;;  %v1385_v35 = vmul.f32 %v11410_v12, %v11410_v12 }
 0x1cb   :  { %v11830_v4 = vadd.f32 %v1237_v27, %v1185_v59 }
 0x1cd   :  { %16145 = vst [vmem:[#allocation30_spill] sm:$0xff] %v11830_v4  ;;  %v1316_v49 = vadd.f32 %v11830_v4, %v11391_v60  ;;  %v1384_v23 = vmul.f32 %v11830_v4, %v11830_v4 }
 0x1cf   :  { %1317 = vadd.xlane.f32.xlu2 %v1316_v49  ;;  %1416 = vadd.xlane.f32.xlu1 %v1415_v30  ;;  %v1418_v44 = vadd.f32 %v1384_v23, %v1383_v52  ;;  %v10026_v23 = vld [vmem:[%s16038_s1 + $0x34] sm:$0xf]  ;;  %v1387_v52 = vmul.f32 %v11422_v32, %v11422_v32 }
 0x1d0   :  { %v2222_v31 = vpop.f32.mrf.mxu2  ;;  %v1187_v26 = vpop.f32.mrf.mxu0 }
 0x1d1   :  { %v2275_v53 = vpop.f32.mrf.mxu3  ;;  %v1188_v27 = vadd.f32 %v1187_v26, %v11424_v34  ;;  %v1240_v51 = vpop.f32.mrf.mxu1 }
 0x1d2   :  { %v11860_v59 = vadd.f32 %v2275_v53, %v2222_v31 }
 0x1d3   :  { %v11865_v21 = vadd.f32 %v1240_v51, %v1188_v27  ;;  %2325 = vmatmul.bf16.vlgmr.msrb.gmra.mxu0 %v11854_v6  ;;  %v8248_v27 = vld [vmem:[%s16038_s1 + $0x30] sm:$0xf]  ;;  %v10028_v51 = vld [vmem:[%s16038_s1 + $0x40] sm:$0xf0] }
 0x1d4   :  { %2378 = vmatmul.bf16.vlgmr.msrb.gmra.mxu1 %v11856_v62 }
 0x1d5   :  { %16146 = vst [vmem:[#allocation31_spill] sm:$0xff] %v11865_v21  ;;  %8666 = vmatmul.msk.bf16.vlgmr.msrb.gmra.mxu2 %vm721_vm0, %v11858_v48  ;;  %v1319_v34 = vadd.f32 %v11865_v21, %v11410_v12  ;;  %v1386_v49 = vmul.f32 %v11865_v21, %v11865_v21 }
 0x1d6   :  { %2484 = vmatmul.bf16.vlgmr.msrb.gmra.mxu3 %v11407_v11 }
 0x1d7   :  { %1320 = vadd.xlane.f32.xlu0 %v1319_v34  ;;  %1419 = vadd.xlane.f32.xlu2 %v1418_v44  ;;  %v1421_v38 = vadd.f32 %v1386_v49, %v1385_v35  ;;  %v8250_v34 = vld [vmem:[%s16038_s1 + $0x44] sm:$0xf0]  ;;  %v8256_v44 = vld [vmem:[%s16038_s1 + $0x38] sm:$0xf]  ;;  %v10029_v35 = vld [vmem:[%s16038_s1 + $0x48] sm:$0xf0] }
 0x1d8   :  { %v2225_v30 = vpop.f32.mrf.mxu2  ;;  %v1189_v22 = vpop.f32.mrf.mxu0  ;;  %v11913_v9 = vor.u32 %v10029_v35, %v8256_v44  ;;  %v8268_v35 = vld [vmem:[%s16038_s1 + $0x58] sm:$0xf] }
 0x1d9   :  { %v2278_v36 = vpop.f32.mrf.mxu3  ;;  %v1190_v11 = vadd.f32 %v1189_v22, %v11445_v16  ;;  %v1242_v53 = vpop.f32.mrf.mxu1  ;;  %1422 = vadd.xlane.f32.xlu1 %v1421_v38 }
 0x1da   :  { %v11880_v31 = vadd.f32 %v2278_v36, %v2225_v30  ;;  %v11909_v36 = vor.u32 %v10028_v51, %v8248_v27  ;;  %v1389_v27 = vmul.f32 %v11441_v57, %v11441_v57 }
 0x1db   :  { %v11883_v26 = vadd.f32 %v1242_v53, %v1190_v11  ;;  %v11911_v53 = vor.u32 %v10026_v23, %v8250_v34 }
 0x1dd   :  { %16147 = vst [vmem:[#allocation32_spill] sm:$0xff] %v11883_v26  ;;  %v1388_v16 = vmul.f32 %v11883_v26, %v11883_v26  ;;  %v1322_v38 = vadd.f32 %v11883_v26, %v11422_v32 }
 0x1df   :  { %v1424_v30 = vadd.f32 %v1388_v16, %v1387_v52 }
 0x1e0   :  { %v2227_v49 = vpop.f32.mrf.mxu2  ;;  %v1192_v11 = vpop.f32.mrf.mxu0 }
 0x1e1   :  { %v2280_v22 = vpop.f32.mrf.mxu3  ;;  %v1193_v60 = vadd.f32 %v1192_v11, %v11455_v54  ;;  %v1245_v21 = vpop.f32.mrf.mxu1  ;;  %1425 = vadd.xlane.f32.xlu2 %v1424_v30  ;;  %1323 = vadd.xlane.f32.xlu1 %v1322_v38  ;;  %v10031_v30 = vld [vmem:[%s16038_s1 + $0x5c] sm:$0xf]  ;;  %v8276_v11 = vld [vmem:[%s16038_s1 + $0x60] sm:$0xf] }
 0x1e2   :  { %v11915_v4 = vadd.f32 %v2280_v22, %v2227_v49  ;;  %v10033_v49 = vld [vmem:[%s16038_s1 + $0x68] sm:$0xf0]  ;;  %v8270_v22 = vld [vmem:[%s16038_s1 + $0x6c] sm:$0xf0] }
 0x1e3   :  { %v11918_v12 = vadd.f32 %v1245_v21, %v1193_v60  ;;  %2330 = vmatmul.bf16.gmra.mxu0 %v11909_v36 }
 0x1e4   :  { %2383 = vmatmul.bf16.gmra.mxu1 %v11911_v53 }
 0x1e5   :  { %16148 = vst [vmem:[#allocation33_spill] sm:$0xff] %v11918_v12  ;;  %8667 = vmatmul.msk.bf16.gmra.mxu2 %vm721_vm0, %v11913_v9  ;;  %v1390_v54 = vmul.f32 %v11918_v12, %v11918_v12  ;;  %v1325_v60 = vadd.f32 %v11918_v12, %v11441_v57 }
 0x1e6   :  { %2489 = vmatmul.bf16.gmra.mxu3 %v11438_v2 }
 0x1e7   :  { %v1427_v23 = vadd.f32 %v1390_v54, %v1389_v27  ;;  %v10034_v27 = vld [vmem:[%s16038_s1 + $0x70] sm:$0xf0] }
 0x1e8   :  { %v2230_v51 = vpop.f32.mrf.mxu2  ;;  %v1194_v52 = vpop.f32.mrf.mxu0 }
 0x1e9   :  { %v2283_v21 = vpop.f32.mrf.mxu3  ;;  %v1195_v34 = vadd.f32 %v1194_v52, %v11476_v40  ;;  %v1247_v44 = vpop.f32.mrf.mxu1  ;;  %1428 = vadd.xlane.f32.xlu2 %v1427_v23  ;;  %1326 = vadd.xlane.f32.xlu1 %v1325_v60  ;;  %v1391_v40 = vmul.f32 %v11453_v7, %v11453_v7  ;;  %v11960_v60 = vor.u32 %v10033_v49, %v8268_v35 }
 0x1ea   :  { %v11931_v16 = vadd.f32 %v2283_v21, %v2230_v51  ;;  %v1393_v35 = vmul.f32 %v11472_v29, %v11472_v29 }
 0x1eb   :  { %v11934_v2 = vadd.f32 %v1247_v44, %v1195_v34  ;;  %v11962_v34 = vor.u32 %v10031_v30, %v8270_v22  ;;  %v11964_v44 = vor.u32 %v10034_v27, %v8276_v11  ;;  %v8288_v27 = vld [vmem:[%s16038_s1 + $0x80] sm:$0xf] }
 0x1ed   :  { %16149 = vst [vmem:[#allocation34_spill] sm:$0xff] %v11934_v2  ;;  %v1392_v38 = vmul.f32 %v11934_v2, %v11934_v2  ;;  %v1328_v23 = vadd.f32 %v11934_v2, %v11453_v7 }
 0x1ef   :  { %v1430_v51 = vadd.f32 %v1392_v38, %v1391_v40 }
 0x1f0   :  { %v2232_v54 = vpop.f32.mrf.mxu2  ;;  %v1197_v52 = vpop.f32.mrf.mxu0 }
 0x1f1   :  { %v2285_v21 = vpop.f32.mrf.mxu3  ;;  %v1198_v32 = vadd.f32 %v1197_v52, %v11486_v24  ;;  %v1250_v12 = vpop.f32.mrf.mxu1  ;;  %1431 = vadd.xlane.f32.xlu0 %v1430_v51  ;;  %1329 = vadd.xlane.f32.xlu2 %v1328_v23  ;;  %v10036_v51 = vld [vmem:[%s16038_s1 + $0x84] sm:$0xf]  ;;  %v8296_v52 = vld [vmem:[%s16038_s1 + $0x88] sm:$0xf] }
 0x1f2   :  { %v11966_v26 = vadd.f32 %v2285_v21, %v2232_v54  ;;  %v10038_v54 = vld [vmem:[%s16038_s1 + $0x90] sm:$0xf0]  ;;  %v8290_v21 = vld [vmem:[%s16038_s1 + $0x94] sm:$0xf0] }
 0x1f3   :  { %v11969_v57 = vadd.f32 %v1250_v12, %v1198_v32  ;;  %2335 = vmatmul.bf16.gmra.mxu0 %v11960_v60 }
 0x1f4   :  { %2388 = vmatmul.bf16.gmra.mxu1 %v11962_v34 }
 0x1f5   :  { %16150 = vst [vmem:[#allocation35_spill] sm:$0xff] %v11969_v57  ;;  %8668 = vmatmul.msk.bf16.gmra.mxu2 %vm721_vm0, %v11964_v44  ;;  %v1394_v24 = vmul.f32 %v11969_v57, %v11969_v57  ;;  %v1331_v12 = vadd.f32 %v11969_v57, %v11472_v29 }
 0x1f6   :  { %2494 = vmatmul.bf16.gmra.mxu3 %v11469_v37 }
 0x1f7   :  { %v1433_v30 = vadd.f32 %v1394_v24, %v1393_v35  ;;  %v10039_v35 = vld [vmem:[%s16038_s1 + $0x98] sm:$0xf0] }
 0x1f8   :  { %v2235_v49 = vpop.f32.mrf.mxu2  ;;  %v1199_v40 = vpop.f32.mrf.mxu0 }
 0x1f9   :  { %v2288_v32 = vpop.f32.mrf.mxu3  ;;  %v1200_v22 = vadd.f32 %v1199_v40, %v11507_v14  ;;  %v1252_v11 = vpop.f32.mrf.mxu1  ;;  %1434 = vadd.xlane.f32.xlu0 %v1433_v30  ;;  %1332 = vadd.xlane.f32.xlu2 %v1331_v12  ;;  %v1395_v14 = vmul.f32 %v11484_v46, %v11484_v46  ;;  %v12011_v12 = vor.u32 %v10038_v54, %v8288_v27 }
 0x1fa   :  { %v11982_v38 = vadd.f32 %v2288_v32, %v2235_v49  ;;  %v1397_v27 = vmul.f32 %v11503_v41, %v11503_v41 }
 0x1fb   :  { %v11985_v37 = vadd.f32 %v1252_v11, %v1200_v22  ;;  %v12013_v22 = vor.u32 %v10036_v51, %v8290_v21  ;;  %v12015_v11 = vor.u32 %v10039_v35, %v8296_v52  ;;  %v8308_v35 = vld [vmem:[%s16038_s1 + $0xa8] sm:$0xf] }
 0x1fd   :  { %16151 = vst [vmem:[#allocation36_spill] sm:$0xff] %v11985_v37  ;;  %v1396_v23 = vmul.f32 %v11985_v37, %v11985_v37  ;;  %v1334_v49 = vadd.f32 %v11985_v37, %v11484_v46 }
 0x1ff   :  { %v1436_v30 = vadd.f32 %v1396_v23, %v1395_v14 }
 0x200   :  { %v2237_v24 = vpop.f32.mrf.mxu2  ;;  %v1202_v40 = vpop.f32.mrf.mxu0 }
 0x201   :  { %v2290_v32 = vpop.f32.mrf.mxu3  ;;  %v1203_v7 = vadd.f32 %v1202_v40, %v11517_v8  ;;  %v1255_v57 = vpop.f32.mrf.mxu1  ;;  %1335 = vadd.xlane.f32.xlu0 %v1334_v49  ;;  %1437 = vadd.xlane.f32.xlu1 %v1436_v30  ;;  %v10041_v49 = vld [vmem:[%s16038_s1 + $0xac] sm:$0xf]  ;;  %v8316_v40 = vld [vmem:[%s16038_s1 + $0xb0] sm:$0xf] }
 0x202   :  { %v12017_v2 = vadd.f32 %v2290_v32, %v2237_v24  ;;  %v10043_v24 = vld [vmem:[%s16038_s1 + $0xb8] sm:$0xf0]  ;;  %v8310_v32 = vld [vmem:[%s16038_s1 + $0xbc] sm:$0xf0] }
 0x203   :  { %v12020_v29 = vadd.f32 %v1255_v57, %v1203_v7  ;;  %2340 = vmatmul.bf16.gmra.mxu0 %v12011_v12 }
 0x204   :  { %2393 = vmatmul.bf16.gmra.mxu1 %v12013_v22 }
 0x205   :  { %16152 = vst [vmem:[#allocation37_spill] sm:$0xff] %v12020_v29  ;;  %8669 = vmatmul.msk.bf16.gmra.mxu2 %vm721_vm0, %v12015_v11  ;;  %v1398_v8 = vmul.f32 %v12020_v29, %v12020_v29  ;;  %v1337_v57 = vadd.f32 %v12020_v29, %v11503_v41 }
 0x206   :  { %2499 = vmatmul.bf16.gmra.mxu3 %v11500_v55 }
 0x207   :  { %v1439_v7 = vadd.f32 %v1398_v8, %v1397_v27  ;;  %v10044_v27 = vld [vmem:[%s16038_s1 + $0xc0] sm:$0xf0] }
 0x208   :  { %v2240_v54 = vpop.f32.mrf.mxu2  ;;  %v1204_v14 = vpop.f32.mrf.mxu0 }
 0x209   :  { %v2293_v51 = vpop.f32.mrf.mxu3  ;;  %v1205_v21 = vadd.f32 %v1204_v14, %v11538_v20  ;;  %v1257_v52 = vpop.f32.mrf.mxu1  ;;  %1338 = vadd.xlane.f32.xlu0 %v1337_v57  ;;  %1440 = vadd.xlane.f32.xlu1 %v1439_v7  ;;  %v1399_v20 = vmul.f32 %v11515_v18, %v11515_v18  ;;  %v12062_v7 = vor.u32 %v10043_v24, %v8308_v35 }
 0x20a   :  { %v12033_v23 = vadd.f32 %v2293_v51, %v2240_v54  ;;  %v1401_v35 = vmul.f32 %v11534_v61, %v11534_v61 }
 0x20b   :  { %v12036_v55 = vadd.f32 %v1257_v52, %v1205_v21  ;;  %v12064_v21 = vor.u32 %v10041_v49, %v8310_v32  ;;  %v12066_v52 = vor.u32 %v10044_v27, %v8316_v40  ;;  %v8328_v27 = vld [vmem:[%s16038_s1 + $0xd0] sm:$0xf] }
 0x20d   :  { %16153 = vst [vmem:[#allocation38_spill] sm:$0xff] %v12036_v55  ;;  %v1400_v30 = vmul.f32 %v12036_v55, %v12036_v55  ;;  %v1340_v57 = vadd.f32 %v12036_v55, %v11515_v18 }
 0x20f   :  { %v1442_v54 = vadd.f32 %v1400_v30, %v1399_v20 }
 0x210   :  { %v2242_v8 = vpop.f32.mrf.mxu2  ;;  %v1207_v14 = vpop.f32.mrf.mxu0 }
 0x211   :  { %v2295_v51 = vpop.f32.mrf.mxu3  ;;  %v1208_v46 = vadd.f32 %v1207_v14, %v11548_v43  ;;  %v1260_v29 = vpop.f32.mrf.mxu1  ;;  %1443 = vadd.xlane.f32.xlu2 %v1442_v54  ;;  %1341 = vadd.xlane.f32.xlu1 %v1340_v57  ;;  %v10046_v54 = vld [vmem:[%s16038_s1 + $0xd4] sm:$0xf]  ;;  %v8336_v14 = vld [vmem:[%s16038_s1 + $0xd8] sm:$0xf] }
 0x212   :  { %v12068_v37 = vadd.f32 %v2295_v51, %v2242_v8  ;;  %v10048_v8 = vld [vmem:[%s16038_s1 + $0xe0] sm:$0xf0]  ;;  %v8330_v51 = vld [vmem:[%s16038_s1 + $0xe4] sm:$0xf0] }
 0x213   :  { %v12071_v41 = vadd.f32 %v1260_v29, %v1208_v46  ;;  %2345 = vmatmul.bf16.gmra.mxu0 %v12062_v7 }
 0x214   :  { %2398 = vmatmul.bf16.gmra.mxu1 %v12064_v21 }
 0x215   :  { %16154 = vst [vmem:[#allocation39_spill] sm:$0xff] %v12071_v41  ;;  %8670 = vmatmul.msk.bf16.gmra.mxu2 %vm721_vm0, %v12066_v52  ;;  %v1402_v43 = vmul.f32 %v12071_v41, %v12071_v41  ;;  %v1343_v29 = vadd.f32 %v12071_v41, %v11534_v61 }
 0x216   :  { %2504 = vmatmul.bf16.gmra.mxu3 %v11531_v45 }
 0x217   :  { %v1445_v49 = vadd.f32 %v1402_v43, %v1401_v35  ;;  %v10049_v35 = vld [vmem:[%s16038_s1 + $0xe8] sm:$0xf0] }
 0x218   :  { %v2245_v24 = vpop.f32.mrf.mxu2  ;;  %v1209_v20 = vpop.f32.mrf.mxu0 }
 0x219   :  { %v2298_v46 = vpop.f32.mrf.mxu3  ;;  %v1210_v32 = vadd.f32 %v1209_v20, %v11569_v47  ;;  %v1262_v40 = vpop.f32.mrf.mxu1  ;;  %1446 = vadd.xlane.f32.xlu2 %v1445_v49  ;;  %1344 = vadd.xlane.f32.xlu1 %v1343_v29  ;;  %v1403_v47 = vmul.f32 %v11546_v56, %v11546_v56  ;;  %v12113_v29 = vor.u32 %v10048_v8, %v8328_v27  ;;  %v10090_v27 = vld [vmem:[%s16037_s0 + $0x334] sm:$0xf] }
 0x21a   :  { %v12084_v30 = vadd.f32 %v2298_v46, %v2245_v24 }
 0x21b   :  { %v12087_v45 = vadd.f32 %v1262_v40, %v1210_v32  ;;  %v12115_v32 = vor.u32 %v10046_v54, %v8330_v51  ;;  %v12117_v40 = vor.u32 %v10049_v35, %v8336_v14  ;;  %v8630_v51 = vld [vmem:[%s16037_s0 + $0x438] sm:$0xf0] }
 0x21d   :  { %16155 = vst [vmem:[#allocation40_spill] sm:$0xff] %v12087_v45  ;;  %v1404_v57 = vmul.f32 %v12087_v45, %v12087_v45  ;;  %v1346_v49 = vadd.f32 %v12087_v45, %v11546_v56  ;;  %v8478_v45 = vld [vmem:[%s16037_s0 + $0x308] sm:$0xf0] }
 0x21e   :  { %16156 = vst [vmem:[#allocation41_spill] sm:$0xff] %v12117_v40 }
 0x21f   :  { %v1448_v24 = vadd.f32 %v1404_v57, %v1403_v47  ;;  %v8566_v47 = vld [vmem:[%s16037_s0 + $0x3b8] sm:$0xf0]  ;;  %v10122_v57 = vld [vmem:[%s16037_s0 + $0x434] sm:$0xf] }
 0x220   :  { %v2247_v43 = vpop.f32.mrf.mxu2  ;;  %v1212_v20 = vpop.f32.mrf.mxu0  ;;  %v8633_v14 = vor.u32 %v10122_v57, %v8630_v51 }
 0x221   :  { %v2300_v46 = vpop.f32.mrf.mxu3  ;;  %v1213_v61 = vadd.f32 %v1212_v20, %v11615_v25  ;;  %v1265_v55 = vpop.f32.mrf.mxu1  ;;  %1449 = vadd.xlane.f32.xlu0 %v1448_v24  ;;  %1347 = vadd.xlane.f32.xlu2 %v1346_v49  ;;  %v8502_v25 = vld [vmem:[%s16037_s0 + $0x338] sm:$0xf0]  ;;  %v10088_v49 = vld [vmem:[%s16037_s0 + $0x324] sm:$0xf] }
 0x222   :  { %v12119_v41 = vadd.f32 %v2300_v46, %v2247_v43  ;;  %v8505_v54 = vor.u32 %v10090_v27, %v8502_v25  ;;  %v8494_v46 = vld [vmem:[%s16037_s0 + $0x328] sm:$0xf0]  ;;  %v10104_v20 = vld [vmem:[%s16037_s0 + $0x3a4] sm:$0xf]  ;;  %2635 = vmatpush.bf16.msra.mxu2 %v8633_v14 }
 0x223   :  { %v12122_v18 = vadd.f32 %v1265_v55, %v1213_v61  ;;  %2350 = vmatmul.bf16.gmra.mxu0 %v12113_v29  ;;  %v10106_v61 = vld [vmem:[%s16037_s0 + $0x3b4] sm:$0xf]  ;;  %v1405_v55 = vmul.f32 %v11565_v0, %v11565_v0 }
 0x224   :  { %2403 = vmatmul.bf16.gmra.mxu1 %v12115_v32  ;;  %2529 = vmatpush.bf16.msra.mxu0 %v8505_v54  ;;  %v8622_v54 = vld [vmem:[%s16037_s0 + $0x428] sm:$0xf0] }
 0x225   :  { %16157 = vst [vmem:[#allocation42_spill] sm:$0xff] %v12122_v18  ;;  %8671 = vmatmul.msk.bf16.gmra.mxu2 %vm721_vm0, %v12117_v40  ;;  %v1406_v8 = vmul.f32 %v12122_v18, %v12122_v18  ;;  %v1349_v24 = vadd.f32 %v12122_v18, %v11565_v0  ;;  %v10100_v18 = vld [vmem:[%s16037_s0 + $0x384] sm:$0xf] }
 0x226   :  { %2509 = vmatmul.bf16.gmra.mxu3 %v11562_v50  ;;  %v8569_v50 = vor.u32 %v10106_v61, %v8566_v47  ;;  %v8497_v61 = vor.u32 %v10088_v49, %v8494_v46  ;;  %v10086_v49 = vld [vmem:[%s16037_s0 + $0x314] sm:$0xf]  ;;  %v8486_v46 = vld [vmem:[%s16037_s0 + $0x318] sm:$0xf0]  ;;  %v10076_v40 = vld [vmem:[%s16037_s0 + $0x2c4] sm:$0xf] }
 0x227   :  { %v1451_v43 = vadd.f32 %v1406_v8, %v1405_v55  ;;  %v8558_v55 = vld [vmem:[%s16037_s0 + $0x3a8] sm:$0xf0]  ;;  %v10120_v8 = vld [vmem:[%s16037_s0 + $0x424] sm:$0xf] }
 0x228   :  { %v2250_v35 = vpop.f32.mrf.mxu2  ;;  %v1214_v25 = vpop.f32.mrf.mxu0  ;;  %2582 = vmatpush.bf16.msra.mxu1 %v8569_v50  ;;  %v8561_v50 = vor.u32 %v10104_v20, %v8558_v55  ;;  %v8625_v14 = vor.u32 %v10120_v8, %v8622_v54  ;;  %2530 = vmatpush.bf16.msra.mxu0 %v8497_v61  ;;  %v8614_v20 = vld [vmem:[%s16037_s0 + $0x418] sm:$0xf0]  ;;  %v10053_v61 = vld [vmem:[%s16038_s1 + $0x108] sm:$0xf0] }
 0x229   :  { %v2303_v27 = vpop.f32.mrf.mxu3  ;;  %v1215_v57 = vadd.f32 %v1214_v25, %v11672_v19  ;;  %v1267_v51 = vpop.f32.mrf.mxu1  ;;  %1452 = vadd.xlane.f32.xlu0 %v1451_v43  ;;  %1350 = vadd.xlane.f32.xlu2 %v1349_v24  ;;  %v8489_v19 = vor.u32 %v10086_v49, %v8486_v46  ;;  %v8550_v43 = vld [vmem:[%s16037_s0 + $0x398] sm:$0xf0]  ;;  %v10118_v24 = vld [vmem:[%s16037_s0 + $0x414] sm:$0xf]  ;;  %v8348_v25 = vld [vmem:[%s16038_s1 + $0xf8] sm:$0xf] }
 0x22a   :  { %v12171_v47 = vadd.f32 %v2303_v27, %v2250_v35  ;;  %v10102_v35 = vld [vmem:[%s16037_s0 + $0x394] sm:$0xf]  ;;  %v10051_v55 = vld [vmem:[%s16038_s1 + $0xfc] sm:$0xf]  ;;  %2636 = vmatpush.bf16.msra.mxu2 %v8625_v14  ;;  %v8617_v54 = vor.u32 %v10118_v24, %v8614_v20  ;;  %v8350_v49 = vld [vmem:[%s16038_s1 + $0x10c] sm:$0xf0]  ;;  %v12218_v24 = vor.u32 %v10053_v61, %v8348_v25 }
 0x22b   :  { %v12183_v27 = vadd.f32 %v1267_v51, %v1215_v57  ;;  %v8553_v8 = vor.u32 %v10102_v35, %v8550_v43  ;;  %v1407_v57 = vmul.f32 %v11613_v39, %v11613_v39  ;;  %v8356_v46 = vld [vmem:[%s16038_s1 + $0x100] sm:$0xf]  ;;  %v10084_v20 = vld [vmem:[%s16037_s0 + $0x304] sm:$0xf]  ;;  %v12229_v58 = vor.u32 %v10051_v55, %v8350_v49  ;;  %v8606_v61 = vld [vmem:[%s16037_s0 + $0x408] sm:$0xf0] }
 0x22c   :  { %2583 = vmatpush.bf16.msra.mxu1 %v8561_v50  ;;  %v10054_v50 = vld [vmem:[%s16038_s1 + $0x110] sm:$0xf0]  ;;  %16159 = vst [vmem:[#allocation44_spill] sm:$0xff] %v12218_v24  ;;  %2531 = vmatpush.bf16.msra.mxu0 %v8489_v19  ;;  %v8542_v19 = vld [vmem:[%s16037_s0 + $0x388] sm:$0xf0] }
 0x22d   :  { %16158 = vst [vmem:[#allocation43_spill] sm:$0xff] %v12183_v27  ;;  %v1408_v51 = vmul.f32 %v12183_v27, %v12183_v27  ;;  %v1352_v35 = vadd.f32 %v12183_v27, %v11613_v39  ;;  %v10116_v25 = vld [vmem:[%s16037_s0 + $0x404] sm:$0xf]  ;;  %v10082_v27 = vld [vmem:[%s16037_s0 + $0x2f4] sm:$0xf] }
 0x22e   :  { %16160 = vst [vmem:[#allocation45_spill] sm:$0xff] %v12229_v58  ;;  %2637 = vmatpush.bf16.msra.mxu2 %v8617_v54  ;;  %v8545_v54 = vor.u32 %v10100_v18, %v8542_v19  ;;  %v8534_v18 = vld [vmem:[%s16037_s0 + $0x378] sm:$0xf0] }
 0x22f   :  { %v1454_v43 = vadd.f32 %v1408_v51, %v1407_v57  ;;  %v12231_v57 = vor.u32 %v10054_v50, %v8356_v46  ;;  %v8609_v46 = vor.u32 %v10116_v25, %v8606_v61 }
 0x230   :  { %v2252_v14 = vpop.f32.mrf.mxu2  ;;  %v1217_v56 = vpop.f32.mrf.mxu0  ;;  %2584 = vmatpush.bf16.msra.mxu1 %v8553_v8  ;;  %v8481_v8 = vor.u32 %v10084_v20, %v8478_v45  ;;  %v8598_v45 = vld [vmem:[%s16037_s0 + $0x3f8] sm:$0xf0] }
 0x231   :  { %v2305_v0 = vpop.f32.mrf.mxu3  ;;  %16161 = vst [vmem:[#allocation46_spill] sm:$0xff] %v12231_v57  ;;  %v1218_v55 = vadd.f32 %v1217_v56, %v11730_v42  ;;  %v1270_v49 = vpop.f32.mrf.mxu1  ;;  %1353 = vadd.xlane.f32.xlu0 %v1352_v35  ;;  %1455 = vadd.xlane.f32.xlu1 %v1454_v43  ;;  %v10098_v56 = vld [vmem:[%s16037_s0 + $0x374] sm:$0xf]  ;;  %v8662_v20 = vld [vmem:[%s16037_s0 + $0x478] sm:$0xf0] }
 0x232   :  { %v12242_v51 = vadd.f32 %v2305_v0, %v2252_v14  ;;  %v8470_v0 = vld [vmem:[%s16037_s0 + $0x2f8] sm:$0xf0]  ;;  %v10114_v42 = vld [vmem:[%s16037_s0 + $0x3f4] sm:$0xf]  ;;  %v1409_v14 = vmul.f32 %v11668_v3, %v11668_v3  ;;  %2532 = vmatpush.bf16.msra.mxu0 %v8481_v8  ;;  %2638 = vmatpush.bf16.msra.mxu2 %v8609_v46  ;;  %v8537_v25 = vor.u32 %v10098_v56, %v8534_v18  ;;  %v10080_v8 = vld [vmem:[%s16037_s0 + $0x2e4] sm:$0xf] }
 0x233   :  { %v12245_v50 = vadd.f32 %v1270_v49, %v1218_v55  ;;  %2355 = vmatmul.bf16.gmra.mxu0 %v12218_v24  ;;  %v10130_v43 = vld [vmem:[%s16037_s0 + $0x474] sm:$0xf]  ;;  %v8473_v19 = vor.u32 %v10082_v27, %v8470_v0  ;;  %v8601_v39 = vor.u32 %v10114_v42, %v8598_v45  ;;  %v10096_v27 = vld [vmem:[%s16037_s0 + $0x364] sm:$0xf]  ;;  %v8526_v0 = vld [vmem:[%s16037_s0 + $0x368] sm:$0xf0] }
 0x234   :  { %16162 = vst [vmem:[#allocation47_spill] sm:$0xff] %v12242_v51  ;;  %2408 = vmatmul.bf16.gmra.mxu1 %v12229_v58  ;;  %v8462_v51 = vld [vmem:[%s16037_s0 + $0x2e8] sm:$0xf0]  ;;  %v10112_v56 = vld [vmem:[%s16037_s0 + $0x3e4] sm:$0xf] }
 0x235   :  { %16163 = vst [vmem:[#allocation48_spill] sm:$0xff] %v12245_v50  ;;  %8672 = vmatmul.msk.bf16.gmra.mxu2 %vm721_vm0, %v12231_v57  ;;  %v1410_v35 = vmul.f32 %v12245_v50, %v12245_v50  ;;  %2585 = vmatpush.bf16.msra.mxu1 %v8545_v54  ;;  %v1355_v55 = vadd.f32 %v12245_v50, %v11668_v3  ;;  %v8590_v18 = vld [vmem:[%s16037_s0 + $0x3e8] sm:$0xf0]  ;;  %v8376_v50 = vld [vmem:[%s16038_s1 + $0x128] sm:$0xf] }
 0x236   :  { %2514 = vmatmul.bf16.gmra.mxu3 %v11656_v1  ;;  %v8665_v1 = vor.u32 %v10130_v43, %v8662_v20  ;;  %v8654_v43 = vld [vmem:[%s16037_s0 + $0x468] sm:$0xf0]  ;;  %v8368_v20 = vld [vmem:[%s16038_s1 + $0x120] sm:$0xf]  ;;  %2533 = vmatpush.bf16.msra.mxu0 %v8473_v19  ;;  %v8593_v19 = vor.u32 %v10112_v56, %v8590_v18  ;;  %v1411_v56 = vmul.f32 %v11722_v13, %v11722_v13 }
 0x237   :  { %v1457_v49 = vadd.f32 %v1410_v35, %v1409_v14  ;;  %v10128_v35 = vld [vmem:[%s16037_s0 + $0x464] sm:$0xf]  ;;  %2639 = vmatpush.bf16.msra.mxu2 %v8601_v39  ;;  %v10110_v39 = vld [vmem:[%s16037_s0 + $0x3d4] sm:$0xf] }
 0x238   :  { %v2255_v61 = vpop.f32.mrf.mxu2  ;;  %v1219_v46 = vpop.f32.mrf.mxu0  ;;  %2692 = vmatpush.bf16.msra.mxu3 %v8665_v1  ;;  %v10058_v1 = vld [vmem:[%s16038_s1 + $0x130] sm:$0xf0] }
 0x239   :  { %v2308_v54 = vpop.f32.mrf.mxu3  ;;  %v1220_v45 = vadd.f32 %v1219_v46, %v11799_v63  ;;  %v1272_v14 = vpop.f32.mrf.mxu1  ;;  %1356 = vadd.xlane.f32.xlu0 %v1355_v55  ;;  %1458 = vadd.xlane.f32.xlu2 %v1457_v49  ;;  %v8465_v63 = vor.u32 %v10080_v8, %v8462_v51  ;;  %v8657_v55 = vor.u32 %v10128_v35, %v8654_v43  ;;  %v8370_v46 = vld [vmem:[%s16038_s1 + $0x134] sm:$0xf0]  ;;  %v10078_v51 = vld [vmem:[%s16037_s0 + $0x2d4] sm:$0xf]  ;;  %v8646_v35 = vld [vmem:[%s16037_s0 + $0x458] sm:$0xf0] }
 0x23a   :  { %v12300_v42 = vadd.f32 %v2308_v54, %v2255_v61  ;;  %2586 = vmatpush.bf16.msra.mxu1 %v8537_v25  ;;  %v8529_v61 = vor.u32 %v10096_v27, %v8526_v0  ;;  %v10056_v54 = vld [vmem:[%s16038_s1 + $0x124] sm:$0xf]  ;;  %v8454_v25 = vld [vmem:[%s16037_s0 + $0x2d8] sm:$0xf0]  ;;  %v10094_v8 = vld [vmem:[%s16037_s0 + $0x354] sm:$0xf]  ;;  %v12359_v24 = vor.u32 %v10058_v1, %v8368_v20 }
 0x23b   :  { %v12315_v49 = vadd.f32 %v1272_v14, %v1220_v45  ;;  %v8518_v27 = vld [vmem:[%s16037_s0 + $0x358] sm:$0xf0]  ;;  %v10126_v14 = vld [vmem:[%s16037_s0 + $0x454] sm:$0xf]  ;;  %2534 = vmatpush.bf16.msra.mxu0 %v8465_v63  ;;  %v8457_v43 = vor.u32 %v10078_v51, %v8454_v25  ;;  %2640 = vmatpush.bf16.msra.mxu2 %v8593_v19  ;;  %v8446_v63 = vld [vmem:[%s16037_s0 + $0x2c8] sm:$0xf0] }
 0x23c   :  { %16164 = vst [vmem:[#allocation49_spill] sm:$0xff] %v12300_v42  ;;  %2693 = vmatpush.bf16.msra.mxu3 %v8657_v55  ;;  %v8582_v0 = vld [vmem:[%s16037_s0 + $0x3d8] sm:$0xf0]  ;;  %v8521_v55 = vor.u32 %v10094_v8, %v8518_v27  ;;  %v8649_v3 = vor.u32 %v10126_v14, %v8646_v35  ;;  %v12370_v8 = vor.u32 %v10056_v54, %v8370_v46  ;;  %v8510_v1 = vld [vmem:[%s16037_s0 + $0x348] sm:$0xf0] }
 0x23d   :  { %16165 = vst [vmem:[#allocation50_spill] sm:$0xff] %v12315_v49  ;;  %v1412_v18 = vmul.f32 %v12315_v49, %v12315_v49  ;;  %v10059_v45 = vld [vmem:[%s16038_s1 + $0x138] sm:$0xf0]  ;;  %v1358_v57 = vadd.f32 %v12315_v49, %v11722_v13  ;;  %v8585_v42 = vor.u32 %v10110_v39, %v8582_v0  ;;  %v10108_v19 = vld [vmem:[%s16037_s0 + $0x3c4] sm:$0xf]  ;;  %v8449_v0 = vor.u32 %v10076_v40, %v8446_v63 }
 0x23e   :  { %2587 = vmatpush.bf16.msra.mxu1 %v8529_v61  ;;  %v10092_v61 = vld [vmem:[%s16037_s0 + $0x344] sm:$0xf]  ;;  %v12372_v20 = vor.u32 %v10059_v45, %v8376_v50  ;;  %v8574_v27 = vld [vmem:[%s16037_s0 + $0x3c8] sm:$0xf0] }
 0x23f   :  { %v1460_v58 = vadd.f32 %v1412_v18, %v1411_v56  ;;  %v8638_v50 = vld [vmem:[%s16037_s0 + $0x448] sm:$0xf0]  ;;  %2535 = vmatpush.bf16.msra.mxu0 %v8457_v43  ;;  %v8513_v56 = vor.u32 %v10092_v61, %v8510_v1  ;;  %2641 = vmatpush.bf16.msra.mxu2 %v8585_v42 }
 0x240   :  { %v2257_v15 = vpop.f32.mrf.mxu2  ;;  %v1222_v25 = vpop.f32.mrf.mxu0  ;;  %2694 = vmatpush.bf16.msra.mxu3 %v8649_v3  ;;  %v10124_v3 = vld [vmem:[%s16037_s0 + $0x444] sm:$0xf]  ;;  %v1532_v42 = vld [vmem:[%s16038_s1 + $0x148] sm:$0xff] }
 0x241   :  { %v2310_v51 = vpop.f32.mrf.mxu3  ;;  %v1223_v54 = vadd.f32 %v1222_v25, %v11809_v17  ;;  %v1275_v46 = vpop.f32.mrf.mxu1  ;;  %1359 = vadd.xlane.f32.xlu0 %v1358_v57  ;;  %1461 = vadd.xlane.f32.xlu2 %v1460_v58  ;;  %v8641_v17 = vor.u32 %v10124_v3, %v8638_v50  ;;  %v1741_v63 = vunpack.c.h.b16 %v1532_v42 }
 0x242   :  { %v12383_v39 = vadd.f32 %v2310_v51, %v2257_v15  ;;  %2588 = vmatpush.bf16.msra.mxu1 %v8521_v55  ;;  %v8577_v15 = vor.u32 %v10108_v19, %v8574_v27  ;;  %v1740_v55 = vunpack.c.l.b16 %v1532_v42  ;;  %v1413_v51 = vmul.f32 %v11789_v10, %v11789_v10 }
 0x243   :  { %v12392_v18 = vadd.f32 %v1275_v46, %v1223_v54  ;;  %2360 = vmatmul.bf16.gmra.mxu0 %v12359_v24  ;;  %v12415_v46 = vpack.c.b16 %v1741_v63, %v1741_v63 }
 0x244   :  { %2413 = vmatmul.bf16.gmra.mxu1 %v12370_v8  ;;  %2536 = vmatpush.bf16.msra.mxu0 %v8449_v0  ;;  %v12413_v19 = vpack.c.b16 %v1740_v55, %v1740_v55 }
 0x245   :  { %16166 = vst [vmem:[#allocation51_spill] sm:$0xff] %v12392_v18  ;;  %8673 = vmatmul.msk.bf16.gmra.mxu2 %vm721_vm0, %v12372_v20  ;;  %v1361_v40 = vadd.f32 %v12392_v18, %v11789_v10  ;;  %2695 = vmatpush.bf16.msra.mxu3 %v8641_v17  ;;  %v1414_v43 = vmul.f32 %v12392_v18, %v12392_v18 }
 0x246   :  { %2519 = vmatmul.bf16.gmra.mxu3 %v11777_v5  ;;  %2589 = vmatpush.bf16.msra.mxu1 %v8513_v56  ;;  %v1533_v5 = vld [vmem:[%s16038_s1 + $0x150] sm:$0xf] }
 0x247   :  { %2642 = vmatpush.bf16.msra.mxu2 %v8577_v15  ;;  %v1742_v61 = vunpack.c.l.b16 %v1533_v5  ;;  %v1463_v1 = vadd.f32 %v1414_v43, %v1413_v51 }
 0x248   :  { %v2260_v58 = vpop.f32.mrf.mxu2  ;;  %v1224_v45 = vpop.f32.mrf.mxu0 }
 0x249   :  { %v2313_v57 = vpop.f32.mrf.mxu3  ;;  %v1277_v35 = vpop.f32.mrf.mxu1  ;;  %1362 = vadd.xlane.f32.xlu2 %v1361_v40  ;;  %v12417_v3 = vpack.c.b16 %v1742_v61, %v1742_v61  ;;  %v16169_v61 = vld [vmem:[#allocation6_spill] sm:$0xff] }
 0x24a   :  { %v12404_v14 = vadd.f32 %v2313_v57, %v2260_v58 }
 0x250   :  { %v2262_v25 = vpop.f32.mrf.mxu2  ;;  %v2326_v54 = vpop.f32.mrf.mxu0 }
 0x251   :  { %v2315_v27 = vpop.f32.mrf.mxu3  ;;  %v2327_v50 = vadd.f32 %v2326_v54, %v11825_v33  ;;  %v2379_v0 = vpop.f32.mrf.mxu1  ;;  %1464 = vadd.xlane.f32.xlu2 %v1463_v1 }
 0x253   :  { %v2380_v56 = vadd.f32 %v2379_v0, %v2327_v50  ;;  %2365 = vmatmul.bf16.gmra.mxu0 %v12413_v19 }
 0x254   :  { %2418 = vmatmul.bf16.gmra.mxu1 %v12415_v46 }
 0x255   :  { %8674 = vmatmul.msk.bf16.gmra.mxu2 %vm721_vm0, %v12417_v3 }
 0x256   :  { %2524 = vmatmul.bf16.gmra.mxu3 %v11811_v28 }
 0x258   :  { %v2432_v15 = vpop.f32.mrf.mxu2  ;;  %v2328_v40 = vpop.f32.mrf.mxu0 }
 0x259   :  { %v12425_v17 = vadd.f32 %v2432_v15, %v2380_v56  ;;  %v12427_v58 = vpop.f32.mrf.mxu3  ;;  %v2329_v33 = vadd.f32 %v2328_v40, %v11860_v59  ;;  %v2381_v57 = vpop.f32.mrf.mxu1  ;;  %v16172_v40 = vld [vmem:[#allocation9_spill] sm:$0xff] }
 0x25b   :  { %16167 = vst [vmem:[#allocation52_spill] sm:$0xff] %v12425_v17  ;;  %v2382_v45 = vadd.f32 %v2381_v57, %v2329_v33 }
 0x260   :  { %v2434_v42 = vpop.f32.mrf.mxu2  ;;  %v2331_v43 = vpop.f32.mrf.mxu0 }
 0x261   :  { %v12430_v35 = vadd.f32 %v2434_v42, %v2382_v45  ;;  %v12432_v5 = vpop.f32.mrf.mxu3  ;;  %v2332_v55 = vadd.f32 %v2331_v43, %v11880_v31  ;;  %v2384_v63 = vpop.f32.mrf.mxu1 }
 0x263   :  { %16168 = vst [vmem:[#allocation53_spill] sm:$0xff] %v12430_v35  ;;  %v2385_v28 = vadd.f32 %v2384_v63, %v2332_v55  ;;  %2537 = vmatmul.bf16.vlgmr.msra.gmra.mxu0 %v16169_v61 }
 0x264   :  { %2590 = vmatmul.bf16.vlgmr.msra.gmra.mxu1 %v11854_v6 }
 0x265   :  { %2643 = vmatmul.bf16.vlgmr.msra.gmra.mxu2 %v11856_v62 }
 0x266   :  { %8675 = vmatmul.msk.bf16.vlgmr.msra.gmra.mxu3 %vm721_vm0, %v11858_v48 }
 0x268   :  { %v2437_v59 = vpop.f32.mrf.mxu2  ;;  %v2333_v1 = vpop.f32.mrf.mxu0 }
 0x269   :  { %v12440_v51 = vadd.f32 %v2437_v59, %v2385_v28  ;;  %v12442_v25 = vpop.f32.mrf.mxu3  ;;  %v2334_v27 = vadd.f32 %v2333_v1, %v11915_v4  ;;  %v2386_v31 = vpop.f32.mrf.mxu1  ;;  %v16175_v59 = vld [vmem:[#allocation12_spill] sm:$0xff] }
 0x26b   :  { %16170 = vst [vmem:[#allocation6_spill] sm:$0xff] %v12440_v51  ;;  %v2387_v54 = vadd.f32 %v2386_v31, %v2334_v27 }
 0x270   :  { %v2439_v50 = vpop.f32.mrf.mxu2  ;;  %v2336_v6 = vpop.f32.mrf.mxu0 }
 0x271   :  { %v12445_v0 = vadd.f32 %v2439_v50, %v2387_v54  ;;  %v12447_v56 = vpop.f32.mrf.mxu3  ;;  %v2337_v62 = vadd.f32 %v2336_v6, %v11931_v16  ;;  %v2389_v15 = vpop.f32.mrf.mxu1 }
 0x273   :  { %16171 = vst [vmem:[#allocation54_spill] sm:$0xff] %v12445_v0  ;;  %v2390_v48 = vadd.f32 %v2389_v15, %v2337_v62  ;;  %2542 = vmatmul.bf16.gmra.mxu0 %v16172_v40  ;;  %v16176_v40 = vld [vmem:[#allocation15_spill] sm:$0xff] }
 0x274   :  { %2595 = vmatmul.bf16.gmra.mxu1 %v11909_v36 }
 0x275   :  { %2648 = vmatmul.bf16.gmra.mxu2 %v11911_v53 }
 0x276   :  { %8676 = vmatmul.msk.bf16.gmra.mxu3 %vm721_vm0, %v11913_v9 }
 0x278   :  { %v2442_v4 = vpop.f32.mrf.mxu2  ;;  %v2338_v45 = vpop.f32.mrf.mxu0 }
 0x279   :  { %v12455_v33 = vadd.f32 %v2442_v4, %v2390_v48  ;;  %v12457_v57 = vpop.f32.mrf.mxu3  ;;  %v2339_v42 = vadd.f32 %v2338_v45, %v11966_v26  ;;  %v2391_v16 = vpop.f32.mrf.mxu1 }
 0x27b   :  { %16173 = vst [vmem:[#allocation9_spill] sm:$0xff] %v12455_v33  ;;  %v2392_v43 = vadd.f32 %v2391_v16, %v2339_v42 }
 0x280   :  { %v2444_v55 = vpop.f32.mrf.mxu2  ;;  %v2341_v36 = vpop.f32.mrf.mxu0 }
 0x281   :  { %v12460_v63 = vadd.f32 %v2444_v55, %v2392_v43  ;;  %v12462_v28 = vpop.f32.mrf.mxu3  ;;  %v2342_v53 = vadd.f32 %v2341_v36, %v11982_v38  ;;  %v2394_v61 = vpop.f32.mrf.mxu1 }
 0x283   :  { %16174 = vst [vmem:[#allocation55_spill] sm:$0xff] %v12460_v63  ;;  %v2395_v9 = vadd.f32 %v2394_v61, %v2342_v53  ;;  %2547 = vmatmul.bf16.gmra.mxu0 %v16175_v59 }
 0x284   :  { %2600 = vmatmul.bf16.gmra.mxu1 %v11960_v60 }
 0x285   :  { %2653 = vmatmul.bf16.gmra.mxu2 %v11962_v34 }
 0x286   :  { %8677 = vmatmul.msk.bf16.gmra.mxu3 %vm721_vm0, %v11964_v44 }
 0x288   :  { %v2447_v26 = vpop.f32.mrf.mxu2  ;;  %v2343_v31 = vpop.f32.mrf.mxu0 }
 0x289   :  { %v12470_v1 = vadd.f32 %v2447_v26, %v2395_v9  ;;  %v12472_v27 = vpop.f32.mrf.mxu3  ;;  %v2344_v54 = vadd.f32 %v2343_v31, %v12017_v2  ;;  %v2396_v38 = vpop.f32.mrf.mxu1  ;;  %v16177_v9 = vld [vmem:[#allocation18_spill] sm:$0xff] }
 0x28b   :  { %v2397_v50 = vadd.f32 %v2396_v38, %v2344_v54 }
 0x290   :  { %v2449_v6 = vpop.f32.mrf.mxu2  ;;  %v2346_v60 = vpop.f32.mrf.mxu0 }
 0x291   :  { %v12475_v62 = vadd.f32 %v2449_v6, %v2397_v50  ;;  %v12477_v15 = vpop.f32.mrf.mxu3  ;;  %v2347_v34 = vadd.f32 %v2346_v60, %v12033_v23  ;;  %v2399_v48 = vpop.f32.mrf.mxu1 }
 0x293   :  { %v2400_v44 = vadd.f32 %v2399_v48, %v2347_v34  ;;  %2552 = vmatmul.bf16.gmra.mxu0 %v16176_v40  ;;  %v16180_v48 = vld [vmem:[#allocation21_spill] sm:$0xff] }
 0x294   :  { %2605 = vmatmul.bf16.gmra.mxu1 %v12011_v12 }
 0x295   :  { %2658 = vmatmul.bf16.gmra.mxu2 %v12013_v22 }
 0x296   :  { %8678 = vmatmul.msk.bf16.gmra.mxu3 %vm721_vm0, %v12015_v11 }
 0x298   :  { %v2452_v2 = vpop.f32.mrf.mxu2  ;;  %v2348_v42 = vpop.f32.mrf.mxu0 }
 0x299   :  { %v12485_v4 = vadd.f32 %v2452_v2, %v2400_v44  ;;  %v12487_v45 = vpop.f32.mrf.mxu3  ;;  %v2349_v16 = vadd.f32 %v2348_v42, %v12068_v37  ;;  %v2401_v23 = vpop.f32.mrf.mxu1  ;;  %v16181_v44 = vld [vmem:[#allocation41_spill] sm:$0xff] }
 0x29b   :  { %v2402_v43 = vadd.f32 %v2401_v23, %v2349_v16 }
 0x2a0   :  { %v2454_v55 = vpop.f32.mrf.mxu2  ;;  %v2351_v12 = vpop.f32.mrf.mxu0 }
 0x2a1   :  { %v12490_v36 = vadd.f32 %v2454_v55, %v2402_v43  ;;  %v12492_v53 = vpop.f32.mrf.mxu3  ;;  %v2352_v22 = vadd.f32 %v2351_v12, %v12084_v30  ;;  %v2404_v61 = vpop.f32.mrf.mxu1 }
 0x2a3   :  { %v2405_v11 = vadd.f32 %v2404_v61, %v2352_v22  ;;  %2557 = vmatmul.bf16.gmra.mxu0 %v16177_v9  ;;  %v16183_v22 = vld [vmem:[#allocation24_spill] sm:$0xff]  ;;  %v16186_v9 = vld [vmem:[#allocation46_spill] sm:$0xff] }
 0x2a4   :  { %2610 = vmatmul.bf16.gmra.mxu1 %v12062_v7  ;;  %v16184_v61 = vld [vmem:[#allocation44_spill] sm:$0xff] }
 0x2a5   :  { %2663 = vmatmul.bf16.gmra.mxu2 %v12064_v21 }
 0x2a6   :  { %8679 = vmatmul.msk.bf16.gmra.mxu3 %vm721_vm0, %v12066_v52 }
 0x2a8   :  { %v2457_v37 = vpop.f32.mrf.mxu2  ;;  %v2353_v31 = vpop.f32.mrf.mxu0 }
 0x2a9   :  { %v12500_v59 = vadd.f32 %v2457_v37, %v2405_v11  ;;  %v12502_v26 = vpop.f32.mrf.mxu3  ;;  %v2354_v54 = vadd.f32 %v2353_v31, %v12119_v41  ;;  %v2406_v30 = vpop.f32.mrf.mxu1  ;;  %v16185_v11 = vld [vmem:[#allocation45_spill] sm:$0xff] }
 0x2ab   :  { %16178 = vst [vmem:[#allocation12_spill] sm:$0xff] %v12500_v59  ;;  %v2407_v38 = vadd.f32 %v2406_v30, %v2354_v54 }
 0x2b0   :  { %v2459_v50 = vpop.f32.mrf.mxu2  ;;  %v2356_v7 = vpop.f32.mrf.mxu0 }
 0x2b1   :  { %v12505_v6 = vadd.f32 %v2459_v50, %v2407_v38  ;;  %v12507_v60 = vpop.f32.mrf.mxu3  ;;  %v2357_v21 = vadd.f32 %v2356_v7, %v12171_v47  ;;  %v2409_v34 = vpop.f32.mrf.mxu1 }
 0x2b3   :  { %16179 = vst [vmem:[#allocation15_spill] sm:$0xff] %v12505_v6  ;;  %v2410_v52 = vadd.f32 %v2409_v34, %v2357_v21  ;;  %2562 = vmatmul.bf16.gmra.mxu0 %v16180_v48 }
 0x2b4   :  { %2615 = vmatmul.bf16.gmra.mxu1 %v12113_v29  ;;  %v16182_v29 = vld [vmem:[#allocation49_spill] sm:$0xff] }
 0x2b5   :  { %2668 = vmatmul.bf16.gmra.mxu2 %v12115_v32 }
 0x2b6   :  { %8680 = vmatmul.msk.bf16.gmra.mxu3 %vm721_vm0, %v16181_v44  ;;  %v16187_v44 = vld [vmem:[#allocation27_spill] sm:$0xff] }
 0x2b8   :  { %v2462_v41 = vpop.f32.mrf.mxu2  ;;  %v12519_v42 = vpop.f32.mrf.mxu0 }
 0x2b9   :  { %v12515_v40 = vadd.f32 %v2462_v41, %v2410_v52  ;;  %v12517_v2 = vpop.f32.mrf.mxu3  ;;  %v12521_v16 = vpop.f32.mrf.mxu1 }
 0x2c0   :  { %v12523_v47 = vpop.f32.mrf.mxu2  ;;  %v2361_v43 = vpop.f32.mrf.mxu0 }
 0x2c1   :  { %v12525_v23 = vpop.f32.mrf.mxu3  ;;  %v2362_v55 = vadd.f32 %v2361_v43, %v16182_v29  ;;  %v2414_v32 = vpop.f32.mrf.mxu1 }
 0x2c3   :  { %v2415_v12 = vadd.f32 %v2414_v32, %v2362_v55  ;;  %2567 = vmatmul.bf16.gmra.mxu0 %v16183_v22 }
 0x2c4   :  { %2620 = vmatmul.bf16.gmra.mxu1 %v16184_v61 }
 0x2c5   :  { %2673 = vmatmul.bf16.gmra.mxu2 %v16185_v11 }
 0x2c6   :  { %8681 = vmatmul.msk.bf16.gmra.mxu3 %vm721_vm0, %v16186_v9  ;;  %v16189_v9 = vld [vmem:[#allocation28_spill] sm:$0xff] }
 0x2c8   :  { %v2467_v37 = vpop.f32.mrf.mxu2  ;;  %v12537_v30 = vpop.f32.mrf.mxu0 }
 0x2c9   :  { %v12533_v31 = vadd.f32 %v2467_v37, %v2415_v12  ;;  %v12535_v54 = vpop.f32.mrf.mxu3  ;;  %v12539_v38 = vpop.f32.mrf.mxu1 }
 0x2d0   :  { %v12541_v50 = vpop.f32.mrf.mxu2  ;;  %v2366_v21 = vpop.f32.mrf.mxu0 }
 0x2d1   :  { %v12543_v7 = vpop.f32.mrf.mxu3  ;;  %v2367_v34 = vadd.f32 %v2366_v21, %v12404_v14  ;;  %v2419_v52 = vpop.f32.mrf.mxu1 }
 0x2d3   :  { %v2420_v48 = vadd.f32 %v2419_v52, %v2367_v34  ;;  %2572 = vmatmul.bf16.gmra.mxu0 %v16187_v44 }
 0x2d4   :  { %2625 = vmatmul.bf16.gmra.mxu1 %v12359_v24 }
 0x2d5   :  { %2678 = vmatmul.bf16.gmra.mxu2 %v12370_v8 }
 0x2d6   :  { %8682 = vmatmul.msk.bf16.gmra.mxu3 %vm721_vm0, %v12372_v20 }
 0x2d8   :  { %v2472_v41 = vpop.f32.mrf.mxu2  ;;  %v2368_v55 = vpop.f32.mrf.mxu0 }
 0x2d9   :  { %v12551_v43 = vadd.f32 %v2472_v41, %v2420_v48  ;;  %v12553_v29 = vpop.f32.mrf.mxu3  ;;  %v2421_v32 = vpop.f32.mrf.mxu1 }
 0x2db   :  { %16188 = vst [vmem:[#allocation18_spill] sm:$0xff] %v12551_v43 }
 0x2e0   :  { %v2474_v12 = vpop.f32.mrf.mxu2  ;;  %v2538_v22 = vpop.f32.mrf.mxu0 }
 0x2e1   :  { %v2527_v14 = vpop.f32.mrf.mxu3  ;;  %v2591_v61 = vpop.f32.mrf.mxu1  ;;  %v2539_v11 = vadd.f32 %v2538_v22, %v12427_v58 }
 0x2e2   :  { %v12564_v58 = vpop.xlane.xlu2 %1317 }
 0x2e3   :  { %2577 = vmatmul.bf16.gmra.mxu0 %v16189_v9  ;;  %v2592_v24 = vadd.f32 %v2591_v61, %v2539_v11 }
 0x2e4   :  { %2630 = vmatmul.bf16.gmra.mxu1 %v12413_v19 }
 0x2e5   :  { %2683 = vmatmul.bf16.gmra.mxu2 %v12415_v46 }
 0x2e6   :  { %8683 = vmatmul.msk.bf16.gmra.mxu3 %vm721_vm0, %v12417_v3 }
 0x2e8   :  { %v2644_v8 = vpop.f32.mrf.mxu2  ;;  %v2540_v21 = vpop.f32.mrf.mxu0 }
 0x2e9   :  { %v2645_v20 = vadd.f32 %v2644_v8, %v2592_v24  ;;  %v2697_v37 = vpop.f32.mrf.mxu3  ;;  %v2593_v34 = vpop.f32.mrf.mxu1  ;;  %v2541_v48 = vadd.f32 %v2540_v21, %v12432_v5  ;;  %v2844_v5 = vmul.f32 %v12425_v17, %v12425_v17 }
 0x2ea   :  { %v12577_v9 = vpop.xlane.xlu2 %1419 }
 0x2eb   :  { %v12561_v52 = vadd.f32 %v2697_v37, %v2645_v20  ;;  %v2594_v44 = vadd.f32 %v2593_v34, %v2541_v48 }
 0x2ed   :  { %16190 = vst [vmem:[#allocation21_spill] sm:$0xff] %v12561_v52  ;;  %v2776_v46 = vadd.f32 %v12561_v52, %v12425_v17  ;;  %v2845_v32 = vmul.f32 %v12561_v52, %v12561_v52 }
 0x2ef   :  { %2777 = vadd.xlane.f32.xlu0 %v2776_v46  ;;  %v2878_v61 = vadd.f32 %v2845_v32, %v2844_v5 }
 0x2f0   :  { %v2646_v19 = vpop.f32.mrf.mxu2  ;;  %v2543_v55 = vpop.f32.mrf.mxu0 }
 0x2f1   :  { %v2647_v41 = vadd.f32 %v2646_v19, %v2594_v44  ;;  %v2699_v3 = vpop.f32.mrf.mxu3  ;;  %v2596_v12 = vpop.f32.mrf.mxu1  ;;  %v2544_v22 = vadd.f32 %v2543_v55, %v12442_v25  ;;  %v2846_v44 = vmul.f32 %v12430_v35, %v12430_v35 }
 0x2f2   :  { %v12592_v32 = vpop.xlane.xlu2 %1425 }
 0x2f3   :  { %v12570_v14 = vadd.f32 %v2699_v3, %v2647_v41  ;;  %v2597_v24 = vadd.f32 %v2596_v12, %v2544_v22  ;;  %v2848_v3 = vmul.f32 %v12440_v51, %v12440_v51 }
 0x2f5   :  { %16191 = vst [vmem:[#allocation41_spill] sm:$0xff] %v12570_v14  ;;  %v2779_v11 = vadd.f32 %v12570_v14, %v12430_v35  ;;  %v2847_v34 = vmul.f32 %v12570_v14, %v12570_v14 }
 0x2f7   :  { %2879 = vadd.xlane.f32.xlu0 %v2878_v61  ;;  %2780 = vadd.xlane.f32.xlu1 %v2779_v11  ;;  %v2881_v41 = vadd.f32 %v2847_v34, %v2846_v44 }
 0x2f8   :  { %v2649_v8 = vpop.f32.mrf.mxu2  ;;  %v2545_v21 = vpop.f32.mrf.mxu0 }
 0x2f9   :  { %v2650_v20 = vadd.f32 %v2649_v8, %v2597_v24  ;;  %v2702_v37 = vpop.f32.mrf.mxu3  ;;  %v2598_v25 = vpop.f32.mrf.mxu1  ;;  %v2546_v46 = vadd.f32 %v2545_v21, %v12447_v56  ;;  %v2850_v21 = vmul.f32 %v12445_v0, %v12445_v0 }
 0x2fb   :  { %v12581_v48 = vadd.f32 %v2702_v37, %v2650_v20  ;;  %v2599_v12 = vadd.f32 %v2598_v25, %v2546_v46  ;;  %v12597_v37 = vpop.xlane.xlu0 %1320 }
 0x2fd   :  { %16192 = vst [vmem:[#allocation49_spill] sm:$0xff] %v12581_v48  ;;  %v2782_v19 = vadd.f32 %v12581_v48, %v12440_v51  ;;  %v2849_v55 = vmul.f32 %v12581_v48, %v12581_v48 }
 0x2ff   :  { %2783 = vadd.xlane.f32.xlu2 %v2782_v19  ;;  %2882 = vadd.xlane.f32.xlu1 %v2881_v41  ;;  %v2884_v22 = vadd.f32 %v2849_v55, %v2848_v3  ;;  %v12605_v19 = vpop.xlane.xlu2 %1428 }
 0x300   :  { %v2651_v56 = vpop.f32.mrf.mxu2  ;;  %v2548_v11 = vpop.f32.mrf.mxu0 }
 0x301   :  { %v2652_v5 = vadd.f32 %v2651_v56, %v2599_v12  ;;  %v2704_v61 = vpop.f32.mrf.mxu3  ;;  %2885 = vadd.xlane.f32.xlu0 %v2884_v22  ;;  %v2601_v24 = vpop.f32.mrf.mxu1  ;;  %v2549_v20 = vadd.f32 %v2548_v11, %v12457_v57  ;;  %v2852_v11 = vmul.f32 %v12455_v33, %v12455_v33 }
 0x303   :  { %v12594_v8 = vadd.f32 %v2704_v61, %v2652_v5  ;;  %v2602_v25 = vadd.f32 %v2601_v24, %v2549_v20  ;;  %v12610_v5 = vpop.xlane.xlu1 %1314  ;;  %v12612_v61 = vpop.xlane.xlu0 %1431 }
 0x305   :  { %16193 = vst [vmem:[#allocation24_spill] sm:$0xff] %v12594_v8  ;;  %v2851_v34 = vmul.f32 %v12594_v8, %v12594_v8  ;;  %v2785_v46 = vadd.f32 %v12594_v8, %v12445_v0 }
 0x307   :  { %v2887_v44 = vadd.f32 %v2851_v34, %v2850_v21 }
 0x308   :  { %v2654_v41 = vpop.f32.mrf.mxu2  ;;  %v2550_v57 = vpop.f32.mrf.mxu0 }
 0x309   :  { %v2655_v3 = vadd.f32 %v2654_v41, %v2602_v25  ;;  %v2707_v55 = vpop.f32.mrf.mxu3  ;;  %2786 = vadd.xlane.f32.xlu0 %v2785_v46  ;;  %2888 = vadd.xlane.f32.xlu1 %v2887_v44  ;;  %v2603_v12 = vpop.f32.mrf.mxu1  ;;  %v2551_v56 = vadd.f32 %v2550_v57, %v12462_v28 }
 0x30a   :  { %v12620_v41 = vpop.xlane.xlu2 %1329 }
 0x30b   :  { %v12607_v22 = vadd.f32 %v2707_v55, %v2655_v3  ;;  %v2604_v20 = vadd.f32 %v2603_v12, %v2551_v56  ;;  %v2854_v12 = vmul.f32 %v12460_v63, %v12460_v63 }
 0x30d   :  { %16194 = vst [vmem:[#allocation44_spill] sm:$0xff] %v12607_v22  ;;  %v2853_v24 = vmul.f32 %v12607_v22, %v12607_v22  ;;  %v2788_v21 = vadd.f32 %v12607_v22, %v12455_v33 }
 0x30f   :  { %v2890_v34 = vadd.f32 %v2853_v24, %v2852_v11  ;;  %v12629_v11 = vpop.xlane.xlu1 %1416  ;;  %v12631_v24 = vpop.xlane.xlu0 %1434 }
 0x310   :  { %v2656_v25 = vpop.f32.mrf.mxu2  ;;  %v2553_v28 = vpop.f32.mrf.mxu0 }
 0x311   :  { %v2657_v46 = vadd.f32 %v2656_v25, %v2604_v20  ;;  %v2709_v44 = vpop.f32.mrf.mxu3  ;;  %2789 = vadd.xlane.f32.xlu0 %v2788_v21  ;;  %2891 = vadd.xlane.f32.xlu1 %v2890_v34  ;;  %v2606_v3 = vpop.f32.mrf.mxu1  ;;  %v2554_v57 = vadd.f32 %v2553_v28, %v12472_v27 }
 0x312   :  { %v12638_v52 = vpop.xlane.xlu2 %1332 }
 0x313   :  { %v12622_v55 = vadd.f32 %v2709_v44, %v2657_v46  ;;  %v2607_v20 = vadd.f32 %v2606_v3, %v2554_v57  ;;  %v2856_v3 = vmul.f32 %v12470_v1, %v12470_v1 }
 0x315   :  { %16195 = vst [vmem:[#allocation45_spill] sm:$0xff] %v12622_v55  ;;  %v2855_v56 = vmul.f32 %v12622_v55, %v12622_v55  ;;  %v2791_v34 = vadd.f32 %v12622_v55, %v12460_v63 }
 0x317   :  { %v2893_v21 = vadd.f32 %v2855_v56, %v2854_v12  ;;  %v12644_v12 = vpop.xlane.xlu1 %1422 }
 0x318   :  { %v2659_v25 = vpop.f32.mrf.mxu2  ;;  %v2555_v27 = vpop.f32.mrf.mxu0 }
 0x319   :  { %v2660_v46 = vadd.f32 %v2659_v25, %v2607_v20  ;;  %v2712_v44 = vpop.f32.mrf.mxu3  ;;  %2894 = vadd.xlane.f32.xlu2 %v2893_v21  ;;  %2792 = vadd.xlane.f32.xlu1 %v2791_v34  ;;  %v2608_v28 = vpop.f32.mrf.mxu1  ;;  %v2556_v35 = vadd.f32 %v2555_v27, %v12477_v15 }
 0x31a   :  { %v12648_v34 = vpop.xlane.xlu0 %1335  ;;  %v12653_v48 = vpop.xlane.xlu2 %1443 }
 0x31b   :  { %v12635_v14 = vadd.f32 %v2712_v44, %v2660_v46  ;;  %v2609_v56 = vadd.f32 %v2608_v28, %v2556_v35  ;;  %v2858_v35 = vmul.f32 %v12475_v62, %v12475_v62 }
 0x31d   :  { %v2857_v57 = vmul.f32 %v12635_v14, %v12635_v14  ;;  %v2794_v21 = vadd.f32 %v12635_v14, %v12470_v1 }
 0x31f   :  { %v2896_v20 = vadd.f32 %v2857_v57, %v2856_v3 }
 0x320   :  { %v2661_v25 = vpop.f32.mrf.mxu2  ;;  %v2558_v44 = vpop.f32.mrf.mxu0 }
 0x321   :  { %v2662_v46 = vadd.f32 %v2661_v25, %v2609_v56  ;;  %v2714_v15 = vpop.f32.mrf.mxu3  ;;  %2897 = vadd.xlane.f32.xlu2 %v2896_v20  ;;  %2795 = vadd.xlane.f32.xlu1 %v2794_v21  ;;  %v2611_v27 = vpop.f32.mrf.mxu1  ;;  %v2559_v8 = vadd.f32 %v2558_v44, %v12487_v45 }
 0x322   :  { %v12661_v20 = vpop.xlane.xlu1 %1323 }
 0x323   :  { %v12650_v17 = vadd.f32 %v2714_v15, %v2662_v46  ;;  %v2612_v3 = vadd.f32 %v2611_v27, %v2559_v8  ;;  %v12663_v15 = vpop.xlane.xlu0 %1338  ;;  %v2860_v8 = vmul.f32 %v12485_v4, %v12485_v4 }
 0x325   :  { %v2859_v28 = vmul.f32 %v12650_v17, %v12650_v17  ;;  %v2797_v56 = vadd.f32 %v12650_v17, %v12475_v62 }
 0x327   :  { %v2899_v57 = vadd.f32 %v2859_v28, %v2858_v35  ;;  %v12672_v35 = vpop.xlane.xlu2 %1446 }
 0x328   :  { %v2664_v21 = vpop.f32.mrf.mxu2  ;;  %v2560_v45 = vpop.f32.mrf.mxu0 }
 0x329   :  { %v2665_v25 = vadd.f32 %v2664_v21, %v2612_v3  ;;  %v2717_v46 = vpop.f32.mrf.mxu3  ;;  %2900 = vadd.xlane.f32.xlu0 %v2899_v57  ;;  %2798 = vadd.xlane.f32.xlu2 %v2797_v56  ;;  %v2613_v44 = vpop.f32.mrf.mxu1  ;;  %v2561_v0 = vadd.f32 %v2560_v45, %v12492_v53 }
 0x32a   :  { %v12678_v45 = vpop.xlane.xlu1 %1326 }
 0x32b   :  { %v12665_v51 = vadd.f32 %v2717_v46, %v2665_v25  ;;  %v2614_v28 = vadd.f32 %v2613_v44, %v2561_v0  ;;  %v12676_v53 = vpop.xlane.xlu0 %1449  ;;  %v2862_v0 = vmul.f32 %v12490_v36, %v12490_v36 }
 0x32d   :  { %v2861_v27 = vmul.f32 %v12665_v51, %v12665_v51  ;;  %v2800_v57 = vadd.f32 %v12665_v51, %v12485_v4 }
 0x32f   :  { %v2902_v3 = vadd.f32 %v2861_v27, %v2860_v8 }
 0x330   :  { %v2666_v56 = vpop.f32.mrf.mxu2  ;;  %v2563_v25 = vpop.f32.mrf.mxu0 }
 0x331   :  { %v2667_v21 = vadd.f32 %v2666_v56, %v2614_v28  ;;  %v2719_v18 = vpop.f32.mrf.mxu3  ;;  %2903 = vadd.xlane.f32.xlu0 %v2902_v3  ;;  %2801 = vadd.xlane.f32.xlu2 %v2800_v57  ;;  %v2616_v46 = vpop.f32.mrf.mxu1  ;;  %v2564_v22 = vadd.f32 %v2563_v25, %v12502_v26 }
 0x332   :  { %v12689_v3 = vpop.xlane.xlu2 %1347 }
 0x333   :  { %v12680_v10 = vadd.f32 %v2719_v18, %v2667_v21  ;;  %v2617_v8 = vadd.f32 %v2616_v46, %v2564_v22  ;;  %v12691_v21 = vpop.xlane.xlu1 %1437  ;;  %v12696_v22 = vpop.xlane.xlu0 %1452  ;;  %v2864_v46 = vmul.f32 %v12500_v59, %v12500_v59 }
 0x335   :  { %16196 = vst [vmem:[#allocation46_spill] sm:$0xff] %v12680_v10  ;;  %v2863_v44 = vmul.f32 %v12680_v10, %v12680_v10  ;;  %v2803_v27 = vadd.f32 %v12680_v10, %v12490_v36 }
 0x337   :  { %v2905_v28 = vadd.f32 %v2863_v44, %v2862_v0 }
 0x338   :  { %v2669_v57 = vpop.f32.mrf.mxu2  ;;  %v2565_v18 = vpop.f32.mrf.mxu0 }
 0x339   :  { %v2670_v56 = vadd.f32 %v2669_v57, %v2617_v8  ;;  %v2722_v33 = vpop.f32.mrf.mxu3  ;;  %2804 = vadd.xlane.f32.xlu0 %v2803_v27  ;;  %2906 = vadd.xlane.f32.xlu1 %v2905_v28  ;;  %v2618_v26 = vpop.f32.mrf.mxu1  ;;  %v2566_v55 = vadd.f32 %v2565_v18, %v12507_v60 }
 0x33a   :  { %v12704_v60 = vpop.xlane.xlu2 %1350 }
 0x33b   :  { %v12693_v25 = vadd.f32 %v2722_v33, %v2670_v56  ;;  %v2619_v44 = vadd.f32 %v2618_v26, %v2566_v55  ;;  %v12709_v13 = vpop.xlane.xlu1 %1440  ;;  %v2866_v55 = vmul.f32 %v12505_v6, %v12505_v6 }
 0x33d   :  { %16197 = vst [vmem:[#allocation27_spill] sm:$0xff] %v12693_v25  ;;  %v2865_v0 = vmul.f32 %v12693_v25, %v12693_v25  ;;  %v2806_v8 = vadd.f32 %v12693_v25, %v12500_v59  ;;  %v16199_v25 = vld [vmem:[#allocation47_spill] sm:$0xff] }
 0x33e   :  { %v2359_v59 = vadd.f32 %v12519_v42, %v16199_v25 }
 0x33f   :  { %v2908_v27 = vadd.f32 %v2865_v0, %v2864_v46  ;;  %v12715_v46 = vpop.xlane.xlu0 %1353 }
 0x340   :  { %v2671_v28 = vpop.f32.mrf.mxu2  ;;  %v2568_v33 = vpop.f32.mrf.mxu0 }
 0x341   :  { %v2672_v57 = vadd.f32 %v2671_v28, %v2619_v44  ;;  %v2724_v63 = vpop.f32.mrf.mxu3  ;;  %2807 = vadd.xlane.f32.xlu0 %v2806_v8  ;;  %2909 = vadd.xlane.f32.xlu1 %v2908_v27  ;;  %v2621_v56 = vpop.f32.mrf.mxu1  ;;  %v2569_v49 = vadd.f32 %v2568_v33, %v12517_v2 }
 0x343   :  { %v12706_v18 = vadd.f32 %v2724_v63, %v2672_v57  ;;  %v2622_v0 = vadd.f32 %v2621_v56, %v2569_v49  ;;  %v12719_v57 = vpop.xlane.xlu2 %1458  ;;  %v2868_v56 = vmul.f32 %v12515_v40, %v12515_v40 }
 0x345   :  { %16198 = vst [vmem:[#allocation28_spill] sm:$0xff] %v12706_v18  ;;  %v2867_v26 = vmul.f32 %v12706_v18, %v12706_v18  ;;  %v2809_v8 = vadd.f32 %v12706_v18, %v12505_v6 }
 0x347   :  { %v2911_v44 = vadd.f32 %v2867_v26, %v2866_v55  ;;  %v12730_v26 = vpop.xlane.xlu1 %1341  ;;  %v12735_v42 = vpop.xlane.xlu0 %1356 }
 0x348   :  { %v2674_v27 = vpop.f32.mrf.mxu2  ;;  %v2570_v2 = vpop.f32.mrf.mxu0 }
 0x349   :  { %v2675_v63 = vadd.f32 %v2674_v27, %v2622_v0  ;;  %v2727_v28 = vpop.f32.mrf.mxu3  ;;  %2912 = vadd.xlane.f32.xlu2 %v2911_v44  ;;  %2810 = vadd.xlane.f32.xlu1 %v2809_v8  ;;  %v2623_v33 = vpop.f32.mrf.mxu1  ;;  %v2571_v49 = vadd.f32 %v2570_v2, %v12525_v23  ;;  %v2412_v0 = vadd.f32 %v12521_v16, %v2359_v59 }
 0x34b   :  { %v12723_v10 = vadd.f32 %v2727_v28, %v2675_v63  ;;  %v2624_v44 = vadd.f32 %v2623_v33, %v2571_v49  ;;  %v12738_v23 = vadd.f32 %v12523_v47, %v2412_v0  ;;  %v12743_v16 = vpop.xlane.xlu2 %1461 }
 0x34d   :  { %v2869_v55 = vmul.f32 %v12723_v10, %v12723_v10  ;;  %v2812_v27 = vadd.f32 %v12723_v10, %v12515_v40  ;;  %16200 = vst [vmem:[#allocation47_spill] sm:$0xff] %v12738_v23  ;;  %v2870_v33 = vmul.f32 %v12738_v23, %v12738_v23 }
 0x34f   :  { %v2914_v8 = vadd.f32 %v2869_v55, %v2868_v56 }
 0x350   :  { %v2676_v25 = vpop.f32.mrf.mxu2  ;;  %v2573_v2 = vpop.f32.mrf.mxu0 }
 0x351   :  { %v2677_v63 = vadd.f32 %v2676_v25, %v2624_v44  ;;  %v2729_v28 = vpop.f32.mrf.mxu3  ;;  %2915 = vadd.xlane.f32.xlu2 %v2914_v8  ;;  %2813 = vadd.xlane.f32.xlu1 %v2812_v27  ;;  %v2626_v18 = vpop.f32.mrf.mxu1  ;;  %v2574_v59 = vadd.f32 %v2573_v2, %v12535_v54 }
 0x352   :  { %v12751_v54 = vpop.xlane.xlu1 %1344  ;;  %v12753_v25 = vpop.xlane.xlu0 %1359 }
 0x353   :  { %v12740_v6 = vadd.f32 %v2729_v28, %v2677_v63  ;;  %v2627_v47 = vadd.f32 %v2626_v18, %v2574_v59  ;;  %v2364_v18 = vadd.f32 %v12537_v30, %v12383_v39 }
 0x355   :  { %16201 = vst [vmem:[#allocation56_spill] sm:$0xff] %v12740_v6  ;;  %v2871_v49 = vmul.f32 %v12740_v6, %v12740_v6  ;;  %v2815_v55 = vadd.f32 %v12740_v6, %v12738_v23 }
 0x357   :  { %v2917_v56 = vadd.f32 %v2871_v49, %v2870_v33  ;;  %v2872_v33 = vmul.f32 %v12533_v31, %v12533_v31 }
 0x358   :  { %v2679_v0 = vpop.f32.mrf.mxu2  ;;  %v2575_v27 = vpop.f32.mrf.mxu0 }
 0x359   :  { %v2680_v44 = vadd.f32 %v2679_v0, %v2627_v47  ;;  %v2732_v8 = vpop.f32.mrf.mxu3  ;;  %2918 = vadd.xlane.f32.xlu0 %v2917_v56  ;;  %2816 = vadd.xlane.f32.xlu2 %v2815_v55  ;;  %v2576_v28 = vadd.f32 %v2575_v27, %v12543_v7  ;;  %v2628_v2 = vpop.f32.mrf.mxu1  ;;  %v2417_v7 = vadd.f32 %v12539_v38, %v2364_v18 }
 0x35a   :  { %v12766_v47 = vpop.xlane.xlu2 %1362  ;;  %v12769_v30 = vpop.xlane.xlu1 %1455 }
 0x35b   :  { %v12755_v63 = vadd.f32 %v2732_v8, %v2680_v44  ;;  %v2629_v56 = vadd.f32 %v2628_v2, %v2576_v28  ;;  %v12772_v6 = vadd.f32 %v12541_v50, %v2417_v7 }
 0x35d   :  { %16202 = vst [vmem:[#allocation57_spill] sm:$0xff] %v12755_v63  ;;  %v2818_v59 = vadd.f32 %v12755_v63, %v12533_v31  ;;  %v2873_v49 = vmul.f32 %v12755_v63, %v12755_v63 }
 0x35f   :  { %2819 = vadd.xlane.f32.xlu1 %v2818_v59  ;;  %v2920_v55 = vadd.f32 %v2873_v49, %v2872_v33 }
 0x360   :  { %v2681_v0 = vpop.f32.mrf.mxu2  ;;  %v2578_v39 = vpop.f32.mrf.mxu0 }
 0x361   :  { %v2682_v44 = vadd.f32 %v2681_v0, %v2629_v56  ;;  %v2734_v8 = vpop.f32.mrf.mxu3  ;;  %2921 = vadd.xlane.f32.xlu0 %v2920_v55  ;;  %v2579_v63 = vadd.f32 %v2578_v39, %v12553_v29  ;;  %v2631_v28 = vpop.f32.mrf.mxu1 }
 0x362   :  { %v2778_v27 = vpop.xlane.xlu0 %2777  ;;  %v12780_v59 = vpop.xlane.xlu2 %1464 }
 0x363   :  { %v12774_v23 = vadd.f32 %v2734_v8, %v2682_v44  ;;  %v2827_v2 = vadd.f32 %v2778_v27, %v12610_v5  ;;  %v2632_v18 = vadd.f32 %v2631_v28, %v2579_v63  ;;  %v2874_v63 = vmul.f32 %v12772_v6, %v12772_v6 }
 0x365   :  { %16203 = vst [vmem:[#allocation58_spill] sm:$0xff] %v12774_v23  ;;  %v2821_v38 = vadd.f32 %v12774_v23, %v12772_v6  ;;  %v12782_v49 = vmul.f32 0.0025510204, %v2827_v2  ;;  %v2875_v55 = vmul.f32 %v12774_v23, %v12774_v23 }
 0x367   :  { %2822 = vadd.xlane.f32.xlu1 %v2821_v38  ;;  %v2980_v27 = vmul.f32 %v12782_v49, %v12782_v49  ;;  %v2923_v38 = vadd.f32 %v2875_v55, %v2874_v63 }
 0x368   :  { %v2684_v33 = vpop.f32.mrf.mxu2  ;;  %v2580_v0 = vpop.f32.mrf.mxu0 }
 0x369   :  { %v2685_v56 = vadd.f32 %v2684_v33, %v2632_v18  ;;  %v2737_v50 = vpop.f32.mrf.mxu3  ;;  %v2633_v8 = vpop.f32.mrf.mxu1 }
 0x36a   :  { %v2880_v29 = vpop.xlane.xlu0 %2879  ;;  %v2781_v7 = vpop.xlane.xlu1 %2780 }
 0x36b   :  { %v12786_v44 = vadd.f32 %v2737_v50, %v2685_v56  ;;  %v2929_v5 = vadd.f32 %v2880_v29, %v12629_v11  ;;  %v2828_v39 = vadd.f32 %v2781_v7, %v12564_v58  ;;  %v2876_v7 = vmul.f32 %v12551_v43, %v12551_v43 }
 0x36d   :  { %16204 = vst [vmem:[#allocation59_spill] sm:$0xff] %v12786_v44  ;;  %v2963_v28 = vmul.f32 0.0025510204, %v2929_v5  ;;  %v2824_v2 = vadd.f32 %v12786_v44, %v12551_v43  ;;  %v12796_v33 = vmul.f32 0.0025510204, %v2828_v39  ;;  %v2877_v56 = vmul.f32 %v12786_v44, %v12786_v44 }
 0x36f   :  { %v2997_v18 = vsub.f32 %v2963_v28, %v2980_v27  ;;  %2825 = vadd.xlane.f32.xlu0 %v2824_v2  ;;  %2924 = vadd.xlane.f32.xlu1 %v2923_v38  ;;  %v2981_v63 = vmul.f32 %v12796_v33, %v12796_v33  ;;  %v2926_v27 = vadd.f32 %v2877_v56, %v2876_v7 }
 0x370   :  { %v2686_v11 = vpop.f32.mrf.mxu2 }
 0x371   :  { %v3014_v50 = vmax.f32 %v2997_v18, 0.0  ;;  %v2739_v0 = vpop.f32.mrf.mxu3 }
 0x372   :  { %v2784_v58 = vpop.xlane.xlu2 %2783  ;;  %v2883_v29 = vpop.xlane.xlu1 %2882 }
 0x373   :  { %v3031_v5 = vadd.f32 1e-05, %v3014_v50  ;;  %v2829_v8 = vadd.f32 %v2784_v58, %v12597_v37  ;;  %v2930_v55 = vadd.f32 %v2883_v29, %v12577_v9 }
 0x374   :  { %v2886_v39 = vpop.xlane.xlu0 %2885 }
 0x375   :  { %10340 = vrsqrt.f32 %v3031_v5  ;;  %v12806_v28 = vmul.f32 0.0025510204, %v2829_v8  ;;  %v2964_v2 = vmul.f32 0.0025510204, %v2930_v55  ;;  %v2931_v38 = vadd.f32 %v2886_v39, %v12644_v12 }
 0x376   :  { %vm3054_vm2 = vweird.f32 %v3031_v5 }
 0x377   :  { %v2982_v18 = vmul.f32 %v12806_v28, %v12806_v28  ;;  %v2998_v11 = vsub.f32 %v2964_v2, %v2981_v63  ;;  %v2965_v50 = vmul.f32 0.0025510204, %v2931_v38  ;;  %2927 = vadd.xlane.f32.xlu0 %v2926_v27 }
 0x379   :  { %v3015_v37 = vmax.f32 %v2998_v11, 0.0  ;;  %v2999_v0 = vsub.f32 %v2965_v50, %v2982_v18 }
 0x37b   :  { %v10341_v9 = vpop.eup %10340  ;;  %v3032_v58 = vadd.f32 1e-05, %v3015_v37  ;;  %v3016_v29 = vmax.f32 %v2999_v0, 0.0 }
 0x37c   :  { %v3049_v44 = vmul.f32 %v10341_v9, %v3031_v5  ;;  %v2787_v43 = vpop.xlane.xlu0 %2786  ;;  %v2889_v56 = vpop.xlane.xlu1 %2888  ;;  %vm3055_vm1 = vweird.f32 %v10341_v9 }
 0x37d   :  { %10342 = vrsqrt.f32 %v3032_v58  ;;  %v12811_v7 = vadd.f32 1e-05, %v3016_v29  ;;  %v2830_v8 = vadd.f32 %v2787_v43, %v12661_v20  ;;  %v2932_v12 = vadd.f32 %v2889_v56, %v12592_v32  ;;  %v3218_v32 = vld [vmem:[%s16039_s2] sm:$0xff]  ;;  %vm3056_vm3 = vmor %vm3054_vm2, %vm3055_vm1 }
 0x37e   :  { %v3050_v55 = vmul.f32 %v10341_v9, %v3049_v44  ;;  %vm3064_vm6 = vweird.f32 %v3032_v58 }
 0x37f   :  { %10344 = vrsqrt.f32 %v12811_v7  ;;  %v12816_v63 = vmul.f32 0.0025510204, %v2830_v8  ;;  %v2966_v2 = vmul.f32 0.0025510204, %v2932_v12  ;;  %v10374_v8 = vmov 0  }
 0x380   :  { %v3051_v39 = vmul.f32 0.5, %v3050_v55  ;;  %10337 = vset.pattern.permute.xlu0 %v10374_v8  ;;  %10338 = vset.pattern.permute.xlu2 %v10374_v8  ;;  %vm3074_vm8 = vweird.f32 %v12811_v7 }
 0x381   :  { %v2983_v27 = vmul.f32 %v12816_v63, %v12816_v63  ;;  %10339 = vset.pattern.permute.xlu1 %v10374_v8  ;;  %v3219_v8 = vld [vmem:[%s16039_s2 + $0x8] sm:$0xff] }
 0x382   :  { %v3052_v38 = vsub.f32 1.5, %v3051_v39 }
 0x383   :  { %v10343_v18 = vpop.eup %10342  ;;  %v3000_v11 = vsub.f32 %v2966_v2, %v2983_v27 }
 0x384   :  { %v3059_v50 = vmul.f32 %v10343_v18, %v3032_v58  ;;  %v2790_v37 = vpop.xlane.xlu0 %2789  ;;  %v2892_v0 = vpop.xlane.xlu1 %2891  ;;  %v3053_v43 = vmul.f32 %v10341_v9, %v3052_v38  ;;  %vm3065_vm4 = vweird.f32 %v10343_v18 }
 0x385   :  { %v10345_v20 = vpop.eup %10344  ;;  %v3017_v44 = vmax.f32 %v3000_v11, 0.0  ;;  %v2831_v29 = vadd.f32 %v2790_v37, %v12678_v45  ;;  %v2933_v56 = vadd.f32 %v2892_v0, %v12605_v19  ;;  %vm3066_vm7 = vmor %vm3064_vm6, %vm3065_vm4 }
 0x386   :  { %v3060_v12 = vmul.f32 %v10343_v18, %v3059_v50  ;;  %v3069_v55 = vmul.f32 %v10345_v20, %v12811_v7  ;;  %v3057_v5 = vsel %vm3056_vm3, %v10341_v9, %v3053_v43  ;;  %vm3075_vm5 = vweird.f32 %v10345_v20 }
 0x387   :  { %v3034_v39 = vadd.f32 1e-05, %v3017_v44  ;;  %v12827_v27 = vmul.f32 0.0025510204, %v2831_v29  ;;  %v12829_v2 = vmul.f32 %v3218_v32, %v3057_v5  ;;  %v2967_v45 = vmul.f32 0.0025510204, %v2933_v56  ;;  %vm3076_vm9 = vmor %vm3074_vm8, %vm3075_vm5 }
 0x388   :  { %v3061_v38 = vmul.f32 0.5, %v3060_v12  ;;  %v3070_v11 = vmul.f32 %v10345_v20, %v3069_v55  ;;  %v3220_v5 = vld [vmem:[%s16039_s2 + $0x10] sm:$0xff] }
 0x389   :  { %10346 = vrsqrt.f32 %v3034_v39  ;;  %v2984_v19 = vmul.f32 %v12827_v27, %v12827_v27  ;;  %v12835_v37 = vmul.f32 %v12829_v2, %v12782_v49  ;;  %vm3084_vm11 = vweird.f32 %v3034_v39 }
 0x38a   :  { %v3071_v50 = vmul.f32 0.5, %v3070_v11  ;;  %v3062_v0 = vsub.f32 1.5, %v3061_v38 }
 0x38b   :  { %v3001_v9 = vsub.f32 %v2967_v45, %v2984_v19 }
 0x38c   :  { %v2895_v43 = vpop.xlane.xlu2 %2894  ;;  %v2793_v44 = vpop.xlane.xlu1 %2792  ;;  %v3072_v29 = vsub.f32 1.5, %v3071_v50  ;;  %v3063_v32 = vmul.f32 %v10343_v18, %v3062_v0 }
 0x38d   :  { %v3018_v12 = vmax.f32 %v3001_v9, 0.0  ;;  %v2934_v56 = vadd.f32 %v2895_v43, %v12612_v61  ;;  %v2832_v49 = vadd.f32 %v2793_v44, %v12620_v41 }
 0x38e   :  { %v3073_v55 = vmul.f32 %v10345_v20, %v3072_v29  ;;  %v3067_v38 = vsel %vm3066_vm7, %v10343_v18, %v3063_v32 }
 0x38f   :  { %v10347_v11 = vpop.eup %10346  ;;  %v3035_v58 = vadd.f32 1e-05, %v3018_v12  ;;  %v12846_v19 = vmul.f32 0.0025510204, %v2832_v49  ;;  %v12849_v45 = vmul.f32 %v3219_v8, %v3067_v38  ;;  %v2968_v41 = vmul.f32 0.0025510204, %v2934_v56 }
 0x390   :  { %v3079_v61 = vmul.f32 %v10347_v11, %v3034_v39  ;;  %v3077_v50 = vsel %vm3076_vm9, %v10345_v20, %v3073_v55  ;;  %vm3085_vm10 = vweird.f32 %v10347_v11 }
 0x391   :  { %10348 = vrsqrt.f32 %v3035_v58  ;;  %v2985_v7 = vmul.f32 %v12846_v19, %v12846_v19  ;;  %v12853_v0 = vmul.f32 %v3220_v5, %v3077_v50  ;;  %v12857_v18 = vmul.f32 %v12849_v45, %v12796_v33  ;;  %vm3086_vm12 = vmor %vm3084_vm11, %vm3085_vm10 }
 0x392   :  { %v3080_v9 = vmul.f32 %v10347_v11, %v3079_v61  ;;  %vm3094_vm14 = vweird.f32 %v3035_v58 }
 0x393   :  { %v3002_v43 = vsub.f32 %v2968_v41, %v2985_v7  ;;  %v12861_v44 = vmul.f32 %v12853_v0, %v12806_v28  ;;  %v3221_v28 = vld [vmem:[%s16039_s2 + $0x18] sm:$0xff] }
 0x394   :  { %v3081_v29 = vmul.f32 0.5, %v3080_v9  ;;  %v2898_v32 = vpop.xlane.xlu2 %2897  ;;  %v2796_v20 = vpop.xlane.xlu1 %2795 }
 0x395   :  { %v3019_v8 = vmax.f32 %v3002_v43, 0.0  ;;  %v2935_v12 = vadd.f32 %v2898_v32, %v12631_v24  ;;  %v2833_v56 = vadd.f32 %v2796_v20, %v12638_v52 }
 0x396   :  { %v3082_v49 = vsub.f32 1.5, %v3081_v29 }
 0x397   :  { %v10349_v55 = vpop.eup %10348  ;;  %v3036_v5 = vadd.f32 1e-05, %v3019_v8  ;;  %v12865_v38 = vmul.f32 0.0025510204, %v2833_v56  ;;  %v2969_v50 = vmul.f32 0.0025510204, %v2935_v12 }
 0x398   :  { %v3089_v33 = vmul.f32 %v10349_v55, %v3035_v58  ;;  %v3083_v61 = vmul.f32 %v10347_v11, %v3082_v49  ;;  %vm3095_vm13 = vweird.f32 %v10349_v55 }
 0x399   :  { %10350 = vrsqrt.f32 %v3036_v5  ;;  %v2986_v24 = vmul.f32 %v12865_v38, %v12865_v38  ;;  %vm3096_vm15 = vmor %vm3094_vm14, %vm3095_vm13  ;;  %vm3104_vm1 = vweird.f32 %v3036_v5 }
 0x39a   :  { %v3090_v52 = vmul.f32 %v10349_v55, %v3089_v33  ;;  %v3087_v41 = vsel %vm3086_vm12, %v10347_v11, %v3083_v61 }
 0x39b   :  { %v3003_v7 = vsub.f32 %v2969_v50, %v2986_v24  ;;  %v12872_v9 = vmul.f32 %v3221_v28, %v3087_v41  ;;  %v3222_v50 = vld [vmem:[%s16039_s2 + $0x20] sm:$0xff] }
 0x39c   :  { %v3091_v43 = vmul.f32 0.5, %v3090_v52  ;;  %v2901_v29 = vpop.xlane.xlu0 %2900  ;;  %v2799_v32 = vpop.xlane.xlu2 %2798 }
 0x39d   :  { %v3020_v20 = vmax.f32 %v3003_v7, 0.0  ;;  %v2936_v39 = vadd.f32 %v2901_v29, %v12691_v21  ;;  %v2834_v8 = vadd.f32 %v2799_v32, %v12648_v34  ;;  %v12878_v12 = vmul.f32 %v12872_v9, %v12816_v63 }
 0x39e   :  { %v3092_v56 = vsub.f32 1.5, %v3091_v43 }
 0x39f   :  { %v10351_v49 = vpop.eup %10350  ;;  %v3037_v33 = vadd.f32 1e-05, %v3020_v20  ;;  %v12880_v11 = vmul.f32 0.0025510204, %v2834_v8  ;;  %v2970_v21 = vmul.f32 0.0025510204, %v2936_v39 }
 0x3a0   :  { %v3099_v61 = vmul.f32 %v10351_v49, %v3036_v5  ;;  %v3093_v28 = vmul.f32 %v10349_v55, %v3092_v56  ;;  %vm3105_vm0 = vweird.f32 %v10351_v49 }
 0x3a1   :  { %10352 = vrsqrt.f32 %v3037_v33  ;;  %v2987_v34 = vmul.f32 %v12880_v11, %v12880_v11  ;;  %vm3106_vm2 = vmor %vm3104_vm1, %vm3105_vm0  ;;  %vm3114_vm4 = vweird.f32 %v3037_v33 }
 0x3a2   :  { %v3100_v63 = vmul.f32 %v10351_v49, %v3099_v61  ;;  %v3097_v24 = vsel %vm3096_vm15, %v10349_v55, %v3093_v28  ;;  %v3223_v55 = vld [vmem:[%s16039_s2 + $0x28] sm:$0xff] }
 0x3a3   :  { %v3004_v52 = vsub.f32 %v2970_v21, %v2987_v34  ;;  %v3239_v41 = vmul.f32 %v3222_v50, %v3097_v24 }
 0x3a4   :  { %v3101_v7 = vmul.f32 0.5, %v3100_v63  ;;  %v2904_v43 = vpop.xlane.xlu0 %2903  ;;  %v2802_v29 = vpop.xlane.xlu2 %2801 }
 0x3a5   :  { %v3021_v32 = vmax.f32 %v3004_v52, 0.0  ;;  %v2937_v58 = vadd.f32 %v2904_v43, %v12709_v13  ;;  %v2835_v20 = vadd.f32 %v2802_v29, %v12663_v15  ;;  %3359 = vperm.xlu0 %10337, %v3239_v41   ;;  %v12890_v8 = vmul.f32 %v3239_v41, %v12827_v27 }
 0x3a6   :  { %v3102_v39 = vsub.f32 1.5, %v3101_v7 }
 0x3a7   :  { %v10353_v56 = vpop.eup %10352  ;;  %v3038_v23 = vadd.f32 1e-05, %v3021_v32  ;;  %v12892_v61 = vmul.f32 0.0025510204, %v2835_v20  ;;  %v2971_v13 = vmul.f32 0.0025510204, %v2937_v58 }
 0x3a8   :  { %v3103_v28 = vmul.f32 %v10351_v49, %v3102_v39  ;;  %v3109_v50 = vmul.f32 %v10353_v56, %v3037_v33  ;;  %vm3115_vm3 = vweird.f32 %v10353_v56  ;;  %v3224_v39 = vld [vmem:[%s16039_s2 + $0x30] sm:$0xff] }
 0x3a9   :  { %10354 = vrsqrt.f32 %v3038_v23  ;;  %v2988_v15 = vmul.f32 %v12892_v61, %v12892_v61  ;;  %vm3116_vm5 = vmor %vm3114_vm4, %vm3115_vm3  ;;  %vm3124_vm7 = vweird.f32 %v3038_v23 }
 0x3aa   :  { %v3107_v27 = vsel %vm3106_vm2, %v10351_v49, %v3103_v28  ;;  %v3110_v21 = vmul.f32 %v10353_v56, %v3109_v50 }
 0x3ab   :  { %v3240_v34 = vmul.f32 %v3223_v55, %v3107_v27  ;;  %v3005_v63 = vsub.f32 %v2971_v13, %v2988_v15 }
 0x3ac   :  { %v3111_v24 = vmul.f32 0.5, %v3110_v21  ;;  %v2805_v52 = vpop.xlane.xlu0 %2804  ;;  %v2907_v41 = vpop.xlane.xlu1 %2906 }
 0x3ad   :  { %v12900_v7 = vmul.f32 %v3240_v34, %v12846_v19  ;;  %v3022_v43 = vmax.f32 %v3005_v63, 0.0  ;;  %v2836_v5 = vadd.f32 %v2805_v52, %v12730_v26  ;;  %v2938_v29 = vadd.f32 %v2907_v41, %v12653_v48  ;;  %3364 = vperm.xlu2 %10338, %v3240_v34   ;;  %v3258_v63 = vld [vmem:[%s16040_s3 + $0x30] sm:$0xff] }
 0x3ae   :  { %v3112_v32 = vsub.f32 1.5, %v3111_v24 }
 0x3af   :  { %v10355_v58 = vpop.eup %10354  ;;  %v3039_v20 = vadd.f32 1e-05, %v3022_v43  ;;  %v12904_v49 = vmul.f32 0.0025510204, %v2836_v5  ;;  %v2972_v48 = vmul.f32 0.0025510204, %v2938_v29 }
 0x3b0   :  { %v3113_v55 = vmul.f32 %v10353_v56, %v3112_v32  ;;  %v3119_v19 = vmul.f32 %v10355_v58, %v3038_v23  ;;  %vm3125_vm6 = vweird.f32 %v10355_v58  ;;  %v3259_v23 = vld [vmem:[%s16040_s3 + $0x38] sm:$0xff] }
 0x3b1   :  { %10356 = vrsqrt.f32 %v3039_v20  ;;  %v2989_v26 = vmul.f32 %v12904_v49, %v12904_v49  ;;  %vm3126_vm8 = vmor %vm3124_vm7, %vm3125_vm6  ;;  %vm3134_vm10 = vweird.f32 %v3039_v20 }
 0x3b2   :  { %v3117_v28 = vsel %vm3116_vm5, %v10353_v56, %v3113_v55  ;;  %v3120_v50 = vmul.f32 %v10355_v58, %v3119_v19 }
 0x3b3   :  { %v3241_v13 = vmul.f32 %v3224_v39, %v3117_v28  ;;  %v3006_v15 = vsub.f32 %v2972_v48, %v2989_v26  ;;  %v3225_v39 = vld [vmem:[%s16039_s2 + $0x38] sm:$0xff] }
 0x3b4   :  { %v3121_v27 = vmul.f32 0.5, %v3120_v50  ;;  %v2808_v21 = vpop.xlane.xlu0 %2807  ;;  %v2910_v34 = vpop.xlane.xlu1 %2909 }
 0x3b5   :  { %v3275_v33 = vmul.f32 %v3241_v13, %v12865_v38  ;;  %v3023_v24 = vmax.f32 %v3006_v15, 0.0  ;;  %v2837_v52 = vadd.f32 %v2808_v21, %v12751_v54  ;;  %v2939_v41 = vadd.f32 %v2910_v34, %v12672_v35  ;;  %3369 = vperm.xlu1 %10339, %v3241_v13  }
 0x3b6   :  { %v3122_v43 = vsub.f32 1.5, %v3121_v27 }
 0x3b7   :  { %v10357_v56 = vpop.eup %10356  ;;  %v12917_v5 = vadd.f32 1e-05, %v3023_v24  ;;  %v12919_v29 = vmul.f32 0.0025510204, %v2837_v52  ;;  %v3292_v32 = vsub.f32 %v3258_v63, %v3275_v33  ;;  %v2973_v54 = vmul.f32 0.0025510204, %v2939_v41 }
 0x3b8   :  { %v3123_v55 = vmul.f32 %v10355_v58, %v3122_v43  ;;  %v3129_v38 = vmul.f32 %v10357_v56, %v3039_v20  ;;  %vm3135_vm9 = vweird.f32 %v10357_v56  ;;  %v3226_v43 = vld [vmem:[%s16039_s2 + $0x40] sm:$0xff] }
 0x3b9   :  { %10358 = vrsqrt.f32 %v12917_v5  ;;  %v2990_v35 = vmul.f32 %v12919_v29, %v12919_v29  ;;  %3488 = vperm.xlu2 %10338, %v3292_v32   ;;  %vm3136_vm11 = vmor %vm3134_vm10, %vm3135_vm9  ;;  %v3260_v20 = vld [vmem:[%s16040_s3 + $0x40] sm:$0xff]  ;;  %vm3144_vm13 = vweird.f32 %v12917_v5 }
 0x3ba   :  { %v3127_v19 = vsel %vm3126_vm8, %v10355_v58, %v3123_v55  ;;  %v3130_v26 = vmul.f32 %v10357_v56, %v3129_v38 }
 0x3bb   :  { %v3242_v48 = vmul.f32 %v3225_v39, %v3127_v19  ;;  %v3007_v28 = vsub.f32 %v2973_v54, %v2990_v35 }
 0x3bc   :  { %v3131_v50 = vmul.f32 0.5, %v3130_v26  ;;  %v2913_v13 = vpop.xlane.xlu2 %2912  ;;  %v2811_v15 = vpop.xlane.xlu1 %2810 }
 0x3bd   :  { %v3276_v27 = vmul.f32 %v3242_v48, %v12880_v11  ;;  %v3024_v21 = vmax.f32 %v3007_v28, 0.0  ;;  %v2940_v34 = vadd.f32 %v2913_v13, %v12676_v53  ;;  %v2838_v63 = vadd.f32 %v2811_v15, %v12689_v3  ;;  %3374 = vperm.xlu0 %10337, %v3242_v48  }
 0x3be   :  { %v3132_v33 = vsub.f32 1.5, %v3131_v50 }
 0x3bf   :  { %v10359_v58 = vpop.eup %10358  ;;  %v12933_v24 = vadd.f32 1e-05, %v3024_v21  ;;  %v12935_v52 = vmul.f32 0.0025510204, %v2838_v63  ;;  %v3293_v41 = vsub.f32 %v3259_v23, %v3276_v27  ;;  %v2974_v53 = vmul.f32 0.0025510204, %v2940_v34 }
 0x3c0   :  { %v3133_v32 = vmul.f32 %v10357_v56, %v3132_v33  ;;  %v3139_v11 = vmul.f32 %v10359_v58, %v12917_v5  ;;  %vm3145_vm12 = vweird.f32 %v10359_v58  ;;  %v3261_v5 = vld [vmem:[%s16040_s3 + $0x48] sm:$0xff] }
 0x3c1   :  { %10360 = vrsqrt.f32 %v12933_v24  ;;  %v2991_v3 = vmul.f32 %v12935_v52, %v12935_v52  ;;  %3493 = vperm.xlu1 %10339, %v3293_v41   ;;  %vm3146_vm14 = vmor %vm3144_vm13, %vm3145_vm12  ;;  %vm3154_vm0 = vweird.f32 %v12933_v24 }
 0x3c2   :  { %v3137_v39 = vsel %vm3136_vm11, %v10357_v56, %v3133_v32  ;;  %v3140_v55 = vmul.f32 %v10359_v58, %v3139_v11 }
 0x3c3   :  { %v3243_v38 = vmul.f32 %v3226_v43, %v3137_v39  ;;  %v3008_v35 = vsub.f32 %v2974_v53, %v2991_v3 }
 0x3c4   :  { %v3141_v54 = vmul.f32 0.5, %v3140_v55  ;;  %v2916_v19 = vpop.xlane.xlu2 %2915  ;;  %v2814_v26 = vpop.xlane.xlu1 %2813 }
 0x3c5   :  { %v3277_v48 = vmul.f32 %v3243_v38, %v12892_v61  ;;  %v3025_v28 = vmax.f32 %v3008_v35, 0.0  ;;  %v2941_v50 = vadd.f32 %v2916_v19, %v12696_v22  ;;  %v2839_v13 = vadd.f32 %v2814_v26, %v12704_v60  ;;  %3379 = vperm.xlu2 %10338, %v3243_v38   ;;  %v3227_v22 = vld [vmem:[%s16039_s2 + $0x48] sm:$0xff] }
 0x3c6   :  { %v3142_v15 = vsub.f32 1.5, %v3141_v54 }
 0x3c7   :  { %v10361_v56 = vpop.eup %10360  ;;  %v12950_v23 = vadd.f32 1e-05, %v3025_v28  ;;  %v12952_v27 = vmul.f32 0.0025510204, %v2839_v13  ;;  %v3294_v21 = vsub.f32 %v3260_v20, %v3277_v48  ;;  %v2975_v60 = vmul.f32 0.0025510204, %v2941_v50 }
 0x3c8   :  { %v3149_v34 = vmul.f32 %v10361_v56, %v12933_v24  ;;  %v3143_v63 = vmul.f32 %v10359_v58, %v3142_v15  ;;  %vm3155_vm15 = vweird.f32 %v10361_v56 }
 0x3c9   :  { %10362 = vrsqrt.f32 %v12950_v23  ;;  %v2992_v61 = vmul.f32 %v12952_v27, %v12952_v27  ;;  %3498 = vperm.xlu0 %10337, %v3294_v21   ;;  %vm3156_vm1 = vmor %vm3154_vm0, %vm3155_vm15  ;;  %vm3164_vm3 = vweird.f32 %v12950_v23 }
 0x3ca   :  { %v3150_v33 = vmul.f32 %v10361_v56, %v3149_v34  ;;  %v3147_v41 = vsel %vm3146_vm14, %v10359_v58, %v3143_v63 }
 0x3cb   :  { %v3009_v43 = vsub.f32 %v2975_v60, %v2992_v61  ;;  %v3244_v32 = vmul.f32 %v3227_v22, %v3147_v41  ;;  %v3262_v60 = vld [vmem:[%s16040_s3 + $0x50] sm:$0xff] }
 0x3cc   :  { %v3151_v11 = vmul.f32 0.5, %v3150_v33  ;;  %v2919_v53 = vpop.xlane.xlu0 %2918  ;;  %v2817_v3 = vpop.xlane.xlu2 %2816 }
 0x3cd   :  { %v3026_v39 = vmax.f32 %v3009_v43, 0.0  ;;  %v2942_v55 = vadd.f32 %v2919_v53, %v12769_v30  ;;  %v2840_v38 = vadd.f32 %v2817_v3, %v12715_v46  ;;  %3384 = vperm.xlu1 %10339, %v3244_v32   ;;  %v3278_v35 = vmul.f32 %v3244_v32, %v12904_v49  ;;  %v3228_v30 = vld [vmem:[%s16039_s2 + $0x50] sm:$0xff] }
 0x3ce   :  { %v3152_v54 = vsub.f32 1.5, %v3151_v11 }
 0x3cf   :  { %v10363_v58 = vpop.eup %10362  ;;  %v3043_v19 = vadd.f32 1e-05, %v3026_v39  ;;  %v12968_v26 = vmul.f32 0.0025510204, %v2840_v38  ;;  %v3295_v20 = vsub.f32 %v3261_v5, %v3278_v35  ;;  %v2976_v46 = vmul.f32 0.0025510204, %v2942_v55 }
 0x3d0   :  { %v3159_v48 = vmul.f32 %v10363_v58, %v12950_v23  ;;  %v3153_v28 = vmul.f32 %v10361_v56, %v3152_v54  ;;  %vm3165_vm2 = vweird.f32 %v10363_v58  ;;  %v3229_v5 = vld [vmem:[%s16039_s2 + $0x58] sm:$0xff] }
 0x3d1   :  { %10364 = vrsqrt.f32 %v3043_v19  ;;  %v2993_v49 = vmul.f32 %v12968_v26, %v12968_v26  ;;  %3503 = vperm.xlu2 %10338, %v3295_v20   ;;  %vm3166_vm4 = vmor %vm3164_vm3, %vm3165_vm2  ;;  %vm3174_vm6 = vweird.f32 %v3043_v19 }
 0x3d2   :  { %v3160_v50 = vmul.f32 %v10363_v58, %v3159_v48  ;;  %v2820_v13 = vpop.xlane.xlu1 %2819  ;;  %v3157_v15 = vsel %vm3156_vm1, %v10361_v56, %v3153_v28  ;;  %v3263_v28 = vld [vmem:[%s16040_s3 + $0x58] sm:$0xff] }
 0x3d3   :  { %v3010_v21 = vsub.f32 %v2976_v46, %v2993_v49  ;;  %v2841_v34 = vadd.f32 %v2820_v13, %v12735_v42  ;;  %v3245_v63 = vmul.f32 %v3228_v30, %v3157_v15  ;;  %v3230_v13 = vld [vmem:[%s16039_s2 + $0x60] sm:$0xff] }
 0x3d4   :  { %v3161_v22 = vmul.f32 0.5, %v3160_v50  ;;  %v2922_v24 = vpop.xlane.xlu0 %2921 }
 0x3d5   :  { %v3027_v61 = vmax.f32 %v3010_v21, 0.0  ;;  %v12981_v33 = vmul.f32 0.0025510204, %v2841_v34  ;;  %v2943_v41 = vadd.f32 %v2922_v24, %v12719_v57  ;;  %3389 = vperm.xlu0 %10337, %v3245_v63   ;;  %v3279_v43 = vmul.f32 %v3245_v63, %v12919_v29 }
 0x3d6   :  { %v3162_v32 = vsub.f32 1.5, %v3161_v22 }
 0x3d7   :  { %v10365_v56 = vpop.eup %10364  ;;  %v3044_v11 = vadd.f32 1e-05, %v3027_v61  ;;  %v2994_v42 = vmul.f32 %v12981_v33, %v12981_v33  ;;  %v2977_v53 = vmul.f32 0.0025510204, %v2943_v41  ;;  %v3296_v3 = vsub.f32 %v3262_v60, %v3279_v43 }
 0x3d8   :  { %v3163_v39 = vmul.f32 %v10363_v58, %v3162_v32  ;;  %v3169_v57 = vmul.f32 %v10365_v56, %v3043_v19  ;;  %vm3175_vm5 = vweird.f32 %v10365_v56 }
 0x3d9   :  { %10366 = vrsqrt.f32 %v3044_v11  ;;  %v3011_v29 = vsub.f32 %v2977_v53, %v2994_v42  ;;  %3508 = vperm.xlu1 %10339, %v3296_v3   ;;  %vm3176_vm7 = vmor %vm3174_vm6, %vm3175_vm5  ;;  %vm3184_vm9 = vweird.f32 %v3044_v11  ;;  %vm4154_vm5 = vcmask 64512  }
 0x3da   :  { %v3167_v55 = vsel %vm3166_vm4, %v10363_v58, %v3163_v39  ;;  %v3170_v38 = vmul.f32 %v10365_v56, %v3169_v57  ;;  %v2823_v35 = vpop.xlane.xlu1 %2822  ;;  %v3264_v57 = vld [vmem:[%s16040_s3 + $0x60] sm:$0xff]  ;;  %vm4308_vm4 = vcmask 1043456  }
 0x3db   :  { %v3246_v54 = vmul.f32 %v3229_v5, %v3167_v55  ;;  %v3028_v20 = vmax.f32 %v3011_v29, 0.0  ;;  %v2842_v23 = vadd.f32 %v2823_v35, %v12753_v25  ;;  %v3231_v5 = vld [vmem:[%s16039_s2 + $0x68] sm:$0xff] }
 0x3dc   :  { %v3171_v48 = vmul.f32 0.5, %v3170_v38 }
 0x3dd   :  { %v3280_v30 = vmul.f32 %v3246_v54, %v12935_v52  ;;  %v3045_v46 = vadd.f32 1e-05, %v3028_v20  ;;  %3394 = vperm.xlu2 %10338, %v3246_v54   ;;  %v12999_v34 = vmul.f32 0.0025510204, %v2842_v23 }
 0x3de   :  { %v3172_v49 = vsub.f32 1.5, %v3171_v48 }
 0x3df   :  { %v10367_v50 = vpop.eup %10366  ;;  %10368 = vrsqrt.f32 %v3045_v46  ;;  %v3297_v58 = vsub.f32 %v3263_v28, %v3280_v30  ;;  %v2995_v43 = vmul.f32 %v12999_v34, %v12999_v34  ;;  %vm3194_vm12 = vweird.f32 %v3045_v46 }
 0x3e0   :  { %v3173_v15 = vmul.f32 %v10365_v56, %v3172_v49  ;;  %v3179_v21 = vmul.f32 %v10367_v50, %v3044_v11  ;;  %vm3185_vm8 = vweird.f32 %v10367_v50 }
 0x3e1   :  { %3513 = vperm.xlu0 %10337, %v3297_v58   ;;  %vm3186_vm10 = vmor %vm3184_vm9, %vm3185_vm8 }
 0x3e2   :  { %v3177_v52 = vsel %vm3176_vm7, %v10365_v56, %v3173_v15  ;;  %v3180_v63 = vmul.f32 %v10367_v50, %v3179_v21  ;;  %v2826_v25 = vpop.xlane.xlu0 %2825  ;;  %v2925_v22 = vpop.xlane.xlu1 %2924 }
 0x3e3   :  { %v3247_v24 = vmul.f32 %v3230_v13, %v3177_v52  ;;  %v2944_v60 = vadd.f32 %v2925_v22, %v12743_v16  ;;  %v2843_v32 = vadd.f32 %v2826_v25, %v12766_v47  ;;  %v3232_v13 = vld [vmem:[%s16039_s2 + $0x70] sm:$0xff] }
 0x3e4   :  { %v3181_v61 = vmul.f32 0.5, %v3180_v63 }
 0x3e5   :  { %v10369_v41 = vpop.eup %10368  ;;  %v2978_v19 = vmul.f32 0.0025510204, %v2944_v60  ;;  %3399 = vperm.xlu2 %10338, %v3247_v24   ;;  %v3281_v56 = vmul.f32 %v3247_v24, %v12952_v27  ;;  %v13012_v47 = vmul.f32 0.0025510204, %v2843_v32  ;;  %v3266_v60 = vld [vmem:[%s16040_s3 + $0x70] sm:$0xff] }
 0x3e6   :  { %v3182_v42 = vsub.f32 1.5, %v3181_v61  ;;  %v3189_v53 = vmul.f32 %v10369_v41, %v3045_v46  ;;  %vm3195_vm11 = vweird.f32 %v10369_v41 }
 0x3e7   :  { %v3012_v3 = vsub.f32 %v2978_v19, %v2995_v43  ;;  %v3298_v48 = vsub.f32 %v3264_v57, %v3281_v56  ;;  %v2996_v11 = vmul.f32 %v13012_v47, %v13012_v47  ;;  %vm3196_vm13 = vmor %vm3194_vm12, %vm3195_vm11 }
 0x3e8   :  { %v3183_v16 = vmul.f32 %v10367_v50, %v3182_v42  ;;  %v3190_v39 = vmul.f32 %v10369_v41, %v3189_v53  ;;  %v3233_v42 = vld [vmem:[%s16039_s2 + $0x78] sm:$0xff] }
 0x3e9   :  { %v3029_v29 = vmax.f32 %v3012_v3, 0.0  ;;  %v3256_v3 = vld [vmem:[%s16040_s3 + $0x20] sm:$0xff] }
 0x3ea   :  { %v3187_v55 = vsel %vm3186_vm10, %v10367_v50, %v3183_v16  ;;  %v3191_v38 = vmul.f32 0.5, %v3190_v39  ;;  %v2928_v35 = vpop.xlane.xlu0 %2927  ;;  %v3290_v39 = vsub.f32 %v3256_v3, %v12890_v8 }
 0x3eb   :  { %v3248_v27 = vmul.f32 %v3231_v5, %v3187_v55  ;;  %v3046_v54 = vadd.f32 1e-05, %v3029_v29  ;;  %v2945_v20 = vadd.f32 %v2928_v35, %v12780_v59  ;;  %v3265_v59 = vld [vmem:[%s16040_s3 + $0x68] sm:$0xff]  ;;  %v3267_v5 = vld [vmem:[%s16040_s3 + $0x78] sm:$0xff] }
 0x3ec   :  { %v3192_v28 = vsub.f32 1.5, %v3191_v38  ;;  %v3257_v55 = vld [vmem:[%s16040_s3 + $0x28] sm:$0xff] }
 0x3ed   :  { %10370 = vrsqrt.f32 %v3046_v54  ;;  %v2979_v30 = vmul.f32 0.0025510204, %v2945_v20  ;;  %3404 = vperm.xlu1 %10339, %v3248_v27   ;;  %3518 = vperm.xlu2 %10338, %v3298_v48   ;;  %v3282_v49 = vmul.f32 %v3248_v27, %v12968_v26  ;;  %vm3204_vm15 = vweird.f32 %v3046_v54  ;;  %v3254_v27 = vld [vmem:[%s16040_s3 + $0x10] sm:$0xff]  ;;  %v3255_v20 = vld [vmem:[%s16040_s3 + $0x18] sm:$0xff] }
 0x3ee   :  { %v3193_v23 = vmul.f32 %v10369_v41, %v3192_v28  ;;  %v3291_v38 = vsub.f32 %v3257_v55, %v12900_v7  ;;  %v3288_v8 = vsub.f32 %v3254_v27, %v12861_v44  ;;  %v3234_v7 = vld [vmem:[%s16039_s2 + $0x80] sm:$0xff]  ;;  %v3289_v28 = vsub.f32 %v3255_v20, %v12878_v12  ;;  %v16215_v27 = vld [vmem:[#allocation12_spill] sm:$0xff] }
 0x3ef   :  { %v3013_v50 = vsub.f32 %v2979_v30, %v2996_v11  ;;  %v3299_v63 = vsub.f32 %v3265_v59, %v3282_v49  ;;  %v3268_v44 = vld [vmem:[%s16040_s3 + $0x80] sm:$0xff] }
 0x3f0   :  { %v3197_v58 = vsel %vm3196_vm13, %v10369_v41, %v3193_v23  ;;  %v3252_v11 = vld [vmem:[%s16040_s3] sm:$0xff] }
 0x3f1   :  { %v3030_v15 = vmax.f32 %v3013_v50, 0.0  ;;  %v3249_v25 = vmul.f32 %v3232_v13, %v3197_v58  ;;  %v3286_v12 = vsub.f32 %v3252_v11, %v12835_v37  ;;  %v16205_v50 = vld [vmem:[#allocation11_spill] sm:$0xff] }
 0x3f2   :  { %v16206_v58 = vld [vmem:[#allocation35_spill] sm:$0xff] }
 0x3f3   :  { %v10371_v21 = vpop.eup %10370  ;;  %v3047_v52 = vadd.f32 1e-05, %v3030_v15  ;;  %v3283_v46 = vmul.f32 %v3249_v25, %v12981_v33 }
 0x3f4   :  { %v3199_v22 = vmul.f32 %v10371_v21, %v3046_v54  ;;  %vm3205_vm14 = vweird.f32 %v10371_v21 }
 0x3f5   :  { %10372 = vrsqrt.f32 %v3047_v52  ;;  %3523 = vperm.xlu1 %10339, %v3299_v63   ;;  %3409 = vperm.xlu2 %10338, %v3249_v25   ;;  %v3300_v43 = vsub.f32 %v3266_v60, %v3283_v46  ;;  %vm3206_vm0 = vmor %vm3204_vm15, %vm3205_vm14  ;;  %vm3214_vm2 = vweird.f32 %v3047_v52  ;;  %v16229_v60 = vld [vmem:[#allocation42_spill] sm:$0xff] }
 0x3f6   :  { %v3200_v26 = vmul.f32 %v10371_v21, %v3199_v22 }
 0x3f8   :  { %v3201_v24 = vmul.f32 0.5, %v3200_v26 }
 0x3fa   :  { %v3202_v61 = vsub.f32 1.5, %v3201_v24 }
 0x3fb   :  { %v10373_v41 = vpop.eup %10372 }
 0x3fc   :  { %v3209_v32 = vmul.f32 %v10373_v41, %v3047_v52  ;;  %v3203_v19 = vmul.f32 %v10371_v21, %v3202_v61  ;;  %vm3215_vm1 = vweird.f32 %v10373_v41 }
 0x3fd   :  { %3528 = vperm.xlu1 %10339, %v3300_v43   ;;  %vm3216_vm3 = vmor %vm3214_vm2, %vm3215_vm1 }
 0x3fe   :  { %v3207_v53 = vsel %vm3206_vm0, %v10371_v21, %v3203_v19  ;;  %v3210_v56 = vmul.f32 %v10373_v41, %v3209_v32 }
 0x3ff   :  { %v3250_v33 = vmul.f32 %v3233_v42, %v3207_v53 }
 0x400   :  { %v3211_v29 = vmul.f32 0.5, %v3210_v56 }
 0x401   :  { %3414 = vperm.xlu0 %10337, %v3250_v33   ;;  %v3284_v16 = vmul.f32 %v3250_v33, %v12999_v34  ;;  %v16212_v33 = vld [vmem:[#allocation46_spill] sm:$0xff] }
 0x402   :  { %v3212_v35 = vsub.f32 1.5, %v3211_v29 }
 0x403   :  { %v3301_v57 = vsub.f32 %v3267_v5, %v3284_v16 }
 0x404   :  { %v3213_v54 = vmul.f32 %v10373_v41, %v3212_v35 }
 0x405   :  { %3478 = vperm.xlu1 %10339, %v3290_v39   ;;  %3533 = vperm.xlu2 %10338, %v3301_v57  }
 0x406   :  { %v3217_v34 = vsel %vm3216_vm3, %v10373_v41, %v3213_v54 }
 0x407   :  { %v3251_v48 = vmul.f32 %v3234_v7, %v3217_v34  ;;  %v13069_v30 = vpop.permute.xlu2 %3364 }
 0x409   :  { %3483 = vperm.xlu0 %10337, %v3291_v38   ;;  %v16214_v38 = vld [vmem:[#allocation28_spill] sm:$0xff] }
 0x40d   :  { %3354 = vperm.xlu1 %10339, %v12872_v9   ;;  %3349 = vperm.xlu2 %10338, %v12853_v0   ;;  %v3285_v0 = vmul.f32 %v3251_v48, %v13012_v47  ;;  %v3253_v47 = vld [vmem:[%s16040_s3 + $0x8] sm:$0xff] }
 0x40e   :  { %v3287_v23 = vsub.f32 %v3253_v47, %v12857_v18 }
 0x40f   :  { %v3302_v9 = vsub.f32 %v3268_v44, %v3285_v0  ;;  %v16231_v44 = vld [vmem:[#allocation16_spill] sm:$0xff] }
 0x411   :  { %3468 = vperm.xlu0 %10337, %v3288_v8   ;;  %v16216_v8 = vld [vmem:[#allocation27_spill] sm:$0xff] }
 0x413   :  { %v3489_v15 = vpop.permute.xlu2 %3488 }
 0x415   :  { %3419 = vperm.xlu1 %10339, %v3251_v48   ;;  %3473 = vperm.xlu2 %10338, %v3289_v28  }
 0x419   :  { %3339 = vperm.xlu0 %10337, %v12829_v2   ;;  %v13072_v2 = vpop.permute.xlu0 %3359 }
 0x41d   :  { %3538 = vperm.xlu1 %10339, %v3302_v9   ;;  %3344 = vperm.xlu2 %10338, %v12849_v45  }
 0x421   :  { %3458 = vperm.xlu0 %10337, %v3286_v12  }
 0x425   :  { %3463 = vperm.xlu2 %10338, %v3287_v23  }
 0x427   :  { %v3370_v49 = vpop.permute.xlu1 %3369 }
 0x428   :  { %v3434_v59 = vmul.f32 %v3370_v49, %v16205_v50  ;;  %v3435_v13 = vmul.f32 %v3370_v49, %v16206_v58  ;;  %v5621_v45 = vmul.f32 %v3370_v49, %v12470_v1  ;;  %v5622_v37 = vmul.f32 %v3370_v49, %v12635_v14  ;;  %v13092_v1 = vpop.permute.xlu2 %3379 }
 0x42a   :  { %v13078_v21 = vadd.f32 %v3489_v15, %v3434_v59  ;;  %v13080_v52 = vadd.f32 %v3489_v15, %v3435_v13  ;;  %v13082_v63 = vadd.f32 %v5621_v45, %v3489_v15  ;;  %v13084_v18 = vadd.f32 %v5622_v37, %v3489_v15  ;;  %v16217_v13 = vld [vmem:[#allocation25_spill] sm:$0xff]  ;;  %v16218_v37 = vld [vmem:[#allocation50_spill] sm:$0xff] }
 0x42c   :  { %16207 = vst [vmem:[#allocation11_spill] sm:$0xff] %v13082_v63  ;;  %v16233_v63 = vld [vmem:[#allocation17_spill] sm:$0xff] }
 0x42d   :  { %16208 = vst [vmem:[#allocation35_spill] sm:$0xff] %v13084_v18 }
 0x42f   :  { %v13086_v25 = vpop.permute.xlu0 %3374 }
 0x430   :  { %v5623_v22 = vmul.f32 %v13086_v25, %v12475_v62  ;;  %v5624_v26 = vmul.f32 %v13086_v25, %v12650_v17  ;;  %v5625_v62 = vmul.f32 %v13092_v1, %v12485_v4  ;;  %v5626_v17 = vmul.f32 %v13092_v1, %v12665_v51  ;;  %v13110_v41 = vpop.permute.xlu2 %3503 }
 0x433   :  { %v13094_v14 = vpop.permute.xlu1 %3493 }
 0x434   :  { %v13097_v46 = vadd.f32 %v5623_v22, %v13094_v14  ;;  %v13100_v24 = vadd.f32 %v5624_v26, %v13094_v14  ;;  %v16219_v22 = vld [vmem:[#allocation55_spill] sm:$0xff] }
 0x435   :  { %v5619_v26 = vmul.f32 %v13069_v30, %v16219_v22 }
 0x436   :  { %16209 = vst [vmem:[#allocation60_spill] sm:$0xff] %v13097_v46  ;;  %v16234_v46 = vld [vmem:[#allocation39_spill] sm:$0xff] }
 0x437   :  { %16210 = vst [vmem:[#allocation61_spill] sm:$0xff] %v13100_v24  ;;  %v16232_v24 = vld [vmem:[#allocation38_spill] sm:$0xff] }
 0x438   :  { %v3395_v3 = vpop.permute.xlu2 %3394 }
 0x439   :  { %v5632_v35 = vmul.f32 %v3395_v3, %v16214_v38 }
 0x43b   :  { %v13112_v43 = vpop.permute.xlu0 %3498 }
 0x43c   :  { %v13115_v32 = vadd.f32 %v5625_v62, %v13112_v43  ;;  %v13118_v19 = vadd.f32 %v5626_v17, %v13112_v43  ;;  %v16220_v62 = vld [vmem:[#allocation23_spill] sm:$0xff] }
 0x43e   :  { %16211 = vst [vmem:[#allocation62_spill] sm:$0xff] %v13118_v19 }
 0x43f   :  { %v3385_v42 = vpop.permute.xlu1 %3384 }
 0x440   :  { %v5627_v53 = vmul.f32 %v3385_v42, %v12490_v36  ;;  %v5628_v56 = vmul.f32 %v3385_v42, %v16212_v33  ;;  %v13132_v57 = vpop.permute.xlu2 %3399  ;;  %v16213_v36 = vld [vmem:[#allocation15_spill] sm:$0xff]  ;;  %v3440_v18 = vmul.f32 %v3385_v42, %v16231_v44 }
 0x441   :  { %v5631_v55 = vmul.f32 %v3395_v3, %v16213_v36 }
 0x442   :  { %v13123_v4 = vadd.f32 %v5627_v53, %v13110_v41  ;;  %v13126_v51 = vadd.f32 %v5628_v56, %v13110_v41  ;;  %v16221_v53 = vld [vmem:[#allocation48_spill] sm:$0xff]  ;;  %v16222_v56 = vld [vmem:[#allocation45_spill] sm:$0xff] }
 0x443   :  { %v5620_v36 = vmul.f32 %v13069_v30, %v16222_v56 }
 0x447   :  { %v3390_v39 = vpop.permute.xlu0 %3389 }
 0x448   :  { %v5629_v54 = vmul.f32 %v3390_v39, %v16215_v27  ;;  %v5630_v34 = vmul.f32 %v3390_v39, %v16216_v8  ;;  %v13154_v11 = vpop.permute.xlu2 %3518  ;;  %v3443_v19 = vmul.f32 %v3390_v39, %v16234_v46 }
 0x44b   :  { %v13134_v29 = vpop.permute.xlu1 %3508 }
 0x44c   :  { %v13141_v20 = vadd.f32 %v5629_v54, %v13134_v29  ;;  %v13144_v48 = vadd.f32 %v5630_v34, %v13134_v29  ;;  %v16224_v54 = vld [vmem:[#allocation22_spill] sm:$0xff]  ;;  %v16225_v34 = vld [vmem:[#allocation43_spill] sm:$0xff] }
 0x450   :  { %v13158_v47 = vpop.permute.xlu2 %3409 }
 0x451   :  { %v3450_v17 = vmul.f32 %v13158_v47, %v16220_v62  ;;  %v3451_v33 = vmul.f32 %v13158_v47, %v16221_v53  ;;  %v16226_v53 = vld [vmem:[#allocation44_spill] sm:$0xff] }
 0x452   :  { %v5618_v56 = vmul.f32 %v13072_v2, %v16226_v53  ;;  %v3441_v53 = vmul.f32 %v3385_v42, %v16232_v24 }
 0x453   :  { %v3514_v7 = vpop.permute.xlu0 %3513 }
 0x454   :  { %v13146_v28 = vadd.f32 %v5631_v55, %v3514_v7  ;;  %v13148_v0 = vadd.f32 %v5632_v35, %v3514_v7  ;;  %v16223_v55 = vld [vmem:[#allocation9_spill] sm:$0xff] }
 0x455   :  { %v5617_v38 = vmul.f32 %v13072_v2, %v16223_v55  ;;  %v16227_v55 = vld [vmem:[#allocation19_spill] sm:$0xff] }
 0x456   :  { %v3444_v61 = vmul.f32 %v3395_v3, %v16227_v55  ;;  %v3442_v55 = vmul.f32 %v3390_v39, %v16233_v63 }
 0x458   :  { %v3563_v63 = vadd.f32 %v3514_v7, %v3444_v61  ;;  %v16235_v61 = vld [vmem:[#allocation14_spill] sm:$0xff] }
 0x45f   :  { %v13156_v12 = vpop.permute.xlu1 %3404  ;;  %v13162_v49 = vpop.permute.xlu2 %3533 }
 0x460   :  { %v3448_v8 = vmul.f32 %v13156_v12, %v16224_v54  ;;  %v3447_v54 = vmul.f32 %v13132_v57, %v16229_v60 }
 0x462   :  { %v3566_v60 = vadd.f32 %v13154_v11, %v3447_v54 }
 0x467   :  { %v13160_v23 = vpop.permute.xlu1 %3523  ;;  %v13166_v59 = vpop.permute.xlu2 %3349 }
 0x468   :  { %v3567_v16 = vadd.f32 %v13160_v23, %v3448_v8 }
 0x46f   :  { %v13164_v50 = vpop.permute.xlu1 %3528  ;;  %v13220_v46 = vpop.permute.xlu2 %3473 }
 0x470   :  { %v3570_v22 = vadd.f32 %v13164_v50, %v3451_v33  ;;  %v16230_v33 = vld [vmem:[#allocation40_spill] sm:$0xff] }
 0x471   :  { %v3445_v9 = vmul.f32 %v3395_v3, %v16230_v33 }
 0x473   :  { %v13168_v58 = vpop.permute.xlu0 %3414  ;;  %v3564_v42 = vadd.f32 %v3514_v7, %v3445_v9  ;;  %v3438_v7 = vmul.f32 %v13092_v1, %v16235_v61  ;;  %v16236_v9 = vld [vmem:[#allocation37_spill] sm:$0xff] }
 0x474   :  { %v3452_v45 = vmul.f32 %v13168_v58, %v16217_v13  ;;  %v3453_v15 = vmul.f32 %v13168_v58, %v16218_v37  ;;  %v3449_v13 = vmul.f32 %v13156_v12, %v16225_v34  ;;  %v3569_v37 = vadd.f32 %v13164_v50, %v3450_v17 }
 0x476   :  { %v3571_v35 = vadd.f32 %v13162_v49, %v3452_v45  ;;  %v3572_v27 = vadd.f32 %v13162_v49, %v3453_v15  ;;  %v16228_v45 = vld [vmem:[#allocation20_spill] sm:$0xff]  ;;  %v3568_v34 = vadd.f32 %v13160_v23, %v3449_v13  ;;  %v3561_v13 = vadd.f32 %v13134_v29, %v3442_v55 }
 0x477   :  { %v13192_v62 = vpop.permute.xlu1 %3478  ;;  %v3446_v15 = vmul.f32 %v13132_v57, %v16228_v45  ;;  %v3557_v55 = vadd.f32 %v13112_v43, %v3438_v7 }
 0x478   :  { %v3589_v17 = vpack.c.bf16 %v3571_v35, %v3569_v37  ;;  %v3590_v5 = vpack.c.bf16 %v3572_v27, %v3570_v22  ;;  %v13211_v35 = vadd.f32 %v5617_v38, %v13192_v62  ;;  %v13214_v3 = vadd.f32 %v5618_v56, %v13192_v62  ;;  %v16238_v56 = vld [vmem:[#allocation36_spill] sm:$0xff] }
 0x479   :  { %v3565_v45 = vadd.f32 %v13154_v11, %v3446_v15  ;;  %v3588_v27 = vpack.c.bf16 %v3568_v34, %v3566_v60  ;;  %v3562_v37 = vadd.f32 %v13134_v29, %v3443_v19  ;;  %v3437_v15 = vmul.f32 %v13086_v25, %v16238_v56 }
 0x47a   :  { %4315 = vmatpush.bf16.msrb.mxu0 %v3589_v17  ;;  %4843 = vmatpush.bf16.msrb.mxu2 %v3590_v5  ;;  %v3585_v54 = vpack.c.bf16 %v3563_v63, %v3561_v13  ;;  %v3559_v19 = vadd.f32 %v13110_v41, %v3440_v18  ;;  %v3560_v29 = vadd.f32 %v13110_v41, %v3441_v53  ;;  %v16239_v63 = vld [vmem:[#allocation10_spill] sm:$0xff]  ;;  %v16241_v53 = vld [vmem:[#allocation8_spill] sm:$0xff]  ;;  %v13258_v13 = vpop.permute.xlu2 %3344 }
 0x47b   :  { %v3484_v8 = vpop.permute.xlu0 %3483  ;;  %v3587_v39 = vpack.c.bf16 %v3567_v16, %v3565_v45  ;;  %v3439_v16 = vmul.f32 %v13092_v1, %v16236_v9  ;;  %v3586_v34 = vpack.c.bf16 %v3564_v42, %v3562_v37  ;;  %v3556_v33 = vadd.f32 %v13094_v14, %v3437_v15  ;;  %v16240_v18 = vld [vmem:[#allocation34_spill] sm:$0xff]  ;;  %v16243_v9 = vld [vmem:[#allocation47_spill] sm:$0xff]  ;;  %v16246_v15 = vld [vmem:[#allocation5_spill] sm:$0xff] }
 0x47c   :  { %v13216_v44 = vadd.f32 %v5619_v26, %v3484_v8  ;;  %v13218_v24 = vadd.f32 %v5620_v36, %v3484_v8  ;;  %v16237_v36 = vld [vmem:[#allocation13_spill] sm:$0xff]  ;;  %v3583_v60 = vpack.c.bf16 %v3559_v19, %v3557_v55  ;;  %v3432_v42 = vmul.f32 %v13069_v30, %v16239_v63 }
 0x47d   :  { %v3436_v22 = vmul.f32 %v13086_v25, %v16237_v36  ;;  %v3558_v1 = vadd.f32 %v13112_v43, %v3439_v16  ;;  %v3433_v41 = vmul.f32 %v13069_v30, %v16240_v18  ;;  %v13256_v43 = vmul.f32 %v13132_v57, %v12515_v40  ;;  %v16244_v16 = vld [vmem:[#allocation56_spill] sm:$0xff] }
 0x47e   :  { %v5681_v5 = vpack.c.bf16 %v13216_v44, %v13211_v35  ;;  %v5682_v38 = vpack.c.bf16 %v13218_v24, %v13214_v3  ;;  %4316 = vmatpush.bf16.msrb.mxu0 %v3587_v39  ;;  %4844 = vmatpush.bf16.msrb.mxu2 %v3588_v27  ;;  %v3430_v39 = vmul.f32 %v13072_v2, %v16241_v53  ;;  %v16252_v53 = vld [vmem:[#allocation26_spill] sm:$0xff] }
 0x47f   :  { %v13228_v26 = vpop.permute.xlu1 %3354  ;;  %v3555_v17 = vadd.f32 %v13094_v14, %v3436_v22  ;;  %v3584_v25 = vpack.c.bf16 %v3560_v29, %v3558_v1  ;;  %v16242_v14 = vld [vmem:[#allocation33_spill] sm:$0xff]  ;;  %v3582_v7 = vpack.c.bf16 %v3556_v33, %v13080_v52  ;;  %v13264_v30 = vmul.f32 %v13132_v57, %v12723_v10  ;;  %v16248_v29 = vld [vmem:[#allocation7_spill] sm:$0xff]  ;;  %v16250_v1 = vld [vmem:[#allocation58_spill] sm:$0xff] }
 0x480   :  { %v3431_v27 = vmul.f32 %v13072_v2, %v16242_v14  ;;  %v5637_v2 = vmul.f32 %v13158_v47, %v12533_v31  ;;  %v5635_v40 = vmul.f32 %v13156_v12, %v16243_v9  ;;  %v5636_v36 = vmul.f32 %v13156_v12, %v16244_v16  ;;  %v16245_v22 = vld [vmem:[#allocation57_spill] sm:$0xff]  ;;  %v16253_v14 = vld [vmem:[#allocation51_spill] sm:$0xff]  ;;  %v16256_v9 = vld [vmem:[#allocation30_spill] sm:$0xff] }
 0x481   :  { %v3581_v61 = vpack.c.bf16 %v3555_v17, %v13078_v21  ;;  %v5638_v56 = vmul.f32 %v13158_v47, %v16245_v22  ;;  %v3426_v21 = vmul.f32 %v13166_v59, %v16246_v15  ;;  %v3551_v52 = vadd.f32 %v3484_v8, %v3432_v42  ;;  %v16249_v17 = vld [vmem:[#allocation32_spill] sm:$0xff] }
 0x482   :  { %4317 = vmatpush.bf16.msrb.mxu0 %v3585_v54  ;;  %4845 = vmatpush.bf16.msrb.mxu2 %v3586_v34  ;;  %v3552_v54 = vadd.f32 %v3484_v8, %v3433_v41  ;;  %v16247_v34 = vld [vmem:[#allocation31_spill] sm:$0xff]  ;;  %v13279_v57 = vadd.f32 %v5635_v40, %v13160_v23  ;;  %v13282_v31 = vadd.f32 %v5636_v36, %v13160_v23 }
 0x483   :  { %v13244_v45 = vpop.permute.xlu0 %3468  ;;  %v3427_v10 = vmul.f32 %v13166_v59, %v16247_v34  ;;  %v3549_v19 = vadd.f32 %v13192_v62, %v3430_v39  ;;  %v3550_v12 = vadd.f32 %v13192_v62, %v3431_v27  ;;  %v3428_v47 = vmul.f32 %v13228_v26, %v16248_v29  ;;  %v16251_v62 = vld [vmem:[#allocation4_spill] sm:$0xff] }
 0x484   :  { %v3429_v33 = vmul.f32 %v13228_v26, %v16249_v17  ;;  %v13293_v55 = vadd.f32 %v5637_v2, %v13164_v50  ;;  %v5639_v23 = vmul.f32 %v13168_v58, %v12772_v6  ;;  %v3545_v63 = vadd.f32 %v13244_v45, %v3426_v21  ;;  %v16255_v2 = vld [vmem:[#allocation59_spill] sm:$0xff] }
 0x485   :  { %v3546_v42 = vadd.f32 %v13244_v45, %v3427_v10  ;;  %v3579_v18 = vpack.c.bf16 %v3551_v52, %v3549_v19  ;;  %v3580_v41 = vpack.c.bf16 %v3552_v54, %v3550_v12  ;;  %v3547_v16 = vadd.f32 %v13220_v46, %v3428_v47  ;;  %v13311_v54 = vpop.permute.xlu2 %3463  ;;  %v16258_v12 = vld [vmem:[#allocation29_spill] sm:$0xff] }
 0x486   :  { %4318 = vmatpush.bf16.msrb.mxu0 %v3583_v60  ;;  %4846 = vmatpush.bf16.msrb.mxu2 %v3584_v25  ;;  %v5640_v60 = vmul.f32 %v13168_v58, %v16250_v1  ;;  %v3424_v25 = vmul.f32 %v13258_v13, %v16251_v62  ;;  %v3425_v58 = vmul.f32 %v13258_v13, %v16256_v9 }
 0x487   :  { %v3420_v37 = vpop.permute.xlu1 %3419  ;;  %v3548_v36 = vadd.f32 %v13220_v46, %v3429_v33  ;;  %v3577_v34 = vpack.c.bf16 %v3547_v16, %v3545_v63  ;;  %v5672_v33 = vadd.f32 %v5638_v56, %v13164_v50  ;;  %v5667_v16 = vadd.f32 %v13256_v43, %v13154_v11 }
 0x488   :  { %v3454_v39 = vmul.f32 %v3420_v37, %v16252_v53  ;;  %v3455_v27 = vmul.f32 %v3420_v37, %v16253_v14  ;;  %v5642_v6 = vmul.f32 %v3420_v37, %v16255_v2  ;;  %v8688_v53 = vld [vmem:[%s16041_s4 + $0x8] sm:$0xf0]  ;;  %v3544_v50 = vadd.f32 %v13311_v54, %v3425_v58 }
 0x489   :  { %v3578_v10 = vpack.c.bf16 %v3548_v36, %v3546_v42  ;;  %v10132_v42 = vld [vmem:[%s16041_s4 + $0x4] sm:$0xf]  ;;  %v5668_v36 = vadd.f32 %v13264_v30, %v13154_v11  ;;  %v16259_v43 = vpack.c.bf16 %v13146_v28, %v13141_v20  ;;  %v16260_v11 = vpack.c.bf16 %v13148_v0, %v13144_v48  ;;  %v10134_v30 = vld [vmem:[%s16041_s4 + $0x14] sm:$0xf]  ;;  %v10135_v20 = vld [vmem:[%s16041_s4 + $0x14] sm:$0xf0] }
 0x48a   :  { %4319 = vmatpush.bf16.msrb.mxu0 %v3581_v61  ;;  %4847 = vmatpush.bf16.msrb.mxu2 %v3582_v7  ;;  %v16254_v61 = vld [vmem:[#allocation18_spill] sm:$0xff]  ;;  %v16261_v48 = vpack.c.bf16 %v13123_v4, %v13115_v32  ;;  %v16268_v32 = vld [vmem:[#allocation60_spill] sm:$0xff]  ;;  %v16269_v4 = vld [vmem:[#allocation11_spill] sm:$0xff] }
 0x48b   :  { %v13290_v8 = vpop.permute.xlu0 %3339  ;;  %v5641_v7 = vmul.f32 %v3420_v37, %v16254_v61  ;;  %v16257_v37 = vld [vmem:[#allocation3_spill] sm:$0xff]  ;;  %v16262_v28 = vld [vmem:[#allocation62_spill] sm:$0xff] }
 0x48c   :  { %v3422_v19 = vmul.f32 %v13290_v8, %v16257_v37  ;;  %v3423_v29 = vmul.f32 %v13290_v8, %v16258_v12  ;;  %v16263_v0 = vpack.c.bf16 %v13126_v51, %v16262_v28  ;;  %v16271_v51 = vld [vmem:[#allocation61_spill] sm:$0xff]  ;;  %v8734_v28 = vld [vmem:[%s16041_s4 + $0x60] sm:$0xf] }
 0x48e   :  { %4320 = vmatpush.bf16.msrb.mxu0 %v3579_v18  ;;  %4848 = vmatpush.bf16.msrb.mxu2 %v3580_v41  ;;  %v5673_v18 = vadd.f32 %v5639_v23, %v13162_v49  ;;  %v5674_v41 = vadd.f32 %v5640_v60, %v13162_v49  ;;  %v8686_v23 = vld [vmem:[%s16041_s4] sm:$0xf]  ;;  %v10133_v60 = vld [vmem:[%s16041_s4 + $0x4] sm:$0xf0] }
 0x48f   :  { %v3539_v40 = vpop.permute.xlu1 %3538 }
 0x490   :  { %v3573_v22 = vadd.f32 %v3539_v40, %v3454_v39  ;;  %v3574_v15 = vadd.f32 %v3539_v40, %v3455_v27  ;;  %v5675_v21 = vadd.f32 %v5641_v7, %v3539_v40  ;;  %v5676_v52 = vadd.f32 %v5642_v6, %v3539_v40 }
 0x491   :  { %v3543_v39 = vadd.f32 %v13311_v54, %v3424_v25  ;;  %v8691_v6 = vor.u32 %v10132_v42, %v8688_v53  ;;  %v5691_v9 = vpack.c.bf16 %v5673_v18, %v13293_v55  ;;  %v5692_v58 = vpack.c.bf16 %v5674_v41, %v5672_v33  ;;  %v16275_v42 = vld [vmem:[#allocation21_spill] sm:$0xff] }
 0x492   :  { %v3591_v17 = vpack.c.bf16 %v3573_v22, %v3573_v22  ;;  %v3592_v1 = vpack.c.bf16 %v3574_v15, %v3574_v15  ;;  %v5693_v47 = vpack.c.bf16 %v5675_v21, %v5675_v21  ;;  %v5694_v62 = vpack.c.bf16 %v5676_v52, %v5676_v52  ;;  %4321 = vmatpush.bf16.msrb.mxu0 %v3577_v34  ;;  %v16264_v52 = vld [vmem:[#allocation54_spill] sm:$0xff] }
 0x493   :  { %4849 = vmatpush.bf16.msrb.mxu2 %v3578_v10  ;;  %v13320_v63 = vpop.permute.xlu0 %3458  ;;  %v8687_v40 = vor.u32 %v10133_v60, %v8686_v23  ;;  %v5689_v22 = vpack.c.bf16 %v13279_v57, %v5667_v16  ;;  %v5690_v55 = vpack.c.bf16 %v13282_v31, %v5668_v36  ;;  %v8696_v57 = vld [vmem:[%s16041_s4 + $0x18] sm:$0xf0]  ;;  %v8694_v31 = vld [vmem:[%s16041_s4 + $0x10] sm:$0xf]  ;;  %v5615_v34 = vmul.f32 %v13228_v26, %v16264_v52  ;;  %v10141_v16 = vld [vmem:[%s16041_s4 + $0x44] sm:$0xf0] }
 0x494   :  { %v3541_v56 = vadd.f32 %v13320_v63, %v3422_v19  ;;  %v3542_v49 = vadd.f32 %v13320_v63, %v3423_v29  ;;  %v4310_v14 = vsel %vm4308_vm4, %v3591_v17, 0  ;;  %v4313_v27 = vsel %vm4308_vm4, %v3592_v1, 0  ;;  %v16265_v10 = vld [vmem:[#allocation6_spill] sm:$0xff]  ;;  %v16266_v19 = vld [vmem:[#allocation49_spill] sm:$0xff]  ;;  %v16267_v29 = vld [vmem:[#allocation24_spill] sm:$0xff] }
 0x495   :  { %v6410_v25 = vsel %vm4308_vm4, %v5693_v47, 0  ;;  %v6413_v61 = vsel %vm4308_vm4, %v5694_v62, 0  ;;  %4586 = vmatpush.bf16.msrb.mxu1 %v4310_v14  ;;  %5114 = vmatpush.bf16.msrb.mxu3 %v4313_v27  ;;  %v8699_v15 = vor.u32 %v10134_v30, %v8696_v57  ;;  %v8695_v21 = vor.u32 %v10135_v20, %v8694_v31  ;;  %v16272_v47 = vld [vmem:[#allocation35_spill] sm:$0xff]  ;;  %v10138_v27 = vld [vmem:[%s16041_s4 + $0x34] sm:$0xf] }
 0x496   :  { %v3575_v7 = vpack.c.bf16 %v3543_v39, %v3541_v56  ;;  %v3576_v2 = vpack.c.bf16 %v3544_v50, %v3542_v49  ;;  %v5613_v37 = vmul.f32 %v13166_v59, %v16265_v10  ;;  %v5614_v12 = vmul.f32 %v13166_v59, %v16266_v19  ;;  %v16276_v39 = vld [vmem:[#allocation53_spill] sm:$0xff]  ;;  %v10143_v30 = vld [vmem:[%s16041_s4 + $0x54] sm:$0xf0]  ;;  %v10144_v20 = vld [vmem:[%s16041_s4 + $0x64] sm:$0xf] }
 0x497   :  { %v5616_v17 = vmul.f32 %v13228_v26, %v16267_v29  ;;  %v16270_v1 = vpack.c.bf16 %v16268_v32, %v16269_v4  ;;  %v16273_v62 = vpack.c.bf16 %v16271_v51, %v16272_v47  ;;  %v5649_v59 = vadd.f32 %v5615_v34, %v13220_v46  ;;  %v16274_v26 = vld [vmem:[#allocation52_spill] sm:$0xff]  ;;  %v16277_v56 = vld [vmem:[#allocation41_spill] sm:$0xff]  ;;  %v8744_v34 = vld [vmem:[%s16041_s4 + $0x78] sm:$0xf0] }
 0x498   :  { %4322 = vmatpush.bf16.msrb.mxu0 %v3575_v7  ;;  %4850 = vmatpush.bf16.msrb.mxu2 %v3576_v2  ;;  %v5647_v33 = vadd.f32 %v5613_v37, %v13244_v45  ;;  %v5648_v18 = vadd.f32 %v5614_v12, %v13244_v45  ;;  %v5609_v41 = vmul.f32 %v13290_v8, %v16274_v26  ;;  %v10139_v7 = vld [vmem:[%s16041_s4 + $0x34] sm:$0xf0]  ;;  %v10146_v52 = vld [vmem:[%s16041_s4 + $0x74] sm:$0xf]  ;;  %v8742_v10 = vld [vmem:[%s16041_s4 + $0x70] sm:$0xf] }
 0x499   :  { %6686 = vmatpush.bf16.msra.mxu1 %v6410_v25  ;;  %7214 = vmatpush.bf16.msra.mxu3 %v6413_v61  ;;  %v5610_v53 = vmul.f32 %v13290_v8, %v16275_v42  ;;  %v5650_v45 = vadd.f32 %v5616_v17, %v13220_v46  ;;  %v5611_v50 = vmul.f32 %v13258_v13, %v16276_v39  ;;  %v10136_v46 = vld [vmem:[%s16041_s4 + $0x24] sm:$0xf]  ;;  %v8712_v25 = vld [vmem:[%s16041_s4 + $0x38] sm:$0xf0]  ;;  %v8710_v61 = vld [vmem:[%s16041_s4 + $0x30] sm:$0xf] }
 0x49a   :  { %9143 = vmatmul.msk.bf16.vlgmr.msrb.gmra.mxu3 %vm4154_vm5, %v8691_v6  ;;  %9092 = vmatmul.msk.bf16.vlgmr.msrb.gmra.mxu1 %vm4154_vm5, %v8691_v6  ;;  %v5612_v49 = vmul.f32 %v13258_v13, %v16277_v56  ;;  %v5643_v23 = vadd.f32 %v5609_v41, %v13320_v63  ;;  %v5679_v60 = vpack.c.bf16 %v5649_v59, %v5647_v33  ;;  %v10137_v13 = vld [vmem:[%s16041_s4 + $0x24] sm:$0xf0]  ;;  %v10147_v37 = vld [vmem:[%s16041_s4 + $0x74] sm:$0xf0]  ;;  %v10148_v29 = vld [vmem:[%s16041_s4 + $0x84] sm:$0xf] }
 0x49b   :  { %4851 = vmatmul.bf16.vlgmr.msrb.gmra.mxu2 %v8687_v40  ;;  %4323 = vmatmul.bf16.vlgmr.msrb.gmra.mxu0 %v8687_v40  ;;  %v5644_v8 = vadd.f32 %v5610_v53, %v13320_v63  ;;  %v5680_v14 = vpack.c.bf16 %v5650_v45, %v5648_v18  ;;  %v5645_v35 = vadd.f32 %v5611_v50, %v13311_v54  ;;  %v8718_v40 = vld [vmem:[%s16041_s4 + $0x40] sm:$0xf]  ;;  %v8752_v17 = vld [vmem:[%s16041_s4 + $0x88] sm:$0xf0]  ;;  %v10149_v4 = vld [vmem:[%s16041_s4 + $0x84] sm:$0xf0] }
 0x49c   :  { %6415 = vmatpush.bf16.msra.mxu0 %v5691_v9  ;;  %6943 = vmatpush.bf16.msra.mxu2 %v5692_v58  ;;  %v5646_v44 = vadd.f32 %v5612_v49, %v13311_v54  ;;  %v8715_v2 = vor.u32 %v10138_v27, %v8712_v25  ;;  %v8711_v6 = vor.u32 %v10139_v7, %v8710_v61  ;;  %v10140_v9 = vld [vmem:[%s16041_s4 + $0x44] sm:$0xf]  ;;  %v8720_v58 = vld [vmem:[%s16041_s4 + $0x48] sm:$0xf0]  ;;  %v8750_v32 = vld [vmem:[%s16041_s4 + $0x80] sm:$0xf] }
 0x49d   :  { %v5677_v3 = vpack.c.bf16 %v5645_v35, %v5643_v23  ;;  %v8723_v36 = vor.u32 %v10140_v9, %v8720_v58  ;;  %v8747_v19 = vor.u32 %v10146_v52, %v8744_v34  ;;  %v8743_v12 = vor.u32 %v10147_v37, %v8742_v10  ;;  %v10150_v45 = vld [vmem:[%s16041_s4 + $0x94] sm:$0xf]  ;;  %v8760_v39 = vld [vmem:[%s16041_s4 + $0x98] sm:$0xf0]  ;;  %v8758_v50 = vld [vmem:[%s16041_s4 + $0x90] sm:$0xf] }
 0x49e   :  { %v5678_v24 = vpack.c.bf16 %v5646_v44, %v5644_v8  ;;  %v8751_v51 = vor.u32 %v10149_v4, %v8750_v32  ;;  %v10151_v56 = vld [vmem:[%s16041_s4 + $0x94] sm:$0xf0]  ;;  %v8763_v8 = vor.u32 %v10150_v45, %v8760_v39  ;;  %v8768_v27 = vld [vmem:[%s16041_s4 + $0xa8] sm:$0xf0]  ;;  %v8766_v25 = vld [vmem:[%s16041_s4 + $0xa0] sm:$0xf] }
 0x49f   :  { %v10153_v61 = vld [vmem:[%s16041_s4 + $0xa4] sm:$0xf0] }
 0x4a0   :  { %6416 = vmatpush.bf16.msra.mxu0 %v5689_v22  ;;  %6944 = vmatpush.bf16.msra.mxu2 %v5690_v55  ;;  %v8719_v22 = vor.u32 %v10141_v16, %v8718_v40  ;;  %v10142_v55 = vld [vmem:[%s16041_s4 + $0x54] sm:$0xf]  ;;  %v8767_v58 = vor.u32 %v10153_v61, %v8766_v25 }
 0x4a4   :  { %6417 = vmatpush.bf16.msra.mxu0 %v16259_v43  ;;  %6945 = vmatpush.bf16.msra.mxu2 %v16260_v11  ;;  %v8728_v43 = vld [vmem:[%s16041_s4 + $0x58] sm:$0xf0]  ;;  %v8726_v11 = vld [vmem:[%s16041_s4 + $0x50] sm:$0xf] }
 0x4a5   :  { %v8731_v57 = vor.u32 %v10142_v55, %v8728_v43  ;;  %v8727_v31 = vor.u32 %v10143_v30, %v8726_v11 }
 0x4a8   :  { %6418 = vmatpush.bf16.msra.mxu0 %v16261_v48  ;;  %6946 = vmatpush.bf16.msra.mxu2 %v16263_v0  ;;  %v8736_v48 = vld [vmem:[%s16041_s4 + $0x68] sm:$0xf0]  ;;  %v10145_v0 = vld [vmem:[%s16041_s4 + $0x64] sm:$0xf0] }
 0x4aa   :  { %9144 = vmatmul.msk.bf16.gmra.mxu3 %vm4154_vm5, %v8699_v15  ;;  %9093 = vmatmul.msk.bf16.gmra.mxu1 %vm4154_vm5, %v8699_v15  ;;  %v8739_v15 = vor.u32 %v10144_v20, %v8736_v48  ;;  %v8776_v20 = vld [vmem:[%s16041_s4 + $0xb8] sm:$0xf0]  ;;  %v8774_v48 = vld [vmem:[%s16041_s4 + $0xb0] sm:$0xf] }
 0x4ab   :  { %4856 = vmatmul.bf16.gmra.mxu2 %v8695_v21  ;;  %4328 = vmatmul.bf16.gmra.mxu0 %v8695_v21  ;;  %v8735_v21 = vor.u32 %v10145_v0, %v8734_v28  ;;  %v10155_v28 = vld [vmem:[%s16041_s4 + $0xb4] sm:$0xf0] }
 0x4ac   :  { %6419 = vmatpush.bf16.msra.mxu0 %v16270_v1  ;;  %6947 = vmatpush.bf16.msra.mxu2 %v16273_v62  ;;  %v8755_v1 = vor.u32 %v10148_v29, %v8752_v17  ;;  %v8775_v34 = vor.u32 %v10155_v28, %v8774_v48 }
 0x4b0   :  { %6420 = vmatpush.bf16.msra.mxu0 %v5681_v5  ;;  %6948 = vmatpush.bf16.msra.mxu2 %v5682_v38  ;;  %v8704_v5 = vld [vmem:[%s16041_s4 + $0x28] sm:$0xf0]  ;;  %v8702_v38 = vld [vmem:[%s16041_s4 + $0x20] sm:$0xf] }
 0x4b1   :  { %v8707_v54 = vor.u32 %v10136_v46, %v8704_v5  ;;  %v8703_v63 = vor.u32 %v10137_v13, %v8702_v38 }
 0x4b4   :  { %6421 = vmatpush.bf16.msra.mxu0 %v5679_v60  ;;  %6949 = vmatpush.bf16.msra.mxu2 %v5680_v14  ;;  %v8759_v14 = vor.u32 %v10151_v56, %v8758_v50 }
 0x4b8   :  { %6422 = vmatpush.bf16.msra.mxu0 %v5677_v3  ;;  %6950 = vmatpush.bf16.msra.mxu2 %v5678_v24 }
 0x4ba   :  { %9145 = vmatmul.msk.bf16.gmra.mxu3 %vm4154_vm5, %v8707_v54  ;;  %9094 = vmatmul.msk.bf16.gmra.mxu1 %vm4154_vm5, %v8707_v54 }
 0x4bb   :  { %4861 = vmatmul.bf16.gmra.mxu2 %v8703_v63  ;;  %4333 = vmatmul.bf16.gmra.mxu0 %v8703_v63  ;;  %v10152_v63 = vld [vmem:[%s16041_s4 + $0xa4] sm:$0xf] }
 0x4ca   :  { %9146 = vmatmul.msk.bf16.gmra.mxu3 %vm4154_vm5, %v8715_v2  ;;  %9095 = vmatmul.msk.bf16.gmra.mxu1 %vm4154_vm5, %v8715_v2 }
 0x4cb   :  { %4866 = vmatmul.bf16.gmra.mxu2 %v8711_v6  ;;  %4338 = vmatmul.bf16.gmra.mxu0 %v8711_v6  ;;  %v8771_v6 = vor.u32 %v10152_v63, %v8768_v27 }
 0x4da   :  { %9147 = vmatmul.msk.bf16.gmra.mxu3 %vm4154_vm5, %v8723_v36  ;;  %9096 = vmatmul.msk.bf16.gmra.mxu1 %vm4154_vm5, %v8723_v36 }
 0x4db   :  { %4871 = vmatmul.bf16.gmra.mxu2 %v8719_v22  ;;  %4343 = vmatmul.bf16.gmra.mxu0 %v8719_v22 }
 0x4ea   :  { %9148 = vmatmul.msk.bf16.gmra.mxu3 %vm4154_vm5, %v8731_v57  ;;  %9097 = vmatmul.msk.bf16.gmra.mxu1 %vm4154_vm5, %v8731_v57 }
 0x4eb   :  { %4876 = vmatmul.bf16.gmra.mxu2 %v8727_v31  ;;  %4348 = vmatmul.bf16.gmra.mxu0 %v8727_v31  ;;  %v10154_v31 = vld [vmem:[%s16041_s4 + $0xb4] sm:$0xf] }
 0x4fa   :  { %9149 = vmatmul.msk.bf16.gmra.mxu3 %vm4154_vm5, %v8739_v15  ;;  %9098 = vmatmul.msk.bf16.gmra.mxu1 %vm4154_vm5, %v8739_v15 }
 0x4fb   :  { %4881 = vmatmul.bf16.gmra.mxu2 %v8735_v21  ;;  %4353 = vmatmul.bf16.gmra.mxu0 %v8735_v21  ;;  %v8779_v21 = vor.u32 %v10154_v31, %v8776_v20 }
 0x50a   :  { %9150 = vmatmul.msk.bf16.gmra.mxu3 %vm4154_vm5, %v8747_v19  ;;  %9099 = vmatmul.msk.bf16.gmra.mxu1 %vm4154_vm5, %v8747_v19 }
 0x50b   :  { %4886 = vmatmul.bf16.gmra.mxu2 %v8743_v12  ;;  %4358 = vmatmul.bf16.gmra.mxu0 %v8743_v12 }
 0x517   :  { %v4588_v47 = vpop.f32.mrf.mxu1 }
 0x518   :  { %v4324_v62 = vpop.f32.mrf.mxu0 }
 0x519   :  { %v4589_v33 = vadd.f32 %v4588_v47, %v4324_v62  ;;  %v8784_v47 = vld [vmem:[%s16041_s4 + $0xc8] sm:$0xf0]  ;;  %v8782_v62 = vld [vmem:[%s16041_s4 + $0xc0] sm:$0xf] }
 0x51a   :  { %9151 = vmatmul.msk.bf16.gmra.mxu3 %vm4154_vm5, %v8755_v1  ;;  %9100 = vmatmul.msk.bf16.gmra.mxu1 %vm4154_vm5, %v8755_v1 }
 0x51b   :  { %4891 = vmatmul.bf16.gmra.mxu2 %v8751_v51  ;;  %5371 = vst [vmem:[%s16042_s5] sm:$0xff] %v4589_v33  ;;  %4363 = vmatmul.bf16.gmra.mxu0 %v8751_v51  ;;  %v10156_v51 = vld [vmem:[%s16041_s4 + $0xc4] sm:$0xf]  ;;  %v10157_v33 = vld [vmem:[%s16041_s4 + $0xc4] sm:$0xf0] }
 0x51d   :  { %v5116_v18 = vpop.f32.mrf.mxu3 }
 0x51e   :  { %v4852_v59 = vpop.f32.mrf.mxu2 }
 0x51f   :  { %v5117_v26 = vadd.f32 %v5116_v18, %v4852_v59  ;;  %v4590_v41 = vpop.f32.mrf.mxu1 }
 0x520   :  { %v4326_v42 = vpop.f32.mrf.mxu0 }
 0x521   :  { %5372 = vst [vmem:[%s16042_s5 + $0x8] sm:$0xff] %v5117_v26  ;;  %v4591_v53 = vadd.f32 %v4590_v41, %v4326_v42  ;;  %v8787_v26 = vor.u32 %v10156_v51, %v8784_v47  ;;  %v8783_v42 = vor.u32 %v10157_v33, %v8782_v62 }
 0x523   :  { %5373 = vst [vmem:[%s16042_s5 + $0x10] sm:$0xff] %v4591_v53 }
 0x525   :  { %v5118_v49 = vpop.f32.mrf.mxu3 }
 0x526   :  { %v4854_v23 = vpop.f32.mrf.mxu2 }
 0x527   :  { %v5119_v60 = vadd.f32 %v5118_v49, %v4854_v23  ;;  %v4593_v35 = vpop.f32.mrf.mxu1 }
 0x528   :  { %v4329_v44 = vpop.f32.mrf.mxu0 }
 0x529   :  { %5374 = vst [vmem:[%s16042_s5 + $0x18] sm:$0xff] %v5119_v60  ;;  %v4594_v3 = vadd.f32 %v4593_v35, %v4329_v44  ;;  %v8792_v35 = vld [vmem:[%s16041_s4 + $0xd8] sm:$0xf0]  ;;  %v8790_v44 = vld [vmem:[%s16041_s4 + $0xd0] sm:$0xf] }
 0x52a   :  { %9152 = vmatmul.msk.bf16.gmra.mxu3 %vm4154_vm5, %v8763_v8  ;;  %9101 = vmatmul.msk.bf16.gmra.mxu1 %vm4154_vm5, %v8763_v8 }
 0x52b   :  { %4896 = vmatmul.bf16.gmra.mxu2 %v8759_v14  ;;  %5375 = vst [vmem:[%s16042_s5 + $0x20] sm:$0xff] %v4594_v3  ;;  %4368 = vmatmul.bf16.gmra.mxu0 %v8759_v14  ;;  %v10158_v14 = vld [vmem:[%s16041_s4 + $0xd4] sm:$0xf]  ;;  %v10159_v3 = vld [vmem:[%s16041_s4 + $0xd4] sm:$0xf0] }
 0x52d   :  { %v5121_v24 = vpop.f32.mrf.mxu3 }
 0x52e   :  { %v4857_v46 = vpop.f32.mrf.mxu2 }
 0x52f   :  { %v5122_v5 = vadd.f32 %v5121_v24, %v4857_v46  ;;  %v4595_v38 = vpop.f32.mrf.mxu1 }
 0x530   :  { %v4331_v13 = vpop.f32.mrf.mxu0 }
 0x531   :  { %5376 = vst [vmem:[%s16042_s5 + $0x28] sm:$0xff] %v5122_v5  ;;  %v4596_v54 = vadd.f32 %v4595_v38, %v4331_v13  ;;  %v8795_v5 = vor.u32 %v10158_v14, %v8792_v35  ;;  %v8791_v13 = vor.u32 %v10159_v3, %v8790_v44 }
 0x533   :  { %5377 = vst [vmem:[%s16042_s5 + $0x30] sm:$0xff] %v4596_v54 }
 0x535   :  { %v5123_v7 = vpop.f32.mrf.mxu3 }
 0x536   :  { %v4859_v2 = vpop.f32.mrf.mxu2 }
 0x537   :  { %v5124_v9 = vadd.f32 %v5123_v7, %v4859_v2  ;;  %v4598_v40 = vpop.f32.mrf.mxu1 }
 0x538   :  { %v4334_v16 = vpop.f32.mrf.mxu0 }
 0x539   :  { %5378 = vst [vmem:[%s16042_s5 + $0x38] sm:$0xff] %v5124_v9  ;;  %v4599_v36 = vadd.f32 %v4598_v40, %v4334_v16  ;;  %v8800_v40 = vld [vmem:[%s16041_s4 + $0xe8] sm:$0xf0]  ;;  %v8798_v16 = vld [vmem:[%s16041_s4 + $0xe0] sm:$0xf] }
 0x53a   :  { %9153 = vmatmul.msk.bf16.gmra.mxu3 %vm4154_vm5, %v8771_v6  ;;  %9102 = vmatmul.msk.bf16.gmra.mxu1 %vm4154_vm5, %v8771_v6 }
 0x53b   :  { %4901 = vmatmul.bf16.gmra.mxu2 %v8767_v58  ;;  %5379 = vst [vmem:[%s16042_s5 + $0x40] sm:$0xff] %v4599_v36  ;;  %4373 = vmatmul.bf16.gmra.mxu0 %v8767_v58  ;;  %v10160_v58 = vld [vmem:[%s16041_s4 + $0xe4] sm:$0xf]  ;;  %v10161_v36 = vld [vmem:[%s16041_s4 + $0xe4] sm:$0xf0] }
 0x53d   :  { %v5126_v22 = vpop.f32.mrf.mxu3 }
 0x53e   :  { %v4862_v55 = vpop.f32.mrf.mxu2 }
 0x53f   :  { %v5127_v43 = vadd.f32 %v5126_v22, %v4862_v55  ;;  %v4600_v11 = vpop.f32.mrf.mxu1 }
 0x540   :  { %v4336_v30 = vpop.f32.mrf.mxu0 }
 0x541   :  { %5380 = vst [vmem:[%s16042_s5 + $0x48] sm:$0xff] %v5127_v43  ;;  %v4601_v57 = vadd.f32 %v4600_v11, %v4336_v30  ;;  %v8803_v43 = vor.u32 %v10160_v58, %v8800_v40  ;;  %v8799_v30 = vor.u32 %v10161_v36, %v8798_v16 }
 0x543   :  { %5381 = vst [vmem:[%s16042_s5 + $0x50] sm:$0xff] %v4601_v57 }
 0x545   :  { %v5128_v0 = vpop.f32.mrf.mxu3 }
 0x546   :  { %v4864_v15 = vpop.f32.mrf.mxu2 }
 0x547   :  { %v5129_v52 = vadd.f32 %v5128_v0, %v4864_v15  ;;  %v4603_v10 = vpop.f32.mrf.mxu1 }
 0x548   :  { %v4339_v37 = vpop.f32.mrf.mxu0 }
 0x549   :  { %5382 = vst [vmem:[%s16042_s5 + $0x58] sm:$0xff] %v5129_v52  ;;  %v4604_v19 = vadd.f32 %v4603_v10, %v4339_v37  ;;  %v8808_v10 = vld [vmem:[%s16041_s4 + $0xf8] sm:$0xf0]  ;;  %v8806_v37 = vld [vmem:[%s16041_s4 + $0xf0] sm:$0xf] }
 0x54a   :  { %9154 = vmatmul.msk.bf16.gmra.mxu3 %vm4154_vm5, %v8779_v21  ;;  %9103 = vmatmul.msk.bf16.gmra.mxu1 %vm4154_vm5, %v8779_v21 }
 0x54b   :  { %4906 = vmatmul.bf16.gmra.mxu2 %v8775_v34  ;;  %5383 = vst [vmem:[%s16042_s5 + $0x60] sm:$0xff] %v4604_v19  ;;  %4378 = vmatmul.bf16.gmra.mxu0 %v8775_v34  ;;  %v10162_v34 = vld [vmem:[%s16041_s4 + $0xf4] sm:$0xf]  ;;  %v10163_v19 = vld [vmem:[%s16041_s4 + $0xf4] sm:$0xf0] }
 0x54d   :  { %v5131_v12 = vpop.f32.mrf.mxu3 }
 0x54e   :  { %v4867_v29 = vpop.f32.mrf.mxu2 }
 0x54f   :  { %v5132_v17 = vadd.f32 %v5131_v12, %v4867_v29  ;;  %v4605_v32 = vpop.f32.mrf.mxu1 }
 0x550   :  { %v4341_v4 = vpop.f32.mrf.mxu0 }
 0x551   :  { %5384 = vst [vmem:[%s16042_s5 + $0x68] sm:$0xff] %v5132_v17  ;;  %v4606_v1 = vadd.f32 %v4605_v32, %v4341_v4  ;;  %v8811_v17 = vor.u32 %v10162_v34, %v8808_v10  ;;  %v8807_v4 = vor.u32 %v10163_v19, %v8806_v37 }
 0x553   :  { %5385 = vst [vmem:[%s16042_s5 + $0x70] sm:$0xff] %v4606_v1 }
 0x555   :  { %v5133_v18 = vpop.f32.mrf.mxu3 }
 0x556   :  { %v4869_v59 = vpop.f32.mrf.mxu2 }
 0x557   :  { %v5134_v41 = vadd.f32 %v5133_v18, %v4869_v59  ;;  %v4608_v53 = vpop.f32.mrf.mxu1 }
 0x558   :  { %v4344_v45 = vpop.f32.mrf.mxu0 }
 0x559   :  { %5386 = vst [vmem:[%s16042_s5 + $0x78] sm:$0xff] %v5134_v41  ;;  %v4609_v39 = vadd.f32 %v4608_v53, %v4344_v45  ;;  %v8816_v53 = vld [vmem:[%s16041_s4 + $0x108] sm:$0xf0]  ;;  %v8814_v45 = vld [vmem:[%s16041_s4 + $0x100] sm:$0xf] }
 0x55a   :  { %9155 = vmatmul.msk.bf16.gmra.mxu3 %vm4154_vm5, %v8787_v26  ;;  %9104 = vmatmul.msk.bf16.gmra.mxu1 %vm4154_vm5, %v8787_v26 }
 0x55b   :  { %4911 = vmatmul.bf16.gmra.mxu2 %v8783_v42  ;;  %5387 = vst [vmem:[%s16042_s5 + $0x80] sm:$0xff] %v4609_v39  ;;  %4383 = vmatmul.bf16.gmra.mxu0 %v8783_v42  ;;  %v10164_v42 = vld [vmem:[%s16041_s4 + $0x104] sm:$0xf]  ;;  %v10165_v39 = vld [vmem:[%s16041_s4 + $0x104] sm:$0xf0] }
 0x55d   :  { %v5136_v50 = vpop.f32.mrf.mxu3 }
 0x55e   :  { %v4872_v56 = vpop.f32.mrf.mxu2 }
 0x55f   :  { %v5137_v49 = vadd.f32 %v5136_v50, %v4872_v56  ;;  %v4610_v23 = vpop.f32.mrf.mxu1 }
 0x560   :  { %v4346_v8 = vpop.f32.mrf.mxu0 }
 0x561   :  { %5388 = vst [vmem:[%s16042_s5 + $0x88] sm:$0xff] %v5137_v49  ;;  %v4611_v60 = vadd.f32 %v4610_v23, %v4346_v8  ;;  %v8819_v49 = vor.u32 %v10164_v42, %v8816_v53  ;;  %v8815_v8 = vor.u32 %v10165_v39, %v8814_v45 }
 0x563   :  { %5389 = vst [vmem:[%s16042_s5 + $0x90] sm:$0xff] %v4611_v60 }
 0x565   :  { %v5138_v24 = vpop.f32.mrf.mxu3 }
 0x566   :  { %v4874_v46 = vpop.f32.mrf.mxu2 }
 0x567   :  { %v5139_v38 = vadd.f32 %v5138_v24, %v4874_v46  ;;  %v4613_v54 = vpop.f32.mrf.mxu1 }
 0x568   :  { %v4349_v63 = vpop.f32.mrf.mxu0 }
 0x569   :  { %5390 = vst [vmem:[%s16042_s5 + $0x98] sm:$0xff] %v5139_v38  ;;  %v4614_v27 = vadd.f32 %v4613_v54, %v4349_v63  ;;  %v8824_v54 = vld [vmem:[%s16041_s4 + $0x118] sm:$0xf0]  ;;  %v8822_v63 = vld [vmem:[%s16041_s4 + $0x110] sm:$0xf] }
 0x56a   :  { %9156 = vmatmul.msk.bf16.gmra.mxu3 %vm4154_vm5, %v8795_v5  ;;  %9105 = vmatmul.msk.bf16.gmra.mxu1 %vm4154_vm5, %v8795_v5 }
 0x56b   :  { %4916 = vmatmul.bf16.gmra.mxu2 %v8791_v13  ;;  %5391 = vst [vmem:[%s16042_s5 + $0xa0] sm:$0xff] %v4614_v27  ;;  %4388 = vmatmul.bf16.gmra.mxu0 %v8791_v13  ;;  %v10166_v13 = vld [vmem:[%s16041_s4 + $0x114] sm:$0xf]  ;;  %v10167_v27 = vld [vmem:[%s16041_s4 + $0x114] sm:$0xf0] }
 0x56d   :  { %v5141_v25 = vpop.f32.mrf.mxu3 }
 0x56e   :  { %v4877_v61 = vpop.f32.mrf.mxu2 }
 0x56f   :  { %v5142_v7 = vadd.f32 %v5141_v25, %v4877_v61  ;;  %v4615_v2 = vpop.f32.mrf.mxu1 }
 0x570   :  { %v4351_v6 = vpop.f32.mrf.mxu0 }
 0x571   :  { %5392 = vst [vmem:[%s16042_s5 + $0xa8] sm:$0xff] %v5142_v7  ;;  %v4616_v9 = vadd.f32 %v4615_v2, %v4351_v6  ;;  %v8827_v7 = vor.u32 %v10166_v13, %v8824_v54  ;;  %v8823_v6 = vor.u32 %v10167_v27, %v8822_v63 }
 0x573   :  { %5393 = vst [vmem:[%s16042_s5 + $0xb0] sm:$0xff] %v4616_v9 }
 0x575   :  { %v5143_v22 = vpop.f32.mrf.mxu3 }
 0x576   :  { %v4879_v55 = vpop.f32.mrf.mxu2 }
 0x577   :  { %v5144_v11 = vadd.f32 %v5143_v22, %v4879_v55  ;;  %v4618_v57 = vpop.f32.mrf.mxu1 }
 0x578   :  { %v4354_v31 = vpop.f32.mrf.mxu0 }
 0x579   :  { %5394 = vst [vmem:[%s16042_s5 + $0xb8] sm:$0xff] %v5144_v11  ;;  %v4619_v20 = vadd.f32 %v4618_v57, %v4354_v31  ;;  %v8832_v57 = vld [vmem:[%s16041_s4 + $0x128] sm:$0xf0]  ;;  %v8830_v31 = vld [vmem:[%s16041_s4 + $0x120] sm:$0xf] }
 0x57a   :  { %9157 = vmatmul.msk.bf16.gmra.mxu3 %vm4154_vm5, %v8803_v43  ;;  %9106 = vmatmul.msk.bf16.gmra.mxu1 %vm4154_vm5, %v8803_v43 }
 0x57b   :  { %4921 = vmatmul.bf16.gmra.mxu2 %v8799_v30  ;;  %5395 = vst [vmem:[%s16042_s5 + $0xc0] sm:$0xff] %v4619_v20  ;;  %4393 = vmatmul.bf16.gmra.mxu0 %v8799_v30  ;;  %v10168_v30 = vld [vmem:[%s16041_s4 + $0x124] sm:$0xf]  ;;  %v10169_v20 = vld [vmem:[%s16041_s4 + $0x124] sm:$0xf0] }
 0x57d   :  { %v5146_v48 = vpop.f32.mrf.mxu3 }
 0x57e   :  { %v4882_v28 = vpop.f32.mrf.mxu2 }
 0x57f   :  { %v5147_v0 = vadd.f32 %v5146_v48, %v4882_v28  ;;  %v4620_v15 = vpop.f32.mrf.mxu1 }
 0x580   :  { %v4356_v21 = vpop.f32.mrf.mxu0 }
 0x581   :  { %5396 = vst [vmem:[%s16042_s5 + $0xc8] sm:$0xff] %v5147_v0  ;;  %v4621_v52 = vadd.f32 %v4620_v15, %v4356_v21  ;;  %v8835_v0 = vor.u32 %v10168_v30, %v8832_v57  ;;  %v8831_v21 = vor.u32 %v10169_v20, %v8830_v31 }
 0x583   :  { %5397 = vst [vmem:[%s16042_s5 + $0xd0] sm:$0xff] %v4621_v52 }
 0x585   :  { %v5148_v12 = vpop.f32.mrf.mxu3 }
 0x586   :  { %v4884_v29 = vpop.f32.mrf.mxu2 }
 0x587   :  { %v5149_v32 = vadd.f32 %v5148_v12, %v4884_v29  ;;  %v4623_v1 = vpop.f32.mrf.mxu1 }
 0x588   :  { %v4359_v51 = vpop.f32.mrf.mxu0 }
 0x589   :  { %5398 = vst [vmem:[%s16042_s5 + $0xd8] sm:$0xff] %v5149_v32  ;;  %v4624_v47 = vadd.f32 %v4623_v1, %v4359_v51  ;;  %v8840_v1 = vld [vmem:[%s16041_s4 + $0x138] sm:$0xf0]  ;;  %v8838_v51 = vld [vmem:[%s16041_s4 + $0x130] sm:$0xf] }
 0x58a   :  { %9158 = vmatmul.msk.bf16.gmra.mxu3 %vm4154_vm5, %v8811_v17  ;;  %9107 = vmatmul.msk.bf16.gmra.mxu1 %vm4154_vm5, %v8811_v17 }
 0x58b   :  { %4926 = vmatmul.bf16.gmra.mxu2 %v8807_v4  ;;  %5399 = vst [vmem:[%s16042_s5 + $0xe0] sm:$0xff] %v4624_v47  ;;  %4398 = vmatmul.bf16.gmra.mxu0 %v8807_v4  ;;  %v10170_v4 = vld [vmem:[%s16041_s4 + $0x134] sm:$0xf]  ;;  %v10171_v47 = vld [vmem:[%s16041_s4 + $0x134] sm:$0xf0] }
 0x58d   :  { %v5151_v62 = vpop.f32.mrf.mxu3 }
 0x58e   :  { %v4887_v33 = vpop.f32.mrf.mxu2 }
 0x58f   :  { %v5152_v18 = vadd.f32 %v5151_v62, %v4887_v33  ;;  %v4625_v59 = vpop.f32.mrf.mxu1 }
 0x590   :  { %v4361_v26 = vpop.f32.mrf.mxu0 }
 0x591   :  { %5400 = vst [vmem:[%s16042_s5 + $0xe8] sm:$0xff] %v5152_v18  ;;  %v4626_v41 = vadd.f32 %v4625_v59, %v4361_v26  ;;  %v8843_v18 = vor.u32 %v10170_v4, %v8840_v1  ;;  %v8839_v26 = vor.u32 %v10171_v47, %v8838_v51 }
 0x593   :  { %5401 = vst [vmem:[%s16042_s5 + $0xf0] sm:$0xff] %v4626_v41 }
 0x595   :  { %v5153_v50 = vpop.f32.mrf.mxu3 }
 0x596   :  { %v4889_v56 = vpop.f32.mrf.mxu2 }
 0x597   :  { %v5154_v23 = vadd.f32 %v5153_v50, %v4889_v56  ;;  %v4628_v60 = vpop.f32.mrf.mxu1 }
 0x598   :  { %v4364_v14 = vpop.f32.mrf.mxu0 }
 0x599   :  { %5402 = vst [vmem:[%s16042_s5 + $0xf8] sm:$0xff] %v5154_v23  ;;  %v4629_v35 = vadd.f32 %v4628_v60, %v4364_v14  ;;  %v8848_v60 = vld [vmem:[%s16041_s4 + $0x148] sm:$0xf0]  ;;  %v8846_v14 = vld [vmem:[%s16041_s4 + $0x140] sm:$0xf] }
 0x59a   :  { %9159 = vmatmul.msk.bf16.gmra.mxu3 %vm4154_vm5, %v8819_v49  ;;  %9108 = vmatmul.msk.bf16.gmra.mxu1 %vm4154_vm5, %v8819_v49 }
 0x59b   :  { %4931 = vmatmul.bf16.gmra.mxu2 %v8815_v8  ;;  %5403 = vst [vmem:[%s16042_s5 + $0x100] sm:$0xff] %v4629_v35  ;;  %4403 = vmatmul.bf16.gmra.mxu0 %v8815_v8  ;;  %v10172_v8 = vld [vmem:[%s16041_s4 + $0x144] sm:$0xf]  ;;  %v10173_v35 = vld [vmem:[%s16041_s4 + $0x144] sm:$0xf0] }
 0x59d   :  { %v5156_v44 = vpop.f32.mrf.mxu3 }
 0x59e   :  { %v4892_v3 = vpop.f32.mrf.mxu2 }
 0x59f   :  { %v5157_v24 = vadd.f32 %v5156_v44, %v4892_v3  ;;  %v4630_v46 = vpop.f32.mrf.mxu1 }
 0x5a0   :  { %v4366_v5 = vpop.f32.mrf.mxu0 }
 0x5a1   :  { %5404 = vst [vmem:[%s16042_s5 + $0x108] sm:$0xff] %v5157_v24  ;;  %v4631_v38 = vadd.f32 %v4630_v46, %v4366_v5  ;;  %v8851_v24 = vor.u32 %v10172_v8, %v8848_v60  ;;  %v8847_v5 = vor.u32 %v10173_v35, %v8846_v14 }
 0x5a3   :  { %5405 = vst [vmem:[%s16042_s5 + $0x110] sm:$0xff] %v4631_v38 }
 0x5a5   :  { %v5158_v25 = vpop.f32.mrf.mxu3 }
 0x5a6   :  { %v4894_v61 = vpop.f32.mrf.mxu2 }
 0x5a7   :  { %v5159_v2 = vadd.f32 %v5158_v25, %v4894_v61  ;;  %v4633_v9 = vpop.f32.mrf.mxu1 }
 0x5a8   :  { %v4369_v58 = vpop.f32.mrf.mxu0 }
 0x5a9   :  { %5406 = vst [vmem:[%s16042_s5 + $0x118] sm:$0xff] %v5159_v2  ;;  %v4634_v40 = vadd.f32 %v4633_v9, %v4369_v58  ;;  %v8856_v9 = vld [vmem:[%s16041_s4 + $0x158] sm:$0xf0]  ;;  %v8854_v58 = vld [vmem:[%s16041_s4 + $0x150] sm:$0xf] }
 0x5aa   :  { %9160 = vmatmul.msk.bf16.gmra.mxu3 %vm4154_vm5, %v8827_v7  ;;  %9109 = vmatmul.msk.bf16.gmra.mxu1 %vm4154_vm5, %v8827_v7 }
 0x5ab   :  { %4936 = vmatmul.bf16.gmra.mxu2 %v8823_v6  ;;  %5407 = vst [vmem:[%s16042_s5 + $0x120] sm:$0xff] %v4634_v40  ;;  %4408 = vmatmul.bf16.gmra.mxu0 %v8823_v6  ;;  %v10174_v6 = vld [vmem:[%s16041_s4 + $0x154] sm:$0xf]  ;;  %v10175_v40 = vld [vmem:[%s16041_s4 + $0x154] sm:$0xf0] }
 0x5ad   :  { %v5161_v16 = vpop.f32.mrf.mxu3 }
 0x5ae   :  { %v4897_v36 = vpop.f32.mrf.mxu2 }
 0x5af   :  { %v5162_v22 = vadd.f32 %v5161_v16, %v4897_v36  ;;  %v4635_v55 = vpop.f32.mrf.mxu1 }
 0x5b0   :  { %v4371_v43 = vpop.f32.mrf.mxu0 }
 0x5b1   :  { %5408 = vst [vmem:[%s16042_s5 + $0x128] sm:$0xff] %v5162_v22  ;;  %v4636_v11 = vadd.f32 %v4635_v55, %v4371_v43  ;;  %v8859_v22 = vor.u32 %v10174_v6, %v8856_v9  ;;  %v8855_v43 = vor.u32 %v10175_v40, %v8854_v58 }
 0x5b3   :  { %5409 = vst [vmem:[%s16042_s5 + $0x130] sm:$0xff] %v4636_v11 }
 0x5b5   :  { %v5163_v48 = vpop.f32.mrf.mxu3 }
 0x5b6   :  { %v4899_v28 = vpop.f32.mrf.mxu2 }
 0x5b7   :  { %v5164_v15 = vadd.f32 %v5163_v48, %v4899_v28  ;;  %v4638_v52 = vpop.f32.mrf.mxu1 }
 0x5b8   :  { %v4374_v34 = vpop.f32.mrf.mxu0 }
 0x5b9   :  { %5410 = vst [vmem:[%s16042_s5 + $0x138] sm:$0xff] %v5164_v15  ;;  %v4639_v10 = vadd.f32 %v4638_v52, %v4374_v34  ;;  %v8864_v52 = vld [vmem:[%s16041_s4 + $0x168] sm:$0xf0]  ;;  %v8862_v34 = vld [vmem:[%s16041_s4 + $0x160] sm:$0xf] }
 0x5ba   :  { %9161 = vmatmul.msk.bf16.gmra.mxu3 %vm4154_vm5, %v8835_v0  ;;  %9110 = vmatmul.msk.bf16.gmra.mxu1 %vm4154_vm5, %v8835_v0 }
 0x5bb   :  { %4941 = vmatmul.bf16.gmra.mxu2 %v8831_v21  ;;  %5411 = vst [vmem:[%s16042_s5 + $0x140] sm:$0xff] %v4639_v10  ;;  %4413 = vmatmul.bf16.gmra.mxu0 %v8831_v21  ;;  %v10176_v21 = vld [vmem:[%s16041_s4 + $0x164] sm:$0xf]  ;;  %v10177_v10 = vld [vmem:[%s16041_s4 + $0x164] sm:$0xf0] }
 0x5bd   :  { %v5166_v37 = vpop.f32.mrf.mxu3 }
 0x5be   :  { %v4902_v19 = vpop.f32.mrf.mxu2 }
 0x5bf   :  { %v5167_v12 = vadd.f32 %v5166_v37, %v4902_v19  ;;  %v4640_v29 = vpop.f32.mrf.mxu1 }
 0x5c0   :  { %v4376_v17 = vpop.f32.mrf.mxu0 }
 0x5c1   :  { %5412 = vst [vmem:[%s16042_s5 + $0x148] sm:$0xff] %v5167_v12  ;;  %v4641_v32 = vadd.f32 %v4640_v29, %v4376_v17  ;;  %v8867_v12 = vor.u32 %v10176_v21, %v8864_v52  ;;  %v8863_v17 = vor.u32 %v10177_v10, %v8862_v34 }
 0x5c3   :  { %5413 = vst [vmem:[%s16042_s5 + $0x150] sm:$0xff] %v4641_v32 }
 0x5c5   :  { %v5168_v62 = vpop.f32.mrf.mxu3 }
 0x5c6   :  { %v4904_v33 = vpop.f32.mrf.mxu2 }
 0x5c7   :  { %v5169_v59 = vadd.f32 %v5168_v62, %v4904_v33  ;;  %v4643_v41 = vpop.f32.mrf.mxu1 }
 0x5c8   :  { %v4379_v42 = vpop.f32.mrf.mxu0 }
 0x5c9   :  { %5414 = vst [vmem:[%s16042_s5 + $0x158] sm:$0xff] %v5169_v59  ;;  %v4644_v53 = vadd.f32 %v4643_v41, %v4379_v42  ;;  %v8872_v41 = vld [vmem:[%s16041_s4 + $0x178] sm:$0xf0]  ;;  %v8870_v42 = vld [vmem:[%s16041_s4 + $0x170] sm:$0xf] }
 0x5ca   :  { %9162 = vmatmul.msk.bf16.gmra.mxu3 %vm4154_vm5, %v8843_v18  ;;  %9111 = vmatmul.msk.bf16.gmra.mxu1 %vm4154_vm5, %v8843_v18 }
 0x5cb   :  { %4946 = vmatmul.bf16.gmra.mxu2 %v8839_v26  ;;  %5415 = vst [vmem:[%s16042_s5 + $0x160] sm:$0xff] %v4644_v53  ;;  %4418 = vmatmul.bf16.gmra.mxu0 %v8839_v26  ;;  %v10178_v26 = vld [vmem:[%s16041_s4 + $0x174] sm:$0xf]  ;;  %v10179_v53 = vld [vmem:[%s16041_s4 + $0x174] sm:$0xf0] }
 0x5cd   :  { %v5171_v45 = vpop.f32.mrf.mxu3 }
 0x5ce   :  { %v4907_v39 = vpop.f32.mrf.mxu2 }
 0x5cf   :  { %v5172_v50 = vadd.f32 %v5171_v45, %v4907_v39  ;;  %v4645_v56 = vpop.f32.mrf.mxu1 }
 0x5d0   :  { %v4381_v49 = vpop.f32.mrf.mxu0 }
 0x5d1   :  { %5416 = vst [vmem:[%s16042_s5 + $0x168] sm:$0xff] %v5172_v50  ;;  %v4646_v23 = vadd.f32 %v4645_v56, %v4381_v49  ;;  %v8875_v50 = vor.u32 %v10178_v26, %v8872_v41  ;;  %v8871_v49 = vor.u32 %v10179_v53, %v8870_v42 }
 0x5d3   :  { %5417 = vst [vmem:[%s16042_s5 + $0x170] sm:$0xff] %v4646_v23 }
 0x5d5   :  { %v5173_v44 = vpop.f32.mrf.mxu3 }
 0x5d6   :  { %v4909_v3 = vpop.f32.mrf.mxu2 }
 0x5d7   :  { %v5174_v46 = vadd.f32 %v5173_v44, %v4909_v3  ;;  %v4648_v38 = vpop.f32.mrf.mxu1 }
 0x5d8   :  { %v4384_v13 = vpop.f32.mrf.mxu0 }
 0x5d9   :  { %5418 = vst [vmem:[%s16042_s5 + $0x178] sm:$0xff] %v5174_v46  ;;  %v4649_v54 = vadd.f32 %v4648_v38, %v4384_v13  ;;  %v8880_v38 = vld [vmem:[%s16041_s4 + $0x188] sm:$0xf0]  ;;  %v8878_v13 = vld [vmem:[%s16041_s4 + $0x180] sm:$0xf] }
 0x5da   :  { %9163 = vmatmul.msk.bf16.gmra.mxu3 %vm4154_vm5, %v8851_v24  ;;  %9112 = vmatmul.msk.bf16.gmra.mxu1 %vm4154_vm5, %v8851_v24 }
 0x5db   :  { %4951 = vmatmul.bf16.gmra.mxu2 %v8847_v5  ;;  %5419 = vst [vmem:[%s16042_s5 + $0x180] sm:$0xff] %v4649_v54  ;;  %4423 = vmatmul.bf16.gmra.mxu0 %v8847_v5  ;;  %v10180_v5 = vld [vmem:[%s16041_s4 + $0x184] sm:$0xf]  ;;  %v10181_v54 = vld [vmem:[%s16041_s4 + $0x184] sm:$0xf0] }
 0x5dd   :  { %v5176_v63 = vpop.f32.mrf.mxu3 }
 0x5de   :  { %v4912_v27 = vpop.f32.mrf.mxu2 }
 0x5df   :  { %v5177_v25 = vadd.f32 %v5176_v63, %v4912_v27  ;;  %v4650_v61 = vpop.f32.mrf.mxu1 }
 0x5e0   :  { %v4386_v7 = vpop.f32.mrf.mxu0 }
 0x5e1   :  { %5420 = vst [vmem:[%s16042_s5 + $0x188] sm:$0xff] %v5177_v25  ;;  %v4651_v2 = vadd.f32 %v4650_v61, %v4386_v7  ;;  %v8883_v25 = vor.u32 %v10180_v5, %v8880_v38  ;;  %v8879_v7 = vor.u32 %v10181_v54, %v8878_v13 }
 0x5e3   :  { %5421 = vst [vmem:[%s16042_s5 + $0x190] sm:$0xff] %v4651_v2 }
 0x5e5   :  { %v5178_v16 = vpop.f32.mrf.mxu3 }
 0x5e6   :  { %v4914_v36 = vpop.f32.mrf.mxu2 }
 0x5e7   :  { %v5179_v55 = vadd.f32 %v5178_v16, %v4914_v36  ;;  %v4653_v11 = vpop.f32.mrf.mxu1 }
 0x5e8   :  { %v4389_v30 = vpop.f32.mrf.mxu0 }
 0x5e9   :  { %5422 = vst [vmem:[%s16042_s5 + $0x198] sm:$0xff] %v5179_v55  ;;  %v4654_v57 = vadd.f32 %v4653_v11, %v4389_v30  ;;  %v8888_v11 = vld [vmem:[%s16041_s4 + $0x198] sm:$0xf0]  ;;  %v8886_v30 = vld [vmem:[%s16041_s4 + $0x190] sm:$0xf] }
 0x5ea   :  { %9164 = vmatmul.msk.bf16.gmra.mxu3 %vm4154_vm5, %v8859_v22  ;;  %9113 = vmatmul.msk.bf16.gmra.mxu1 %vm4154_vm5, %v8859_v22 }
 0x5eb   :  { %4956 = vmatmul.bf16.gmra.mxu2 %v8855_v43  ;;  %5423 = vst [vmem:[%s16042_s5 + $0x1a0] sm:$0xff] %v4654_v57  ;;  %4428 = vmatmul.bf16.gmra.mxu0 %v8855_v43  ;;  %v10182_v43 = vld [vmem:[%s16041_s4 + $0x194] sm:$0xf]  ;;  %v10183_v57 = vld [vmem:[%s16041_s4 + $0x194] sm:$0xf0] }
 0x5ed   :  { %v5181_v31 = vpop.f32.mrf.mxu3 }
 0x5ee   :  { %v4917_v20 = vpop.f32.mrf.mxu2 }
 0x5ef   :  { %v5182_v48 = vadd.f32 %v5181_v31, %v4917_v20  ;;  %v4655_v28 = vpop.f32.mrf.mxu1 }
 0x5f0   :  { %v4391_v0 = vpop.f32.mrf.mxu0 }
 0x5f1   :  { %5424 = vst [vmem:[%s16042_s5 + $0x1a8] sm:$0xff] %v5182_v48  ;;  %v4656_v15 = vadd.f32 %v4655_v28, %v4391_v0  ;;  %v8891_v48 = vor.u32 %v10182_v43, %v8888_v11  ;;  %v8887_v0 = vor.u32 %v10183_v57, %v8886_v30 }
 0x5f3   :  { %5425 = vst [vmem:[%s16042_s5 + $0x1b0] sm:$0xff] %v4656_v15 }
 0x5f5   :  { %v5183_v37 = vpop.f32.mrf.mxu3 }
 0x5f6   :  { %v4919_v19 = vpop.f32.mrf.mxu2 }
 0x5f7   :  { %v5184_v29 = vadd.f32 %v5183_v37, %v4919_v19  ;;  %v4658_v32 = vpop.f32.mrf.mxu1 }
 0x5f8   :  { %v4394_v4 = vpop.f32.mrf.mxu0 }
 0x5f9   :  { %5426 = vst [vmem:[%s16042_s5 + $0x1b8] sm:$0xff] %v5184_v29  ;;  %v4659_v1 = vadd.f32 %v4658_v32, %v4394_v4  ;;  %v8896_v32 = vld [vmem:[%s16041_s4 + $0x1a8] sm:$0xf0]  ;;  %v8894_v4 = vld [vmem:[%s16041_s4 + $0x1a0] sm:$0xf] }
 0x5fa   :  { %9165 = vmatmul.msk.bf16.gmra.mxu3 %vm4154_vm5, %v8867_v12  ;;  %9114 = vmatmul.msk.bf16.gmra.mxu1 %vm4154_vm5, %v8867_v12 }
 0x5fb   :  { %4961 = vmatmul.bf16.gmra.mxu2 %v8863_v17  ;;  %5427 = vst [vmem:[%s16042_s5 + $0x1c0] sm:$0xff] %v4659_v1  ;;  %4433 = vmatmul.bf16.gmra.mxu0 %v8863_v17  ;;  %v10184_v17 = vld [vmem:[%s16041_s4 + $0x1a4] sm:$0xf]  ;;  %v10185_v1 = vld [vmem:[%s16041_s4 + $0x1a4] sm:$0xf0] }
 0x5fd   :  { %v5186_v51 = vpop.f32.mrf.mxu3 }
 0x5fe   :  { %v4922_v47 = vpop.f32.mrf.mxu2 }
 0x5ff   :  { %v5187_v62 = vadd.f32 %v5186_v51, %v4922_v47  ;;  %v4660_v33 = vpop.f32.mrf.mxu1 }
 0x600   :  { %v4396_v18 = vpop.f32.mrf.mxu0 }
 0x601   :  { %5428 = vst [vmem:[%s16042_s5 + $0x1c8] sm:$0xff] %v5187_v62  ;;  %v4661_v59 = vadd.f32 %v4660_v33, %v4396_v18  ;;  %v8899_v62 = vor.u32 %v10184_v17, %v8896_v32  ;;  %v8895_v18 = vor.u32 %v10185_v1, %v8894_v4 }
 0x603   :  { %5429 = vst [vmem:[%s16042_s5 + $0x1d0] sm:$0xff] %v4661_v59 }
 0x605   :  { %v5188_v45 = vpop.f32.mrf.mxu3 }
 0x606   :  { %v4924_v39 = vpop.f32.mrf.mxu2 }
 0x607   :  { %v5189_v56 = vadd.f32 %v5188_v45, %v4924_v39  ;;  %v4663_v23 = vpop.f32.mrf.mxu1 }
 0x608   :  { %v4399_v8 = vpop.f32.mrf.mxu0 }
 0x609   :  { %5430 = vst [vmem:[%s16042_s5 + $0x1d8] sm:$0xff] %v5189_v56  ;;  %v4664_v60 = vadd.f32 %v4663_v23, %v4399_v8  ;;  %v8904_v23 = vld [vmem:[%s16041_s4 + $0x1b8] sm:$0xf0]  ;;  %v8902_v8 = vld [vmem:[%s16041_s4 + $0x1b0] sm:$0xf] }
 0x60a   :  { %9166 = vmatmul.msk.bf16.gmra.mxu3 %vm4154_vm5, %v8875_v50  ;;  %9115 = vmatmul.msk.bf16.gmra.mxu1 %vm4154_vm5, %v8875_v50 }
 0x60b   :  { %4966 = vmatmul.bf16.gmra.mxu2 %v8871_v49  ;;  %5431 = vst [vmem:[%s16042_s5 + $0x1e0] sm:$0xff] %v4664_v60  ;;  %4438 = vmatmul.bf16.gmra.mxu0 %v8871_v49  ;;  %v10186_v49 = vld [vmem:[%s16041_s4 + $0x1b4] sm:$0xf]  ;;  %v10187_v60 = vld [vmem:[%s16041_s4 + $0x1b4] sm:$0xf0] }
 0x60d   :  { %v5191_v14 = vpop.f32.mrf.mxu3 }
 0x60e   :  { %v4927_v35 = vpop.f32.mrf.mxu2 }
 0x60f   :  { %v5192_v44 = vadd.f32 %v5191_v14, %v4927_v35  ;;  %v4665_v3 = vpop.f32.mrf.mxu1 }
 0x610   :  { %v4401_v24 = vpop.f32.mrf.mxu0 }
 0x611   :  { %5432 = vst [vmem:[%s16042_s5 + $0x1e8] sm:$0xff] %v5192_v44  ;;  %v4666_v46 = vadd.f32 %v4665_v3, %v4401_v24  ;;  %v8907_v44 = vor.u32 %v10186_v49, %v8904_v23  ;;  %v8903_v24 = vor.u32 %v10187_v60, %v8902_v8 }
 0x613   :  { %5433 = vst [vmem:[%s16042_s5 + $0x1f0] sm:$0xff] %v4666_v46 }
 0x615   :  { %v5193_v63 = vpop.f32.mrf.mxu3 }
 0x616   :  { %v4929_v27 = vpop.f32.mrf.mxu2 }
 0x617   :  { %v5194_v61 = vadd.f32 %v5193_v63, %v4929_v27  ;;  %v4668_v2 = vpop.f32.mrf.mxu1 }
 0x618   :  { %v4404_v6 = vpop.f32.mrf.mxu0 }
 0x619   :  { %5434 = vst [vmem:[%s16042_s5 + $0x1f8] sm:$0xff] %v5194_v61  ;;  %v4669_v9 = vadd.f32 %v4668_v2, %v4404_v6  ;;  %v8912_v2 = vld [vmem:[%s16041_s4 + $0x1c8] sm:$0xf0]  ;;  %v8910_v6 = vld [vmem:[%s16041_s4 + $0x1c0] sm:$0xf] }
 0x61a   :  { %9167 = vmatmul.msk.bf16.gmra.mxu3 %vm4154_vm5, %v8883_v25  ;;  %9116 = vmatmul.msk.bf16.gmra.mxu1 %vm4154_vm5, %v8883_v25 }
 0x61b   :  { %4971 = vmatmul.bf16.gmra.mxu2 %v8879_v7  ;;  %5435 = vst [vmem:[%s16042_s5 + $0x200] sm:$0xff] %v4669_v9  ;;  %4443 = vmatmul.bf16.gmra.mxu0 %v8879_v7  ;;  %v10188_v7 = vld [vmem:[%s16041_s4 + $0x1c4] sm:$0xf]  ;;  %v10189_v9 = vld [vmem:[%s16041_s4 + $0x1c4] sm:$0xf0] }
 0x61d   :  { %v5196_v58 = vpop.f32.mrf.mxu3 }
 0x61e   :  { %v4932_v40 = vpop.f32.mrf.mxu2 }
 0x61f   :  { %v5197_v16 = vadd.f32 %v5196_v58, %v4932_v40  ;;  %v4670_v36 = vpop.f32.mrf.mxu1 }
 0x620   :  { %v4406_v22 = vpop.f32.mrf.mxu0 }
 0x621   :  { %5436 = vst [vmem:[%s16042_s5 + $0x208] sm:$0xff] %v5197_v16  ;;  %v4671_v55 = vadd.f32 %v4670_v36, %v4406_v22  ;;  %v8915_v16 = vor.u32 %v10188_v7, %v8912_v2  ;;  %v8911_v22 = vor.u32 %v10189_v9, %v8910_v6 }
 0x623   :  { %5437 = vst [vmem:[%s16042_s5 + $0x210] sm:$0xff] %v4671_v55 }
 0x625   :  { %v5198_v31 = vpop.f32.mrf.mxu3 }
 0x626   :  { %v4934_v20 = vpop.f32.mrf.mxu2 }
 0x627   :  { %v5199_v28 = vadd.f32 %v5198_v31, %v4934_v20  ;;  %v4673_v15 = vpop.f32.mrf.mxu1 }
 0x628   :  { %v4409_v21 = vpop.f32.mrf.mxu0 }
 0x629   :  { %5438 = vst [vmem:[%s16042_s5 + $0x218] sm:$0xff] %v5199_v28  ;;  %v4674_v52 = vadd.f32 %v4673_v15, %v4409_v21  ;;  %v8920_v15 = vld [vmem:[%s16041_s4 + $0x1d8] sm:$0xf0]  ;;  %v8918_v21 = vld [vmem:[%s16041_s4 + $0x1d0] sm:$0xf] }
 0x62a   :  { %9168 = vmatmul.msk.bf16.gmra.mxu3 %vm4154_vm5, %v8891_v48  ;;  %9117 = vmatmul.msk.bf16.gmra.mxu1 %vm4154_vm5, %v8891_v48 }
 0x62b   :  { %4976 = vmatmul.bf16.gmra.mxu2 %v8887_v0  ;;  %5439 = vst [vmem:[%s16042_s5 + $0x220] sm:$0xff] %v4674_v52  ;;  %4448 = vmatmul.bf16.gmra.mxu0 %v8887_v0  ;;  %v10190_v0 = vld [vmem:[%s16041_s4 + $0x1d4] sm:$0xf]  ;;  %v10191_v52 = vld [vmem:[%s16041_s4 + $0x1d4] sm:$0xf0] }
 0x62d   :  { %v5201_v34 = vpop.f32.mrf.mxu3 }
 0x62e   :  { %v4937_v10 = vpop.f32.mrf.mxu2 }
 0x62f   :  { %v5202_v37 = vadd.f32 %v5201_v34, %v4937_v10  ;;  %v4675_v19 = vpop.f32.mrf.mxu1 }
 0x630   :  { %v4411_v12 = vpop.f32.mrf.mxu0 }
 0x631   :  { %5440 = vst [vmem:[%s16042_s5 + $0x228] sm:$0xff] %v5202_v37  ;;  %v4676_v29 = vadd.f32 %v4675_v19, %v4411_v12  ;;  %v8923_v37 = vor.u32 %v10190_v0, %v8920_v15  ;;  %v8919_v12 = vor.u32 %v10191_v52, %v8918_v21 }
 0x633   :  { %5441 = vst [vmem:[%s16042_s5 + $0x230] sm:$0xff] %v4676_v29 }
 0x635   :  { %v5203_v51 = vpop.f32.mrf.mxu3 }
 0x636   :  { %v4939_v47 = vpop.f32.mrf.mxu2 }
 0x637   :  { %v5204_v33 = vadd.f32 %v5203_v51, %v4939_v47  ;;  %v4678_v59 = vpop.f32.mrf.mxu1 }
 0x638   :  { %v4414_v26 = vpop.f32.mrf.mxu0 }
 0x639   :  { %5442 = vst [vmem:[%s16042_s5 + $0x238] sm:$0xff] %v5204_v33  ;;  %v4679_v41 = vadd.f32 %v4678_v59, %v4414_v26  ;;  %v8928_v59 = vld [vmem:[%s16041_s4 + $0x1e8] sm:$0xf0]  ;;  %v8926_v26 = vld [vmem:[%s16041_s4 + $0x1e0] sm:$0xf] }
 0x63a   :  { %9169 = vmatmul.msk.bf16.gmra.mxu3 %vm4154_vm5, %v8899_v62  ;;  %9118 = vmatmul.msk.bf16.gmra.mxu1 %vm4154_vm5, %v8899_v62 }
 0x63b   :  { %4981 = vmatmul.bf16.gmra.mxu2 %v8895_v18  ;;  %5443 = vst [vmem:[%s16042_s5 + $0x240] sm:$0xff] %v4679_v41  ;;  %4453 = vmatmul.bf16.gmra.mxu0 %v8895_v18  ;;  %v10192_v18 = vld [vmem:[%s16041_s4 + $0x1e4] sm:$0xf]  ;;  %v10193_v41 = vld [vmem:[%s16041_s4 + $0x1e4] sm:$0xf0] }
 0x63d   :  { %v5206_v42 = vpop.f32.mrf.mxu3 }
 0x63e   :  { %v4942_v53 = vpop.f32.mrf.mxu2 }
 0x63f   :  { %v5207_v45 = vadd.f32 %v5206_v42, %v4942_v53  ;;  %v4680_v39 = vpop.f32.mrf.mxu1 }
 0x640   :  { %v4416_v50 = vpop.f32.mrf.mxu0 }
 0x641   :  { %5444 = vst [vmem:[%s16042_s5 + $0x248] sm:$0xff] %v5207_v45  ;;  %v4681_v56 = vadd.f32 %v4680_v39, %v4416_v50  ;;  %v8931_v45 = vor.u32 %v10192_v18, %v8928_v59  ;;  %v8927_v50 = vor.u32 %v10193_v41, %v8926_v26 }
 0x643   :  { %5445 = vst [vmem:[%s16042_s5 + $0x250] sm:$0xff] %v4681_v56 }
 0x645   :  { %v5208_v14 = vpop.f32.mrf.mxu3 }
 0x646   :  { %v4944_v35 = vpop.f32.mrf.mxu2 }
 0x647   :  { %v5209_v3 = vadd.f32 %v5208_v14, %v4944_v35  ;;  %v4683_v46 = vpop.f32.mrf.mxu1 }
 0x648   :  { %v4419_v5 = vpop.f32.mrf.mxu0 }
 0x649   :  { %5446 = vst [vmem:[%s16042_s5 + $0x258] sm:$0xff] %v5209_v3  ;;  %v4684_v38 = vadd.f32 %v4683_v46, %v4419_v5  ;;  %v8936_v46 = vld [vmem:[%s16041_s4 + $0x1f8] sm:$0xf0]  ;;  %v8934_v5 = vld [vmem:[%s16041_s4 + $0x1f0] sm:$0xf] }
 0x64a   :  { %9170 = vmatmul.msk.bf16.gmra.mxu3 %vm4154_vm5, %v8907_v44  ;;  %9119 = vmatmul.msk.bf16.gmra.mxu1 %vm4154_vm5, %v8907_v44 }
 0x64b   :  { %4986 = vmatmul.bf16.gmra.mxu2 %v8903_v24  ;;  %5447 = vst [vmem:[%s16042_s5 + $0x260] sm:$0xff] %v4684_v38  ;;  %4458 = vmatmul.bf16.gmra.mxu0 %v8903_v24  ;;  %v10194_v24 = vld [vmem:[%s16041_s4 + $0x1f4] sm:$0xf]  ;;  %v10195_v38 = vld [vmem:[%s16041_s4 + $0x1f4] sm:$0xf0] }
 0x64d   :  { %v5211_v13 = vpop.f32.mrf.mxu3 }
 0x64e   :  { %v4947_v54 = vpop.f32.mrf.mxu2 }
 0x64f   :  { %v5212_v63 = vadd.f32 %v5211_v13, %v4947_v54  ;;  %v4685_v27 = vpop.f32.mrf.mxu1 }
 0x650   :  { %v4421_v25 = vpop.f32.mrf.mxu0 }
 0x651   :  { %5448 = vst [vmem:[%s16042_s5 + $0x268] sm:$0xff] %v5212_v63  ;;  %v4686_v61 = vadd.f32 %v4685_v27, %v4421_v25  ;;  %v8939_v63 = vor.u32 %v10194_v24, %v8936_v46  ;;  %v8935_v25 = vor.u32 %v10195_v38, %v8934_v5 }
 0x653   :  { %5449 = vst [vmem:[%s16042_s5 + $0x270] sm:$0xff] %v4686_v61 }
 0x655   :  { %v5213_v58 = vpop.f32.mrf.mxu3 }
 0x656   :  { %v4949_v40 = vpop.f32.mrf.mxu2 }
 0x657   :  { %v5214_v36 = vadd.f32 %v5213_v58, %v4949_v40  ;;  %v4688_v55 = vpop.f32.mrf.mxu1 }
 0x658   :  { %v4424_v43 = vpop.f32.mrf.mxu0 }
 0x659   :  { %5450 = vst [vmem:[%s16042_s5 + $0x278] sm:$0xff] %v5214_v36  ;;  %v4689_v11 = vadd.f32 %v4688_v55, %v4424_v43  ;;  %v8944_v55 = vld [vmem:[%s16041_s4 + $0x208] sm:$0xf0]  ;;  %v8942_v43 = vld [vmem:[%s16041_s4 + $0x200] sm:$0xf] }
 0x65a   :  { %9171 = vmatmul.msk.bf16.gmra.mxu3 %vm4154_vm5, %v8915_v16  ;;  %9120 = vmatmul.msk.bf16.gmra.mxu1 %vm4154_vm5, %v8915_v16 }
 0x65b   :  { %4991 = vmatmul.bf16.gmra.mxu2 %v8911_v22  ;;  %5451 = vst [vmem:[%s16042_s5 + $0x280] sm:$0xff] %v4689_v11  ;;  %4463 = vmatmul.bf16.gmra.mxu0 %v8911_v22  ;;  %v10196_v22 = vld [vmem:[%s16041_s4 + $0x204] sm:$0xf]  ;;  %v10197_v11 = vld [vmem:[%s16041_s4 + $0x204] sm:$0xf0] }
 0x65d   :  { %v5216_v30 = vpop.f32.mrf.mxu3 }
 0x65e   :  { %v4952_v57 = vpop.f32.mrf.mxu2 }
 0x65f   :  { %v5217_v31 = vadd.f32 %v5216_v30, %v4952_v57  ;;  %v4690_v20 = vpop.f32.mrf.mxu1 }
 0x660   :  { %v4426_v48 = vpop.f32.mrf.mxu0 }
 0x661   :  { %5452 = vst [vmem:[%s16042_s5 + $0x288] sm:$0xff] %v5217_v31  ;;  %v4691_v28 = vadd.f32 %v4690_v20, %v4426_v48  ;;  %v8947_v31 = vor.u32 %v10196_v22, %v8944_v55  ;;  %v8943_v48 = vor.u32 %v10197_v11, %v8942_v43 }
 0x663   :  { %5453 = vst [vmem:[%s16042_s5 + $0x290] sm:$0xff] %v4691_v28 }
 0x665   :  { %v5218_v34 = vpop.f32.mrf.mxu3 }
 0x666   :  { %v4954_v10 = vpop.f32.mrf.mxu2 }
 0x667   :  { %v5219_v19 = vadd.f32 %v5218_v34, %v4954_v10  ;;  %v4693_v29 = vpop.f32.mrf.mxu1 }
 0x668   :  { %v4429_v17 = vpop.f32.mrf.mxu0 }
 0x669   :  { %5454 = vst [vmem:[%s16042_s5 + $0x298] sm:$0xff] %v5219_v19  ;;  %v4694_v32 = vadd.f32 %v4693_v29, %v4429_v17  ;;  %v8952_v29 = vld [vmem:[%s16041_s4 + $0x218] sm:$0xf0]  ;;  %v8950_v17 = vld [vmem:[%s16041_s4 + $0x210] sm:$0xf] }
 0x66a   :  { %9172 = vmatmul.msk.bf16.gmra.mxu3 %vm4154_vm5, %v8923_v37  ;;  %9121 = vmatmul.msk.bf16.gmra.mxu1 %vm4154_vm5, %v8923_v37 }
 0x66b   :  { %4996 = vmatmul.bf16.gmra.mxu2 %v8919_v12  ;;  %5455 = vst [vmem:[%s16042_s5 + $0x2a0] sm:$0xff] %v4694_v32  ;;  %4468 = vmatmul.bf16.gmra.mxu0 %v8919_v12  ;;  %v10198_v12 = vld [vmem:[%s16041_s4 + $0x214] sm:$0xf]  ;;  %v10199_v32 = vld [vmem:[%s16041_s4 + $0x214] sm:$0xf0] }
 0x66d   :  { %v5221_v4 = vpop.f32.mrf.mxu3 }
 0x66e   :  { %v4957_v1 = vpop.f32.mrf.mxu2 }
 0x66f   :  { %v5222_v51 = vadd.f32 %v5221_v4, %v4957_v1  ;;  %v4695_v47 = vpop.f32.mrf.mxu1 }
 0x670   :  { %v4431_v62 = vpop.f32.mrf.mxu0 }
 0x671   :  { %5456 = vst [vmem:[%s16042_s5 + $0x2a8] sm:$0xff] %v5222_v51  ;;  %v4696_v33 = vadd.f32 %v4695_v47, %v4431_v62  ;;  %v8955_v51 = vor.u32 %v10198_v12, %v8952_v29  ;;  %v8951_v62 = vor.u32 %v10199_v32, %v8950_v17 }
 0x673   :  { %5457 = vst [vmem:[%s16042_s5 + $0x2b0] sm:$0xff] %v4696_v33 }
 0x675   :  { %v5223_v42 = vpop.f32.mrf.mxu3 }
 0x676   :  { %v4959_v53 = vpop.f32.mrf.mxu2 }
 0x677   :  { %v5224_v39 = vadd.f32 %v5223_v42, %v4959_v53  ;;  %v4698_v56 = vpop.f32.mrf.mxu1 }
 0x678   :  { %v4434_v49 = vpop.f32.mrf.mxu0 }
 0x679   :  { %5458 = vst [vmem:[%s16042_s5 + $0x2b8] sm:$0xff] %v5224_v39  ;;  %v4699_v23 = vadd.f32 %v4698_v56, %v4434_v49  ;;  %v8960_v56 = vld [vmem:[%s16041_s4 + $0x228] sm:$0xf0]  ;;  %v8958_v49 = vld [vmem:[%s16041_s4 + $0x220] sm:$0xf] }
 0x67a   :  { %9173 = vmatmul.msk.bf16.gmra.mxu3 %vm4154_vm5, %v8931_v45  ;;  %9122 = vmatmul.msk.bf16.gmra.mxu1 %vm4154_vm5, %v8931_v45 }
 0x67b   :  { %5001 = vmatmul.bf16.gmra.mxu2 %v8927_v50  ;;  %5459 = vst [vmem:[%s16042_s5 + $0x2c0] sm:$0xff] %v4699_v23  ;;  %4473 = vmatmul.bf16.gmra.mxu0 %v8927_v50  ;;  %v10200_v50 = vld [vmem:[%s16041_s4 + $0x224] sm:$0xf]  ;;  %v10201_v23 = vld [vmem:[%s16041_s4 + $0x224] sm:$0xf0] }
 0x67d   :  { %v5226_v8 = vpop.f32.mrf.mxu3 }
 0x67e   :  { %v4962_v60 = vpop.f32.mrf.mxu2 }
 0x67f   :  { %v5227_v14 = vadd.f32 %v5226_v8, %v4962_v60  ;;  %v4700_v35 = vpop.f32.mrf.mxu1 }
 0x680   :  { %v4436_v44 = vpop.f32.mrf.mxu0 }
 0x681   :  { %5460 = vst [vmem:[%s16042_s5 + $0x2c8] sm:$0xff] %v5227_v14  ;;  %v4701_v3 = vadd.f32 %v4700_v35, %v4436_v44  ;;  %v8963_v14 = vor.u32 %v10200_v50, %v8960_v56  ;;  %v8959_v44 = vor.u32 %v10201_v23, %v8958_v49 }
 0x683   :  { %5461 = vst [vmem:[%s16042_s5 + $0x2d0] sm:$0xff] %v4701_v3 }
 0x685   :  { %v5228_v13 = vpop.f32.mrf.mxu3 }
 0x686   :  { %v4964_v54 = vpop.f32.mrf.mxu2 }
 0x687   :  { %v5229_v27 = vadd.f32 %v5228_v13, %v4964_v54  ;;  %v4703_v61 = vpop.f32.mrf.mxu1 }
 0x688   :  { %v4439_v7 = vpop.f32.mrf.mxu0 }
 0x689   :  { %5462 = vst [vmem:[%s16042_s5 + $0x2d8] sm:$0xff] %v5229_v27  ;;  %v4704_v2 = vadd.f32 %v4703_v61, %v4439_v7  ;;  %v8968_v61 = vld [vmem:[%s16041_s4 + $0x238] sm:$0xf0]  ;;  %v8966_v7 = vld [vmem:[%s16041_s4 + $0x230] sm:$0xf] }
 0x68a   :  { %9174 = vmatmul.msk.bf16.gmra.mxu3 %vm4154_vm5, %v8939_v63  ;;  %9123 = vmatmul.msk.bf16.gmra.mxu1 %vm4154_vm5, %v8939_v63 }
 0x68b   :  { %5006 = vmatmul.bf16.gmra.mxu2 %v8935_v25  ;;  %5463 = vst [vmem:[%s16042_s5 + $0x2e0] sm:$0xff] %v4704_v2  ;;  %4478 = vmatmul.bf16.gmra.mxu0 %v8935_v25  ;;  %v10202_v25 = vld [vmem:[%s16041_s4 + $0x234] sm:$0xf]  ;;  %v10203_v2 = vld [vmem:[%s16041_s4 + $0x234] sm:$0xf0] }
 0x68d   :  { %v5231_v6 = vpop.f32.mrf.mxu3 }
 0x68e   :  { %v4967_v9 = vpop.f32.mrf.mxu2 }
 0x68f   :  { %v5232_v58 = vadd.f32 %v5231_v6, %v4967_v9  ;;  %v4705_v40 = vpop.f32.mrf.mxu1 }
 0x690   :  { %v4441_v16 = vpop.f32.mrf.mxu0 }
 0x691   :  { %5464 = vst [vmem:[%s16042_s5 + $0x2e8] sm:$0xff] %v5232_v58  ;;  %v4706_v36 = vadd.f32 %v4705_v40, %v4441_v16  ;;  %v8971_v58 = vor.u32 %v10202_v25, %v8968_v61  ;;  %v8967_v16 = vor.u32 %v10203_v2, %v8966_v7 }
 0x693   :  { %5465 = vst [vmem:[%s16042_s5 + $0x2f0] sm:$0xff] %v4706_v36 }
 0x695   :  { %v5233_v30 = vpop.f32.mrf.mxu3 }
 0x696   :  { %v4969_v57 = vpop.f32.mrf.mxu2 }
 0x697   :  { %v5234_v20 = vadd.f32 %v5233_v30, %v4969_v57  ;;  %v4708_v28 = vpop.f32.mrf.mxu1 }
 0x698   :  { %v4444_v0 = vpop.f32.mrf.mxu0 }
 0x699   :  { %5466 = vst [vmem:[%s16042_s5 + $0x2f8] sm:$0xff] %v5234_v20  ;;  %v4709_v15 = vadd.f32 %v4708_v28, %v4444_v0  ;;  %v8976_v28 = vld [vmem:[%s16041_s4 + $0x248] sm:$0xf0]  ;;  %v8974_v0 = vld [vmem:[%s16041_s4 + $0x240] sm:$0xf] }
 0x69a   :  { %9175 = vmatmul.msk.bf16.gmra.mxu3 %vm4154_vm5, %v8947_v31  ;;  %9124 = vmatmul.msk.bf16.gmra.mxu1 %vm4154_vm5, %v8947_v31 }
 0x69b   :  { %5011 = vmatmul.bf16.gmra.mxu2 %v8943_v48  ;;  %5467 = vst [vmem:[%s16042_s5 + $0x300] sm:$0xff] %v4709_v15  ;;  %4483 = vmatmul.bf16.gmra.mxu0 %v8943_v48  ;;  %v10204_v48 = vld [vmem:[%s16041_s4 + $0x244] sm:$0xf]  ;;  %v10205_v15 = vld [vmem:[%s16041_s4 + $0x244] sm:$0xf0] }
 0x69d   :  { %v5236_v21 = vpop.f32.mrf.mxu3 }
 0x69e   :  { %v4972_v52 = vpop.f32.mrf.mxu2 }
 0x69f   :  { %v5237_v34 = vadd.f32 %v5236_v21, %v4972_v52  ;;  %v4710_v10 = vpop.f32.mrf.mxu1 }
 0x6a0   :  { %v4446_v37 = vpop.f32.mrf.mxu0 }
 0x6a1   :  { %5468 = vst [vmem:[%s16042_s5 + $0x308] sm:$0xff] %v5237_v34  ;;  %v4711_v19 = vadd.f32 %v4710_v10, %v4446_v37  ;;  %v8979_v34 = vor.u32 %v10204_v48, %v8976_v28  ;;  %v8975_v37 = vor.u32 %v10205_v15, %v8974_v0 }
 0x6a3   :  { %5469 = vst [vmem:[%s16042_s5 + $0x310] sm:$0xff] %v4711_v19 }
 0x6a5   :  { %v5238_v4 = vpop.f32.mrf.mxu3 }
 0x6a6   :  { %v4974_v1 = vpop.f32.mrf.mxu2 }
 0x6a7   :  { %v5239_v47 = vadd.f32 %v5238_v4, %v4974_v1  ;;  %v4713_v33 = vpop.f32.mrf.mxu1 }
 0x6a8   :  { %v4449_v18 = vpop.f32.mrf.mxu0 }
 0x6a9   :  { %5470 = vst [vmem:[%s16042_s5 + $0x318] sm:$0xff] %v5239_v47  ;;  %v4714_v59 = vadd.f32 %v4713_v33, %v4449_v18  ;;  %v8984_v33 = vld [vmem:[%s16041_s4 + $0x258] sm:$0xf0]  ;;  %v8982_v18 = vld [vmem:[%s16041_s4 + $0x250] sm:$0xf] }
 0x6aa   :  { %9176 = vmatmul.msk.bf16.gmra.mxu3 %vm4154_vm5, %v8955_v51  ;;  %9125 = vmatmul.msk.bf16.gmra.mxu1 %vm4154_vm5, %v8955_v51 }
 0x6ab   :  { %5016 = vmatmul.bf16.gmra.mxu2 %v8951_v62  ;;  %5471 = vst [vmem:[%s16042_s5 + $0x320] sm:$0xff] %v4714_v59  ;;  %4488 = vmatmul.bf16.gmra.mxu0 %v8951_v62  ;;  %v10206_v62 = vld [vmem:[%s16041_s4 + $0x254] sm:$0xf]  ;;  %v10207_v59 = vld [vmem:[%s16041_s4 + $0x254] sm:$0xf0] }
 0x6ad   :  { %v5241_v26 = vpop.f32.mrf.mxu3 }
 0x6ae   :  { %v4977_v41 = vpop.f32.mrf.mxu2 }
 0x6af   :  { %v5242_v42 = vadd.f32 %v5241_v26, %v4977_v41  ;;  %v4715_v53 = vpop.f32.mrf.mxu1 }
 0x6b0   :  { %v4451_v45 = vpop.f32.mrf.mxu0 }
 0x6b1   :  { %5472 = vst [vmem:[%s16042_s5 + $0x328] sm:$0xff] %v5242_v42  ;;  %v4716_v39 = vadd.f32 %v4715_v53, %v4451_v45  ;;  %v8987_v42 = vor.u32 %v10206_v62, %v8984_v33  ;;  %v8983_v45 = vor.u32 %v10207_v59, %v8982_v18 }
 0x6b3   :  { %5473 = vst [vmem:[%s16042_s5 + $0x330] sm:$0xff] %v4716_v39 }
 0x6b5   :  { %v5243_v8 = vpop.f32.mrf.mxu3 }
 0x6b6   :  { %v4979_v60 = vpop.f32.mrf.mxu2 }
 0x6b7   :  { %v5244_v35 = vadd.f32 %v5243_v8, %v4979_v60  ;;  %v4718_v3 = vpop.f32.mrf.mxu1 }
 0x6b8   :  { %v4454_v24 = vpop.f32.mrf.mxu0 }
 0x6b9   :  { %5474 = vst [vmem:[%s16042_s5 + $0x338] sm:$0xff] %v5244_v35  ;;  %v4719_v46 = vadd.f32 %v4718_v3, %v4454_v24  ;;  %v8992_v3 = vld [vmem:[%s16041_s4 + $0x268] sm:$0xf0]  ;;  %v8990_v24 = vld [vmem:[%s16041_s4 + $0x260] sm:$0xf] }
 0x6ba   :  { %9177 = vmatmul.msk.bf16.gmra.mxu3 %vm4154_vm5, %v8963_v14  ;;  %9126 = vmatmul.msk.bf16.gmra.mxu1 %vm4154_vm5, %v8963_v14 }
 0x6bb   :  { %5021 = vmatmul.bf16.gmra.mxu2 %v8959_v44  ;;  %5475 = vst [vmem:[%s16042_s5 + $0x340] sm:$0xff] %v4719_v46  ;;  %4493 = vmatmul.bf16.gmra.mxu0 %v8959_v44  ;;  %v10208_v44 = vld [vmem:[%s16041_s4 + $0x264] sm:$0xf]  ;;  %v10209_v46 = vld [vmem:[%s16041_s4 + $0x264] sm:$0xf0] }
 0x6bd   :  { %v5246_v5 = vpop.f32.mrf.mxu3 }
 0x6be   :  { %v4982_v38 = vpop.f32.mrf.mxu2 }
 0x6bf   :  { %v5247_v13 = vadd.f32 %v5246_v5, %v4982_v38  ;;  %v4720_v54 = vpop.f32.mrf.mxu1 }
 0x6c0   :  { %v4456_v63 = vpop.f32.mrf.mxu0 }
 0x6c1   :  { %5476 = vst [vmem:[%s16042_s5 + $0x348] sm:$0xff] %v5247_v13  ;;  %v4721_v27 = vadd.f32 %v4720_v54, %v4456_v63  ;;  %v8995_v13 = vor.u32 %v10208_v44, %v8992_v3  ;;  %v8991_v63 = vor.u32 %v10209_v46, %v8990_v24 }
 0x6c3   :  { %5477 = vst [vmem:[%s16042_s5 + $0x350] sm:$0xff] %v4721_v27 }
 0x6c5   :  { %v5248_v6 = vpop.f32.mrf.mxu3 }
 0x6c6   :  { %v4984_v9 = vpop.f32.mrf.mxu2 }
 0x6c7   :  { %v5249_v40 = vadd.f32 %v5248_v6, %v4984_v9  ;;  %v4723_v36 = vpop.f32.mrf.mxu1 }
 0x6c8   :  { %v4459_v22 = vpop.f32.mrf.mxu0 }
 0x6c9   :  { %5478 = vst [vmem:[%s16042_s5 + $0x358] sm:$0xff] %v5249_v40  ;;  %v4724_v55 = vadd.f32 %v4723_v36, %v4459_v22  ;;  %v9000_v36 = vld [vmem:[%s16041_s4 + $0x278] sm:$0xf0]  ;;  %v8998_v22 = vld [vmem:[%s16041_s4 + $0x270] sm:$0xf] }
 0x6ca   :  { %9178 = vmatmul.msk.bf16.gmra.mxu3 %vm4154_vm5, %v8971_v58  ;;  %9127 = vmatmul.msk.bf16.gmra.mxu1 %vm4154_vm5, %v8971_v58 }
 0x6cb   :  { %5026 = vmatmul.bf16.gmra.mxu2 %v8967_v16  ;;  %5479 = vst [vmem:[%s16042_s5 + $0x360] sm:$0xff] %v4724_v55  ;;  %4498 = vmatmul.bf16.gmra.mxu0 %v8967_v16  ;;  %v10210_v16 = vld [vmem:[%s16041_s4 + $0x274] sm:$0xf]  ;;  %v10211_v55 = vld [vmem:[%s16041_s4 + $0x274] sm:$0xf0] }
 0x6cd   :  { %v5251_v43 = vpop.f32.mrf.mxu3 }
 0x6ce   :  { %v4987_v11 = vpop.f32.mrf.mxu2 }
 0x6cf   :  { %v5252_v30 = vadd.f32 %v5251_v43, %v4987_v11  ;;  %v4725_v57 = vpop.f32.mrf.mxu1 }
 0x6d0   :  { %v4461_v31 = vpop.f32.mrf.mxu0 }
 0x6d1   :  { %5480 = vst [vmem:[%s16042_s5 + $0x368] sm:$0xff] %v5252_v30  ;;  %v4726_v20 = vadd.f32 %v4725_v57, %v4461_v31  ;;  %v9003_v30 = vor.u32 %v10210_v16, %v9000_v36  ;;  %v8999_v31 = vor.u32 %v10211_v55, %v8998_v22 }
 0x6d3   :  { %5481 = vst [vmem:[%s16042_s5 + $0x370] sm:$0xff] %v4726_v20 }
 0x6d5   :  { %v5253_v21 = vpop.f32.mrf.mxu3 }
 0x6d6   :  { %v4989_v52 = vpop.f32.mrf.mxu2 }
 0x6d7   :  { %v5254_v10 = vadd.f32 %v5253_v21, %v4989_v52  ;;  %v4728_v19 = vpop.f32.mrf.mxu1 }
 0x6d8   :  { %v4464_v12 = vpop.f32.mrf.mxu0 }
 0x6d9   :  { %5482 = vst [vmem:[%s16042_s5 + $0x378] sm:$0xff] %v5254_v10  ;;  %v4729_v29 = vadd.f32 %v4728_v19, %v4464_v12  ;;  %v9008_v19 = vld [vmem:[%s16041_s4 + $0x288] sm:$0xf0]  ;;  %v9006_v12 = vld [vmem:[%s16041_s4 + $0x280] sm:$0xf] }
 0x6da   :  { %9179 = vmatmul.msk.bf16.gmra.mxu3 %vm4154_vm5, %v8979_v34  ;;  %9128 = vmatmul.msk.bf16.gmra.mxu1 %vm4154_vm5, %v8979_v34 }
 0x6db   :  { %5031 = vmatmul.bf16.gmra.mxu2 %v8975_v37  ;;  %5483 = vst [vmem:[%s16042_s5 + $0x380] sm:$0xff] %v4729_v29  ;;  %4503 = vmatmul.bf16.gmra.mxu0 %v8975_v37  ;;  %v10212_v37 = vld [vmem:[%s16041_s4 + $0x284] sm:$0xf]  ;;  %v10213_v29 = vld [vmem:[%s16041_s4 + $0x284] sm:$0xf0] }
 0x6dd   :  { %v5256_v17 = vpop.f32.mrf.mxu3 }
 0x6de   :  { %v4992_v32 = vpop.f32.mrf.mxu2 }
 0x6df   :  { %v5257_v4 = vadd.f32 %v5256_v17, %v4992_v32  ;;  %v4730_v1 = vpop.f32.mrf.mxu1 }
 0x6e0   :  { %v4466_v51 = vpop.f32.mrf.mxu0 }
 0x6e1   :  { %5484 = vst [vmem:[%s16042_s5 + $0x388] sm:$0xff] %v5257_v4  ;;  %v4731_v47 = vadd.f32 %v4730_v1, %v4466_v51  ;;  %v9011_v4 = vor.u32 %v10212_v37, %v9008_v19  ;;  %v9007_v51 = vor.u32 %v10213_v29, %v9006_v12 }
 0x6e3   :  { %5485 = vst [vmem:[%s16042_s5 + $0x390] sm:$0xff] %v4731_v47 }
 0x6e5   :  { %v5258_v26 = vpop.f32.mrf.mxu3 }
 0x6e6   :  { %v4994_v41 = vpop.f32.mrf.mxu2 }
 0x6e7   :  { %v5259_v53 = vadd.f32 %v5258_v26, %v4994_v41  ;;  %v4733_v39 = vpop.f32.mrf.mxu1 }
 0x6e8   :  { %v4469_v50 = vpop.f32.mrf.mxu0 }
 0x6e9   :  { %5486 = vst [vmem:[%s16042_s5 + $0x398] sm:$0xff] %v5259_v53  ;;  %v4734_v56 = vadd.f32 %v4733_v39, %v4469_v50  ;;  %v9016_v39 = vld [vmem:[%s16041_s4 + $0x298] sm:$0xf0]  ;;  %v9014_v50 = vld [vmem:[%s16041_s4 + $0x290] sm:$0xf] }
 0x6ea   :  { %9180 = vmatmul.msk.bf16.gmra.mxu3 %vm4154_vm5, %v8987_v42  ;;  %9129 = vmatmul.msk.bf16.gmra.mxu1 %vm4154_vm5, %v8987_v42 }
 0x6eb   :  { %5036 = vmatmul.bf16.gmra.mxu2 %v8983_v45  ;;  %5487 = vst [vmem:[%s16042_s5 + $0x3a0] sm:$0xff] %v4734_v56  ;;  %4508 = vmatmul.bf16.gmra.mxu0 %v8983_v45  ;;  %v10214_v45 = vld [vmem:[%s16041_s4 + $0x294] sm:$0xf]  ;;  %v10215_v56 = vld [vmem:[%s16041_s4 + $0x294] sm:$0xf0] }
 0x6ed   :  { %v5261_v49 = vpop.f32.mrf.mxu3 }
 0x6ee   :  { %v4997_v23 = vpop.f32.mrf.mxu2 }
 0x6ef   :  { %v5262_v8 = vadd.f32 %v5261_v49, %v4997_v23  ;;  %v4735_v60 = vpop.f32.mrf.mxu1 }
 0x6f0   :  { %v4471_v14 = vpop.f32.mrf.mxu0 }
 0x6f1   :  { %5488 = vst [vmem:[%s16042_s5 + $0x3a8] sm:$0xff] %v5262_v8  ;;  %v4736_v35 = vadd.f32 %v4735_v60, %v4471_v14  ;;  %v9019_v8 = vor.u32 %v10214_v45, %v9016_v39  ;;  %v9015_v14 = vor.u32 %v10215_v56, %v9014_v50 }
 0x6f3   :  { %5489 = vst [vmem:[%s16042_s5 + $0x3b0] sm:$0xff] %v4736_v35 }
 0x6f5   :  { %v5263_v5 = vpop.f32.mrf.mxu3 }
 0x6f6   :  { %v4999_v38 = vpop.f32.mrf.mxu2 }
 0x6f7   :  { %v5264_v54 = vadd.f32 %v5263_v5, %v4999_v38  ;;  %v4738_v27 = vpop.f32.mrf.mxu1 }
 0x6f8   :  { %v4474_v25 = vpop.f32.mrf.mxu0 }
 0x6f9   :  { %5490 = vst [vmem:[%s16042_s5 + $0x3b8] sm:$0xff] %v5264_v54  ;;  %v4739_v61 = vadd.f32 %v4738_v27, %v4474_v25  ;;  %v9024_v27 = vld [vmem:[%s16041_s4 + $0x2a8] sm:$0xf0]  ;;  %v9022_v25 = vld [vmem:[%s16041_s4 + $0x2a0] sm:$0xf] }
 0x6fa   :  { %9181 = vmatmul.msk.bf16.gmra.mxu3 %vm4154_vm5, %v8995_v13  ;;  %9130 = vmatmul.msk.bf16.gmra.mxu1 %vm4154_vm5, %v8995_v13 }
 0x6fb   :  { %5041 = vmatmul.bf16.gmra.mxu2 %v8991_v63  ;;  %5491 = vst [vmem:[%s16042_s5 + $0x3c0] sm:$0xff] %v4739_v61  ;;  %4513 = vmatmul.bf16.gmra.mxu0 %v8991_v63  ;;  %v10216_v63 = vld [vmem:[%s16041_s4 + $0x2a4] sm:$0xf]  ;;  %v10217_v61 = vld [vmem:[%s16041_s4 + $0x2a4] sm:$0xf0] }
 0x6fd   :  { %v5266_v7 = vpop.f32.mrf.mxu3 }
 0x6fe   :  { %v5002_v2 = vpop.f32.mrf.mxu2 }
 0x6ff   :  { %v5267_v6 = vadd.f32 %v5266_v7, %v5002_v2  ;;  %v4740_v9 = vpop.f32.mrf.mxu1 }
 0x700   :  { %v4476_v58 = vpop.f32.mrf.mxu0 }
 0x701   :  { %5492 = vst [vmem:[%s16042_s5 + $0x3c8] sm:$0xff] %v5267_v6  ;;  %v4741_v40 = vadd.f32 %v4740_v9, %v4476_v58  ;;  %v9027_v6 = vor.u32 %v10216_v63, %v9024_v27  ;;  %v9023_v58 = vor.u32 %v10217_v61, %v9022_v25 }
 0x703   :  { %5493 = vst [vmem:[%s16042_s5 + $0x3d0] sm:$0xff] %v4741_v40 }
 0x705   :  { %v5268_v43 = vpop.f32.mrf.mxu3 }
 0x706   :  { %v5004_v11 = vpop.f32.mrf.mxu2 }
 0x707   :  { %v5269_v57 = vadd.f32 %v5268_v43, %v5004_v11  ;;  %v4743_v20 = vpop.f32.mrf.mxu1 }
 0x708   :  { %v4479_v48 = vpop.f32.mrf.mxu0 }
 0x709   :  { %5494 = vst [vmem:[%s16042_s5 + $0x3d8] sm:$0xff] %v5269_v57  ;;  %v4744_v28 = vadd.f32 %v4743_v20, %v4479_v48  ;;  %v9032_v20 = vld [vmem:[%s16041_s4 + $0x2b8] sm:$0xf0]  ;;  %v9030_v48 = vld [vmem:[%s16041_s4 + $0x2b0] sm:$0xf] }
 0x70a   :  { %9182 = vmatmul.msk.bf16.gmra.mxu3 %vm4154_vm5, %v9003_v30  ;;  %9131 = vmatmul.msk.bf16.gmra.mxu1 %vm4154_vm5, %v9003_v30 }
 0x70b   :  { %5046 = vmatmul.bf16.gmra.mxu2 %v8999_v31  ;;  %5495 = vst [vmem:[%s16042_s5 + $0x3e0] sm:$0xff] %v4744_v28  ;;  %4518 = vmatmul.bf16.gmra.mxu0 %v8999_v31  ;;  %v10218_v31 = vld [vmem:[%s16041_s4 + $0x2b4] sm:$0xf]  ;;  %v10219_v28 = vld [vmem:[%s16041_s4 + $0x2b4] sm:$0xf0] }
 0x70d   :  { %v5271_v0 = vpop.f32.mrf.mxu3 }
 0x70e   :  { %v5007_v15 = vpop.f32.mrf.mxu2 }
 0x70f   :  { %v5272_v21 = vadd.f32 %v5271_v0, %v5007_v15  ;;  %v4745_v52 = vpop.f32.mrf.mxu1 }
 0x710   :  { %v4481_v34 = vpop.f32.mrf.mxu0 }
 0x711   :  { %5496 = vst [vmem:[%s16042_s5 + $0x3e8] sm:$0xff] %v5272_v21  ;;  %v4746_v10 = vadd.f32 %v4745_v52, %v4481_v34  ;;  %v9035_v21 = vor.u32 %v10218_v31, %v9032_v20  ;;  %v9031_v34 = vor.u32 %v10219_v28, %v9030_v48 }
 0x713   :  { %5497 = vst [vmem:[%s16042_s5 + $0x3f0] sm:$0xff] %v4746_v10 }
 0x715   :  { %v5273_v17 = vpop.f32.mrf.mxu3 }
 0x716   :  { %v5009_v32 = vpop.f32.mrf.mxu2 }
 0x717   :  { %v5274_v1 = vadd.f32 %v5273_v17, %v5009_v32  ;;  %v4748_v47 = vpop.f32.mrf.mxu1 }
 0x718   :  { %v4484_v62 = vpop.f32.mrf.mxu0 }
 0x719   :  { %5498 = vst [vmem:[%s16042_s5 + $0x3f8] sm:$0xff] %v5274_v1  ;;  %v4749_v33 = vadd.f32 %v4748_v47, %v4484_v62  ;;  %v9040_v47 = vld [vmem:[%s16041_s4 + $0x2c8] sm:$0xf0]  ;;  %v9038_v62 = vld [vmem:[%s16041_s4 + $0x2c0] sm:$0xf] }
 0x71a   :  { %9183 = vmatmul.msk.bf16.gmra.mxu3 %vm4154_vm5, %v9011_v4  ;;  %9132 = vmatmul.msk.bf16.gmra.mxu1 %vm4154_vm5, %v9011_v4 }
 0x71b   :  { %5051 = vmatmul.bf16.gmra.mxu2 %v9007_v51  ;;  %5499 = vst [vmem:[%s16042_s5 + $0x400] sm:$0xff] %v4749_v33  ;;  %4523 = vmatmul.bf16.gmra.mxu0 %v9007_v51  ;;  %v10220_v51 = vld [vmem:[%s16041_s4 + $0x2c4] sm:$0xf]  ;;  %v10221_v33 = vld [vmem:[%s16041_s4 + $0x2c4] sm:$0xf0] }
 0x71d   :  { %v5276_v18 = vpop.f32.mrf.mxu3 }
 0x71e   :  { %v5012_v59 = vpop.f32.mrf.mxu2 }
 0x71f   :  { %v5277_v26 = vadd.f32 %v5276_v18, %v5012_v59  ;;  %v4750_v41 = vpop.f32.mrf.mxu1 }
 0x720   :  { %v4486_v42 = vpop.f32.mrf.mxu0 }
 0x721   :  { %5500 = vst [vmem:[%s16042_s5 + $0x408] sm:$0xff] %v5277_v26  ;;  %v4751_v53 = vadd.f32 %v4750_v41, %v4486_v42  ;;  %v9043_v26 = vor.u32 %v10220_v51, %v9040_v47  ;;  %v9039_v42 = vor.u32 %v10221_v33, %v9038_v62 }
 0x723   :  { %5501 = vst [vmem:[%s16042_s5 + $0x410] sm:$0xff] %v4751_v53 }
 0x725   :  { %v5278_v49 = vpop.f32.mrf.mxu3 }
 0x726   :  { %v5014_v23 = vpop.f32.mrf.mxu2 }
 0x727   :  { %v5279_v60 = vadd.f32 %v5278_v49, %v5014_v23  ;;  %v4753_v35 = vpop.f32.mrf.mxu1 }
 0x728   :  { %v4489_v44 = vpop.f32.mrf.mxu0 }
 0x729   :  { %5502 = vst [vmem:[%s16042_s5 + $0x418] sm:$0xff] %v5279_v60  ;;  %v4754_v3 = vadd.f32 %v4753_v35, %v4489_v44  ;;  %v9048_v35 = vld [vmem:[%s16041_s4 + $0x2d8] sm:$0xf0]  ;;  %v9046_v44 = vld [vmem:[%s16041_s4 + $0x2d0] sm:$0xf] }
 0x72a   :  { %9184 = vmatmul.msk.bf16.gmra.mxu3 %vm4154_vm5, %v9019_v8  ;;  %9133 = vmatmul.msk.bf16.gmra.mxu1 %vm4154_vm5, %v9019_v8 }
 0x72b   :  { %5056 = vmatmul.bf16.gmra.mxu2 %v9015_v14  ;;  %5503 = vst [vmem:[%s16042_s5 + $0x420] sm:$0xff] %v4754_v3  ;;  %4528 = vmatmul.bf16.gmra.mxu0 %v9015_v14  ;;  %v10222_v14 = vld [vmem:[%s16041_s4 + $0x2d4] sm:$0xf]  ;;  %v10223_v3 = vld [vmem:[%s16041_s4 + $0x2d4] sm:$0xf0] }
 0x72d   :  { %v5281_v24 = vpop.f32.mrf.mxu3 }
 0x72e   :  { %v5017_v46 = vpop.f32.mrf.mxu2 }
 0x72f   :  { %v5282_v5 = vadd.f32 %v5281_v24, %v5017_v46  ;;  %v4755_v38 = vpop.f32.mrf.mxu1 }
 0x730   :  { %v4491_v13 = vpop.f32.mrf.mxu0 }
 0x731   :  { %5504 = vst [vmem:[%s16042_s5 + $0x428] sm:$0xff] %v5282_v5  ;;  %v4756_v54 = vadd.f32 %v4755_v38, %v4491_v13  ;;  %v9051_v5 = vor.u32 %v10222_v14, %v9048_v35  ;;  %v9047_v13 = vor.u32 %v10223_v3, %v9046_v44 }
 0x733   :  { %5505 = vst [vmem:[%s16042_s5 + $0x430] sm:$0xff] %v4756_v54 }
 0x735   :  { %v5283_v7 = vpop.f32.mrf.mxu3 }
 0x736   :  { %v5019_v2 = vpop.f32.mrf.mxu2 }
 0x737   :  { %v5284_v9 = vadd.f32 %v5283_v7, %v5019_v2  ;;  %v4758_v40 = vpop.f32.mrf.mxu1 }
 0x738   :  { %v4494_v16 = vpop.f32.mrf.mxu0 }
 0x739   :  { %5506 = vst [vmem:[%s16042_s5 + $0x438] sm:$0xff] %v5284_v9  ;;  %v4759_v36 = vadd.f32 %v4758_v40, %v4494_v16  ;;  %v9056_v40 = vld [vmem:[%s16041_s4 + $0x2e8] sm:$0xf0]  ;;  %v9054_v16 = vld [vmem:[%s16041_s4 + $0x2e0] sm:$0xf] }
 0x73a   :  { %9185 = vmatmul.msk.bf16.gmra.mxu3 %vm4154_vm5, %v9027_v6  ;;  %9134 = vmatmul.msk.bf16.gmra.mxu1 %vm4154_vm5, %v9027_v6 }
 0x73b   :  { %5061 = vmatmul.bf16.gmra.mxu2 %v9023_v58  ;;  %5507 = vst [vmem:[%s16042_s5 + $0x440] sm:$0xff] %v4759_v36  ;;  %4533 = vmatmul.bf16.gmra.mxu0 %v9023_v58  ;;  %v10224_v58 = vld [vmem:[%s16041_s4 + $0x2e4] sm:$0xf]  ;;  %v10225_v36 = vld [vmem:[%s16041_s4 + $0x2e4] sm:$0xf0] }
 0x73d   :  { %v5286_v22 = vpop.f32.mrf.mxu3 }
 0x73e   :  { %v5022_v55 = vpop.f32.mrf.mxu2 }
 0x73f   :  { %v5287_v43 = vadd.f32 %v5286_v22, %v5022_v55  ;;  %v4760_v11 = vpop.f32.mrf.mxu1 }
 0x740   :  { %v4496_v30 = vpop.f32.mrf.mxu0 }
 0x741   :  { %5508 = vst [vmem:[%s16042_s5 + $0x448] sm:$0xff] %v5287_v43  ;;  %v4761_v57 = vadd.f32 %v4760_v11, %v4496_v30  ;;  %v9059_v43 = vor.u32 %v10224_v58, %v9056_v40  ;;  %v9055_v30 = vor.u32 %v10225_v36, %v9054_v16 }
 0x743   :  { %5509 = vst [vmem:[%s16042_s5 + $0x450] sm:$0xff] %v4761_v57 }
 0x745   :  { %v5288_v0 = vpop.f32.mrf.mxu3 }
 0x746   :  { %v5024_v15 = vpop.f32.mrf.mxu2 }
 0x747   :  { %v5289_v52 = vadd.f32 %v5288_v0, %v5024_v15  ;;  %v4763_v10 = vpop.f32.mrf.mxu1 }
 0x748   :  { %v4499_v37 = vpop.f32.mrf.mxu0 }
 0x749   :  { %5510 = vst [vmem:[%s16042_s5 + $0x458] sm:$0xff] %v5289_v52  ;;  %v4764_v19 = vadd.f32 %v4763_v10, %v4499_v37  ;;  %v9064_v10 = vld [vmem:[%s16041_s4 + $0x2f8] sm:$0xf0]  ;;  %v9062_v37 = vld [vmem:[%s16041_s4 + $0x2f0] sm:$0xf] }
 0x74a   :  { %9186 = vmatmul.msk.bf16.gmra.mxu3 %vm4154_vm5, %v9035_v21  ;;  %9135 = vmatmul.msk.bf16.gmra.mxu1 %vm4154_vm5, %v9035_v21 }
 0x74b   :  { %5066 = vmatmul.bf16.gmra.mxu2 %v9031_v34  ;;  %5511 = vst [vmem:[%s16042_s5 + $0x460] sm:$0xff] %v4764_v19  ;;  %4538 = vmatmul.bf16.gmra.mxu0 %v9031_v34  ;;  %v10226_v34 = vld [vmem:[%s16041_s4 + $0x2f4] sm:$0xf]  ;;  %v10227_v19 = vld [vmem:[%s16041_s4 + $0x2f4] sm:$0xf0] }
 0x74d   :  { %v5291_v12 = vpop.f32.mrf.mxu3 }
 0x74e   :  { %v5027_v29 = vpop.f32.mrf.mxu2 }
 0x74f   :  { %v5292_v17 = vadd.f32 %v5291_v12, %v5027_v29  ;;  %v4765_v32 = vpop.f32.mrf.mxu1 }
 0x750   :  { %v4501_v4 = vpop.f32.mrf.mxu0 }
 0x751   :  { %5512 = vst [vmem:[%s16042_s5 + $0x468] sm:$0xff] %v5292_v17  ;;  %v4766_v1 = vadd.f32 %v4765_v32, %v4501_v4  ;;  %v9067_v17 = vor.u32 %v10226_v34, %v9064_v10  ;;  %v9063_v4 = vor.u32 %v10227_v19, %v9062_v37 }
 0x753   :  { %5513 = vst [vmem:[%s16042_s5 + $0x470] sm:$0xff] %v4766_v1 }
 0x755   :  { %v5293_v18 = vpop.f32.mrf.mxu3 }
 0x756   :  { %v5029_v59 = vpop.f32.mrf.mxu2 }
 0x757   :  { %v5294_v41 = vadd.f32 %v5293_v18, %v5029_v59  ;;  %v4768_v53 = vpop.f32.mrf.mxu1 }
 0x758   :  { %v4504_v45 = vpop.f32.mrf.mxu0 }
 0x759   :  { %5514 = vst [vmem:[%s16042_s5 + $0x478] sm:$0xff] %v5294_v41  ;;  %v4769_v39 = vadd.f32 %v4768_v53, %v4504_v45  ;;  %v9072_v53 = vld [vmem:[%s16041_s4 + $0x308] sm:$0xf0]  ;;  %v9070_v45 = vld [vmem:[%s16041_s4 + $0x300] sm:$0xf] }
 0x75a   :  { %9187 = vmatmul.msk.bf16.gmra.mxu3 %vm4154_vm5, %v9043_v26  ;;  %9136 = vmatmul.msk.bf16.gmra.mxu1 %vm4154_vm5, %v9043_v26 }
 0x75b   :  { %5071 = vmatmul.bf16.gmra.mxu2 %v9039_v42  ;;  %5515 = vst [vmem:[%s16042_s5 + $0x480] sm:$0xff] %v4769_v39  ;;  %4543 = vmatmul.bf16.gmra.mxu0 %v9039_v42  ;;  %v10228_v42 = vld [vmem:[%s16041_s4 + $0x304] sm:$0xf]  ;;  %v10229_v39 = vld [vmem:[%s16041_s4 + $0x304] sm:$0xf0] }
 0x75d   :  { %v5296_v50 = vpop.f32.mrf.mxu3 }
 0x75e   :  { %v5032_v56 = vpop.f32.mrf.mxu2 }
 0x75f   :  { %v5297_v49 = vadd.f32 %v5296_v50, %v5032_v56  ;;  %v4770_v23 = vpop.f32.mrf.mxu1 }
 0x760   :  { %v4506_v8 = vpop.f32.mrf.mxu0 }
 0x761   :  { %5516 = vst [vmem:[%s16042_s5 + $0x488] sm:$0xff] %v5297_v49  ;;  %v4771_v60 = vadd.f32 %v4770_v23, %v4506_v8  ;;  %v9075_v49 = vor.u32 %v10228_v42, %v9072_v53  ;;  %v9071_v8 = vor.u32 %v10229_v39, %v9070_v45 }
 0x763   :  { %5517 = vst [vmem:[%s16042_s5 + $0x490] sm:$0xff] %v4771_v60 }
 0x765   :  { %v5298_v24 = vpop.f32.mrf.mxu3 }
 0x766   :  { %v5034_v46 = vpop.f32.mrf.mxu2 }
 0x767   :  { %v5299_v38 = vadd.f32 %v5298_v24, %v5034_v46  ;;  %v4773_v54 = vpop.f32.mrf.mxu1 }
 0x768   :  { %v4509_v63 = vpop.f32.mrf.mxu0 }
 0x769   :  { %5518 = vst [vmem:[%s16042_s5 + $0x498] sm:$0xff] %v5299_v38  ;;  %v4774_v27 = vadd.f32 %v4773_v54, %v4509_v63  ;;  %v9080_v54 = vld [vmem:[%s16041_s4 + $0x318] sm:$0xf0]  ;;  %v9078_v63 = vld [vmem:[%s16041_s4 + $0x310] sm:$0xf] }
 0x76a   :  { %9188 = vmatmul.msk.bf16.gmra.mxu3 %vm4154_vm5, %v9051_v5  ;;  %9137 = vmatmul.msk.bf16.gmra.mxu1 %vm4154_vm5, %v9051_v5 }
 0x76b   :  { %5076 = vmatmul.bf16.gmra.mxu2 %v9047_v13  ;;  %5519 = vst [vmem:[%s16042_s5 + $0x4a0] sm:$0xff] %v4774_v27  ;;  %4548 = vmatmul.bf16.gmra.mxu0 %v9047_v13  ;;  %v10230_v13 = vld [vmem:[%s16041_s4 + $0x314] sm:$0xf]  ;;  %v10231_v27 = vld [vmem:[%s16041_s4 + $0x314] sm:$0xf0] }
 0x76d   :  { %v5301_v25 = vpop.f32.mrf.mxu3 }
 0x76e   :  { %v5037_v61 = vpop.f32.mrf.mxu2 }
 0x76f   :  { %v5302_v7 = vadd.f32 %v5301_v25, %v5037_v61  ;;  %v4775_v2 = vpop.f32.mrf.mxu1 }
 0x770   :  { %v4511_v6 = vpop.f32.mrf.mxu0 }
 0x771   :  { %5520 = vst [vmem:[%s16042_s5 + $0x4a8] sm:$0xff] %v5302_v7  ;;  %v4776_v9 = vadd.f32 %v4775_v2, %v4511_v6  ;;  %v9083_v7 = vor.u32 %v10230_v13, %v9080_v54  ;;  %v9079_v6 = vor.u32 %v10231_v27, %v9078_v63 }
 0x773   :  { %5521 = vst [vmem:[%s16042_s5 + $0x4b0] sm:$0xff] %v4776_v9 }
 0x775   :  { %v5303_v22 = vpop.f32.mrf.mxu3 }
 0x776   :  { %v5039_v55 = vpop.f32.mrf.mxu2 }
 0x777   :  { %v5304_v11 = vadd.f32 %v5303_v22, %v5039_v55  ;;  %v4778_v57 = vpop.f32.mrf.mxu1 }
 0x778   :  { %v4514_v31 = vpop.f32.mrf.mxu0 }
 0x779   :  { %5522 = vst [vmem:[%s16042_s5 + $0x4b8] sm:$0xff] %v5304_v11  ;;  %v4779_v20 = vadd.f32 %v4778_v57, %v4514_v31  ;;  %v9088_v57 = vld [vmem:[%s16041_s4 + $0x328] sm:$0xf0]  ;;  %v9086_v31 = vld [vmem:[%s16041_s4 + $0x320] sm:$0xf] }
 0x77a   :  { %9189 = vmatmul.msk.bf16.gmra.mxu3 %vm4154_vm5, %v9059_v43  ;;  %9138 = vmatmul.msk.bf16.gmra.mxu1 %vm4154_vm5, %v9059_v43 }
 0x77b   :  { %5081 = vmatmul.bf16.gmra.mxu2 %v9055_v30  ;;  %5523 = vst [vmem:[%s16042_s5 + $0x4c0] sm:$0xff] %v4779_v20  ;;  %4553 = vmatmul.bf16.gmra.mxu0 %v9055_v30  ;;  %v10232_v30 = vld [vmem:[%s16041_s4 + $0x324] sm:$0xf]  ;;  %v10233_v20 = vld [vmem:[%s16041_s4 + $0x324] sm:$0xf0] }
 0x77d   :  { %v5306_v48 = vpop.f32.mrf.mxu3 }
 0x77e   :  { %v5042_v28 = vpop.f32.mrf.mxu2 }
 0x77f   :  { %v5307_v0 = vadd.f32 %v5306_v48, %v5042_v28  ;;  %v4780_v15 = vpop.f32.mrf.mxu1 }
 0x780   :  { %v4516_v21 = vpop.f32.mrf.mxu0 }
 0x781   :  { %5524 = vst [vmem:[%s16042_s5 + $0x4c8] sm:$0xff] %v5307_v0  ;;  %v4781_v52 = vadd.f32 %v4780_v15, %v4516_v21  ;;  %v9091_v0 = vor.u32 %v10232_v30, %v9088_v57  ;;  %v9087_v21 = vor.u32 %v10233_v20, %v9086_v31 }
 0x783   :  { %5525 = vst [vmem:[%s16042_s5 + $0x4d0] sm:$0xff] %v4781_v52 }
 0x785   :  { %v5308_v12 = vpop.f32.mrf.mxu3 }
 0x786   :  { %v5044_v29 = vpop.f32.mrf.mxu2 }
 0x787   :  { %v5309_v32 = vadd.f32 %v5308_v12, %v5044_v29  ;;  %v4783_v1 = vpop.f32.mrf.mxu1 }
 0x788   :  { %v4519_v51 = vpop.f32.mrf.mxu0 }
 0x789   :  { %5526 = vst [vmem:[%s16042_s5 + $0x4d8] sm:$0xff] %v5309_v32  ;;  %v4784_v47 = vadd.f32 %v4783_v1, %v4519_v51  ;;  %v9198_v1 = vld [vmem:[%s16041_s4 + $0x8] sm:$0xf0]  ;;  %v9196_v51 = vld [vmem:[%s16041_s4] sm:$0xf] }
 0x78a   :  { %9190 = vmatmul.msk.bf16.gmra.mxu3 %vm4154_vm5, %v9067_v17  ;;  %9139 = vmatmul.msk.bf16.gmra.mxu1 %vm4154_vm5, %v9067_v17 }
 0x78b   :  { %5086 = vmatmul.bf16.gmra.mxu2 %v9063_v4  ;;  %5527 = vst [vmem:[%s16042_s5 + $0x4e0] sm:$0xff] %v4784_v47  ;;  %4558 = vmatmul.bf16.gmra.mxu0 %v9063_v4  ;;  %v10234_v4 = vld [vmem:[%s16041_s4 + $0x4] sm:$0xf]  ;;  %v10235_v47 = vld [vmem:[%s16041_s4 + $0x4] sm:$0xf0] }
 0x78d   :  { %v5311_v62 = vpop.f32.mrf.mxu3 }
 0x78e   :  { %v5047_v33 = vpop.f32.mrf.mxu2 }
 0x78f   :  { %v5312_v18 = vadd.f32 %v5311_v62, %v5047_v33  ;;  %v4785_v59 = vpop.f32.mrf.mxu1 }
 0x790   :  { %v4521_v26 = vpop.f32.mrf.mxu0 }
 0x791   :  { %5528 = vst [vmem:[%s16042_s5 + $0x4e8] sm:$0xff] %v5312_v18  ;;  %v4786_v41 = vadd.f32 %v4785_v59, %v4521_v26  ;;  %v9201_v18 = vor.u32 %v10234_v4, %v9198_v1  ;;  %v9197_v26 = vor.u32 %v10235_v47, %v9196_v51 }
 0x793   :  { %5529 = vst [vmem:[%s16042_s5 + $0x4f0] sm:$0xff] %v4786_v41 }
 0x795   :  { %v5313_v50 = vpop.f32.mrf.mxu3 }
 0x796   :  { %v5049_v56 = vpop.f32.mrf.mxu2 }
 0x797   :  { %v5314_v23 = vadd.f32 %v5313_v50, %v5049_v56  ;;  %v4788_v60 = vpop.f32.mrf.mxu1 }
 0x798   :  { %v4524_v14 = vpop.f32.mrf.mxu0 }
 0x799   :  { %5530 = vst [vmem:[%s16042_s5 + $0x4f8] sm:$0xff] %v5314_v23  ;;  %v4789_v35 = vadd.f32 %v4788_v60, %v4524_v14  ;;  %v9206_v60 = vld [vmem:[%s16041_s4 + $0x18] sm:$0xf0]  ;;  %v9204_v14 = vld [vmem:[%s16041_s4 + $0x10] sm:$0xf] }
 0x79a   :  { %9191 = vmatmul.msk.bf16.gmra.mxu3 %vm4154_vm5, %v9075_v49  ;;  %9140 = vmatmul.msk.bf16.gmra.mxu1 %vm4154_vm5, %v9075_v49 }
 0x79b   :  { %5091 = vmatmul.bf16.gmra.mxu2 %v9071_v8  ;;  %5531 = vst [vmem:[%s16042_s5 + $0x500] sm:$0xff] %v4789_v35  ;;  %4563 = vmatmul.bf16.gmra.mxu0 %v9071_v8  ;;  %v10236_v8 = vld [vmem:[%s16041_s4 + $0x14] sm:$0xf]  ;;  %v10237_v35 = vld [vmem:[%s16041_s4 + $0x14] sm:$0xf0] }
 0x79d   :  { %v5316_v44 = vpop.f32.mrf.mxu3 }
 0x79e   :  { %v5052_v3 = vpop.f32.mrf.mxu2 }
 0x79f   :  { %v5317_v24 = vadd.f32 %v5316_v44, %v5052_v3  ;;  %v4790_v46 = vpop.f32.mrf.mxu1 }
 0x7a0   :  { %v4526_v5 = vpop.f32.mrf.mxu0 }
 0x7a1   :  { %5532 = vst [vmem:[%s16042_s5 + $0x508] sm:$0xff] %v5317_v24  ;;  %v4791_v38 = vadd.f32 %v4790_v46, %v4526_v5  ;;  %v9209_v24 = vor.u32 %v10236_v8, %v9206_v60  ;;  %v9205_v5 = vor.u32 %v10237_v35, %v9204_v14 }
 0x7a3   :  { %5533 = vst [vmem:[%s16042_s5 + $0x510] sm:$0xff] %v4791_v38 }
 0x7a5   :  { %v5318_v25 = vpop.f32.mrf.mxu3 }
 0x7a6   :  { %v5054_v61 = vpop.f32.mrf.mxu2 }
 0x7a7   :  { %v5319_v2 = vadd.f32 %v5318_v25, %v5054_v61  ;;  %v4793_v9 = vpop.f32.mrf.mxu1 }
 0x7a8   :  { %v4529_v58 = vpop.f32.mrf.mxu0 }
 0x7a9   :  { %5534 = vst [vmem:[%s16042_s5 + $0x518] sm:$0xff] %v5319_v2  ;;  %v4794_v40 = vadd.f32 %v4793_v9, %v4529_v58  ;;  %v9214_v9 = vld [vmem:[%s16041_s4 + $0x28] sm:$0xf0]  ;;  %v9212_v58 = vld [vmem:[%s16041_s4 + $0x20] sm:$0xf] }
 0x7aa   :  { %9192 = vmatmul.msk.bf16.gmra.mxu3 %vm4154_vm5, %v9083_v7  ;;  %9141 = vmatmul.msk.bf16.gmra.mxu1 %vm4154_vm5, %v9083_v7 }
 0x7ab   :  { %5096 = vmatmul.bf16.gmra.mxu2 %v9079_v6  ;;  %5535 = vst [vmem:[%s16042_s5 + $0x520] sm:$0xff] %v4794_v40  ;;  %4568 = vmatmul.bf16.gmra.mxu0 %v9079_v6  ;;  %v10238_v6 = vld [vmem:[%s16041_s4 + $0x24] sm:$0xf]  ;;  %v10239_v40 = vld [vmem:[%s16041_s4 + $0x24] sm:$0xf0] }
 0x7ad   :  { %v5321_v16 = vpop.f32.mrf.mxu3 }
 0x7ae   :  { %v5057_v36 = vpop.f32.mrf.mxu2 }
 0x7af   :  { %v5322_v22 = vadd.f32 %v5321_v16, %v5057_v36  ;;  %v4795_v55 = vpop.f32.mrf.mxu1 }
 0x7b0   :  { %v4531_v43 = vpop.f32.mrf.mxu0 }
 0x7b1   :  { %5536 = vst [vmem:[%s16042_s5 + $0x528] sm:$0xff] %v5322_v22  ;;  %v4796_v11 = vadd.f32 %v4795_v55, %v4531_v43  ;;  %v9217_v22 = vor.u32 %v10238_v6, %v9214_v9  ;;  %v9213_v43 = vor.u32 %v10239_v40, %v9212_v58 }
 0x7b3   :  { %5537 = vst [vmem:[%s16042_s5 + $0x530] sm:$0xff] %v4796_v11 }
 0x7b5   :  { %v5323_v48 = vpop.f32.mrf.mxu3 }
 0x7b6   :  { %v5059_v28 = vpop.f32.mrf.mxu2 }
 0x7b7   :  { %v5324_v15 = vadd.f32 %v5323_v48, %v5059_v28  ;;  %v4798_v52 = vpop.f32.mrf.mxu1 }
 0x7b8   :  { %v4534_v34 = vpop.f32.mrf.mxu0 }
 0x7b9   :  { %5538 = vst [vmem:[%s16042_s5 + $0x538] sm:$0xff] %v5324_v15  ;;  %v4799_v10 = vadd.f32 %v4798_v52, %v4534_v34  ;;  %v9222_v52 = vld [vmem:[%s16041_s4 + $0x38] sm:$0xf0]  ;;  %v9220_v34 = vld [vmem:[%s16041_s4 + $0x30] sm:$0xf] }
 0x7ba   :  { %9193 = vmatmul.msk.bf16.gmra.mxu3 %vm4154_vm5, %v9091_v0  ;;  %9142 = vmatmul.msk.bf16.gmra.mxu1 %vm4154_vm5, %v9091_v0 }
 0x7bb   :  { %5101 = vmatmul.bf16.gmra.mxu2 %v9087_v21  ;;  %5539 = vst [vmem:[%s16042_s5 + $0x540] sm:$0xff] %v4799_v10  ;;  %4573 = vmatmul.bf16.gmra.mxu0 %v9087_v21  ;;  %v10240_v21 = vld [vmem:[%s16041_s4 + $0x34] sm:$0xf]  ;;  %v10241_v10 = vld [vmem:[%s16041_s4 + $0x34] sm:$0xf0] }
 0x7bd   :  { %v5326_v37 = vpop.f32.mrf.mxu3 }
 0x7be   :  { %v5062_v19 = vpop.f32.mrf.mxu2 }
 0x7bf   :  { %v5327_v12 = vadd.f32 %v5326_v37, %v5062_v19  ;;  %v4800_v29 = vpop.f32.mrf.mxu1 }
 0x7c0   :  { %v4536_v17 = vpop.f32.mrf.mxu0 }
 0x7c1   :  { %5540 = vst [vmem:[%s16042_s5 + $0x548] sm:$0xff] %v5327_v12  ;;  %v4801_v32 = vadd.f32 %v4800_v29, %v4536_v17  ;;  %v9225_v12 = vor.u32 %v10240_v21, %v9222_v52  ;;  %v9221_v17 = vor.u32 %v10241_v10, %v9220_v34 }
 0x7c3   :  { %5541 = vst [vmem:[%s16042_s5 + $0x550] sm:$0xff] %v4801_v32 }
 0x7c5   :  { %v5328_v62 = vpop.f32.mrf.mxu3 }
 0x7c6   :  { %v5064_v33 = vpop.f32.mrf.mxu2 }
 0x7c7   :  { %v5329_v59 = vadd.f32 %v5328_v62, %v5064_v33  ;;  %v4803_v41 = vpop.f32.mrf.mxu1 }
 0x7c8   :  { %v4539_v42 = vpop.f32.mrf.mxu0 }
 0x7c9   :  { %5542 = vst [vmem:[%s16042_s5 + $0x558] sm:$0xff] %v5329_v59  ;;  %v4804_v53 = vadd.f32 %v4803_v41, %v4539_v42  ;;  %v9230_v41 = vld [vmem:[%s16041_s4 + $0x48] sm:$0xf0]  ;;  %v9228_v42 = vld [vmem:[%s16041_s4 + $0x40] sm:$0xf] }
 0x7ca   :  { %9653 = vmatmul.msk.bf16.vlgmr.msra.gmra.mxu3 %vm4154_vm5, %v9201_v18  ;;  %9602 = vmatmul.msk.bf16.vlgmr.msra.gmra.mxu1 %vm4154_vm5, %v9201_v18 }
 0x7cb   :  { %6951 = vmatmul.bf16.vlgmr.msra.gmra.mxu2 %v9197_v26  ;;  %5543 = vst [vmem:[%s16042_s5 + $0x560] sm:$0xff] %v4804_v53  ;;  %6423 = vmatmul.bf16.vlgmr.msra.gmra.mxu0 %v9197_v26  ;;  %v10242_v26 = vld [vmem:[%s16041_s4 + $0x44] sm:$0xf]  ;;  %v10243_v53 = vld [vmem:[%s16041_s4 + $0x44] sm:$0xf0] }
 0x7cd   :  { %v5331_v45 = vpop.f32.mrf.mxu3 }
 0x7ce   :  { %v5067_v39 = vpop.f32.mrf.mxu2 }
 0x7cf   :  { %v5332_v50 = vadd.f32 %v5331_v45, %v5067_v39  ;;  %v4805_v56 = vpop.f32.mrf.mxu1 }
 0x7d0   :  { %v4541_v49 = vpop.f32.mrf.mxu0 }
 0x7d1   :  { %5544 = vst [vmem:[%s16042_s5 + $0x568] sm:$0xff] %v5332_v50  ;;  %v4806_v23 = vadd.f32 %v4805_v56, %v4541_v49  ;;  %v9233_v50 = vor.u32 %v10242_v26, %v9230_v41  ;;  %v9229_v49 = vor.u32 %v10243_v53, %v9228_v42 }
 0x7d3   :  { %5545 = vst [vmem:[%s16042_s5 + $0x570] sm:$0xff] %v4806_v23 }
 0x7d5   :  { %v5333_v44 = vpop.f32.mrf.mxu3 }
 0x7d6   :  { %v5069_v3 = vpop.f32.mrf.mxu2 }
 0x7d7   :  { %v5334_v46 = vadd.f32 %v5333_v44, %v5069_v3  ;;  %v4808_v38 = vpop.f32.mrf.mxu1 }
 0x7d8   :  { %v4544_v13 = vpop.f32.mrf.mxu0 }
 0x7d9   :  { %5546 = vst [vmem:[%s16042_s5 + $0x578] sm:$0xff] %v5334_v46  ;;  %v4809_v54 = vadd.f32 %v4808_v38, %v4544_v13  ;;  %v9238_v38 = vld [vmem:[%s16041_s4 + $0x58] sm:$0xf0]  ;;  %v9236_v13 = vld [vmem:[%s16041_s4 + $0x50] sm:$0xf] }
 0x7da   :  { %9654 = vmatmul.msk.bf16.gmra.mxu3 %vm4154_vm5, %v9209_v24  ;;  %9603 = vmatmul.msk.bf16.gmra.mxu1 %vm4154_vm5, %v9209_v24 }
 0x7db   :  { %6956 = vmatmul.bf16.gmra.mxu2 %v9205_v5  ;;  %5547 = vst [vmem:[%s16042_s5 + $0x580] sm:$0xff] %v4809_v54  ;;  %6428 = vmatmul.bf16.gmra.mxu0 %v9205_v5  ;;  %v10244_v5 = vld [vmem:[%s16041_s4 + $0x54] sm:$0xf]  ;;  %v10245_v54 = vld [vmem:[%s16041_s4 + $0x54] sm:$0xf0] }
 0x7dd   :  { %v5336_v63 = vpop.f32.mrf.mxu3 }
 0x7de   :  { %v5072_v27 = vpop.f32.mrf.mxu2 }
 0x7df   :  { %v5337_v25 = vadd.f32 %v5336_v63, %v5072_v27  ;;  %v4810_v61 = vpop.f32.mrf.mxu1 }
 0x7e0   :  { %v4546_v7 = vpop.f32.mrf.mxu0 }
 0x7e1   :  { %5548 = vst [vmem:[%s16042_s5 + $0x588] sm:$0xff] %v5337_v25  ;;  %v4811_v2 = vadd.f32 %v4810_v61, %v4546_v7  ;;  %v9241_v25 = vor.u32 %v10244_v5, %v9238_v38  ;;  %v9237_v7 = vor.u32 %v10245_v54, %v9236_v13 }
 0x7e3   :  { %5549 = vst [vmem:[%s16042_s5 + $0x590] sm:$0xff] %v4811_v2 }
 0x7e5   :  { %v5338_v16 = vpop.f32.mrf.mxu3 }
 0x7e6   :  { %v5074_v36 = vpop.f32.mrf.mxu2 }
 0x7e7   :  { %v5339_v55 = vadd.f32 %v5338_v16, %v5074_v36  ;;  %v4813_v11 = vpop.f32.mrf.mxu1 }
 0x7e8   :  { %v4549_v30 = vpop.f32.mrf.mxu0 }
 0x7e9   :  { %5550 = vst [vmem:[%s16042_s5 + $0x598] sm:$0xff] %v5339_v55  ;;  %v4814_v57 = vadd.f32 %v4813_v11, %v4549_v30  ;;  %v9246_v11 = vld [vmem:[%s16041_s4 + $0x68] sm:$0xf0]  ;;  %v9244_v30 = vld [vmem:[%s16041_s4 + $0x60] sm:$0xf] }
 0x7ea   :  { %9655 = vmatmul.msk.bf16.gmra.mxu3 %vm4154_vm5, %v9217_v22  ;;  %9604 = vmatmul.msk.bf16.gmra.mxu1 %vm4154_vm5, %v9217_v22 }
 0x7eb   :  { %6961 = vmatmul.bf16.gmra.mxu2 %v9213_v43  ;;  %5551 = vst [vmem:[%s16042_s5 + $0x5a0] sm:$0xff] %v4814_v57  ;;  %6433 = vmatmul.bf16.gmra.mxu0 %v9213_v43  ;;  %v10246_v43 = vld [vmem:[%s16041_s4 + $0x64] sm:$0xf]  ;;  %v10247_v57 = vld [vmem:[%s16041_s4 + $0x64] sm:$0xf0] }
 0x7ed   :  { %v5341_v31 = vpop.f32.mrf.mxu3 }
 0x7ee   :  { %v5077_v20 = vpop.f32.mrf.mxu2 }
 0x7ef   :  { %v5342_v48 = vadd.f32 %v5341_v31, %v5077_v20  ;;  %v4815_v28 = vpop.f32.mrf.mxu1 }
 0x7f0   :  { %v4551_v0 = vpop.f32.mrf.mxu0 }
 0x7f1   :  { %5552 = vst [vmem:[%s16042_s5 + $0x5a8] sm:$0xff] %v5342_v48  ;;  %v4816_v15 = vadd.f32 %v4815_v28, %v4551_v0  ;;  %v9249_v48 = vor.u32 %v10246_v43, %v9246_v11  ;;  %v9245_v0 = vor.u32 %v10247_v57, %v9244_v30 }
 0x7f3   :  { %5553 = vst [vmem:[%s16042_s5 + $0x5b0] sm:$0xff] %v4816_v15 }
 0x7f5   :  { %v5343_v37 = vpop.f32.mrf.mxu3 }
 0x7f6   :  { %v5079_v19 = vpop.f32.mrf.mxu2 }
 0x7f7   :  { %v5344_v29 = vadd.f32 %v5343_v37, %v5079_v19  ;;  %v4818_v32 = vpop.f32.mrf.mxu1 }
 0x7f8   :  { %v4554_v4 = vpop.f32.mrf.mxu0 }
 0x7f9   :  { %5554 = vst [vmem:[%s16042_s5 + $0x5b8] sm:$0xff] %v5344_v29  ;;  %v4819_v1 = vadd.f32 %v4818_v32, %v4554_v4  ;;  %v9254_v32 = vld [vmem:[%s16041_s4 + $0x78] sm:$0xf0]  ;;  %v9252_v4 = vld [vmem:[%s16041_s4 + $0x70] sm:$0xf] }
 0x7fa   :  { %9656 = vmatmul.msk.bf16.gmra.mxu3 %vm4154_vm5, %v9225_v12  ;;  %9605 = vmatmul.msk.bf16.gmra.mxu1 %vm4154_vm5, %v9225_v12 }
 0x7fb   :  { %6966 = vmatmul.bf16.gmra.mxu2 %v9221_v17  ;;  %5555 = vst [vmem:[%s16042_s5 + $0x5c0] sm:$0xff] %v4819_v1  ;;  %6438 = vmatmul.bf16.gmra.mxu0 %v9221_v17  ;;  %v10248_v17 = vld [vmem:[%s16041_s4 + $0x74] sm:$0xf]  ;;  %v10249_v1 = vld [vmem:[%s16041_s4 + $0x74] sm:$0xf0] }
 0x7fd   :  { %v5346_v51 = vpop.f32.mrf.mxu3 }
 0x7fe   :  { %v5082_v47 = vpop.f32.mrf.mxu2 }
 0x7ff   :  { %v5347_v62 = vadd.f32 %v5346_v51, %v5082_v47  ;;  %v4820_v33 = vpop.f32.mrf.mxu1 }
 0x800   :  { %v4556_v18 = vpop.f32.mrf.mxu0 }
 0x801   :  { %5556 = vst [vmem:[%s16042_s5 + $0x5c8] sm:$0xff] %v5347_v62  ;;  %v4821_v59 = vadd.f32 %v4820_v33, %v4556_v18  ;;  %v9257_v62 = vor.u32 %v10248_v17, %v9254_v32  ;;  %v9253_v18 = vor.u32 %v10249_v1, %v9252_v4 }
 0x803   :  { %5557 = vst [vmem:[%s16042_s5 + $0x5d0] sm:$0xff] %v4821_v59 }
 0x805   :  { %v5348_v45 = vpop.f32.mrf.mxu3 }
 0x806   :  { %v5084_v39 = vpop.f32.mrf.mxu2 }
 0x807   :  { %v5349_v56 = vadd.f32 %v5348_v45, %v5084_v39  ;;  %v4823_v23 = vpop.f32.mrf.mxu1 }
 0x808   :  { %v4559_v8 = vpop.f32.mrf.mxu0 }
 0x809   :  { %5558 = vst [vmem:[%s16042_s5 + $0x5d8] sm:$0xff] %v5349_v56  ;;  %v4824_v60 = vadd.f32 %v4823_v23, %v4559_v8  ;;  %v9262_v23 = vld [vmem:[%s16041_s4 + $0x88] sm:$0xf0]  ;;  %v9260_v8 = vld [vmem:[%s16041_s4 + $0x80] sm:$0xf] }
 0x80a   :  { %9657 = vmatmul.msk.bf16.gmra.mxu3 %vm4154_vm5, %v9233_v50  ;;  %9606 = vmatmul.msk.bf16.gmra.mxu1 %vm4154_vm5, %v9233_v50 }
 0x80b   :  { %6971 = vmatmul.bf16.gmra.mxu2 %v9229_v49  ;;  %5559 = vst [vmem:[%s16042_s5 + $0x5e0] sm:$0xff] %v4824_v60  ;;  %6443 = vmatmul.bf16.gmra.mxu0 %v9229_v49  ;;  %v10250_v49 = vld [vmem:[%s16041_s4 + $0x84] sm:$0xf]  ;;  %v10251_v60 = vld [vmem:[%s16041_s4 + $0x84] sm:$0xf0] }
 0x80d   :  { %v5351_v14 = vpop.f32.mrf.mxu3 }
 0x80e   :  { %v5087_v35 = vpop.f32.mrf.mxu2 }
 0x80f   :  { %v5352_v44 = vadd.f32 %v5351_v14, %v5087_v35  ;;  %v4825_v3 = vpop.f32.mrf.mxu1 }
 0x810   :  { %v4561_v24 = vpop.f32.mrf.mxu0 }
 0x811   :  { %5560 = vst [vmem:[%s16042_s5 + $0x5e8] sm:$0xff] %v5352_v44  ;;  %v4826_v46 = vadd.f32 %v4825_v3, %v4561_v24  ;;  %v9265_v44 = vor.u32 %v10250_v49, %v9262_v23  ;;  %v9261_v24 = vor.u32 %v10251_v60, %v9260_v8 }
 0x813   :  { %5561 = vst [vmem:[%s16042_s5 + $0x5f0] sm:$0xff] %v4826_v46 }
 0x815   :  { %v5353_v63 = vpop.f32.mrf.mxu3 }
 0x816   :  { %v5089_v27 = vpop.f32.mrf.mxu2 }
 0x817   :  { %v5354_v61 = vadd.f32 %v5353_v63, %v5089_v27  ;;  %v4828_v2 = vpop.f32.mrf.mxu1 }
 0x818   :  { %v4564_v6 = vpop.f32.mrf.mxu0 }
 0x819   :  { %5562 = vst [vmem:[%s16042_s5 + $0x5f8] sm:$0xff] %v5354_v61  ;;  %v4829_v9 = vadd.f32 %v4828_v2, %v4564_v6  ;;  %v9270_v2 = vld [vmem:[%s16041_s4 + $0x98] sm:$0xf0]  ;;  %v9268_v6 = vld [vmem:[%s16041_s4 + $0x90] sm:$0xf] }
 0x81a   :  { %9658 = vmatmul.msk.bf16.gmra.mxu3 %vm4154_vm5, %v9241_v25  ;;  %9607 = vmatmul.msk.bf16.gmra.mxu1 %vm4154_vm5, %v9241_v25 }
 0x81b   :  { %6976 = vmatmul.bf16.gmra.mxu2 %v9237_v7  ;;  %5563 = vst [vmem:[%s16042_s5 + $0x600] sm:$0xff] %v4829_v9  ;;  %6448 = vmatmul.bf16.gmra.mxu0 %v9237_v7  ;;  %v10252_v7 = vld [vmem:[%s16041_s4 + $0x94] sm:$0xf]  ;;  %v10253_v9 = vld [vmem:[%s16041_s4 + $0x94] sm:$0xf0] }
 0x81d   :  { %v5356_v58 = vpop.f32.mrf.mxu3 }
 0x81e   :  { %v5092_v40 = vpop.f32.mrf.mxu2 }
 0x81f   :  { %v5357_v16 = vadd.f32 %v5356_v58, %v5092_v40  ;;  %v4830_v36 = vpop.f32.mrf.mxu1 }
 0x820   :  { %v4566_v22 = vpop.f32.mrf.mxu0 }
 0x821   :  { %5564 = vst [vmem:[%s16042_s5 + $0x608] sm:$0xff] %v5357_v16  ;;  %v4831_v55 = vadd.f32 %v4830_v36, %v4566_v22  ;;  %v9273_v16 = vor.u32 %v10252_v7, %v9270_v2  ;;  %v9269_v22 = vor.u32 %v10253_v9, %v9268_v6 }
 0x823   :  { %5565 = vst [vmem:[%s16042_s5 + $0x610] sm:$0xff] %v4831_v55 }
 0x825   :  { %v5358_v31 = vpop.f32.mrf.mxu3 }
 0x826   :  { %v5094_v20 = vpop.f32.mrf.mxu2 }
 0x827   :  { %v5359_v28 = vadd.f32 %v5358_v31, %v5094_v20  ;;  %v4833_v15 = vpop.f32.mrf.mxu1 }
 0x828   :  { %v4569_v21 = vpop.f32.mrf.mxu0 }
 0x829   :  { %5566 = vst [vmem:[%s16042_s5 + $0x618] sm:$0xff] %v5359_v28  ;;  %v4834_v52 = vadd.f32 %v4833_v15, %v4569_v21  ;;  %v9278_v15 = vld [vmem:[%s16041_s4 + $0xa8] sm:$0xf0]  ;;  %v9276_v21 = vld [vmem:[%s16041_s4 + $0xa0] sm:$0xf] }
 0x82a   :  { %9659 = vmatmul.msk.bf16.gmra.mxu3 %vm4154_vm5, %v9249_v48  ;;  %9608 = vmatmul.msk.bf16.gmra.mxu1 %vm4154_vm5, %v9249_v48 }
 0x82b   :  { %6981 = vmatmul.bf16.gmra.mxu2 %v9245_v0  ;;  %5567 = vst [vmem:[%s16042_s5 + $0x620] sm:$0xff] %v4834_v52  ;;  %6453 = vmatmul.bf16.gmra.mxu0 %v9245_v0  ;;  %v10254_v0 = vld [vmem:[%s16041_s4 + $0xa4] sm:$0xf]  ;;  %v10255_v52 = vld [vmem:[%s16041_s4 + $0xa4] sm:$0xf0] }
 0x82d   :  { %v5361_v34 = vpop.f32.mrf.mxu3 }
 0x82e   :  { %v5097_v10 = vpop.f32.mrf.mxu2 }
 0x82f   :  { %v5362_v37 = vadd.f32 %v5361_v34, %v5097_v10  ;;  %v4835_v19 = vpop.f32.mrf.mxu1 }
 0x830   :  { %v4571_v12 = vpop.f32.mrf.mxu0 }
 0x831   :  { %5568 = vst [vmem:[%s16042_s5 + $0x628] sm:$0xff] %v5362_v37  ;;  %v4836_v29 = vadd.f32 %v4835_v19, %v4571_v12  ;;  %v9281_v37 = vor.u32 %v10254_v0, %v9278_v15  ;;  %v9277_v12 = vor.u32 %v10255_v52, %v9276_v21 }
 0x833   :  { %5569 = vst [vmem:[%s16042_s5 + $0x630] sm:$0xff] %v4836_v29 }
 0x835   :  { %v5363_v51 = vpop.f32.mrf.mxu3 }
 0x836   :  { %v5099_v47 = vpop.f32.mrf.mxu2 }
 0x837   :  { %v5364_v33 = vadd.f32 %v5363_v51, %v5099_v47  ;;  %v4838_v59 = vpop.f32.mrf.mxu1 }
 0x838   :  { %v4574_v26 = vpop.f32.mrf.mxu0 }
 0x839   :  { %5570 = vst [vmem:[%s16042_s5 + $0x638] sm:$0xff] %v5364_v33  ;;  %v4839_v41 = vadd.f32 %v4838_v59, %v4574_v26  ;;  %v9286_v59 = vld [vmem:[%s16041_s4 + $0xb8] sm:$0xf0]  ;;  %v9284_v26 = vld [vmem:[%s16041_s4 + $0xb0] sm:$0xf] }
 0x83a   :  { %9660 = vmatmul.msk.bf16.gmra.mxu3 %vm4154_vm5, %v9257_v62  ;;  %9609 = vmatmul.msk.bf16.gmra.mxu1 %vm4154_vm5, %v9257_v62 }
 0x83b   :  { %6986 = vmatmul.bf16.gmra.mxu2 %v9253_v18  ;;  %5571 = vst [vmem:[%s16042_s5 + $0x640] sm:$0xff] %v4839_v41  ;;  %6458 = vmatmul.bf16.gmra.mxu0 %v9253_v18  ;;  %v10256_v18 = vld [vmem:[%s16041_s4 + $0xb4] sm:$0xf]  ;;  %v10257_v41 = vld [vmem:[%s16041_s4 + $0xb4] sm:$0xf0] }
 0x83d   :  { %v5366_v42 = vpop.f32.mrf.mxu3 }
 0x83e   :  { %v5102_v53 = vpop.f32.mrf.mxu2 }
 0x83f   :  { %v5367_v45 = vadd.f32 %v5366_v42, %v5102_v53  ;;  %v4840_v39 = vpop.f32.mrf.mxu1 }
 0x840   :  { %v4576_v50 = vpop.f32.mrf.mxu0 }
 0x841   :  { %5572 = vst [vmem:[%s16042_s5 + $0x648] sm:$0xff] %v5367_v45  ;;  %v4841_v56 = vadd.f32 %v4840_v39, %v4576_v50  ;;  %v9289_v45 = vor.u32 %v10256_v18, %v9286_v59  ;;  %v9285_v50 = vor.u32 %v10257_v41, %v9284_v26 }
 0x843   :  { %5573 = vst [vmem:[%s16042_s5 + $0x650] sm:$0xff] %v4841_v56 }
 0x845   :  { %v5368_v14 = vpop.f32.mrf.mxu3 }
 0x846   :  { %v5104_v35 = vpop.f32.mrf.mxu2 }
 0x847   :  { %v5369_v3 = vadd.f32 %v5368_v14, %v5104_v35  ;;  %v6688_v46 = vpop.f32.mrf.mxu1 }
 0x848   :  { %v6424_v5 = vpop.f32.mrf.mxu0 }
 0x849   :  { %5574 = vst [vmem:[%s16042_s5 + $0x658] sm:$0xff] %v5369_v3  ;;  %v6689_v38 = vadd.f32 %v6688_v46, %v6424_v5  ;;  %v9294_v46 = vld [vmem:[%s16041_s4 + $0xc8] sm:$0xf0]  ;;  %v9292_v5 = vld [vmem:[%s16041_s4 + $0xc0] sm:$0xf] }
 0x84a   :  { %9661 = vmatmul.msk.bf16.gmra.mxu3 %vm4154_vm5, %v9265_v44  ;;  %9610 = vmatmul.msk.bf16.gmra.mxu1 %vm4154_vm5, %v9265_v44 }
 0x84b   :  { %6991 = vmatmul.bf16.gmra.mxu2 %v9261_v24  ;;  %9704 = vst [vmem:[%s16042_s5 + $0x660] sm:$0xff] %v6689_v38  ;;  %6463 = vmatmul.bf16.gmra.mxu0 %v9261_v24  ;;  %v10258_v24 = vld [vmem:[%s16041_s4 + $0xc4] sm:$0xf]  ;;  %v10259_v38 = vld [vmem:[%s16041_s4 + $0xc4] sm:$0xf0] }
 0x84d   :  { %v7216_v13 = vpop.f32.mrf.mxu3 }
 0x84e   :  { %v6952_v54 = vpop.f32.mrf.mxu2 }
 0x84f   :  { %v7217_v63 = vadd.f32 %v7216_v13, %v6952_v54  ;;  %v6690_v27 = vpop.f32.mrf.mxu1 }
 0x850   :  { %v6426_v25 = vpop.f32.mrf.mxu0 }
 0x851   :  { %9705 = vst [vmem:[%s16042_s5 + $0x668] sm:$0xff] %v7217_v63  ;;  %v6691_v61 = vadd.f32 %v6690_v27, %v6426_v25  ;;  %v9297_v63 = vor.u32 %v10258_v24, %v9294_v46  ;;  %v9293_v25 = vor.u32 %v10259_v38, %v9292_v5 }
 0x853   :  { %9706 = vst [vmem:[%s16042_s5 + $0x670] sm:$0xff] %v6691_v61 }
 0x855   :  { %v7218_v58 = vpop.f32.mrf.mxu3 }
 0x856   :  { %v6954_v40 = vpop.f32.mrf.mxu2 }
 0x857   :  { %v7219_v36 = vadd.f32 %v7218_v58, %v6954_v40  ;;  %v6693_v55 = vpop.f32.mrf.mxu1 }
 0x858   :  { %v6429_v43 = vpop.f32.mrf.mxu0 }
 0x859   :  { %9707 = vst [vmem:[%s16042_s5 + $0x678] sm:$0xff] %v7219_v36  ;;  %v6694_v11 = vadd.f32 %v6693_v55, %v6429_v43  ;;  %v9302_v55 = vld [vmem:[%s16041_s4 + $0xd8] sm:$0xf0]  ;;  %v9300_v43 = vld [vmem:[%s16041_s4 + $0xd0] sm:$0xf] }
 0x85a   :  { %9662 = vmatmul.msk.bf16.gmra.mxu3 %vm4154_vm5, %v9273_v16  ;;  %9611 = vmatmul.msk.bf16.gmra.mxu1 %vm4154_vm5, %v9273_v16 }
 0x85b   :  { %6996 = vmatmul.bf16.gmra.mxu2 %v9269_v22  ;;  %9708 = vst [vmem:[%s16042_s5 + $0x680] sm:$0xff] %v6694_v11  ;;  %6468 = vmatmul.bf16.gmra.mxu0 %v9269_v22  ;;  %v10260_v22 = vld [vmem:[%s16041_s4 + $0xd4] sm:$0xf]  ;;  %v10261_v11 = vld [vmem:[%s16041_s4 + $0xd4] sm:$0xf0] }
 0x85d   :  { %v7221_v30 = vpop.f32.mrf.mxu3 }
 0x85e   :  { %v6957_v57 = vpop.f32.mrf.mxu2 }
 0x85f   :  { %v7222_v31 = vadd.f32 %v7221_v30, %v6957_v57  ;;  %v6695_v20 = vpop.f32.mrf.mxu1 }
 0x860   :  { %v6431_v48 = vpop.f32.mrf.mxu0 }
 0x861   :  { %9709 = vst [vmem:[%s16042_s5 + $0x688] sm:$0xff] %v7222_v31  ;;  %v6696_v28 = vadd.f32 %v6695_v20, %v6431_v48  ;;  %v9305_v31 = vor.u32 %v10260_v22, %v9302_v55  ;;  %v9301_v48 = vor.u32 %v10261_v11, %v9300_v43 }
 0x863   :  { %9710 = vst [vmem:[%s16042_s5 + $0x690] sm:$0xff] %v6696_v28 }
 0x865   :  { %v7223_v34 = vpop.f32.mrf.mxu3 }
 0x866   :  { %v6959_v10 = vpop.f32.mrf.mxu2 }
 0x867   :  { %v7224_v19 = vadd.f32 %v7223_v34, %v6959_v10  ;;  %v6698_v29 = vpop.f32.mrf.mxu1 }
 0x868   :  { %v6434_v17 = vpop.f32.mrf.mxu0 }
 0x869   :  { %9711 = vst [vmem:[%s16042_s5 + $0x698] sm:$0xff] %v7224_v19  ;;  %v6699_v32 = vadd.f32 %v6698_v29, %v6434_v17  ;;  %v9310_v29 = vld [vmem:[%s16041_s4 + $0xe8] sm:$0xf0]  ;;  %v9308_v17 = vld [vmem:[%s16041_s4 + $0xe0] sm:$0xf] }
 0x86a   :  { %9663 = vmatmul.msk.bf16.gmra.mxu3 %vm4154_vm5, %v9281_v37  ;;  %9612 = vmatmul.msk.bf16.gmra.mxu1 %vm4154_vm5, %v9281_v37 }
 0x86b   :  { %7001 = vmatmul.bf16.gmra.mxu2 %v9277_v12  ;;  %9712 = vst [vmem:[%s16042_s5 + $0x6a0] sm:$0xff] %v6699_v32  ;;  %6473 = vmatmul.bf16.gmra.mxu0 %v9277_v12  ;;  %v10262_v12 = vld [vmem:[%s16041_s4 + $0xe4] sm:$0xf]  ;;  %v10263_v32 = vld [vmem:[%s16041_s4 + $0xe4] sm:$0xf0] }
 0x86d   :  { %v7226_v4 = vpop.f32.mrf.mxu3 }
 0x86e   :  { %v6962_v1 = vpop.f32.mrf.mxu2 }
 0x86f   :  { %v7227_v51 = vadd.f32 %v7226_v4, %v6962_v1  ;;  %v6700_v47 = vpop.f32.mrf.mxu1 }
 0x870   :  { %v6436_v62 = vpop.f32.mrf.mxu0 }
 0x871   :  { %9713 = vst [vmem:[%s16042_s5 + $0x6a8] sm:$0xff] %v7227_v51  ;;  %v6701_v33 = vadd.f32 %v6700_v47, %v6436_v62  ;;  %v9313_v51 = vor.u32 %v10262_v12, %v9310_v29  ;;  %v9309_v62 = vor.u32 %v10263_v32, %v9308_v17 }
 0x873   :  { %9714 = vst [vmem:[%s16042_s5 + $0x6b0] sm:$0xff] %v6701_v33 }
 0x875   :  { %v7228_v42 = vpop.f32.mrf.mxu3 }
 0x876   :  { %v6964_v53 = vpop.f32.mrf.mxu2 }
 0x877   :  { %v7229_v39 = vadd.f32 %v7228_v42, %v6964_v53  ;;  %v6703_v56 = vpop.f32.mrf.mxu1 }
 0x878   :  { %v6439_v49 = vpop.f32.mrf.mxu0 }
 0x879   :  { %9715 = vst [vmem:[%s16042_s5 + $0x6b8] sm:$0xff] %v7229_v39  ;;  %v6704_v23 = vadd.f32 %v6703_v56, %v6439_v49  ;;  %v9318_v56 = vld [vmem:[%s16041_s4 + $0xf8] sm:$0xf0]  ;;  %v9316_v49 = vld [vmem:[%s16041_s4 + $0xf0] sm:$0xf] }
 0x87a   :  { %9664 = vmatmul.msk.bf16.gmra.mxu3 %vm4154_vm5, %v9289_v45  ;;  %9613 = vmatmul.msk.bf16.gmra.mxu1 %vm4154_vm5, %v9289_v45 }
 0x87b   :  { %7006 = vmatmul.bf16.gmra.mxu2 %v9285_v50  ;;  %9716 = vst [vmem:[%s16042_s5 + $0x6c0] sm:$0xff] %v6704_v23  ;;  %6478 = vmatmul.bf16.gmra.mxu0 %v9285_v50  ;;  %v10264_v50 = vld [vmem:[%s16041_s4 + $0xf4] sm:$0xf]  ;;  %v10265_v23 = vld [vmem:[%s16041_s4 + $0xf4] sm:$0xf0] }
 0x87d   :  { %v7231_v8 = vpop.f32.mrf.mxu3 }
 0x87e   :  { %v6967_v60 = vpop.f32.mrf.mxu2 }
 0x87f   :  { %v7232_v14 = vadd.f32 %v7231_v8, %v6967_v60  ;;  %v6705_v35 = vpop.f32.mrf.mxu1 }
 0x880   :  { %v6441_v44 = vpop.f32.mrf.mxu0 }
 0x881   :  { %9717 = vst [vmem:[%s16042_s5 + $0x6c8] sm:$0xff] %v7232_v14  ;;  %v6706_v3 = vadd.f32 %v6705_v35, %v6441_v44  ;;  %v9321_v14 = vor.u32 %v10264_v50, %v9318_v56  ;;  %v9317_v44 = vor.u32 %v10265_v23, %v9316_v49 }
 0x883   :  { %9718 = vst [vmem:[%s16042_s5 + $0x6d0] sm:$0xff] %v6706_v3 }
 0x885   :  { %v7233_v13 = vpop.f32.mrf.mxu3 }
 0x886   :  { %v6969_v54 = vpop.f32.mrf.mxu2 }
 0x887   :  { %v7234_v27 = vadd.f32 %v7233_v13, %v6969_v54  ;;  %v6708_v61 = vpop.f32.mrf.mxu1 }
 0x888   :  { %v6444_v7 = vpop.f32.mrf.mxu0 }
 0x889   :  { %9719 = vst [vmem:[%s16042_s5 + $0x6d8] sm:$0xff] %v7234_v27  ;;  %v6709_v2 = vadd.f32 %v6708_v61, %v6444_v7  ;;  %v9326_v61 = vld [vmem:[%s16041_s4 + $0x108] sm:$0xf0]  ;;  %v9324_v7 = vld [vmem:[%s16041_s4 + $0x100] sm:$0xf] }
 0x88a   :  { %9665 = vmatmul.msk.bf16.gmra.mxu3 %vm4154_vm5, %v9297_v63  ;;  %9614 = vmatmul.msk.bf16.gmra.mxu1 %vm4154_vm5, %v9297_v63 }
 0x88b   :  { %7011 = vmatmul.bf16.gmra.mxu2 %v9293_v25  ;;  %9720 = vst [vmem:[%s16042_s5 + $0x6e0] sm:$0xff] %v6709_v2  ;;  %6483 = vmatmul.bf16.gmra.mxu0 %v9293_v25  ;;  %v10266_v25 = vld [vmem:[%s16041_s4 + $0x104] sm:$0xf]  ;;  %v10267_v2 = vld [vmem:[%s16041_s4 + $0x104] sm:$0xf0] }
 0x88d   :  { %v7236_v6 = vpop.f32.mrf.mxu3 }
 0x88e   :  { %v6972_v9 = vpop.f32.mrf.mxu2 }
 0x88f   :  { %v7237_v58 = vadd.f32 %v7236_v6, %v6972_v9  ;;  %v6710_v40 = vpop.f32.mrf.mxu1 }
 0x890   :  { %v6446_v16 = vpop.f32.mrf.mxu0 }
 0x891   :  { %9721 = vst [vmem:[%s16042_s5 + $0x6e8] sm:$0xff] %v7237_v58  ;;  %v6711_v36 = vadd.f32 %v6710_v40, %v6446_v16  ;;  %v9329_v58 = vor.u32 %v10266_v25, %v9326_v61  ;;  %v9325_v16 = vor.u32 %v10267_v2, %v9324_v7 }
 0x893   :  { %9722 = vst [vmem:[%s16042_s5 + $0x6f0] sm:$0xff] %v6711_v36 }
 0x895   :  { %v7238_v30 = vpop.f32.mrf.mxu3 }
 0x896   :  { %v6974_v57 = vpop.f32.mrf.mxu2 }
 0x897   :  { %v7239_v20 = vadd.f32 %v7238_v30, %v6974_v57  ;;  %v6713_v28 = vpop.f32.mrf.mxu1 }
 0x898   :  { %v6449_v0 = vpop.f32.mrf.mxu0 }
 0x899   :  { %9723 = vst [vmem:[%s16042_s5 + $0x6f8] sm:$0xff] %v7239_v20  ;;  %v6714_v15 = vadd.f32 %v6713_v28, %v6449_v0  ;;  %v9334_v28 = vld [vmem:[%s16041_s4 + $0x118] sm:$0xf0]  ;;  %v9332_v0 = vld [vmem:[%s16041_s4 + $0x110] sm:$0xf] }
 0x89a   :  { %9666 = vmatmul.msk.bf16.gmra.mxu3 %vm4154_vm5, %v9305_v31  ;;  %9615 = vmatmul.msk.bf16.gmra.mxu1 %vm4154_vm5, %v9305_v31 }
 0x89b   :  { %7016 = vmatmul.bf16.gmra.mxu2 %v9301_v48  ;;  %9724 = vst [vmem:[%s16042_s5 + $0x700] sm:$0xff] %v6714_v15  ;;  %6488 = vmatmul.bf16.gmra.mxu0 %v9301_v48  ;;  %v10268_v48 = vld [vmem:[%s16041_s4 + $0x114] sm:$0xf]  ;;  %v10269_v15 = vld [vmem:[%s16041_s4 + $0x114] sm:$0xf0] }
 0x89d   :  { %v7241_v21 = vpop.f32.mrf.mxu3 }
 0x89e   :  { %v6977_v52 = vpop.f32.mrf.mxu2 }
 0x89f   :  { %v7242_v34 = vadd.f32 %v7241_v21, %v6977_v52  ;;  %v6715_v10 = vpop.f32.mrf.mxu1 }
 0x8a0   :  { %v6451_v37 = vpop.f32.mrf.mxu0 }
 0x8a1   :  { %9725 = vst [vmem:[%s16042_s5 + $0x708] sm:$0xff] %v7242_v34  ;;  %v6716_v19 = vadd.f32 %v6715_v10, %v6451_v37  ;;  %v9337_v34 = vor.u32 %v10268_v48, %v9334_v28  ;;  %v9333_v37 = vor.u32 %v10269_v15, %v9332_v0 }
 0x8a3   :  { %9726 = vst [vmem:[%s16042_s5 + $0x710] sm:$0xff] %v6716_v19 }
 0x8a5   :  { %v7243_v4 = vpop.f32.mrf.mxu3 }
 0x8a6   :  { %v6979_v1 = vpop.f32.mrf.mxu2 }
 0x8a7   :  { %v7244_v47 = vadd.f32 %v7243_v4, %v6979_v1  ;;  %v6718_v33 = vpop.f32.mrf.mxu1 }
 0x8a8   :  { %v6454_v18 = vpop.f32.mrf.mxu0 }
 0x8a9   :  { %9727 = vst [vmem:[%s16042_s5 + $0x718] sm:$0xff] %v7244_v47  ;;  %v6719_v59 = vadd.f32 %v6718_v33, %v6454_v18  ;;  %v9342_v33 = vld [vmem:[%s16041_s4 + $0x128] sm:$0xf0]  ;;  %v9340_v18 = vld [vmem:[%s16041_s4 + $0x120] sm:$0xf] }
 0x8aa   :  { %9667 = vmatmul.msk.bf16.gmra.mxu3 %vm4154_vm5, %v9313_v51  ;;  %9616 = vmatmul.msk.bf16.gmra.mxu1 %vm4154_vm5, %v9313_v51 }
 0x8ab   :  { %7021 = vmatmul.bf16.gmra.mxu2 %v9309_v62  ;;  %9728 = vst [vmem:[%s16042_s5 + $0x720] sm:$0xff] %v6719_v59  ;;  %6493 = vmatmul.bf16.gmra.mxu0 %v9309_v62  ;;  %v10270_v62 = vld [vmem:[%s16041_s4 + $0x124] sm:$0xf]  ;;  %v10271_v59 = vld [vmem:[%s16041_s4 + $0x124] sm:$0xf0] }
 0x8ad   :  { %v7246_v26 = vpop.f32.mrf.mxu3 }
 0x8ae   :  { %v6982_v41 = vpop.f32.mrf.mxu2 }
 0x8af   :  { %v7247_v42 = vadd.f32 %v7246_v26, %v6982_v41  ;;  %v6720_v53 = vpop.f32.mrf.mxu1 }
 0x8b0   :  { %v6456_v45 = vpop.f32.mrf.mxu0 }
 0x8b1   :  { %9729 = vst [vmem:[%s16042_s5 + $0x728] sm:$0xff] %v7247_v42  ;;  %v6721_v39 = vadd.f32 %v6720_v53, %v6456_v45  ;;  %v9345_v42 = vor.u32 %v10270_v62, %v9342_v33  ;;  %v9341_v45 = vor.u32 %v10271_v59, %v9340_v18 }
 0x8b3   :  { %9730 = vst [vmem:[%s16042_s5 + $0x730] sm:$0xff] %v6721_v39 }
 0x8b5   :  { %v7248_v8 = vpop.f32.mrf.mxu3 }
 0x8b6   :  { %v6984_v60 = vpop.f32.mrf.mxu2 }
 0x8b7   :  { %v7249_v35 = vadd.f32 %v7248_v8, %v6984_v60  ;;  %v6723_v3 = vpop.f32.mrf.mxu1 }
 0x8b8   :  { %v6459_v24 = vpop.f32.mrf.mxu0 }
 0x8b9   :  { %9731 = vst [vmem:[%s16042_s5 + $0x738] sm:$0xff] %v7249_v35  ;;  %v6724_v46 = vadd.f32 %v6723_v3, %v6459_v24  ;;  %v9350_v3 = vld [vmem:[%s16041_s4 + $0x138] sm:$0xf0]  ;;  %v9348_v24 = vld [vmem:[%s16041_s4 + $0x130] sm:$0xf] }
 0x8ba   :  { %9668 = vmatmul.msk.bf16.gmra.mxu3 %vm4154_vm5, %v9321_v14  ;;  %9617 = vmatmul.msk.bf16.gmra.mxu1 %vm4154_vm5, %v9321_v14 }
 0x8bb   :  { %7026 = vmatmul.bf16.gmra.mxu2 %v9317_v44  ;;  %9732 = vst [vmem:[%s16042_s5 + $0x740] sm:$0xff] %v6724_v46  ;;  %6498 = vmatmul.bf16.gmra.mxu0 %v9317_v44  ;;  %v10272_v44 = vld [vmem:[%s16041_s4 + $0x134] sm:$0xf]  ;;  %v10273_v46 = vld [vmem:[%s16041_s4 + $0x134] sm:$0xf0] }
 0x8bd   :  { %v7251_v5 = vpop.f32.mrf.mxu3 }
 0x8be   :  { %v6987_v38 = vpop.f32.mrf.mxu2 }
 0x8bf   :  { %v7252_v13 = vadd.f32 %v7251_v5, %v6987_v38  ;;  %v6725_v54 = vpop.f32.mrf.mxu1 }
 0x8c0   :  { %v6461_v63 = vpop.f32.mrf.mxu0 }
 0x8c1   :  { %9733 = vst [vmem:[%s16042_s5 + $0x748] sm:$0xff] %v7252_v13  ;;  %v6726_v27 = vadd.f32 %v6725_v54, %v6461_v63  ;;  %v9353_v13 = vor.u32 %v10272_v44, %v9350_v3  ;;  %v9349_v63 = vor.u32 %v10273_v46, %v9348_v24 }
 0x8c3   :  { %9734 = vst [vmem:[%s16042_s5 + $0x750] sm:$0xff] %v6726_v27 }
 0x8c5   :  { %v7253_v6 = vpop.f32.mrf.mxu3 }
 0x8c6   :  { %v6989_v9 = vpop.f32.mrf.mxu2 }
 0x8c7   :  { %v7254_v40 = vadd.f32 %v7253_v6, %v6989_v9  ;;  %v6728_v36 = vpop.f32.mrf.mxu1 }
 0x8c8   :  { %v6464_v22 = vpop.f32.mrf.mxu0 }
 0x8c9   :  { %9735 = vst [vmem:[%s16042_s5 + $0x758] sm:$0xff] %v7254_v40  ;;  %v6729_v55 = vadd.f32 %v6728_v36, %v6464_v22  ;;  %v9358_v36 = vld [vmem:[%s16041_s4 + $0x148] sm:$0xf0]  ;;  %v9356_v22 = vld [vmem:[%s16041_s4 + $0x140] sm:$0xf] }
 0x8ca   :  { %9669 = vmatmul.msk.bf16.gmra.mxu3 %vm4154_vm5, %v9329_v58  ;;  %9618 = vmatmul.msk.bf16.gmra.mxu1 %vm4154_vm5, %v9329_v58 }
 0x8cb   :  { %7031 = vmatmul.bf16.gmra.mxu2 %v9325_v16  ;;  %9736 = vst [vmem:[%s16042_s5 + $0x760] sm:$0xff] %v6729_v55  ;;  %6503 = vmatmul.bf16.gmra.mxu0 %v9325_v16  ;;  %v10274_v16 = vld [vmem:[%s16041_s4 + $0x144] sm:$0xf]  ;;  %v10275_v55 = vld [vmem:[%s16041_s4 + $0x144] sm:$0xf0] }
 0x8cd   :  { %v7256_v43 = vpop.f32.mrf.mxu3 }
 0x8ce   :  { %v6992_v11 = vpop.f32.mrf.mxu2 }
 0x8cf   :  { %v7257_v30 = vadd.f32 %v7256_v43, %v6992_v11  ;;  %v6730_v57 = vpop.f32.mrf.mxu1 }
 0x8d0   :  { %v6466_v31 = vpop.f32.mrf.mxu0 }
 0x8d1   :  { %9737 = vst [vmem:[%s16042_s5 + $0x768] sm:$0xff] %v7257_v30  ;;  %v6731_v20 = vadd.f32 %v6730_v57, %v6466_v31  ;;  %v9361_v30 = vor.u32 %v10274_v16, %v9358_v36  ;;  %v9357_v31 = vor.u32 %v10275_v55, %v9356_v22 }
 0x8d3   :  { %9738 = vst [vmem:[%s16042_s5 + $0x770] sm:$0xff] %v6731_v20 }
 0x8d5   :  { %v7258_v21 = vpop.f32.mrf.mxu3 }
 0x8d6   :  { %v6994_v52 = vpop.f32.mrf.mxu2 }
 0x8d7   :  { %v7259_v10 = vadd.f32 %v7258_v21, %v6994_v52  ;;  %v6733_v19 = vpop.f32.mrf.mxu1 }
 0x8d8   :  { %v6469_v12 = vpop.f32.mrf.mxu0 }
 0x8d9   :  { %9739 = vst [vmem:[%s16042_s5 + $0x778] sm:$0xff] %v7259_v10  ;;  %v6734_v29 = vadd.f32 %v6733_v19, %v6469_v12  ;;  %v9366_v19 = vld [vmem:[%s16041_s4 + $0x158] sm:$0xf0]  ;;  %v9364_v12 = vld [vmem:[%s16041_s4 + $0x150] sm:$0xf] }
 0x8da   :  { %9670 = vmatmul.msk.bf16.gmra.mxu3 %vm4154_vm5, %v9337_v34  ;;  %9619 = vmatmul.msk.bf16.gmra.mxu1 %vm4154_vm5, %v9337_v34 }
 0x8db   :  { %7036 = vmatmul.bf16.gmra.mxu2 %v9333_v37  ;;  %9740 = vst [vmem:[%s16042_s5 + $0x780] sm:$0xff] %v6734_v29  ;;  %6508 = vmatmul.bf16.gmra.mxu0 %v9333_v37  ;;  %v10276_v37 = vld [vmem:[%s16041_s4 + $0x154] sm:$0xf]  ;;  %v10277_v29 = vld [vmem:[%s16041_s4 + $0x154] sm:$0xf0] }
 0x8dd   :  { %v7261_v17 = vpop.f32.mrf.mxu3 }
 0x8de   :  { %v6997_v32 = vpop.f32.mrf.mxu2 }
 0x8df   :  { %v7262_v4 = vadd.f32 %v7261_v17, %v6997_v32  ;;  %v6735_v1 = vpop.f32.mrf.mxu1 }
 0x8e0   :  { %v6471_v51 = vpop.f32.mrf.mxu0 }
 0x8e1   :  { %9741 = vst [vmem:[%s16042_s5 + $0x788] sm:$0xff] %v7262_v4  ;;  %v6736_v47 = vadd.f32 %v6735_v1, %v6471_v51  ;;  %v9369_v4 = vor.u32 %v10276_v37, %v9366_v19  ;;  %v9365_v51 = vor.u32 %v10277_v29, %v9364_v12 }
 0x8e3   :  { %9742 = vst [vmem:[%s16042_s5 + $0x790] sm:$0xff] %v6736_v47 }
 0x8e5   :  { %v7263_v26 = vpop.f32.mrf.mxu3 }
 0x8e6   :  { %v6999_v41 = vpop.f32.mrf.mxu2 }
 0x8e7   :  { %v7264_v53 = vadd.f32 %v7263_v26, %v6999_v41  ;;  %v6738_v39 = vpop.f32.mrf.mxu1 }
 0x8e8   :  { %v6474_v50 = vpop.f32.mrf.mxu0 }
 0x8e9   :  { %9743 = vst [vmem:[%s16042_s5 + $0x798] sm:$0xff] %v7264_v53  ;;  %v6739_v56 = vadd.f32 %v6738_v39, %v6474_v50  ;;  %v9374_v39 = vld [vmem:[%s16041_s4 + $0x168] sm:$0xf0]  ;;  %v9372_v50 = vld [vmem:[%s16041_s4 + $0x160] sm:$0xf] }
 0x8ea   :  { %9671 = vmatmul.msk.bf16.gmra.mxu3 %vm4154_vm5, %v9345_v42  ;;  %9620 = vmatmul.msk.bf16.gmra.mxu1 %vm4154_vm5, %v9345_v42 }
 0x8eb   :  { %7041 = vmatmul.bf16.gmra.mxu2 %v9341_v45  ;;  %9744 = vst [vmem:[%s16042_s5 + $0x7a0] sm:$0xff] %v6739_v56  ;;  %6513 = vmatmul.bf16.gmra.mxu0 %v9341_v45  ;;  %v10278_v45 = vld [vmem:[%s16041_s4 + $0x164] sm:$0xf]  ;;  %v10279_v56 = vld [vmem:[%s16041_s4 + $0x164] sm:$0xf0] }
 0x8ed   :  { %v7266_v49 = vpop.f32.mrf.mxu3 }
 0x8ee   :  { %v7002_v23 = vpop.f32.mrf.mxu2 }
 0x8ef   :  { %v7267_v8 = vadd.f32 %v7266_v49, %v7002_v23  ;;  %v6740_v60 = vpop.f32.mrf.mxu1 }
 0x8f0   :  { %v6476_v14 = vpop.f32.mrf.mxu0 }
 0x8f1   :  { %9745 = vst [vmem:[%s16042_s5 + $0x7a8] sm:$0xff] %v7267_v8  ;;  %v6741_v35 = vadd.f32 %v6740_v60, %v6476_v14  ;;  %v9377_v8 = vor.u32 %v10278_v45, %v9374_v39  ;;  %v9373_v14 = vor.u32 %v10279_v56, %v9372_v50 }
 0x8f3   :  { %9746 = vst [vmem:[%s16042_s5 + $0x7b0] sm:$0xff] %v6741_v35 }
 0x8f5   :  { %v7268_v5 = vpop.f32.mrf.mxu3 }
 0x8f6   :  { %v7004_v38 = vpop.f32.mrf.mxu2 }
 0x8f7   :  { %v7269_v54 = vadd.f32 %v7268_v5, %v7004_v38  ;;  %v6743_v27 = vpop.f32.mrf.mxu1 }
 0x8f8   :  { %v6479_v25 = vpop.f32.mrf.mxu0 }
 0x8f9   :  { %9747 = vst [vmem:[%s16042_s5 + $0x7b8] sm:$0xff] %v7269_v54  ;;  %v6744_v61 = vadd.f32 %v6743_v27, %v6479_v25  ;;  %v9382_v27 = vld [vmem:[%s16041_s4 + $0x178] sm:$0xf0]  ;;  %v9380_v25 = vld [vmem:[%s16041_s4 + $0x170] sm:$0xf] }
 0x8fa   :  { %9672 = vmatmul.msk.bf16.gmra.mxu3 %vm4154_vm5, %v9353_v13  ;;  %9621 = vmatmul.msk.bf16.gmra.mxu1 %vm4154_vm5, %v9353_v13 }
 0x8fb   :  { %7046 = vmatmul.bf16.gmra.mxu2 %v9349_v63  ;;  %9748 = vst [vmem:[%s16042_s5 + $0x7c0] sm:$0xff] %v6744_v61  ;;  %6518 = vmatmul.bf16.gmra.mxu0 %v9349_v63  ;;  %v10280_v63 = vld [vmem:[%s16041_s4 + $0x174] sm:$0xf]  ;;  %v10281_v61 = vld [vmem:[%s16041_s4 + $0x174] sm:$0xf0] }
 0x8fd   :  { %v7271_v7 = vpop.f32.mrf.mxu3 }
 0x8fe   :  { %v7007_v2 = vpop.f32.mrf.mxu2 }
 0x8ff   :  { %v7272_v6 = vadd.f32 %v7271_v7, %v7007_v2  ;;  %v6745_v9 = vpop.f32.mrf.mxu1 }
 0x900   :  { %v6481_v58 = vpop.f32.mrf.mxu0 }
 0x901   :  { %9749 = vst [vmem:[%s16042_s5 + $0x7c8] sm:$0xff] %v7272_v6  ;;  %v6746_v40 = vadd.f32 %v6745_v9, %v6481_v58  ;;  %v9385_v6 = vor.u32 %v10280_v63, %v9382_v27  ;;  %v9381_v58 = vor.u32 %v10281_v61, %v9380_v25 }
 0x903   :  { %9750 = vst [vmem:[%s16042_s5 + $0x7d0] sm:$0xff] %v6746_v40 }
 0x905   :  { %v7273_v43 = vpop.f32.mrf.mxu3 }
 0x906   :  { %v7009_v11 = vpop.f32.mrf.mxu2 }
 0x907   :  { %v7274_v57 = vadd.f32 %v7273_v43, %v7009_v11  ;;  %v6748_v20 = vpop.f32.mrf.mxu1 }
 0x908   :  { %v6484_v48 = vpop.f32.mrf.mxu0 }
 0x909   :  { %9751 = vst [vmem:[%s16042_s5 + $0x7d8] sm:$0xff] %v7274_v57  ;;  %v6749_v28 = vadd.f32 %v6748_v20, %v6484_v48  ;;  %v9390_v20 = vld [vmem:[%s16041_s4 + $0x188] sm:$0xf0]  ;;  %v9388_v48 = vld [vmem:[%s16041_s4 + $0x180] sm:$0xf] }
 0x90a   :  { %9673 = vmatmul.msk.bf16.gmra.mxu3 %vm4154_vm5, %v9361_v30  ;;  %9622 = vmatmul.msk.bf16.gmra.mxu1 %vm4154_vm5, %v9361_v30 }
 0x90b   :  { %7051 = vmatmul.bf16.gmra.mxu2 %v9357_v31  ;;  %9752 = vst [vmem:[%s16042_s5 + $0x7e0] sm:$0xff] %v6749_v28  ;;  %6523 = vmatmul.bf16.gmra.mxu0 %v9357_v31  ;;  %v10282_v31 = vld [vmem:[%s16041_s4 + $0x184] sm:$0xf]  ;;  %v10283_v28 = vld [vmem:[%s16041_s4 + $0x184] sm:$0xf0] }
 0x90d   :  { %v7276_v0 = vpop.f32.mrf.mxu3 }
 0x90e   :  { %v7012_v15 = vpop.f32.mrf.mxu2 }
 0x90f   :  { %v7277_v21 = vadd.f32 %v7276_v0, %v7012_v15  ;;  %v6750_v52 = vpop.f32.mrf.mxu1 }
 0x910   :  { %v6486_v34 = vpop.f32.mrf.mxu0 }
 0x911   :  { %9753 = vst [vmem:[%s16042_s5 + $0x7e8] sm:$0xff] %v7277_v21  ;;  %v6751_v10 = vadd.f32 %v6750_v52, %v6486_v34  ;;  %v9393_v21 = vor.u32 %v10282_v31, %v9390_v20  ;;  %v9389_v34 = vor.u32 %v10283_v28, %v9388_v48 }
 0x913   :  { %9754 = vst [vmem:[%s16042_s5 + $0x7f0] sm:$0xff] %v6751_v10 }
 0x915   :  { %v7278_v17 = vpop.f32.mrf.mxu3 }
 0x916   :  { %v7014_v32 = vpop.f32.mrf.mxu2 }
 0x917   :  { %v7279_v1 = vadd.f32 %v7278_v17, %v7014_v32  ;;  %v6753_v47 = vpop.f32.mrf.mxu1 }
 0x918   :  { %v6489_v62 = vpop.f32.mrf.mxu0 }
 0x919   :  { %9755 = vst [vmem:[%s16042_s5 + $0x7f8] sm:$0xff] %v7279_v1  ;;  %v6754_v33 = vadd.f32 %v6753_v47, %v6489_v62  ;;  %v9398_v47 = vld [vmem:[%s16041_s4 + $0x198] sm:$0xf0]  ;;  %v9396_v62 = vld [vmem:[%s16041_s4 + $0x190] sm:$0xf] }
 0x91a   :  { %9674 = vmatmul.msk.bf16.gmra.mxu3 %vm4154_vm5, %v9369_v4  ;;  %9623 = vmatmul.msk.bf16.gmra.mxu1 %vm4154_vm5, %v9369_v4 }
 0x91b   :  { %7056 = vmatmul.bf16.gmra.mxu2 %v9365_v51  ;;  %9756 = vst [vmem:[%s16042_s5 + $0x800] sm:$0xff] %v6754_v33  ;;  %6528 = vmatmul.bf16.gmra.mxu0 %v9365_v51  ;;  %v10284_v51 = vld [vmem:[%s16041_s4 + $0x194] sm:$0xf]  ;;  %v10285_v33 = vld [vmem:[%s16041_s4 + $0x194] sm:$0xf0] }
 0x91d   :  { %v7281_v18 = vpop.f32.mrf.mxu3 }
 0x91e   :  { %v7017_v59 = vpop.f32.mrf.mxu2 }
 0x91f   :  { %v7282_v26 = vadd.f32 %v7281_v18, %v7017_v59  ;;  %v6755_v41 = vpop.f32.mrf.mxu1 }
 0x920   :  { %v6491_v42 = vpop.f32.mrf.mxu0 }
 0x921   :  { %9757 = vst [vmem:[%s16042_s5 + $0x808] sm:$0xff] %v7282_v26  ;;  %v6756_v53 = vadd.f32 %v6755_v41, %v6491_v42  ;;  %v9401_v26 = vor.u32 %v10284_v51, %v9398_v47  ;;  %v9397_v42 = vor.u32 %v10285_v33, %v9396_v62 }
 0x923   :  { %9758 = vst [vmem:[%s16042_s5 + $0x810] sm:$0xff] %v6756_v53 }
 0x925   :  { %v7283_v49 = vpop.f32.mrf.mxu3 }
 0x926   :  { %v7019_v23 = vpop.f32.mrf.mxu2 }
 0x927   :  { %v7284_v60 = vadd.f32 %v7283_v49, %v7019_v23  ;;  %v6758_v35 = vpop.f32.mrf.mxu1 }
 0x928   :  { %v6494_v44 = vpop.f32.mrf.mxu0 }
 0x929   :  { %9759 = vst [vmem:[%s16042_s5 + $0x818] sm:$0xff] %v7284_v60  ;;  %v6759_v3 = vadd.f32 %v6758_v35, %v6494_v44  ;;  %v9406_v35 = vld [vmem:[%s16041_s4 + $0x1a8] sm:$0xf0]  ;;  %v9404_v44 = vld [vmem:[%s16041_s4 + $0x1a0] sm:$0xf] }
 0x92a   :  { %9675 = vmatmul.msk.bf16.gmra.mxu3 %vm4154_vm5, %v9377_v8  ;;  %9624 = vmatmul.msk.bf16.gmra.mxu1 %vm4154_vm5, %v9377_v8 }
 0x92b   :  { %7061 = vmatmul.bf16.gmra.mxu2 %v9373_v14  ;;  %9760 = vst [vmem:[%s16042_s5 + $0x820] sm:$0xff] %v6759_v3  ;;  %6533 = vmatmul.bf16.gmra.mxu0 %v9373_v14  ;;  %v10286_v14 = vld [vmem:[%s16041_s4 + $0x1a4] sm:$0xf]  ;;  %v10287_v3 = vld [vmem:[%s16041_s4 + $0x1a4] sm:$0xf0] }
 0x92d   :  { %v7286_v24 = vpop.f32.mrf.mxu3 }
 0x92e   :  { %v7022_v46 = vpop.f32.mrf.mxu2 }
 0x92f   :  { %v7287_v5 = vadd.f32 %v7286_v24, %v7022_v46  ;;  %v6760_v38 = vpop.f32.mrf.mxu1 }
 0x930   :  { %v6496_v13 = vpop.f32.mrf.mxu0 }
 0x931   :  { %9761 = vst [vmem:[%s16042_s5 + $0x828] sm:$0xff] %v7287_v5  ;;  %v6761_v54 = vadd.f32 %v6760_v38, %v6496_v13  ;;  %v9409_v5 = vor.u32 %v10286_v14, %v9406_v35  ;;  %v9405_v13 = vor.u32 %v10287_v3, %v9404_v44 }
 0x933   :  { %9762 = vst [vmem:[%s16042_s5 + $0x830] sm:$0xff] %v6761_v54 }
 0x935   :  { %v7288_v7 = vpop.f32.mrf.mxu3 }
 0x936   :  { %v7024_v2 = vpop.f32.mrf.mxu2 }
 0x937   :  { %v7289_v9 = vadd.f32 %v7288_v7, %v7024_v2  ;;  %v6763_v40 = vpop.f32.mrf.mxu1 }
 0x938   :  { %v6499_v16 = vpop.f32.mrf.mxu0 }
 0x939   :  { %9763 = vst [vmem:[%s16042_s5 + $0x838] sm:$0xff] %v7289_v9  ;;  %v6764_v36 = vadd.f32 %v6763_v40, %v6499_v16  ;;  %v9414_v40 = vld [vmem:[%s16041_s4 + $0x1b8] sm:$0xf0]  ;;  %v9412_v16 = vld [vmem:[%s16041_s4 + $0x1b0] sm:$0xf] }
 0x93a   :  { %9676 = vmatmul.msk.bf16.gmra.mxu3 %vm4154_vm5, %v9385_v6  ;;  %9625 = vmatmul.msk.bf16.gmra.mxu1 %vm4154_vm5, %v9385_v6 }
 0x93b   :  { %7066 = vmatmul.bf16.gmra.mxu2 %v9381_v58  ;;  %9764 = vst [vmem:[%s16042_s5 + $0x840] sm:$0xff] %v6764_v36  ;;  %6538 = vmatmul.bf16.gmra.mxu0 %v9381_v58  ;;  %v10288_v58 = vld [vmem:[%s16041_s4 + $0x1b4] sm:$0xf]  ;;  %v10289_v36 = vld [vmem:[%s16041_s4 + $0x1b4] sm:$0xf0] }
 0x93d   :  { %v7291_v22 = vpop.f32.mrf.mxu3 }
 0x93e   :  { %v7027_v55 = vpop.f32.mrf.mxu2 }
 0x93f   :  { %v7292_v43 = vadd.f32 %v7291_v22, %v7027_v55  ;;  %v6765_v11 = vpop.f32.mrf.mxu1 }
 0x940   :  { %v6501_v30 = vpop.f32.mrf.mxu0 }
 0x941   :  { %9765 = vst [vmem:[%s16042_s5 + $0x848] sm:$0xff] %v7292_v43  ;;  %v6766_v57 = vadd.f32 %v6765_v11, %v6501_v30  ;;  %v9417_v43 = vor.u32 %v10288_v58, %v9414_v40  ;;  %v9413_v30 = vor.u32 %v10289_v36, %v9412_v16 }
 0x943   :  { %9766 = vst [vmem:[%s16042_s5 + $0x850] sm:$0xff] %v6766_v57 }
 0x945   :  { %v7293_v0 = vpop.f32.mrf.mxu3 }
 0x946   :  { %v7029_v15 = vpop.f32.mrf.mxu2 }
 0x947   :  { %v7294_v52 = vadd.f32 %v7293_v0, %v7029_v15  ;;  %v6768_v10 = vpop.f32.mrf.mxu1 }
 0x948   :  { %v6504_v37 = vpop.f32.mrf.mxu0 }
 0x949   :  { %9767 = vst [vmem:[%s16042_s5 + $0x858] sm:$0xff] %v7294_v52  ;;  %v6769_v19 = vadd.f32 %v6768_v10, %v6504_v37  ;;  %v9422_v10 = vld [vmem:[%s16041_s4 + $0x1c8] sm:$0xf0]  ;;  %v9420_v37 = vld [vmem:[%s16041_s4 + $0x1c0] sm:$0xf] }
 0x94a   :  { %9677 = vmatmul.msk.bf16.gmra.mxu3 %vm4154_vm5, %v9393_v21  ;;  %9626 = vmatmul.msk.bf16.gmra.mxu1 %vm4154_vm5, %v9393_v21 }
 0x94b   :  { %7071 = vmatmul.bf16.gmra.mxu2 %v9389_v34  ;;  %9768 = vst [vmem:[%s16042_s5 + $0x860] sm:$0xff] %v6769_v19  ;;  %6543 = vmatmul.bf16.gmra.mxu0 %v9389_v34  ;;  %v10290_v34 = vld [vmem:[%s16041_s4 + $0x1c4] sm:$0xf]  ;;  %v10291_v19 = vld [vmem:[%s16041_s4 + $0x1c4] sm:$0xf0] }
 0x94d   :  { %v7296_v12 = vpop.f32.mrf.mxu3 }
 0x94e   :  { %v7032_v29 = vpop.f32.mrf.mxu2 }
 0x94f   :  { %v7297_v17 = vadd.f32 %v7296_v12, %v7032_v29  ;;  %v6770_v32 = vpop.f32.mrf.mxu1 }
 0x950   :  { %v6506_v4 = vpop.f32.mrf.mxu0 }
 0x951   :  { %9769 = vst [vmem:[%s16042_s5 + $0x868] sm:$0xff] %v7297_v17  ;;  %v6771_v1 = vadd.f32 %v6770_v32, %v6506_v4  ;;  %v9425_v17 = vor.u32 %v10290_v34, %v9422_v10  ;;  %v9421_v4 = vor.u32 %v10291_v19, %v9420_v37 }
 0x953   :  { %9770 = vst [vmem:[%s16042_s5 + $0x870] sm:$0xff] %v6771_v1 }
 0x955   :  { %v7298_v18 = vpop.f32.mrf.mxu3 }
 0x956   :  { %v7034_v59 = vpop.f32.mrf.mxu2 }
 0x957   :  { %v7299_v41 = vadd.f32 %v7298_v18, %v7034_v59  ;;  %v6773_v53 = vpop.f32.mrf.mxu1 }
 0x958   :  { %v6509_v45 = vpop.f32.mrf.mxu0 }
 0x959   :  { %9771 = vst [vmem:[%s16042_s5 + $0x878] sm:$0xff] %v7299_v41  ;;  %v6774_v39 = vadd.f32 %v6773_v53, %v6509_v45  ;;  %v9430_v53 = vld [vmem:[%s16041_s4 + $0x1d8] sm:$0xf0]  ;;  %v9428_v45 = vld [vmem:[%s16041_s4 + $0x1d0] sm:$0xf] }
 0x95a   :  { %9678 = vmatmul.msk.bf16.gmra.mxu3 %vm4154_vm5, %v9401_v26  ;;  %9627 = vmatmul.msk.bf16.gmra.mxu1 %vm4154_vm5, %v9401_v26 }
 0x95b   :  { %7076 = vmatmul.bf16.gmra.mxu2 %v9397_v42  ;;  %9772 = vst [vmem:[%s16042_s5 + $0x880] sm:$0xff] %v6774_v39  ;;  %6548 = vmatmul.bf16.gmra.mxu0 %v9397_v42  ;;  %v10292_v42 = vld [vmem:[%s16041_s4 + $0x1d4] sm:$0xf]  ;;  %v10293_v39 = vld [vmem:[%s16041_s4 + $0x1d4] sm:$0xf0] }
 0x95d   :  { %v7301_v50 = vpop.f32.mrf.mxu3 }
 0x95e   :  { %v7037_v56 = vpop.f32.mrf.mxu2 }
 0x95f   :  { %v7302_v49 = vadd.f32 %v7301_v50, %v7037_v56  ;;  %v6775_v23 = vpop.f32.mrf.mxu1 }
 0x960   :  { %v6511_v8 = vpop.f32.mrf.mxu0 }
 0x961   :  { %9773 = vst [vmem:[%s16042_s5 + $0x888] sm:$0xff] %v7302_v49  ;;  %v6776_v60 = vadd.f32 %v6775_v23, %v6511_v8  ;;  %v9433_v49 = vor.u32 %v10292_v42, %v9430_v53  ;;  %v9429_v8 = vor.u32 %v10293_v39, %v9428_v45 }
 0x963   :  { %9774 = vst [vmem:[%s16042_s5 + $0x890] sm:$0xff] %v6776_v60 }
 0x965   :  { %v7303_v24 = vpop.f32.mrf.mxu3 }
 0x966   :  { %v7039_v46 = vpop.f32.mrf.mxu2 }
 0x967   :  { %v7304_v38 = vadd.f32 %v7303_v24, %v7039_v46  ;;  %v6778_v54 = vpop.f32.mrf.mxu1 }
 0x968   :  { %v6514_v63 = vpop.f32.mrf.mxu0 }
 0x969   :  { %9775 = vst [vmem:[%s16042_s5 + $0x898] sm:$0xff] %v7304_v38  ;;  %v6779_v27 = vadd.f32 %v6778_v54, %v6514_v63  ;;  %v9438_v54 = vld [vmem:[%s16041_s4 + $0x1e8] sm:$0xf0]  ;;  %v9436_v63 = vld [vmem:[%s16041_s4 + $0x1e0] sm:$0xf] }
 0x96a   :  { %9679 = vmatmul.msk.bf16.gmra.mxu3 %vm4154_vm5, %v9409_v5  ;;  %9628 = vmatmul.msk.bf16.gmra.mxu1 %vm4154_vm5, %v9409_v5 }
 0x96b   :  { %7081 = vmatmul.bf16.gmra.mxu2 %v9405_v13  ;;  %9776 = vst [vmem:[%s16042_s5 + $0x8a0] sm:$0xff] %v6779_v27  ;;  %6553 = vmatmul.bf16.gmra.mxu0 %v9405_v13  ;;  %v10294_v13 = vld [vmem:[%s16041_s4 + $0x1e4] sm:$0xf]  ;;  %v10295_v27 = vld [vmem:[%s16041_s4 + $0x1e4] sm:$0xf0] }
 0x96d   :  { %v7306_v25 = vpop.f32.mrf.mxu3 }
 0x96e   :  { %v7042_v61 = vpop.f32.mrf.mxu2 }
 0x96f   :  { %v7307_v7 = vadd.f32 %v7306_v25, %v7042_v61  ;;  %v6780_v2 = vpop.f32.mrf.mxu1 }
 0x970   :  { %v6516_v6 = vpop.f32.mrf.mxu0 }
 0x971   :  { %9777 = vst [vmem:[%s16042_s5 + $0x8a8] sm:$0xff] %v7307_v7  ;;  %v6781_v9 = vadd.f32 %v6780_v2, %v6516_v6  ;;  %v9441_v7 = vor.u32 %v10294_v13, %v9438_v54  ;;  %v9437_v6 = vor.u32 %v10295_v27, %v9436_v63 }
 0x973   :  { %9778 = vst [vmem:[%s16042_s5 + $0x8b0] sm:$0xff] %v6781_v9 }
 0x975   :  { %v7308_v22 = vpop.f32.mrf.mxu3 }
 0x976   :  { %v7044_v55 = vpop.f32.mrf.mxu2 }
 0x977   :  { %v7309_v11 = vadd.f32 %v7308_v22, %v7044_v55  ;;  %v6783_v57 = vpop.f32.mrf.mxu1 }
 0x978   :  { %v6519_v31 = vpop.f32.mrf.mxu0 }
 0x979   :  { %9779 = vst [vmem:[%s16042_s5 + $0x8b8] sm:$0xff] %v7309_v11  ;;  %v6784_v20 = vadd.f32 %v6783_v57, %v6519_v31  ;;  %v9446_v57 = vld [vmem:[%s16041_s4 + $0x1f8] sm:$0xf0]  ;;  %v9444_v31 = vld [vmem:[%s16041_s4 + $0x1f0] sm:$0xf] }
 0x97a   :  { %9680 = vmatmul.msk.bf16.gmra.mxu3 %vm4154_vm5, %v9417_v43  ;;  %9629 = vmatmul.msk.bf16.gmra.mxu1 %vm4154_vm5, %v9417_v43 }
 0x97b   :  { %7086 = vmatmul.bf16.gmra.mxu2 %v9413_v30  ;;  %9780 = vst [vmem:[%s16042_s5 + $0x8c0] sm:$0xff] %v6784_v20  ;;  %6558 = vmatmul.bf16.gmra.mxu0 %v9413_v30  ;;  %v10296_v30 = vld [vmem:[%s16041_s4 + $0x1f4] sm:$0xf]  ;;  %v10297_v20 = vld [vmem:[%s16041_s4 + $0x1f4] sm:$0xf0] }
 0x97d   :  { %v7311_v48 = vpop.f32.mrf.mxu3 }
 0x97e   :  { %v7047_v28 = vpop.f32.mrf.mxu2 }
 0x97f   :  { %v7312_v0 = vadd.f32 %v7311_v48, %v7047_v28  ;;  %v6785_v15 = vpop.f32.mrf.mxu1 }
 0x980   :  { %v6521_v21 = vpop.f32.mrf.mxu0 }
 0x981   :  { %9781 = vst [vmem:[%s16042_s5 + $0x8c8] sm:$0xff] %v7312_v0  ;;  %v6786_v52 = vadd.f32 %v6785_v15, %v6521_v21  ;;  %v9449_v0 = vor.u32 %v10296_v30, %v9446_v57  ;;  %v9445_v21 = vor.u32 %v10297_v20, %v9444_v31 }
 0x983   :  { %9782 = vst [vmem:[%s16042_s5 + $0x8d0] sm:$0xff] %v6786_v52 }
 0x985   :  { %v7313_v12 = vpop.f32.mrf.mxu3 }
 0x986   :  { %v7049_v29 = vpop.f32.mrf.mxu2 }
 0x987   :  { %v7314_v32 = vadd.f32 %v7313_v12, %v7049_v29  ;;  %v6788_v1 = vpop.f32.mrf.mxu1 }
 0x988   :  { %v6524_v51 = vpop.f32.mrf.mxu0 }
 0x989   :  { %9783 = vst [vmem:[%s16042_s5 + $0x8d8] sm:$0xff] %v7314_v32  ;;  %v6789_v47 = vadd.f32 %v6788_v1, %v6524_v51  ;;  %v9454_v1 = vld [vmem:[%s16041_s4 + $0x208] sm:$0xf0]  ;;  %v9452_v51 = vld [vmem:[%s16041_s4 + $0x200] sm:$0xf] }
 0x98a   :  { %9681 = vmatmul.msk.bf16.gmra.mxu3 %vm4154_vm5, %v9425_v17  ;;  %9630 = vmatmul.msk.bf16.gmra.mxu1 %vm4154_vm5, %v9425_v17 }
 0x98b   :  { %7091 = vmatmul.bf16.gmra.mxu2 %v9421_v4  ;;  %9784 = vst [vmem:[%s16042_s5 + $0x8e0] sm:$0xff] %v6789_v47  ;;  %6563 = vmatmul.bf16.gmra.mxu0 %v9421_v4  ;;  %v10298_v4 = vld [vmem:[%s16041_s4 + $0x204] sm:$0xf]  ;;  %v10299_v47 = vld [vmem:[%s16041_s4 + $0x204] sm:$0xf0] }
 0x98d   :  { %v7316_v62 = vpop.f32.mrf.mxu3 }
 0x98e   :  { %v7052_v33 = vpop.f32.mrf.mxu2 }
 0x98f   :  { %v7317_v18 = vadd.f32 %v7316_v62, %v7052_v33  ;;  %v6790_v59 = vpop.f32.mrf.mxu1 }
 0x990   :  { %v6526_v26 = vpop.f32.mrf.mxu0 }
 0x991   :  { %9785 = vst [vmem:[%s16042_s5 + $0x8e8] sm:$0xff] %v7317_v18  ;;  %v6791_v41 = vadd.f32 %v6790_v59, %v6526_v26  ;;  %v9457_v18 = vor.u32 %v10298_v4, %v9454_v1  ;;  %v9453_v26 = vor.u32 %v10299_v47, %v9452_v51 }
 0x993   :  { %9786 = vst [vmem:[%s16042_s5 + $0x8f0] sm:$0xff] %v6791_v41 }
 0x995   :  { %v7318_v50 = vpop.f32.mrf.mxu3 }
 0x996   :  { %v7054_v56 = vpop.f32.mrf.mxu2 }
 0x997   :  { %v7319_v23 = vadd.f32 %v7318_v50, %v7054_v56  ;;  %v6793_v60 = vpop.f32.mrf.mxu1 }
 0x998   :  { %v6529_v14 = vpop.f32.mrf.mxu0 }
 0x999   :  { %9787 = vst [vmem:[%s16042_s5 + $0x8f8] sm:$0xff] %v7319_v23  ;;  %v6794_v35 = vadd.f32 %v6793_v60, %v6529_v14  ;;  %v9462_v60 = vld [vmem:[%s16041_s4 + $0x218] sm:$0xf0]  ;;  %v9460_v14 = vld [vmem:[%s16041_s4 + $0x210] sm:$0xf] }
 0x99a   :  { %9682 = vmatmul.msk.bf16.gmra.mxu3 %vm4154_vm5, %v9433_v49  ;;  %9631 = vmatmul.msk.bf16.gmra.mxu1 %vm4154_vm5, %v9433_v49 }
 0x99b   :  { %7096 = vmatmul.bf16.gmra.mxu2 %v9429_v8  ;;  %9788 = vst [vmem:[%s16042_s5 + $0x900] sm:$0xff] %v6794_v35  ;;  %6568 = vmatmul.bf16.gmra.mxu0 %v9429_v8  ;;  %v10300_v8 = vld [vmem:[%s16041_s4 + $0x214] sm:$0xf]  ;;  %v10301_v35 = vld [vmem:[%s16041_s4 + $0x214] sm:$0xf0] }
 0x99d   :  { %v7321_v44 = vpop.f32.mrf.mxu3 }
 0x99e   :  { %v7057_v3 = vpop.f32.mrf.mxu2 }
 0x99f   :  { %v7322_v24 = vadd.f32 %v7321_v44, %v7057_v3  ;;  %v6795_v46 = vpop.f32.mrf.mxu1 }
 0x9a0   :  { %v6531_v5 = vpop.f32.mrf.mxu0 }
 0x9a1   :  { %9789 = vst [vmem:[%s16042_s5 + $0x908] sm:$0xff] %v7322_v24  ;;  %v6796_v38 = vadd.f32 %v6795_v46, %v6531_v5  ;;  %v9465_v24 = vor.u32 %v10300_v8, %v9462_v60  ;;  %v9461_v5 = vor.u32 %v10301_v35, %v9460_v14 }
 0x9a3   :  { %9790 = vst [vmem:[%s16042_s5 + $0x910] sm:$0xff] %v6796_v38 }
 0x9a5   :  { %v7323_v25 = vpop.f32.mrf.mxu3 }
 0x9a6   :  { %v7059_v61 = vpop.f32.mrf.mxu2 }
 0x9a7   :  { %v7324_v2 = vadd.f32 %v7323_v25, %v7059_v61  ;;  %v6798_v9 = vpop.f32.mrf.mxu1 }
 0x9a8   :  { %v6534_v58 = vpop.f32.mrf.mxu0 }
 0x9a9   :  { %9791 = vst [vmem:[%s16042_s5 + $0x918] sm:$0xff] %v7324_v2  ;;  %v6799_v40 = vadd.f32 %v6798_v9, %v6534_v58  ;;  %v9470_v9 = vld [vmem:[%s16041_s4 + $0x228] sm:$0xf0]  ;;  %v9468_v58 = vld [vmem:[%s16041_s4 + $0x220] sm:$0xf] }
 0x9aa   :  { %9683 = vmatmul.msk.bf16.gmra.mxu3 %vm4154_vm5, %v9441_v7  ;;  %9632 = vmatmul.msk.bf16.gmra.mxu1 %vm4154_vm5, %v9441_v7 }
 0x9ab   :  { %7101 = vmatmul.bf16.gmra.mxu2 %v9437_v6  ;;  %9792 = vst [vmem:[%s16042_s5 + $0x920] sm:$0xff] %v6799_v40  ;;  %6573 = vmatmul.bf16.gmra.mxu0 %v9437_v6  ;;  %v10302_v6 = vld [vmem:[%s16041_s4 + $0x224] sm:$0xf]  ;;  %v10303_v40 = vld [vmem:[%s16041_s4 + $0x224] sm:$0xf0] }
 0x9ad   :  { %v7326_v16 = vpop.f32.mrf.mxu3 }
 0x9ae   :  { %v7062_v36 = vpop.f32.mrf.mxu2 }
 0x9af   :  { %v7327_v22 = vadd.f32 %v7326_v16, %v7062_v36  ;;  %v6800_v55 = vpop.f32.mrf.mxu1 }
 0x9b0   :  { %v6536_v43 = vpop.f32.mrf.mxu0 }
 0x9b1   :  { %9793 = vst [vmem:[%s16042_s5 + $0x928] sm:$0xff] %v7327_v22  ;;  %v6801_v11 = vadd.f32 %v6800_v55, %v6536_v43  ;;  %v9473_v22 = vor.u32 %v10302_v6, %v9470_v9  ;;  %v9469_v43 = vor.u32 %v10303_v40, %v9468_v58 }
 0x9b3   :  { %9794 = vst [vmem:[%s16042_s5 + $0x930] sm:$0xff] %v6801_v11 }
 0x9b5   :  { %v7328_v48 = vpop.f32.mrf.mxu3 }
 0x9b6   :  { %v7064_v28 = vpop.f32.mrf.mxu2 }
 0x9b7   :  { %v7329_v15 = vadd.f32 %v7328_v48, %v7064_v28  ;;  %v6803_v52 = vpop.f32.mrf.mxu1 }
 0x9b8   :  { %v6539_v34 = vpop.f32.mrf.mxu0 }
 0x9b9   :  { %9795 = vst [vmem:[%s16042_s5 + $0x938] sm:$0xff] %v7329_v15  ;;  %v6804_v10 = vadd.f32 %v6803_v52, %v6539_v34  ;;  %v9478_v52 = vld [vmem:[%s16041_s4 + $0x238] sm:$0xf0]  ;;  %v9476_v34 = vld [vmem:[%s16041_s4 + $0x230] sm:$0xf] }
 0x9ba   :  { %9684 = vmatmul.msk.bf16.gmra.mxu3 %vm4154_vm5, %v9449_v0  ;;  %9633 = vmatmul.msk.bf16.gmra.mxu1 %vm4154_vm5, %v9449_v0 }
 0x9bb   :  { %7106 = vmatmul.bf16.gmra.mxu2 %v9445_v21  ;;  %9796 = vst [vmem:[%s16042_s5 + $0x940] sm:$0xff] %v6804_v10  ;;  %6578 = vmatmul.bf16.gmra.mxu0 %v9445_v21  ;;  %v10304_v21 = vld [vmem:[%s16041_s4 + $0x234] sm:$0xf]  ;;  %v10305_v10 = vld [vmem:[%s16041_s4 + $0x234] sm:$0xf0] }
 0x9bd   :  { %v7331_v37 = vpop.f32.mrf.mxu3 }
 0x9be   :  { %v7067_v19 = vpop.f32.mrf.mxu2 }
 0x9bf   :  { %v7332_v12 = vadd.f32 %v7331_v37, %v7067_v19  ;;  %v6805_v29 = vpop.f32.mrf.mxu1 }
 0x9c0   :  { %v6541_v17 = vpop.f32.mrf.mxu0 }
 0x9c1   :  { %9797 = vst [vmem:[%s16042_s5 + $0x948] sm:$0xff] %v7332_v12  ;;  %v6806_v32 = vadd.f32 %v6805_v29, %v6541_v17  ;;  %v9481_v12 = vor.u32 %v10304_v21, %v9478_v52  ;;  %v9477_v17 = vor.u32 %v10305_v10, %v9476_v34 }
 0x9c3   :  { %9798 = vst [vmem:[%s16042_s5 + $0x950] sm:$0xff] %v6806_v32 }
 0x9c5   :  { %v7333_v62 = vpop.f32.mrf.mxu3 }
 0x9c6   :  { %v7069_v33 = vpop.f32.mrf.mxu2 }
 0x9c7   :  { %v7334_v59 = vadd.f32 %v7333_v62, %v7069_v33  ;;  %v6808_v41 = vpop.f32.mrf.mxu1 }
 0x9c8   :  { %v6544_v42 = vpop.f32.mrf.mxu0 }
 0x9c9   :  { %9799 = vst [vmem:[%s16042_s5 + $0x958] sm:$0xff] %v7334_v59  ;;  %v6809_v53 = vadd.f32 %v6808_v41, %v6544_v42  ;;  %v9486_v41 = vld [vmem:[%s16041_s4 + $0x248] sm:$0xf0]  ;;  %v9484_v42 = vld [vmem:[%s16041_s4 + $0x240] sm:$0xf] }
 0x9ca   :  { %9685 = vmatmul.msk.bf16.gmra.mxu3 %vm4154_vm5, %v9457_v18  ;;  %9634 = vmatmul.msk.bf16.gmra.mxu1 %vm4154_vm5, %v9457_v18 }
 0x9cb   :  { %7111 = vmatmul.bf16.gmra.mxu2 %v9453_v26  ;;  %9800 = vst [vmem:[%s16042_s5 + $0x960] sm:$0xff] %v6809_v53  ;;  %6583 = vmatmul.bf16.gmra.mxu0 %v9453_v26  ;;  %v10306_v26 = vld [vmem:[%s16041_s4 + $0x244] sm:$0xf]  ;;  %v10307_v53 = vld [vmem:[%s16041_s4 + $0x244] sm:$0xf0] }
 0x9cd   :  { %v7336_v45 = vpop.f32.mrf.mxu3 }
 0x9ce   :  { %v7072_v39 = vpop.f32.mrf.mxu2 }
 0x9cf   :  { %v7337_v50 = vadd.f32 %v7336_v45, %v7072_v39  ;;  %v6810_v56 = vpop.f32.mrf.mxu1 }
 0x9d0   :  { %v6546_v49 = vpop.f32.mrf.mxu0 }
 0x9d1   :  { %9801 = vst [vmem:[%s16042_s5 + $0x968] sm:$0xff] %v7337_v50  ;;  %v6811_v23 = vadd.f32 %v6810_v56, %v6546_v49  ;;  %v9489_v50 = vor.u32 %v10306_v26, %v9486_v41  ;;  %v9485_v49 = vor.u32 %v10307_v53, %v9484_v42 }
 0x9d3   :  { %9802 = vst [vmem:[%s16042_s5 + $0x970] sm:$0xff] %v6811_v23 }
 0x9d5   :  { %v7338_v44 = vpop.f32.mrf.mxu3 }
 0x9d6   :  { %v7074_v3 = vpop.f32.mrf.mxu2 }
 0x9d7   :  { %v7339_v46 = vadd.f32 %v7338_v44, %v7074_v3  ;;  %v6813_v38 = vpop.f32.mrf.mxu1 }
 0x9d8   :  { %v6549_v13 = vpop.f32.mrf.mxu0 }
 0x9d9   :  { %9803 = vst [vmem:[%s16042_s5 + $0x978] sm:$0xff] %v7339_v46  ;;  %v6814_v54 = vadd.f32 %v6813_v38, %v6549_v13  ;;  %v9494_v38 = vld [vmem:[%s16041_s4 + $0x258] sm:$0xf0]  ;;  %v9492_v13 = vld [vmem:[%s16041_s4 + $0x250] sm:$0xf] }
 0x9da   :  { %9686 = vmatmul.msk.bf16.gmra.mxu3 %vm4154_vm5, %v9465_v24  ;;  %9635 = vmatmul.msk.bf16.gmra.mxu1 %vm4154_vm5, %v9465_v24 }
 0x9db   :  { %7116 = vmatmul.bf16.gmra.mxu2 %v9461_v5  ;;  %9804 = vst [vmem:[%s16042_s5 + $0x980] sm:$0xff] %v6814_v54  ;;  %6588 = vmatmul.bf16.gmra.mxu0 %v9461_v5  ;;  %v10308_v5 = vld [vmem:[%s16041_s4 + $0x254] sm:$0xf]  ;;  %v10309_v54 = vld [vmem:[%s16041_s4 + $0x254] sm:$0xf0] }
 0x9dd   :  { %v7341_v63 = vpop.f32.mrf.mxu3 }
 0x9de   :  { %v7077_v27 = vpop.f32.mrf.mxu2 }
 0x9df   :  { %v7342_v25 = vadd.f32 %v7341_v63, %v7077_v27  ;;  %v6815_v61 = vpop.f32.mrf.mxu1 }
 0x9e0   :  { %v6551_v7 = vpop.f32.mrf.mxu0 }
 0x9e1   :  { %9805 = vst [vmem:[%s16042_s5 + $0x988] sm:$0xff] %v7342_v25  ;;  %v6816_v2 = vadd.f32 %v6815_v61, %v6551_v7  ;;  %v9497_v25 = vor.u32 %v10308_v5, %v9494_v38  ;;  %v9493_v7 = vor.u32 %v10309_v54, %v9492_v13 }
 0x9e3   :  { %9806 = vst [vmem:[%s16042_s5 + $0x990] sm:$0xff] %v6816_v2 }
 0x9e5   :  { %v7343_v16 = vpop.f32.mrf.mxu3 }
 0x9e6   :  { %v7079_v36 = vpop.f32.mrf.mxu2 }
 0x9e7   :  { %v7344_v55 = vadd.f32 %v7343_v16, %v7079_v36  ;;  %v6818_v11 = vpop.f32.mrf.mxu1 }
 0x9e8   :  { %v6554_v30 = vpop.f32.mrf.mxu0 }
 0x9e9   :  { %9807 = vst [vmem:[%s16042_s5 + $0x998] sm:$0xff] %v7344_v55  ;;  %v6819_v57 = vadd.f32 %v6818_v11, %v6554_v30  ;;  %v9502_v11 = vld [vmem:[%s16041_s4 + $0x268] sm:$0xf0]  ;;  %v9500_v30 = vld [vmem:[%s16041_s4 + $0x260] sm:$0xf] }
 0x9ea   :  { %9687 = vmatmul.msk.bf16.gmra.mxu3 %vm4154_vm5, %v9473_v22  ;;  %9636 = vmatmul.msk.bf16.gmra.mxu1 %vm4154_vm5, %v9473_v22 }
 0x9eb   :  { %7121 = vmatmul.bf16.gmra.mxu2 %v9469_v43  ;;  %9808 = vst [vmem:[%s16042_s5 + $0x9a0] sm:$0xff] %v6819_v57  ;;  %6593 = vmatmul.bf16.gmra.mxu0 %v9469_v43  ;;  %v10310_v43 = vld [vmem:[%s16041_s4 + $0x264] sm:$0xf]  ;;  %v10311_v57 = vld [vmem:[%s16041_s4 + $0x264] sm:$0xf0] }
 0x9ed   :  { %v7346_v31 = vpop.f32.mrf.mxu3 }
 0x9ee   :  { %v7082_v20 = vpop.f32.mrf.mxu2 }
 0x9ef   :  { %v7347_v48 = vadd.f32 %v7346_v31, %v7082_v20  ;;  %v6820_v28 = vpop.f32.mrf.mxu1 }
 0x9f0   :  { %v6556_v0 = vpop.f32.mrf.mxu0 }
 0x9f1   :  { %9809 = vst [vmem:[%s16042_s5 + $0x9a8] sm:$0xff] %v7347_v48  ;;  %v6821_v15 = vadd.f32 %v6820_v28, %v6556_v0  ;;  %v9505_v48 = vor.u32 %v10310_v43, %v9502_v11  ;;  %v9501_v0 = vor.u32 %v10311_v57, %v9500_v30 }
 0x9f3   :  { %9810 = vst [vmem:[%s16042_s5 + $0x9b0] sm:$0xff] %v6821_v15 }
 0x9f5   :  { %v7348_v37 = vpop.f32.mrf.mxu3 }
 0x9f6   :  { %v7084_v19 = vpop.f32.mrf.mxu2 }
 0x9f7   :  { %v7349_v29 = vadd.f32 %v7348_v37, %v7084_v19  ;;  %v6823_v32 = vpop.f32.mrf.mxu1 }
 0x9f8   :  { %v6559_v4 = vpop.f32.mrf.mxu0 }
 0x9f9   :  { %9811 = vst [vmem:[%s16042_s5 + $0x9b8] sm:$0xff] %v7349_v29  ;;  %v6824_v1 = vadd.f32 %v6823_v32, %v6559_v4  ;;  %v9510_v32 = vld [vmem:[%s16041_s4 + $0x278] sm:$0xf0]  ;;  %v9508_v4 = vld [vmem:[%s16041_s4 + $0x270] sm:$0xf] }
 0x9fa   :  { %9688 = vmatmul.msk.bf16.gmra.mxu3 %vm4154_vm5, %v9481_v12  ;;  %9637 = vmatmul.msk.bf16.gmra.mxu1 %vm4154_vm5, %v9481_v12 }
 0x9fb   :  { %7126 = vmatmul.bf16.gmra.mxu2 %v9477_v17  ;;  %9812 = vst [vmem:[%s16042_s5 + $0x9c0] sm:$0xff] %v6824_v1  ;;  %6598 = vmatmul.bf16.gmra.mxu0 %v9477_v17  ;;  %v10312_v17 = vld [vmem:[%s16041_s4 + $0x274] sm:$0xf]  ;;  %v10313_v1 = vld [vmem:[%s16041_s4 + $0x274] sm:$0xf0] }
 0x9fd   :  { %v7351_v51 = vpop.f32.mrf.mxu3 }
 0x9fe   :  { %v7087_v47 = vpop.f32.mrf.mxu2 }
 0x9ff   :  { %v7352_v62 = vadd.f32 %v7351_v51, %v7087_v47  ;;  %v6825_v33 = vpop.f32.mrf.mxu1 }
 0xa00   :  { %v6561_v18 = vpop.f32.mrf.mxu0 }
 0xa01   :  { %9813 = vst [vmem:[%s16042_s5 + $0x9c8] sm:$0xff] %v7352_v62  ;;  %v6826_v59 = vadd.f32 %v6825_v33, %v6561_v18  ;;  %v9513_v62 = vor.u32 %v10312_v17, %v9510_v32  ;;  %v9509_v18 = vor.u32 %v10313_v1, %v9508_v4 }
 0xa03   :  { %9814 = vst [vmem:[%s16042_s5 + $0x9d0] sm:$0xff] %v6826_v59 }
 0xa05   :  { %v7353_v45 = vpop.f32.mrf.mxu3 }
 0xa06   :  { %v7089_v39 = vpop.f32.mrf.mxu2 }
 0xa07   :  { %v7354_v56 = vadd.f32 %v7353_v45, %v7089_v39  ;;  %v6828_v23 = vpop.f32.mrf.mxu1 }
 0xa08   :  { %v6564_v8 = vpop.f32.mrf.mxu0 }
 0xa09   :  { %9815 = vst [vmem:[%s16042_s5 + $0x9d8] sm:$0xff] %v7354_v56  ;;  %v6829_v60 = vadd.f32 %v6828_v23, %v6564_v8  ;;  %v9518_v23 = vld [vmem:[%s16041_s4 + $0x288] sm:$0xf0]  ;;  %v9516_v8 = vld [vmem:[%s16041_s4 + $0x280] sm:$0xf] }
 0xa0a   :  { %9689 = vmatmul.msk.bf16.gmra.mxu3 %vm4154_vm5, %v9489_v50  ;;  %9638 = vmatmul.msk.bf16.gmra.mxu1 %vm4154_vm5, %v9489_v50 }
 0xa0b   :  { %7131 = vmatmul.bf16.gmra.mxu2 %v9485_v49  ;;  %9816 = vst [vmem:[%s16042_s5 + $0x9e0] sm:$0xff] %v6829_v60  ;;  %6603 = vmatmul.bf16.gmra.mxu0 %v9485_v49  ;;  %v10314_v49 = vld [vmem:[%s16041_s4 + $0x284] sm:$0xf]  ;;  %v10315_v60 = vld [vmem:[%s16041_s4 + $0x284] sm:$0xf0] }
 0xa0d   :  { %v7356_v14 = vpop.f32.mrf.mxu3 }
 0xa0e   :  { %v7092_v35 = vpop.f32.mrf.mxu2 }
 0xa0f   :  { %v7357_v44 = vadd.f32 %v7356_v14, %v7092_v35  ;;  %v6830_v3 = vpop.f32.mrf.mxu1 }
 0xa10   :  { %v6566_v24 = vpop.f32.mrf.mxu0 }
 0xa11   :  { %9817 = vst [vmem:[%s16042_s5 + $0x9e8] sm:$0xff] %v7357_v44  ;;  %v6831_v46 = vadd.f32 %v6830_v3, %v6566_v24  ;;  %v9521_v44 = vor.u32 %v10314_v49, %v9518_v23  ;;  %v9517_v24 = vor.u32 %v10315_v60, %v9516_v8 }
 0xa13   :  { %9818 = vst [vmem:[%s16042_s5 + $0x9f0] sm:$0xff] %v6831_v46 }
 0xa15   :  { %v7358_v63 = vpop.f32.mrf.mxu3 }
 0xa16   :  { %v7094_v27 = vpop.f32.mrf.mxu2 }
 0xa17   :  { %v7359_v61 = vadd.f32 %v7358_v63, %v7094_v27  ;;  %v6833_v2 = vpop.f32.mrf.mxu1 }
 0xa18   :  { %v6569_v6 = vpop.f32.mrf.mxu0 }
 0xa19   :  { %9819 = vst [vmem:[%s16042_s5 + $0x9f8] sm:$0xff] %v7359_v61  ;;  %v6834_v9 = vadd.f32 %v6833_v2, %v6569_v6  ;;  %v9526_v2 = vld [vmem:[%s16041_s4 + $0x298] sm:$0xf0]  ;;  %v9524_v6 = vld [vmem:[%s16041_s4 + $0x290] sm:$0xf] }
 0xa1a   :  { %9690 = vmatmul.msk.bf16.gmra.mxu3 %vm4154_vm5, %v9497_v25  ;;  %9639 = vmatmul.msk.bf16.gmra.mxu1 %vm4154_vm5, %v9497_v25 }
 0xa1b   :  { %7136 = vmatmul.bf16.gmra.mxu2 %v9493_v7  ;;  %9820 = vst [vmem:[%s16042_s5 + $0xa00] sm:$0xff] %v6834_v9  ;;  %6608 = vmatmul.bf16.gmra.mxu0 %v9493_v7  ;;  %v10316_v7 = vld [vmem:[%s16041_s4 + $0x294] sm:$0xf]  ;;  %v10317_v9 = vld [vmem:[%s16041_s4 + $0x294] sm:$0xf0] }
 0xa1d   :  { %v7361_v58 = vpop.f32.mrf.mxu3 }
 0xa1e   :  { %v7097_v40 = vpop.f32.mrf.mxu2 }
 0xa1f   :  { %v7362_v16 = vadd.f32 %v7361_v58, %v7097_v40  ;;  %v6835_v36 = vpop.f32.mrf.mxu1 }
 0xa20   :  { %v6571_v22 = vpop.f32.mrf.mxu0 }
 0xa21   :  { %9821 = vst [vmem:[%s16042_s5 + $0xa08] sm:$0xff] %v7362_v16  ;;  %v6836_v55 = vadd.f32 %v6835_v36, %v6571_v22  ;;  %v9529_v16 = vor.u32 %v10316_v7, %v9526_v2  ;;  %v9525_v22 = vor.u32 %v10317_v9, %v9524_v6 }
 0xa23   :  { %9822 = vst [vmem:[%s16042_s5 + $0xa10] sm:$0xff] %v6836_v55 }
 0xa25   :  { %v7363_v31 = vpop.f32.mrf.mxu3 }
 0xa26   :  { %v7099_v20 = vpop.f32.mrf.mxu2 }
 0xa27   :  { %v7364_v28 = vadd.f32 %v7363_v31, %v7099_v20  ;;  %v6838_v15 = vpop.f32.mrf.mxu1 }
 0xa28   :  { %v6574_v21 = vpop.f32.mrf.mxu0 }
 0xa29   :  { %9823 = vst [vmem:[%s16042_s5 + $0xa18] sm:$0xff] %v7364_v28  ;;  %v6839_v52 = vadd.f32 %v6838_v15, %v6574_v21  ;;  %v9534_v15 = vld [vmem:[%s16041_s4 + $0x2a8] sm:$0xf0]  ;;  %v9532_v21 = vld [vmem:[%s16041_s4 + $0x2a0] sm:$0xf] }
 0xa2a   :  { %9691 = vmatmul.msk.bf16.gmra.mxu3 %vm4154_vm5, %v9505_v48  ;;  %9640 = vmatmul.msk.bf16.gmra.mxu1 %vm4154_vm5, %v9505_v48 }
 0xa2b   :  { %7141 = vmatmul.bf16.gmra.mxu2 %v9501_v0  ;;  %9824 = vst [vmem:[%s16042_s5 + $0xa20] sm:$0xff] %v6839_v52  ;;  %6613 = vmatmul.bf16.gmra.mxu0 %v9501_v0  ;;  %v10318_v0 = vld [vmem:[%s16041_s4 + $0x2a4] sm:$0xf]  ;;  %v10319_v52 = vld [vmem:[%s16041_s4 + $0x2a4] sm:$0xf0] }
 0xa2d   :  { %v7366_v34 = vpop.f32.mrf.mxu3 }
 0xa2e   :  { %v7102_v10 = vpop.f32.mrf.mxu2 }
 0xa2f   :  { %v7367_v37 = vadd.f32 %v7366_v34, %v7102_v10  ;;  %v6840_v19 = vpop.f32.mrf.mxu1 }
 0xa30   :  { %v6576_v12 = vpop.f32.mrf.mxu0 }
 0xa31   :  { %9825 = vst [vmem:[%s16042_s5 + $0xa28] sm:$0xff] %v7367_v37  ;;  %v6841_v29 = vadd.f32 %v6840_v19, %v6576_v12  ;;  %v9537_v37 = vor.u32 %v10318_v0, %v9534_v15  ;;  %v9533_v12 = vor.u32 %v10319_v52, %v9532_v21 }
 0xa33   :  { %9826 = vst [vmem:[%s16042_s5 + $0xa30] sm:$0xff] %v6841_v29 }
 0xa35   :  { %v7368_v51 = vpop.f32.mrf.mxu3 }
 0xa36   :  { %v7104_v47 = vpop.f32.mrf.mxu2 }
 0xa37   :  { %v7369_v33 = vadd.f32 %v7368_v51, %v7104_v47  ;;  %v6843_v59 = vpop.f32.mrf.mxu1 }
 0xa38   :  { %v6579_v26 = vpop.f32.mrf.mxu0 }
 0xa39   :  { %9827 = vst [vmem:[%s16042_s5 + $0xa38] sm:$0xff] %v7369_v33  ;;  %v6844_v41 = vadd.f32 %v6843_v59, %v6579_v26  ;;  %v9542_v59 = vld [vmem:[%s16041_s4 + $0x2b8] sm:$0xf0]  ;;  %v9540_v26 = vld [vmem:[%s16041_s4 + $0x2b0] sm:$0xf] }
 0xa3a   :  { %9692 = vmatmul.msk.bf16.gmra.mxu3 %vm4154_vm5, %v9513_v62  ;;  %9641 = vmatmul.msk.bf16.gmra.mxu1 %vm4154_vm5, %v9513_v62 }
 0xa3b   :  { %7146 = vmatmul.bf16.gmra.mxu2 %v9509_v18  ;;  %9828 = vst [vmem:[%s16042_s5 + $0xa40] sm:$0xff] %v6844_v41  ;;  %6618 = vmatmul.bf16.gmra.mxu0 %v9509_v18  ;;  %v10320_v18 = vld [vmem:[%s16041_s4 + $0x2b4] sm:$0xf]  ;;  %v10321_v41 = vld [vmem:[%s16041_s4 + $0x2b4] sm:$0xf0] }
 0xa3d   :  { %v7371_v42 = vpop.f32.mrf.mxu3 }
 0xa3e   :  { %v7107_v53 = vpop.f32.mrf.mxu2 }
 0xa3f   :  { %v7372_v45 = vadd.f32 %v7371_v42, %v7107_v53  ;;  %v6845_v39 = vpop.f32.mrf.mxu1 }
 0xa40   :  { %v6581_v50 = vpop.f32.mrf.mxu0 }
 0xa41   :  { %9829 = vst [vmem:[%s16042_s5 + $0xa48] sm:$0xff] %v7372_v45  ;;  %v6846_v56 = vadd.f32 %v6845_v39, %v6581_v50  ;;  %v9545_v45 = vor.u32 %v10320_v18, %v9542_v59  ;;  %v9541_v50 = vor.u32 %v10321_v41, %v9540_v26 }
 0xa43   :  { %9830 = vst [vmem:[%s16042_s5 + $0xa50] sm:$0xff] %v6846_v56 }
 0xa45   :  { %v7373_v14 = vpop.f32.mrf.mxu3 }
 0xa46   :  { %v7109_v35 = vpop.f32.mrf.mxu2 }
 0xa47   :  { %v7374_v3 = vadd.f32 %v7373_v14, %v7109_v35  ;;  %v6848_v46 = vpop.f32.mrf.mxu1 }
 0xa48   :  { %v6584_v5 = vpop.f32.mrf.mxu0 }
 0xa49   :  { %9831 = vst [vmem:[%s16042_s5 + $0xa58] sm:$0xff] %v7374_v3  ;;  %v6849_v38 = vadd.f32 %v6848_v46, %v6584_v5  ;;  %v9550_v46 = vld [vmem:[%s16041_s4 + $0x2c8] sm:$0xf0]  ;;  %v9548_v5 = vld [vmem:[%s16041_s4 + $0x2c0] sm:$0xf] }
 0xa4a   :  { %9693 = vmatmul.msk.bf16.gmra.mxu3 %vm4154_vm5, %v9521_v44  ;;  %9642 = vmatmul.msk.bf16.gmra.mxu1 %vm4154_vm5, %v9521_v44 }
 0xa4b   :  { %7151 = vmatmul.bf16.gmra.mxu2 %v9517_v24  ;;  %9832 = vst [vmem:[%s16042_s5 + $0xa60] sm:$0xff] %v6849_v38  ;;  %6623 = vmatmul.bf16.gmra.mxu0 %v9517_v24  ;;  %v10322_v24 = vld [vmem:[%s16041_s4 + $0x2c4] sm:$0xf]  ;;  %v10323_v38 = vld [vmem:[%s16041_s4 + $0x2c4] sm:$0xf0] }
 0xa4d   :  { %v7376_v13 = vpop.f32.mrf.mxu3 }
 0xa4e   :  { %v7112_v54 = vpop.f32.mrf.mxu2 }
 0xa4f   :  { %v7377_v63 = vadd.f32 %v7376_v13, %v7112_v54  ;;  %v6850_v27 = vpop.f32.mrf.mxu1 }
 0xa50   :  { %v6586_v25 = vpop.f32.mrf.mxu0 }
 0xa51   :  { %9833 = vst [vmem:[%s16042_s5 + $0xa68] sm:$0xff] %v7377_v63  ;;  %v6851_v61 = vadd.f32 %v6850_v27, %v6586_v25  ;;  %v9553_v63 = vor.u32 %v10322_v24, %v9550_v46  ;;  %v9549_v25 = vor.u32 %v10323_v38, %v9548_v5 }
 0xa53   :  { %9834 = vst [vmem:[%s16042_s5 + $0xa70] sm:$0xff] %v6851_v61 }
 0xa55   :  { %v7378_v58 = vpop.f32.mrf.mxu3 }
 0xa56   :  { %v7114_v40 = vpop.f32.mrf.mxu2 }
 0xa57   :  { %v7379_v36 = vadd.f32 %v7378_v58, %v7114_v40  ;;  %v6853_v55 = vpop.f32.mrf.mxu1 }
 0xa58   :  { %v6589_v43 = vpop.f32.mrf.mxu0 }
 0xa59   :  { %9835 = vst [vmem:[%s16042_s5 + $0xa78] sm:$0xff] %v7379_v36  ;;  %v6854_v11 = vadd.f32 %v6853_v55, %v6589_v43  ;;  %v9558_v55 = vld [vmem:[%s16041_s4 + $0x2d8] sm:$0xf0]  ;;  %v9556_v43 = vld [vmem:[%s16041_s4 + $0x2d0] sm:$0xf] }
 0xa5a   :  { %9694 = vmatmul.msk.bf16.gmra.mxu3 %vm4154_vm5, %v9529_v16  ;;  %9643 = vmatmul.msk.bf16.gmra.mxu1 %vm4154_vm5, %v9529_v16 }
 0xa5b   :  { %7156 = vmatmul.bf16.gmra.mxu2 %v9525_v22  ;;  %9836 = vst [vmem:[%s16042_s5 + $0xa80] sm:$0xff] %v6854_v11  ;;  %6628 = vmatmul.bf16.gmra.mxu0 %v9525_v22  ;;  %v10324_v22 = vld [vmem:[%s16041_s4 + $0x2d4] sm:$0xf]  ;;  %v10325_v11 = vld [vmem:[%s16041_s4 + $0x2d4] sm:$0xf0] }
 0xa5d   :  { %v7381_v30 = vpop.f32.mrf.mxu3 }
 0xa5e   :  { %v7117_v57 = vpop.f32.mrf.mxu2 }
 0xa5f   :  { %v7382_v31 = vadd.f32 %v7381_v30, %v7117_v57  ;;  %v6855_v20 = vpop.f32.mrf.mxu1 }
 0xa60   :  { %v6591_v48 = vpop.f32.mrf.mxu0 }
 0xa61   :  { %9837 = vst [vmem:[%s16042_s5 + $0xa88] sm:$0xff] %v7382_v31  ;;  %v6856_v28 = vadd.f32 %v6855_v20, %v6591_v48  ;;  %v9561_v31 = vor.u32 %v10324_v22, %v9558_v55  ;;  %v9557_v48 = vor.u32 %v10325_v11, %v9556_v43 }
 0xa63   :  { %9838 = vst [vmem:[%s16042_s5 + $0xa90] sm:$0xff] %v6856_v28 }
 0xa65   :  { %v7383_v34 = vpop.f32.mrf.mxu3 }
 0xa66   :  { %v7119_v10 = vpop.f32.mrf.mxu2 }
 0xa67   :  { %v7384_v19 = vadd.f32 %v7383_v34, %v7119_v10  ;;  %v6858_v29 = vpop.f32.mrf.mxu1 }
 0xa68   :  { %v6594_v17 = vpop.f32.mrf.mxu0 }
 0xa69   :  { %9839 = vst [vmem:[%s16042_s5 + $0xa98] sm:$0xff] %v7384_v19  ;;  %v6859_v32 = vadd.f32 %v6858_v29, %v6594_v17  ;;  %v9566_v29 = vld [vmem:[%s16041_s4 + $0x2e8] sm:$0xf0]  ;;  %v9564_v17 = vld [vmem:[%s16041_s4 + $0x2e0] sm:$0xf] }
 0xa6a   :  { %9695 = vmatmul.msk.bf16.gmra.mxu3 %vm4154_vm5, %v9537_v37  ;;  %9644 = vmatmul.msk.bf16.gmra.mxu1 %vm4154_vm5, %v9537_v37 }
 0xa6b   :  { %7161 = vmatmul.bf16.gmra.mxu2 %v9533_v12  ;;  %9840 = vst [vmem:[%s16042_s5 + $0xaa0] sm:$0xff] %v6859_v32  ;;  %6633 = vmatmul.bf16.gmra.mxu0 %v9533_v12  ;;  %v10326_v12 = vld [vmem:[%s16041_s4 + $0x2e4] sm:$0xf]  ;;  %v10327_v32 = vld [vmem:[%s16041_s4 + $0x2e4] sm:$0xf0] }
 0xa6d   :  { %v7386_v4 = vpop.f32.mrf.mxu3 }
 0xa6e   :  { %v7122_v1 = vpop.f32.mrf.mxu2 }
 0xa6f   :  { %v7387_v51 = vadd.f32 %v7386_v4, %v7122_v1  ;;  %v6860_v47 = vpop.f32.mrf.mxu1 }
 0xa70   :  { %v6596_v62 = vpop.f32.mrf.mxu0 }
 0xa71   :  { %9841 = vst [vmem:[%s16042_s5 + $0xaa8] sm:$0xff] %v7387_v51  ;;  %v6861_v33 = vadd.f32 %v6860_v47, %v6596_v62  ;;  %v9569_v51 = vor.u32 %v10326_v12, %v9566_v29  ;;  %v9565_v62 = vor.u32 %v10327_v32, %v9564_v17 }
 0xa73   :  { %9842 = vst [vmem:[%s16042_s5 + $0xab0] sm:$0xff] %v6861_v33 }
 0xa75   :  { %v7388_v42 = vpop.f32.mrf.mxu3 }
 0xa76   :  { %v7124_v53 = vpop.f32.mrf.mxu2 }
 0xa77   :  { %v7389_v39 = vadd.f32 %v7388_v42, %v7124_v53  ;;  %v6863_v56 = vpop.f32.mrf.mxu1 }
 0xa78   :  { %v6599_v49 = vpop.f32.mrf.mxu0 }
 0xa79   :  { %9843 = vst [vmem:[%s16042_s5 + $0xab8] sm:$0xff] %v7389_v39  ;;  %v6864_v23 = vadd.f32 %v6863_v56, %v6599_v49  ;;  %v9574_v56 = vld [vmem:[%s16041_s4 + $0x2f8] sm:$0xf0]  ;;  %v9572_v49 = vld [vmem:[%s16041_s4 + $0x2f0] sm:$0xf] }
 0xa7a   :  { %9696 = vmatmul.msk.bf16.gmra.mxu3 %vm4154_vm5, %v9545_v45  ;;  %9645 = vmatmul.msk.bf16.gmra.mxu1 %vm4154_vm5, %v9545_v45 }
 0xa7b   :  { %7166 = vmatmul.bf16.gmra.mxu2 %v9541_v50  ;;  %9844 = vst [vmem:[%s16042_s5 + $0xac0] sm:$0xff] %v6864_v23  ;;  %6638 = vmatmul.bf16.gmra.mxu0 %v9541_v50  ;;  %v10328_v50 = vld [vmem:[%s16041_s4 + $0x2f4] sm:$0xf]  ;;  %v10329_v23 = vld [vmem:[%s16041_s4 + $0x2f4] sm:$0xf0] }
 0xa7d   :  { %v7391_v8 = vpop.f32.mrf.mxu3 }
 0xa7e   :  { %v7127_v60 = vpop.f32.mrf.mxu2 }
 0xa7f   :  { %v7392_v14 = vadd.f32 %v7391_v8, %v7127_v60  ;;  %v6865_v35 = vpop.f32.mrf.mxu1 }
 0xa80   :  { %v6601_v44 = vpop.f32.mrf.mxu0 }
 0xa81   :  { %9845 = vst [vmem:[%s16042_s5 + $0xac8] sm:$0xff] %v7392_v14  ;;  %v6866_v3 = vadd.f32 %v6865_v35, %v6601_v44  ;;  %v9577_v14 = vor.u32 %v10328_v50, %v9574_v56  ;;  %v9573_v44 = vor.u32 %v10329_v23, %v9572_v49 }
 0xa83   :  { %9846 = vst [vmem:[%s16042_s5 + $0xad0] sm:$0xff] %v6866_v3 }
 0xa85   :  { %v7393_v13 = vpop.f32.mrf.mxu3 }
 0xa86   :  { %v7129_v54 = vpop.f32.mrf.mxu2 }
 0xa87   :  { %v7394_v27 = vadd.f32 %v7393_v13, %v7129_v54  ;;  %v6868_v61 = vpop.f32.mrf.mxu1 }
 0xa88   :  { %v6604_v7 = vpop.f32.mrf.mxu0 }
 0xa89   :  { %9847 = vst [vmem:[%s16042_s5 + $0xad8] sm:$0xff] %v7394_v27  ;;  %v6869_v2 = vadd.f32 %v6868_v61, %v6604_v7  ;;  %v9582_v61 = vld [vmem:[%s16041_s4 + $0x308] sm:$0xf0]  ;;  %v9580_v7 = vld [vmem:[%s16041_s4 + $0x300] sm:$0xf] }
 0xa8a   :  { %9697 = vmatmul.msk.bf16.gmra.mxu3 %vm4154_vm5, %v9553_v63  ;;  %9646 = vmatmul.msk.bf16.gmra.mxu1 %vm4154_vm5, %v9553_v63 }
 0xa8b   :  { %7171 = vmatmul.bf16.gmra.mxu2 %v9549_v25  ;;  %9848 = vst [vmem:[%s16042_s5 + $0xae0] sm:$0xff] %v6869_v2  ;;  %6643 = vmatmul.bf16.gmra.mxu0 %v9549_v25  ;;  %v10330_v25 = vld [vmem:[%s16041_s4 + $0x304] sm:$0xf]  ;;  %v10331_v2 = vld [vmem:[%s16041_s4 + $0x304] sm:$0xf0] }
 0xa8d   :  { %v7396_v6 = vpop.f32.mrf.mxu3 }
 0xa8e   :  { %v7132_v9 = vpop.f32.mrf.mxu2 }
 0xa8f   :  { %v7397_v58 = vadd.f32 %v7396_v6, %v7132_v9  ;;  %v6870_v40 = vpop.f32.mrf.mxu1 }
 0xa90   :  { %v6606_v16 = vpop.f32.mrf.mxu0 }
 0xa91   :  { %9849 = vst [vmem:[%s16042_s5 + $0xae8] sm:$0xff] %v7397_v58  ;;  %v6871_v36 = vadd.f32 %v6870_v40, %v6606_v16  ;;  %v9585_v58 = vor.u32 %v10330_v25, %v9582_v61  ;;  %v9581_v16 = vor.u32 %v10331_v2, %v9580_v7 }
 0xa93   :  { %9850 = vst [vmem:[%s16042_s5 + $0xaf0] sm:$0xff] %v6871_v36 }
 0xa95   :  { %v7398_v30 = vpop.f32.mrf.mxu3 }
 0xa96   :  { %v7134_v57 = vpop.f32.mrf.mxu2 }
 0xa97   :  { %v7399_v20 = vadd.f32 %v7398_v30, %v7134_v57  ;;  %v6873_v28 = vpop.f32.mrf.mxu1 }
 0xa98   :  { %v6609_v0 = vpop.f32.mrf.mxu0 }
 0xa99   :  { %9851 = vst [vmem:[%s16042_s5 + $0xaf8] sm:$0xff] %v7399_v20  ;;  %v6874_v15 = vadd.f32 %v6873_v28, %v6609_v0  ;;  %v9590_v28 = vld [vmem:[%s16041_s4 + $0x318] sm:$0xf0]  ;;  %v9588_v0 = vld [vmem:[%s16041_s4 + $0x310] sm:$0xf] }
 0xa9a   :  { %9698 = vmatmul.msk.bf16.gmra.mxu3 %vm4154_vm5, %v9561_v31  ;;  %9647 = vmatmul.msk.bf16.gmra.mxu1 %vm4154_vm5, %v9561_v31 }
 0xa9b   :  { %7176 = vmatmul.bf16.gmra.mxu2 %v9557_v48  ;;  %9852 = vst [vmem:[%s16042_s5 + $0xb00] sm:$0xff] %v6874_v15  ;;  %6648 = vmatmul.bf16.gmra.mxu0 %v9557_v48  ;;  %v10332_v48 = vld [vmem:[%s16041_s4 + $0x314] sm:$0xf]  ;;  %v10333_v15 = vld [vmem:[%s16041_s4 + $0x314] sm:$0xf0] }
 0xa9d   :  { %v7401_v21 = vpop.f32.mrf.mxu3 }
 0xa9e   :  { %v7137_v52 = vpop.f32.mrf.mxu2 }
 0xa9f   :  { %v7402_v34 = vadd.f32 %v7401_v21, %v7137_v52  ;;  %v6875_v10 = vpop.f32.mrf.mxu1 }
 0xaa0   :  { %v6611_v37 = vpop.f32.mrf.mxu0 }
 0xaa1   :  { %9853 = vst [vmem:[%s16042_s5 + $0xb08] sm:$0xff] %v7402_v34  ;;  %v6876_v19 = vadd.f32 %v6875_v10, %v6611_v37  ;;  %v9593_v34 = vor.u32 %v10332_v48, %v9590_v28  ;;  %v9589_v37 = vor.u32 %v10333_v15, %v9588_v0 }
 0xaa3   :  { %9854 = vst [vmem:[%s16042_s5 + $0xb10] sm:$0xff] %v6876_v19 }
 0xaa5   :  { %v7403_v4 = vpop.f32.mrf.mxu3 }
 0xaa6   :  { %v7139_v1 = vpop.f32.mrf.mxu2 }
 0xaa7   :  { %v7404_v47 = vadd.f32 %v7403_v4, %v7139_v1  ;;  %v6878_v33 = vpop.f32.mrf.mxu1 }
 0xaa8   :  { %v6614_v18 = vpop.f32.mrf.mxu0 }
 0xaa9   :  { %9855 = vst [vmem:[%s16042_s5 + $0xb18] sm:$0xff] %v7404_v47  ;;  %v6879_v59 = vadd.f32 %v6878_v33, %v6614_v18  ;;  %v9598_v33 = vld [vmem:[%s16041_s4 + $0x328] sm:$0xf0]  ;;  %v9596_v18 = vld [vmem:[%s16041_s4 + $0x320] sm:$0xf] }
 0xaaa   :  { %9699 = vmatmul.msk.bf16.gmra.mxu3 %vm4154_vm5, %v9569_v51  ;;  %9648 = vmatmul.msk.bf16.gmra.mxu1 %vm4154_vm5, %v9569_v51 }
 0xaab   :  { %7181 = vmatmul.bf16.gmra.mxu2 %v9565_v62  ;;  %9856 = vst [vmem:[%s16042_s5 + $0xb20] sm:$0xff] %v6879_v59  ;;  %6653 = vmatmul.bf16.gmra.mxu0 %v9565_v62  ;;  %v10334_v62 = vld [vmem:[%s16041_s4 + $0x324] sm:$0xf]  ;;  %v10335_v59 = vld [vmem:[%s16041_s4 + $0x324] sm:$0xf0] }
 0xaad   :  { %v7406_v26 = vpop.f32.mrf.mxu3 }
 0xaae   :  { %v7142_v41 = vpop.f32.mrf.mxu2 }
 0xaaf   :  { %v7407_v42 = vadd.f32 %v7406_v26, %v7142_v41  ;;  %v6880_v53 = vpop.f32.mrf.mxu1 }
 0xab0   :  { %v6616_v45 = vpop.f32.mrf.mxu0 }
 0xab1   :  { %9857 = vst [vmem:[%s16042_s5 + $0xb28] sm:$0xff] %v7407_v42  ;;  %v6881_v39 = vadd.f32 %v6880_v53, %v6616_v45  ;;  %v9601_v42 = vor.u32 %v10334_v62, %v9598_v33  ;;  %v9597_v45 = vor.u32 %v10335_v59, %v9596_v18 }
 0xab3   :  { %9858 = vst [vmem:[%s16042_s5 + $0xb30] sm:$0xff] %v6881_v39 }
 0xab5   :  { %v7408_v8 = vpop.f32.mrf.mxu3 }
 0xab6   :  { %v7144_v60 = vpop.f32.mrf.mxu2 }
 0xab7   :  { %v7409_v35 = vadd.f32 %v7408_v8, %v7144_v60  ;;  %v6883_v3 = vpop.f32.mrf.mxu1 }
 0xab8   :  { %v6619_v24 = vpop.f32.mrf.mxu0 }
 0xab9   :  { %9859 = vst [vmem:[%s16042_s5 + $0xb38] sm:$0xff] %v7409_v35  ;;  %v6884_v46 = vadd.f32 %v6883_v3, %v6619_v24 }
 0xaba   :  { %9700 = vmatmul.msk.bf16.gmra.mxu3 %vm4154_vm5, %v9577_v14  ;;  %9649 = vmatmul.msk.bf16.gmra.mxu1 %vm4154_vm5, %v9577_v14 }
 0xabb   :  { %7186 = vmatmul.bf16.gmra.mxu2 %v9573_v44  ;;  %9860 = vst [vmem:[%s16042_s5 + $0xb40] sm:$0xff] %v6884_v46  ;;  %6658 = vmatmul.bf16.gmra.mxu0 %v9573_v44 }
 0xabd   :  { %v7411_v5 = vpop.f32.mrf.mxu3 }
 0xabe   :  { %v7147_v38 = vpop.f32.mrf.mxu2 }
 0xabf   :  { %v7412_v13 = vadd.f32 %v7411_v5, %v7147_v38  ;;  %v6885_v54 = vpop.f32.mrf.mxu1 }
 0xac0   :  { %v6621_v63 = vpop.f32.mrf.mxu0 }
 0xac1   :  { %9861 = vst [vmem:[%s16042_s5 + $0xb48] sm:$0xff] %v7412_v13  ;;  %v6886_v27 = vadd.f32 %v6885_v54, %v6621_v63 }
 0xac3   :  { %9862 = vst [vmem:[%s16042_s5 + $0xb50] sm:$0xff] %v6886_v27 }
 0xac5   :  { %v7413_v6 = vpop.f32.mrf.mxu3 }
 0xac6   :  { %v7149_v9 = vpop.f32.mrf.mxu2 }
 0xac7   :  { %v7414_v40 = vadd.f32 %v7413_v6, %v7149_v9  ;;  %v6888_v36 = vpop.f32.mrf.mxu1 }
 0xac8   :  { %v6624_v22 = vpop.f32.mrf.mxu0 }
 0xac9   :  { %9863 = vst [vmem:[%s16042_s5 + $0xb58] sm:$0xff] %v7414_v40  ;;  %v6889_v55 = vadd.f32 %v6888_v36, %v6624_v22 }
 0xaca   :  { %9701 = vmatmul.msk.bf16.gmra.mxu3 %vm4154_vm5, %v9585_v58  ;;  %9650 = vmatmul.msk.bf16.gmra.mxu1 %vm4154_vm5, %v9585_v58 }
 0xacb   :  { %7191 = vmatmul.bf16.gmra.mxu2 %v9581_v16  ;;  %9864 = vst [vmem:[%s16042_s5 + $0xb60] sm:$0xff] %v6889_v55  ;;  %6663 = vmatmul.bf16.gmra.mxu0 %v9581_v16 }
 0xacd   :  { %v7416_v43 = vpop.f32.mrf.mxu3 }
 0xace   :  { %v7152_v11 = vpop.f32.mrf.mxu2 }
 0xacf   :  { %v7417_v30 = vadd.f32 %v7416_v43, %v7152_v11  ;;  %v6890_v57 = vpop.f32.mrf.mxu1 }
 0xad0   :  { %v6626_v31 = vpop.f32.mrf.mxu0 }
 0xad1   :  { %9865 = vst [vmem:[%s16042_s5 + $0xb68] sm:$0xff] %v7417_v30  ;;  %v6891_v20 = vadd.f32 %v6890_v57, %v6626_v31 }
 0xad3   :  { %9866 = vst [vmem:[%s16042_s5 + $0xb70] sm:$0xff] %v6891_v20 }
 0xad5   :  { %v7418_v21 = vpop.f32.mrf.mxu3 }
 0xad6   :  { %v7154_v52 = vpop.f32.mrf.mxu2 }
 0xad7   :  { %v7419_v10 = vadd.f32 %v7418_v21, %v7154_v52  ;;  %v6893_v19 = vpop.f32.mrf.mxu1 }
 0xad8   :  { %v6629_v12 = vpop.f32.mrf.mxu0 }
 0xad9   :  { %9867 = vst [vmem:[%s16042_s5 + $0xb78] sm:$0xff] %v7419_v10  ;;  %v6894_v29 = vadd.f32 %v6893_v19, %v6629_v12 }
 0xada   :  { %9702 = vmatmul.msk.bf16.gmra.mxu3 %vm4154_vm5, %v9593_v34  ;;  %9651 = vmatmul.msk.bf16.gmra.mxu1 %vm4154_vm5, %v9593_v34 }
 0xadb   :  { %7196 = vmatmul.bf16.gmra.mxu2 %v9589_v37  ;;  %9868 = vst [vmem:[%s16042_s5 + $0xb80] sm:$0xff] %v6894_v29  ;;  %6668 = vmatmul.bf16.gmra.mxu0 %v9589_v37 }
 0xadd   :  { %v7421_v17 = vpop.f32.mrf.mxu3 }
 0xade   :  { %v7157_v32 = vpop.f32.mrf.mxu2 }
 0xadf   :  { %v7422_v4 = vadd.f32 %v7421_v17, %v7157_v32  ;;  %v6895_v1 = vpop.f32.mrf.mxu1 }
 0xae0   :  { %v6631_v51 = vpop.f32.mrf.mxu0 }
 0xae1   :  { %9869 = vst [vmem:[%s16042_s5 + $0xb88] sm:$0xff] %v7422_v4  ;;  %v6896_v47 = vadd.f32 %v6895_v1, %v6631_v51 }
 0xae3   :  { %9870 = vst [vmem:[%s16042_s5 + $0xb90] sm:$0xff] %v6896_v47 }
 0xae5   :  { %v7423_v26 = vpop.f32.mrf.mxu3 }
 0xae6   :  { %v7159_v41 = vpop.f32.mrf.mxu2 }
 0xae7   :  { %v7424_v53 = vadd.f32 %v7423_v26, %v7159_v41  ;;  %v6898_v39 = vpop.f32.mrf.mxu1 }
 0xae8   :  { %v6634_v50 = vpop.f32.mrf.mxu0 }
 0xae9   :  { %9871 = vst [vmem:[%s16042_s5 + $0xb98] sm:$0xff] %v7424_v53  ;;  %v6899_v56 = vadd.f32 %v6898_v39, %v6634_v50 }
 0xaea   :  { %9703 = vmatmul.msk.bf16.gmra.mxu3 %vm4154_vm5, %v9601_v42  ;;  %9652 = vmatmul.msk.bf16.gmra.mxu1 %vm4154_vm5, %v9601_v42 }
 0xaeb   :  { %7201 = vmatmul.bf16.gmra.mxu2 %v9597_v45  ;;  %9872 = vst [vmem:[%s16042_s5 + $0xba0] sm:$0xff] %v6899_v56  ;;  %6673 = vmatmul.bf16.gmra.mxu0 %v9597_v45 }
 0xaed   :  { %v7426_v49 = vpop.f32.mrf.mxu3 }
 0xaee   :  { %v7162_v23 = vpop.f32.mrf.mxu2 }
 0xaef   :  { %v7427_v8 = vadd.f32 %v7426_v49, %v7162_v23  ;;  %v6900_v60 = vpop.f32.mrf.mxu1 }
 0xaf0   :  { %v6636_v14 = vpop.f32.mrf.mxu0 }
 0xaf1   :  { %9873 = vst [vmem:[%s16042_s5 + $0xba8] sm:$0xff] %v7427_v8  ;;  %v6901_v35 = vadd.f32 %v6900_v60, %v6636_v14 }
 0xaf3   :  { %9874 = vst [vmem:[%s16042_s5 + $0xbb0] sm:$0xff] %v6901_v35 }
 0xaf5   :  { %v7428_v44 = vpop.f32.mrf.mxu3 }
 0xaf6   :  { %v7164_v3 = vpop.f32.mrf.mxu2 }
 0xaf7   :  { %v7429_v24 = vadd.f32 %v7428_v44, %v7164_v3  ;;  %v6903_v46 = vpop.f32.mrf.mxu1 }
 0xaf8   :  { %v6639_v5 = vpop.f32.mrf.mxu0 }
 0xaf9   :  { %9875 = vst [vmem:[%s16042_s5 + $0xbb8] sm:$0xff] %v7429_v24  ;;  %v6904_v38 = vadd.f32 %v6903_v46, %v6639_v5 }
 0xafb   :  { %9876 = vst [vmem:[%s16042_s5 + $0xbc0] sm:$0xff] %v6904_v38 }
 0xafd   :  { %v7431_v13 = vpop.f32.mrf.mxu3 }
 0xafe   :  { %v7167_v54 = vpop.f32.mrf.mxu2 }
 0xaff   :  { %v7432_v63 = vadd.f32 %v7431_v13, %v7167_v54  ;;  %v6905_v27 = vpop.f32.mrf.mxu1 }
 0xb00   :  { %v6641_v25 = vpop.f32.mrf.mxu0 }
 0xb01   :  { %9877 = vst [vmem:[%s16042_s5 + $0xbc8] sm:$0xff] %v7432_v63  ;;  %v6906_v61 = vadd.f32 %v6905_v27, %v6641_v25 }
 0xb03   :  { %9878 = vst [vmem:[%s16042_s5 + $0xbd0] sm:$0xff] %v6906_v61 }
 0xb05   :  { %v7433_v7 = vpop.f32.mrf.mxu3 }
 0xb06   :  { %v7169_v2 = vpop.f32.mrf.mxu2 }
 0xb07   :  { %v7434_v6 = vadd.f32 %v7433_v7, %v7169_v2  ;;  %v6908_v9 = vpop.f32.mrf.mxu1 }
 0xb08   :  { %v6644_v58 = vpop.f32.mrf.mxu0 }
 0xb09   :  { %9879 = vst [vmem:[%s16042_s5 + $0xbd8] sm:$0xff] %v7434_v6  ;;  %v6909_v40 = vadd.f32 %v6908_v9, %v6644_v58 }
 0xb0b   :  { %9880 = vst [vmem:[%s16042_s5 + $0xbe0] sm:$0xff] %v6909_v40 }
 0xb0d   :  { %v7436_v16 = vpop.f32.mrf.mxu3 }
 0xb0e   :  { %v7172_v36 = vpop.f32.mrf.mxu2 }
 0xb0f   :  { %v7437_v22 = vadd.f32 %v7436_v16, %v7172_v36  ;;  %v6910_v55 = vpop.f32.mrf.mxu1 }
 0xb10   :  { %v6646_v43 = vpop.f32.mrf.mxu0 }
 0xb11   :  { %9881 = vst [vmem:[%s16042_s5 + $0xbe8] sm:$0xff] %v7437_v22  ;;  %v6911_v11 = vadd.f32 %v6910_v55, %v6646_v43 }
 0xb13   :  { %9882 = vst [vmem:[%s16042_s5 + $0xbf0] sm:$0xff] %v6911_v11 }
 0xb15   :  { %v7438_v30 = vpop.f32.mrf.mxu3 }
 0xb16   :  { %v7174_v57 = vpop.f32.mrf.mxu2 }
 0xb17   :  { %v7439_v31 = vadd.f32 %v7438_v30, %v7174_v57  ;;  %v6913_v20 = vpop.f32.mrf.mxu1 }
 0xb18   :  { %v6649_v48 = vpop.f32.mrf.mxu0 }
 0xb19   :  { %9883 = vst [vmem:[%s16042_s5 + $0xbf8] sm:$0xff] %v7439_v31  ;;  %v6914_v28 = vadd.f32 %v6913_v20, %v6649_v48 }
 0xb1b   :  { %9884 = vst [vmem:[%s16042_s5 + $0xc00] sm:$0xff] %v6914_v28 }
 0xb1d   :  { %v7441_v0 = vpop.f32.mrf.mxu3 }
 0xb1e   :  { %v7177_v15 = vpop.f32.mrf.mxu2 }
 0xb1f   :  { %v7442_v21 = vadd.f32 %v7441_v0, %v7177_v15  ;;  %v6915_v52 = vpop.f32.mrf.mxu1 }
 0xb20   :  { %v6651_v34 = vpop.f32.mrf.mxu0 }
 0xb21   :  { %9885 = vst [vmem:[%s16042_s5 + $0xc08] sm:$0xff] %v7442_v21  ;;  %v6916_v10 = vadd.f32 %v6915_v52, %v6651_v34 }
 0xb23   :  { %9886 = vst [vmem:[%s16042_s5 + $0xc10] sm:$0xff] %v6916_v10 }
 0xb25   :  { %v7443_v37 = vpop.f32.mrf.mxu3 }
 0xb26   :  { %v7179_v19 = vpop.f32.mrf.mxu2 }
 0xb27   :  { %v7444_v12 = vadd.f32 %v7443_v37, %v7179_v19  ;;  %v6918_v29 = vpop.f32.mrf.mxu1 }
 0xb28   :  { %v6654_v17 = vpop.f32.mrf.mxu0 }
 0xb29   :  { %9887 = vst [vmem:[%s16042_s5 + $0xc18] sm:$0xff] %v7444_v12  ;;  %v6919_v32 = vadd.f32 %v6918_v29, %v6654_v17 }
 0xb2b   :  { %9888 = vst [vmem:[%s16042_s5 + $0xc20] sm:$0xff] %v6919_v32 }
 0xb2d   :  { %v7446_v4 = vpop.f32.mrf.mxu3 }
 0xb2e   :  { %v7182_v1 = vpop.f32.mrf.mxu2 }
 0xb2f   :  { %v7447_v51 = vadd.f32 %v7446_v4, %v7182_v1  ;;  %v6920_v47 = vpop.f32.mrf.mxu1 }
 0xb30   :  { %v6656_v62 = vpop.f32.mrf.mxu0 }
 0xb31   :  { %9889 = vst [vmem:[%s16042_s5 + $0xc28] sm:$0xff] %v7447_v51  ;;  %v6921_v33 = vadd.f32 %v6920_v47, %v6656_v62 }
 0xb33   :  { %9890 = vst [vmem:[%s16042_s5 + $0xc30] sm:$0xff] %v6921_v33 }
 0xb35   :  { %v7448_v18 = vpop.f32.mrf.mxu3 }
 0xb36   :  { %v7184_v59 = vpop.f32.mrf.mxu2 }
 0xb37   :  { %v7449_v26 = vadd.f32 %v7448_v18, %v7184_v59  ;;  %v6923_v41 = vpop.f32.mrf.mxu1 }
 0xb38   :  { %v6659_v42 = vpop.f32.mrf.mxu0 }
 0xb39   :  { %9891 = vst [vmem:[%s16042_s5 + $0xc38] sm:$0xff] %v7449_v26  ;;  %v6924_v53 = vadd.f32 %v6923_v41, %v6659_v42 }
 0xb3b   :  { %9892 = vst [vmem:[%s16042_s5 + $0xc40] sm:$0xff] %v6924_v53 }
 0xb3d   :  { %v7451_v45 = vpop.f32.mrf.mxu3 }
 0xb3e   :  { %v7187_v39 = vpop.f32.mrf.mxu2 }
 0xb3f   :  { %v7452_v50 = vadd.f32 %v7451_v45, %v7187_v39  ;;  %v6925_v56 = vpop.f32.mrf.mxu1 }
 0xb40   :  { %v6661_v49 = vpop.f32.mrf.mxu0 }
 0xb41   :  { %9893 = vst [vmem:[%s16042_s5 + $0xc48] sm:$0xff] %v7452_v50  ;;  %v6926_v23 = vadd.f32 %v6925_v56, %v6661_v49 }
 0xb43   :  { %9894 = vst [vmem:[%s16042_s5 + $0xc50] sm:$0xff] %v6926_v23 }
 0xb45   :  { %v7453_v8 = vpop.f32.mrf.mxu3 }
 0xb46   :  { %v7189_v60 = vpop.f32.mrf.mxu2 }
 0xb47   :  { %v7454_v14 = vadd.f32 %v7453_v8, %v7189_v60  ;;  %v6928_v35 = vpop.f32.mrf.mxu1 }
 0xb48   :  { %v6664_v44 = vpop.f32.mrf.mxu0 }
 0xb49   :  { %9895 = vst [vmem:[%s16042_s5 + $0xc58] sm:$0xff] %v7454_v14  ;;  %v6929_v3 = vadd.f32 %v6928_v35, %v6664_v44 }
 0xb4b   :  { %9896 = vst [vmem:[%s16042_s5 + $0xc60] sm:$0xff] %v6929_v3 }
 0xb4d   :  { %v7456_v24 = vpop.f32.mrf.mxu3 }
 0xb4e   :  { %v7192_v46 = vpop.f32.mrf.mxu2 }
 0xb4f   :  { %v7457_v5 = vadd.f32 %v7456_v24, %v7192_v46  ;;  %v6930_v38 = vpop.f32.mrf.mxu1 }
 0xb50   :  { %v6666_v13 = vpop.f32.mrf.mxu0 }
 0xb51   :  { %9897 = vst [vmem:[%s16042_s5 + $0xc68] sm:$0xff] %v7457_v5  ;;  %v6931_v54 = vadd.f32 %v6930_v38, %v6666_v13 }
 0xb53   :  { %9898 = vst [vmem:[%s16042_s5 + $0xc70] sm:$0xff] %v6931_v54 }
 0xb55   :  { %v7458_v63 = vpop.f32.mrf.mxu3 }
 0xb56   :  { %v7194_v27 = vpop.f32.mrf.mxu2 }
 0xb57   :  { %v7459_v25 = vadd.f32 %v7458_v63, %v7194_v27  ;;  %v6933_v61 = vpop.f32.mrf.mxu1 }
 0xb58   :  { %v6669_v7 = vpop.f32.mrf.mxu0 }
 0xb59   :  { %9899 = vst [vmem:[%s16042_s5 + $0xc78] sm:$0xff] %v7459_v25  ;;  %v6934_v2 = vadd.f32 %v6933_v61, %v6669_v7 }
 0xb5b   :  { %9900 = vst [vmem:[%s16042_s5 + $0xc80] sm:$0xff] %v6934_v2 }
 0xb5d   :  { %v7461_v6 = vpop.f32.mrf.mxu3 }
 0xb5e   :  { %v7197_v9 = vpop.f32.mrf.mxu2 }
 0xb5f   :  { %v7462_v58 = vadd.f32 %v7461_v6, %v7197_v9  ;;  %v6935_v40 = vpop.f32.mrf.mxu1 }
 0xb60   :  { %v6671_v16 = vpop.f32.mrf.mxu0 }
 0xb61   :  { %9901 = vst [vmem:[%s16042_s5 + $0xc88] sm:$0xff] %v7462_v58  ;;  %v6936_v36 = vadd.f32 %v6935_v40, %v6671_v16 }
 0xb63   :  { %9902 = vst [vmem:[%s16042_s5 + $0xc90] sm:$0xff] %v6936_v36 }
 0xb65   :  { %v7463_v22 = vpop.f32.mrf.mxu3 }
 0xb66   :  { %v7199_v55 = vpop.f32.mrf.mxu2 }
 0xb67   :  { %v7464_v43 = vadd.f32 %v7463_v22, %v7199_v55  ;;  %v6938_v11 = vpop.f32.mrf.mxu1 }
 0xb68   :  { %v6674_v30 = vpop.f32.mrf.mxu0 }
 0xb69   :  { %9903 = vst [vmem:[%s16042_s5 + $0xc98] sm:$0xff] %v7464_v43  ;;  %v6939_v57 = vadd.f32 %v6938_v11, %v6674_v30 }
 0xb6b   :  { %9904 = vst [vmem:[%s16042_s5 + $0xca0] sm:$0xff] %v6939_v57 }
 0xb6d   :  { %v7466_v31 = vpop.f32.mrf.mxu3 }
 0xb6e   :  { %v7202_v20 = vpop.f32.mrf.mxu2 }
 0xb6f   :  { %v7467_v48 = vadd.f32 %v7466_v31, %v7202_v20  ;;  %v6940_v0 = vpop.f32.mrf.mxu1 }
 0xb70   :  { %v6676_v28 = vpop.f32.mrf.mxu0 }
 0xb71   :  { %9905 = vst [vmem:[%s16042_s5 + $0xca8] sm:$0xff] %v7467_v48  ;;  %v6941_v15 = vadd.f32 %v6940_v0, %v6676_v28 }
 0xb73   :  { %9906 = vst [vmem:[%s16042_s5 + $0xcb0] sm:$0xff] %v6941_v15 }
 0xb75   :  { %v7468_v52 = vpop.f32.mrf.mxu3 }
 0xb76   :  { %v7204_v21 = vpop.f32.mrf.mxu2 }
 0xb77   :  { %v7469_v34 = vadd.f32 %v7468_v52, %v7204_v21 }
 0xb79   :  { %9907 = vst [vmem:[%s16042_s5 + $0xcb8] sm:$0xff] %v7469_v34 }

</bundles_post_ra>
